<compile_context>
chip_gen: v7x
topology: tpu7x:2x2x1
jax: 0.10.0
libtpu: 0.0.40
codegen_flags: <defaults>
</compile_context>

<pallas_src>
import numpy as np
import jax
import jax.numpy as jnp
from jax.experimental import pallas as pl
from jax.experimental.pallas import tpu as pltpu


def _round_up(x, m):
    return ((x + m - 1) // m) * m


def _textgnn_kernel(eta_ref, cnt_ref, h_ref, w_ref, em_ref, wl_ref, b_ref,
                    out_ref, ge_ref):
    """One grid step processes TB samples.

    eta_ref : SMEM (1,)        node_eta
    cnt_ref : SMEM (Bp,)       number of valid (unique-token) nodes per sample
    h_ref   : VMEM (TB, N, H)  before_node_embedding (padded rows are 0)
    w_ref   : VMEM (TB, N, N)  w[i, j] = scalar weight of edge i -> j
    em_ref  : VMEM (TB, N, N)  1.0 where edge i -> j exists
    wl_ref  : VMEM (H, H)      bf16 Linear weight (already transposed)
    b_ref   : VMEM (1, H)      Linear bias
    out_ref : VMEM (TB, H)     sigmoid(Linear(mean_nodes(...)))
    ge_ref  : VMEM (TB, H)     f32 scratch: graph embeddings of this step
    """
    eta = eta_ref[0]
    tb = h_ref.shape[0]
    base = pl.program_id(0) * tb

    neg = jnp.float32(-3.0e38)   # "-inf" sentinel, far below any real message

    def per_sample(s, carry):
        h = h_ref[s]                        # (N, H)
        w = w_ref[s]                        # (N, N)
        em = em_ref[s]                      # (N, N)

        # DGL update_all(src_mul_edge('h','w'), max):
        #   after[j] = max over existing edges i->j of h[i] * w[i, j]
        msg = jnp.where(em[:, :, None] > 0.0,
                        h[:, None, :] * w[:, :, None], neg)   # (N, N, H)
        after = jnp.max(msg, axis=0)                          # (N, H)
        # zero-in-degree nodes (incl. padded rows) -> 0 (DGL fill semantics).
        after = jnp.where(after <= jnp.float32(-1.0e38), 0.0, after)

        # new = eta * before + (1 - eta) * after
        new_h = eta * h + (1.0 - eta) * after                 # (N, H)

        # dgl.mean_nodes: padded rows are exactly 0, so sum over all N rows
        # divided by the true node count equals the per-graph mean.
        denom = jnp.maximum(cnt_ref[base + s], 1.0)
        ge_ref[pl.ds(s, 1), :] = jnp.sum(new_h, axis=0, keepdims=True) / denom
        return carry

    jax.lax.fori_loop(0, tb, per_sample, 0, unroll=(tb <= 16))

    # embedding_layer1 (Linear HxH) + Sigmoid on the whole (TB, H) batch tile.
    y = jnp.dot(ge_ref[...].astype(jnp.bfloat16), wl_ref[...],
                preferred_element_type=jnp.float32) + b_ref[...]
    # TODO(synk): nn.Dropout(p=0.1) omitted — eval/inference semantics (identity).
    out_ref[...] = jax.nn.sigmoid(y)


def textgnn_forward(eta, counts, h, w, em, wl_t_bf16, bias, *, tb_max=128):
    """eta (1,), counts (B,), h (B,N,H), w/em (B,N,N), wl_t (H,H) bf16, bias (1,H)."""
    B, N, H = h.shape
    # Batch tile: multiple of 8 (sublane), capped (tb=128 keeps VMEM use small
    # even on v7x's 64 MiB; raise tb_max for bigger chips if desired).
    tb = min(int(tb_max), _round_up(B, 8))
    Bp = _round_up(B, tb)
    if Bp != B:
        pad = Bp - B
        h = jnp.pad(jnp.asarray(h), ((0, pad), (0, 0), (0, 0)))
        w = jnp.pad(jnp.asarray(w), ((0, pad), (0, 0), (0, 0)))
        em = jnp.pad(jnp.asarray(em), ((0, pad), (0, 0), (0, 0)))
        counts = jnp.pad(jnp.asarray(counts, jnp.float32), ((0, pad),))

    out = pl.pallas_call(
        _textgnn_kernel,
        out_shape=jax.ShapeDtypeStruct((Bp, H), jnp.float32),
        grid=(Bp // tb,),
        in_specs=[
            pl.BlockSpec(memory_space=pltpu.MemorySpace.SMEM),   # eta (1,)
            pl.BlockSpec(memory_space=pltpu.MemorySpace.SMEM),   # counts (Bp,)
            pl.BlockSpec((tb, N, H), lambda b: (b, 0, 0)),       # node features
            pl.BlockSpec((tb, N, N), lambda b: (b, 0, 0)),       # edge weights
            pl.BlockSpec((tb, N, N), lambda b: (b, 0, 0)),       # edge-exists mask
            pl.BlockSpec((H, H), lambda b: (0, 0)),              # Linear weight^T (bf16)
            pl.BlockSpec((1, H), lambda b: (0, 0)),              # Linear bias
        ],
        out_specs=pl.BlockSpec((tb, H), lambda b: (b, 0)),
        scratch_shapes=[pltpu.VMEM((tb, H), jnp.float32)],
        compiler_params=pltpu.CompilerParams(
            dimension_semantics=("parallel",)),
    )(jnp.asarray(eta, jnp.float32), jnp.asarray(counts, jnp.float32),
      jnp.asarray(h), jnp.asarray(w), jnp.asarray(em),
      jnp.asarray(wl_t_bf16), jnp.asarray(bias))
    return out[:B]


def build_graph_tensors(token_ids, node_hidden, edge_weights, edge_matrix, N):
    """Numpy glue replicating create_graph_for_a_sample / create_edges_for_a_sample."""
    B, _ = token_ids.shape
    H = node_hidden.shape[1]
    h = np.zeros((B, N, H), np.float32)
    w = np.zeros((B, N, N), np.float32)
    em = np.zeros((B, N, N), np.float32)
    counts = np.zeros((B,), np.float32)
    for b in range(B):
        uniq = sorted(set(int(t) for t in token_ids[b]))     # local_vocab_id
        u = len(uniq)
        h[b, :u] = node_hidden[uniq]
        counts[b] = float(u)
        nz = [t for t in uniq if t != 0]
        if len(nz) == 0:
            nz = [0]
        pos = {tid: idx for idx, tid in enumerate(uniq)}
        for src in nz:                                       # fully-connected (+ self-loops)
            for dst in nz:
                i, j = pos[src], pos[dst]
                em[b, i, j] = 1.0
                w[b, i, j] = edge_weights[edge_matrix[src, dst], 0]
    return h, w, em, counts


def reference_forward(eta, h, w, em, counts, wl_t, bias):
    """Pure-numpy reference of the same dense formulation (f32 throughout)."""
    B, N, H = h.shape
    outs = []
    for b in range(B):
        after = np.zeros((N, H), np.float32)
        for j in range(N):
            srcs = np.where(em[b, :, j] > 0)[0]
            if len(srcs):
                after[j] = (h[b, srcs] * w[b, srcs, j][:, None]).max(axis=0)
        new_h = eta * h[b] + (1.0 - eta) * after
        ge = new_h.sum(axis=0) / max(float(counts[b]), 1.0)
        y = ge @ wl_t + bias[0]
        outs.append(1.0 / (1.0 + np.exp(-y)))
    return np.stack(outs).astype(np.float32)


if __name__ == "__main__":
    B, T, V, H, E = 2, 8, 16, 768, 32   # node_hidden_size = 768 (Linear(768,768))
    N = T                               # max unique nodes per sample (multiple of 8)

    key = jax.random.PRNGKey(0)
    k1, k2, k3, k4, k5, k6 = jax.random.split(key, 6)

    # Deterministic synthetic parameters (shapes from __init__; no checkpoint load).
    node_hidden = np.asarray(jax.random.normal(k1, (V, H), jnp.float32)) * 0.02   # vocab embedding
    edge_weights = np.asarray(jax.random.uniform(k2, (E, 1), jnp.float32,
                                                 minval=0.1, maxval=1.0))          # edge_hidden
    edge_matrix = np.asarray(jax.random.randint(k3, (V, V), 0, E))                 # pair -> edge id
    wl_t = np.asarray(jax.random.normal(k4, (H, H), jnp.float32)) / np.sqrt(H)     # Linear weight^T
    bias = np.asarray(jax.random.normal(k5, (1, H), jnp.float32)) * 0.01           # Linear bias
    eta = np.zeros((1,), np.float32)                                               # node_eta.fill_(0)

    token_ids = np.asarray(jax.random.randint(k6, (B, T), 0, V))                   # <B, T>

    h, w, em, counts = build_graph_tensors(token_ids, node_hidden, edge_weights,
                                           edge_matrix, N)
    wl_bf16 = jnp.asarray(wl_t, dtype=jnp.bfloat16)

    out = textgnn_forward(eta, counts, h, w, em, wl_bf16, bias)
    out = jax.block_until_ready(out)

    ref = reference_forward(float(eta[0]), h, w, em, counts, wl_t, bias)
    assert out.shape == (B, H), out.shape
    if not np.allclose(np.asarray(out), ref, atol=3e-3, rtol=3e-3):
        raise AssertionError("Pallas kernel output does not match reference")
    print("KERNEL_OK")
</pallas_src>

<mosaic_0001>
module attributes {stable_mosaic.version = 11 : i64} {
  func.func @_textgnn_kernel(%arg0: i32, %arg1: memref<1xf32, #tpu.memory_space<smem>>, %arg2: memref<8xf32, #tpu.memory_space<smem>>, %arg3: memref<8x8x768xf32, #tpu.memory_space<vmem>>, %arg4: memref<8x8x8xf32, #tpu.memory_space<vmem>>, %arg5: memref<8x8x8xf32, #tpu.memory_space<vmem>>, %arg6: memref<768x768xbf16, #tpu.memory_space<vmem>>, %arg7: memref<1x768xf32, #tpu.memory_space<vmem>>, %arg8: memref<8x768xf32, #tpu.memory_space<vmem>>, %arg9: memref<8x768xf32, #tpu.memory_space<vmem>>) attributes {dimension_semantics = [#tpu.dimension_semantics<parallel>], iteration_bounds = array<i64: 1>, scalar_prefetch = 0 : i64, scratch_operands = 1 : i64, tpu.core_type = #tpu.core_type<tc>, window_params = [{transform_indices = @transform_0, window_bounds = array<i64: 1>}, {transform_indices = @transform_1, window_bounds = array<i64: 8>}, {transform_indices = @transform_2, window_bounds = array<i64: 8, 8, 768>}, {transform_indices = @transform_3, window_bounds = array<i64: 8, 8, 8>}, {transform_indices = @transform_4, window_bounds = array<i64: 8, 8, 8>}, {pipeline_mode = #tpu.pipeline_mode<synchronous>, transform_indices = @transform_5, window_bounds = array<i64: 768, 768>}, {pipeline_mode = #tpu.pipeline_mode<synchronous>, transform_indices = @transform_6, window_bounds = array<i64: 1, 768>}, {transform_indices = @transform_7, window_bounds = array<i64: 8, 768>}]} {
    %c0 = arith.constant 0 : index
    %0 = memref.load %arg1[%c0] : memref<1xf32, #tpu.memory_space<smem>>
    %c8_i32 = arith.constant 8 : i32
    %1 = arith.muli %arg0, %c8_i32 : i32
    %cst = arith.constant -3.000000e+38 : f32
    %c0_i32 = arith.constant 0 : i32
    %2 = arith.index_cast %c0_i32 : i32 to index
    %c0_0 = arith.constant 0 : index
    %c0_1 = arith.constant 0 : index
    %3 = vector.load %arg3[%2, %c0_0, %c0_1] : memref<8x8x768xf32, #tpu.memory_space<vmem>>, vector<1x8x768xf32>
    %4 = vector.shape_cast %3 : vector<1x8x768xf32> to vector<8x768xf32>
    %5 = arith.index_cast %c0_i32 : i32 to index
    %c0_2 = arith.constant 0 : index
    %c0_3 = arith.constant 0 : index
    %6 = vector.load %arg4[%5, %c0_2, %c0_3] : memref<8x8x8xf32, #tpu.memory_space<vmem>>, vector<1x8x8xf32>
    %7 = vector.shape_cast %6 : vector<1x8x8xf32> to vector<8x8xf32>
    %8 = arith.index_cast %c0_i32 : i32 to index
    %c0_4 = arith.constant 0 : index
    %c0_5 = arith.constant 0 : index
    %9 = vector.load %arg5[%8, %c0_4, %c0_5] : memref<8x8x8xf32, #tpu.memory_space<vmem>>, vector<1x8x8xf32>
    %10 = vector.shape_cast %9 : vector<1x8x8xf32> to vector<8x8xf32>
    %11 = vector.shape_cast %10 : vector<8x8xf32> to vector<8x8x1xf32>
    %cst_6 = arith.constant 0.000000e+00 : f32
    %12 = vector.broadcast %cst_6 : f32 to vector<8x8x1xf32>
    %13 = arith.cmpf ogt, %11, %12 : vector<8x8x1xf32>
    %14 = vector.shape_cast %4 : vector<8x768xf32> to vector<8x1x768xf32>
    %15 = vector.shape_cast %7 : vector<8x8xf32> to vector<8x8x1xf32>
    %16 = vector.broadcast %14 : vector<8x1x768xf32> to vector<8x8x768xf32>
    %17 = vector.broadcast %15 : vector<8x8x1xf32> to vector<8x8x768xf32>
    %18 = arith.mulf %16, %17 : vector<8x8x768xf32>
    %19 = vector.shape_cast %13 : vector<8x8x1xi1> to vector<8x8x1xi1>
    %20 = vector.broadcast %19 : vector<8x8x1xi1> to vector<8x8x768xi1>
    %21 = vector.broadcast %cst : f32 to vector<8x8x768xf32>
    %22 = arith.select %20, %18, %21 : vector<8x8x768xi1>, vector<8x8x768xf32>
    %cst_7 = arith.constant dense<0xFF800000> : vector<8x768xf32>
    %23 = vector.multi_reduction <maximumf>, %22, %cst_7 [0] : vector<8x8x768xf32> to vector<8x768xf32>
    %cst_8 = arith.constant -9.99999968E+37 : f32
    %24 = vector.broadcast %cst_8 : f32 to vector<8x768xf32>
    %25 = arith.cmpf ole, %23, %24 : vector<8x768xf32>
    %cst_9 = arith.constant 0.000000e+00 : f32
    %26 = vector.broadcast %cst_9 : f32 to vector<8x768xf32>
    %27 = arith.select %25, %26, %23 : vector<8x768xi1>, vector<8x768xf32>
    %28 = vector.broadcast %0 : f32 to vector<8x768xf32>
    %29 = arith.mulf %28, %4 : vector<8x768xf32>
    %cst_10 = arith.constant 1.000000e+00 : f32
    %30 = arith.subf %cst_10, %0 : f32
    %31 = vector.broadcast %30 : f32 to vector<8x768xf32>
    %32 = arith.mulf %31, %27 : vector<8x768xf32>
    %33 = arith.addf %29, %32 : vector<8x768xf32>
    %34 = arith.addi %1, %c0_i32 : i32
    %35 = arith.index_cast %34 : i32 to index
    %36 = memref.load %arg2[%35] : memref<8xf32, #tpu.memory_space<smem>>
    %cst_11 = arith.constant 1.000000e+00 : f32
    %37 = arith.maximumf %36, %cst_11 : f32
    %cst_12 = arith.constant dense<0.000000e+00> : vector<768xf32>
    %38 = vector.multi_reduction <add>, %33, %cst_12 [0] : vector<8x768xf32> to vector<768xf32>
    %39 = vector.shape_cast %38 : vector<768xf32> to vector<1x768xf32>
    %40 = vector.broadcast %37 : f32 to vector<1x768xf32>
    %41 = arith.divf %39, %40 : vector<1x768xf32>
    %42 = arith.index_cast %c0_i32 : i32 to index
    %c0_13 = arith.constant 0 : index
    %43 = vector.load %arg9[%42, %c0_13] : memref<8x768xf32, #tpu.memory_space<vmem>>, vector<1x768xf32>
    tpu.vector_store %arg9[%42, %c0_13], %41 {strides = array<i32>} : memref<8x768xf32, #tpu.memory_space<vmem>>, vector<1x768xf32>,
    %c1_i32 = arith.constant 1 : i32
    %44 = arith.index_cast %c1_i32 : i32 to index
    %c0_14 = arith.constant 0 : index
    %c0_15 = arith.constant 0 : index
    %45 = vector.load %arg3[%44, %c0_14, %c0_15] : memref<8x8x768xf32, #tpu.memory_space<vmem>>, vector<1x8x768xf32>
    %46 = vector.shape_cast %45 : vector<1x8x768xf32> to vector<8x768xf32>
    %47 = arith.index_cast %c1_i32 : i32 to index
    %c0_16 = arith.constant 0 : index
    %c0_17 = arith.constant 0 : index
    %48 = vector.load %arg4[%47, %c0_16, %c0_17] : memref<8x8x8xf32, #tpu.memory_space<vmem>>, vector<1x8x8xf32>
    %49 = vector.shape_cast %48 : vector<1x8x8xf32> to vector<8x8xf32>
    %50 = arith.index_cast %c1_i32 : i32 to index
    %c0_18 = arith.constant 0 : index
    %c0_19 = arith.constant 0 : index
    %51 = vector.load %arg5[%50, %c0_18, %c0_19] : memref<8x8x8xf32, #tpu.memory_space<vmem>>, vector<1x8x8xf32>
    %52 = vector.shape_cast %51 : vector<1x8x8xf32> to vector<8x8xf32>
    %53 = vector.shape_cast %52 : vector<8x8xf32> to vector<8x8x1xf32>
    %cst_20 = arith.constant 0.000000e+00 : f32
    %54 = vector.broadcast %cst_20 : f32 to vector<8x8x1xf32>
    %55 = arith.cmpf ogt, %53, %54 : vector<8x8x1xf32>
    %56 = vector.shape_cast %46 : vector<8x768xf32> to vector<8x1x768xf32>
    %57 = vector.shape_cast %49 : vector<8x8xf32> to vector<8x8x1xf32>
    %58 = vector.broadcast %56 : vector<8x1x768xf32> to vector<8x8x768xf32>
    %59 = vector.broadcast %57 : vector<8x8x1xf32> to vector<8x8x768xf32>
    %60 = arith.mulf %58, %59 : vector<8x8x768xf32>
    %61 = vector.shape_cast %55 : vector<8x8x1xi1> to vector<8x8x1xi1>
    %62 = vector.broadcast %61 : vector<8x8x1xi1> to vector<8x8x768xi1>
    %63 = vector.broadcast %cst : f32 to vector<8x8x768xf32>
    %64 = arith.select %62, %60, %63 : vector<8x8x768xi1>, vector<8x8x768xf32>
    %cst_21 = arith.constant dense<0xFF800000> : vector<8x768xf32>
    %65 = vector.multi_reduction <maximumf>, %64, %cst_21 [0] : vector<8x8x768xf32> to vector<8x768xf32>
    %cst_22 = arith.constant -9.99999968E+37 : f32
    %66 = vector.broadcast %cst_22 : f32 to vector<8x768xf32>
    %67 = arith.cmpf ole, %65, %66 : vector<8x768xf32>
    %cst_23 = arith.constant 0.000000e+00 : f32
    %68 = vector.broadcast %cst_23 : f32 to vector<8x768xf32>
    %69 = arith.select %67, %68, %65 : vector<8x768xi1>, vector<8x768xf32>
    %70 = vector.broadcast %0 : f32 to vector<8x768xf32>
    %71 = arith.mulf %70, %46 : vector<8x768xf32>
    %cst_24 = arith.constant 1.000000e+00 : f32
    %72 = arith.subf %cst_24, %0 : f32
    %73 = vector.broadcast %72 : f32 to vector<8x768xf32>
    %74 = arith.mulf %73, %69 : vector<8x768xf32>
    %75 = arith.addf %71, %74 : vector<8x768xf32>
    %76 = arith.addi %1, %c1_i32 : i32
    %77 = arith.index_cast %76 : i32 to index
    %78 = memref.load %arg2[%77] : memref<8xf32, #tpu.memory_space<smem>>
    %cst_25 = arith.constant 1.000000e+00 : f32
    %79 = arith.maximumf %78, %cst_25 : f32
    %cst_26 = arith.constant dense<0.000000e+00> : vector<768xf32>
    %80 = vector.multi_reduction <add>, %75, %cst_26 [0] : vector<8x768xf32> to vector<768xf32>
    %81 = vector.shape_cast %80 : vector<768xf32> to vector<1x768xf32>
    %82 = vector.broadcast %79 : f32 to vector<1x768xf32>
    %83 = arith.divf %81, %82 : vector<1x768xf32>
    %84 = arith.index_cast %c1_i32 : i32 to index
    %c0_27 = arith.constant 0 : index
    %85 = vector.load %arg9[%84, %c0_27] : memref<8x768xf32, #tpu.memory_space<vmem>>, vector<1x768xf32>
    tpu.vector_store %arg9[%84, %c0_27], %83 {strides = array<i32>} : memref<8x768xf32, #tpu.memory_space<vmem>>, vector<1x768xf32>,
    %c2_i32 = arith.constant 2 : i32
    %86 = arith.index_cast %c2_i32 : i32 to index
    %c0_28 = arith.constant 0 : index
    %c0_29 = arith.constant 0 : index
    %87 = vector.load %arg3[%86, %c0_28, %c0_29] : memref<8x8x768xf32, #tpu.memory_space<vmem>>, vector<1x8x768xf32>
    %88 = vector.shape_cast %87 : vector<1x8x768xf32> to vector<8x768xf32>
    %89 = arith.index_cast %c2_i32 : i32 to index
    %c0_30 = arith.constant 0 : index
    %c0_31 = arith.constant 0 : index
    %90 = vector.load %arg4[%89, %c0_30, %c0_31] : memref<8x8x8xf32, #tpu.memory_space<vmem>>, vector<1x8x8xf32>
    %91 = vector.shape_cast %90 : vector<1x8x8xf32> to vector<8x8xf32>
    %92 = arith.index_cast %c2_i32 : i32 to index
    %c0_32 = arith.constant 0 : index
    %c0_33 = arith.constant 0 : index
    %93 = vector.load %arg5[%92, %c0_32, %c0_33] : memref<8x8x8xf32, #tpu.memory_space<vmem>>, vector<1x8x8xf32>
    %94 = vector.shape_cast %93 : vector<1x8x8xf32> to vector<8x8xf32>
    %95 = vector.shape_cast %94 : vector<8x8xf32> to vector<8x8x1xf32>
    %cst_34 = arith.constant 0.000000e+00 : f32
    %96 = vector.broadcast %cst_34 : f32 to vector<8x8x1xf32>
    %97 = arith.cmpf ogt, %95, %96 : vector<8x8x1xf32>
    %98 = vector.shape_cast %88 : vector<8x768xf32> to vector<8x1x768xf32>
    %99 = vector.shape_cast %91 : vector<8x8xf32> to vector<8x8x1xf32>
    %100 = vector.broadcast %98 : vector<8x1x768xf32> to vector<8x8x768xf32>
    %101 = vector.broadcast %99 : vector<8x8x1xf32> to vector<8x8x768xf32>
    %102 = arith.mulf %100, %101 : vector<8x8x768xf32>
    %103 = vector.shape_cast %97 : vector<8x8x1xi1> to vector<8x8x1xi1>
    %104 = vector.broadcast %103 : vector<8x8x1xi1> to vector<8x8x768xi1>
    %105 = vector.broadcast %cst : f32 to vector<8x8x768xf32>
    %106 = arith.select %104, %102, %105 : vector<8x8x768xi1>, vector<8x8x768xf32>
    %cst_35 = arith.constant dense<0xFF800000> : vector<8x768xf32>
    %107 = vector.multi_reduction <maximumf>, %106, %cst_35 [0] : vector<8x8x768xf32> to vector<8x768xf32>
    %cst_36 = arith.constant -9.99999968E+37 : f32
    %108 = vector.broadcast %cst_36 : f32 to vector<8x768xf32>
    %109 = arith.cmpf ole, %107, %108 : vector<8x768xf32>
    %cst_37 = arith.constant 0.000000e+00 : f32
    %110 = vector.broadcast %cst_37 : f32 to vector<8x768xf32>
    %111 = arith.select %109, %110, %107 : vector<8x768xi1>, vector<8x768xf32>
    %112 = vector.broadcast %0 : f32 to vector<8x768xf32>
    %113 = arith.mulf %112, %88 : vector<8x768xf32>
    %cst_38 = arith.constant 1.000000e+00 : f32
    %114 = arith.subf %cst_38, %0 : f32
    %115 = vector.broadcast %114 : f32 to vector<8x768xf32>
    %116 = arith.mulf %115, %111 : vector<8x768xf32>
    %117 = arith.addf %113, %116 : vector<8x768xf32>
    %118 = arith.addi %1, %c2_i32 : i32
    %119 = arith.index_cast %118 : i32 to index
    %120 = memref.load %arg2[%119] : memref<8xf32, #tpu.memory_space<smem>>
    %cst_39 = arith.constant 1.000000e+00 : f32
    %121 = arith.maximumf %120, %cst_39 : f32
    %cst_40 = arith.constant dense<0.000000e+00> : vector<768xf32>
    %122 = vector.multi_reduction <add>, %117, %cst_40 [0] : vector<8x768xf32> to vector<768xf32>
    %123 = vector.shape_cast %122 : vector<768xf32> to vector<1x768xf32>
    %124 = vector.broadcast %121 : f32 to vector<1x768xf32>
    %125 = arith.divf %123, %124 : vector<1x768xf32>
    %126 = arith.index_cast %c2_i32 : i32 to index
    %c0_41 = arith.constant 0 : index
    %127 = vector.load %arg9[%126, %c0_41] : memref<8x768xf32, #tpu.memory_space<vmem>>, vector<1x768xf32>
    tpu.vector_store %arg9[%126, %c0_41], %125 {strides = array<i32>} : memref<8x768xf32, #tpu.memory_space<vmem>>, vector<1x768xf32>,
    %c3_i32 = arith.constant 3 : i32
    %128 = arith.index_cast %c3_i32 : i32 to index
    %c0_42 = arith.constant 0 : index
    %c0_43 = arith.constant 0 : index
    %129 = vector.load %arg3[%128, %c0_42, %c0_43] : memref<8x8x768xf32, #tpu.memory_space<vmem>>, vector<1x8x768xf32>
    %130 = vector.shape_cast %129 : vector<1x8x768xf32> to vector<8x768xf32>
    %131 = arith.index_cast %c3_i32 : i32 to index
    %c0_44 = arith.constant 0 : index
    %c0_45 = arith.constant 0 : index
    %132 = vector.load %arg4[%131, %c0_44, %c0_45] : memref<8x8x8xf32, #tpu.memory_space<vmem>>, vector<1x8x8xf32>
    %133 = vector.shape_cast %132 : vector<1x8x8xf32> to vector<8x8xf32>
    %134 = arith.index_cast %c3_i32 : i32 to index
    %c0_46 = arith.constant 0 : index
    %c0_47 = arith.constant 0 : index
    %135 = vector.load %arg5[%134, %c0_46, %c0_47] : memref<8x8x8xf32, #tpu.memory_space<vmem>>, vector<1x8x8xf32>
    %136 = vector.shape_cast %135 : vector<1x8x8xf32> to vector<8x8xf32>
    %137 = vector.shape_cast %136 : vector<8x8xf32> to vector<8x8x1xf32>
    %cst_48 = arith.constant 0.000000e+00 : f32
    %138 = vector.broadcast %cst_48 : f32 to vector<8x8x1xf32>
    %139 = arith.cmpf ogt, %137, %138 : vector<8x8x1xf32>
    %140 = vector.shape_cast %130 : vector<8x768xf32> to vector<8x1x768xf32>
    %141 = vector.shape_cast %133 : vector<8x8xf32> to vector<8x8x1xf32>
    %142 = vector.broadcast %140 : vector<8x1x768xf32> to vector<8x8x768xf32>
    %143 = vector.broadcast %141 : vector<8x8x1xf32> to vector<8x8x768xf32>
    %144 = arith.mulf %142, %143 : vector<8x8x768xf32>
    %145 = vector.shape_cast %139 : vector<8x8x1xi1> to vector<8x8x1xi1>
    %146 = vector.broadcast %145 : vector<8x8x1xi1> to vector<8x8x768xi1>
    %147 = vector.broadcast %cst : f32 to vector<8x8x768xf32>
    %148 = arith.select %146, %144, %147 : vector<8x8x768xi1>, vector<8x8x768xf32>
    %cst_49 = arith.constant dense<0xFF800000> : vector<8x768xf32>
    %149 = vector.multi_reduction <maximumf>, %148, %cst_49 [0] : vector<8x8x768xf32> to vector<8x768xf32>
    %cst_50 = arith.constant -9.99999968E+37 : f32
    %150 = vector.broadcast %cst_50 : f32 to vector<8x768xf32>
    %151 = arith.cmpf ole, %149, %150 : vector<8x768xf32>
    %cst_51 = arith.constant 0.000000e+00 : f32
    %152 = vector.broadcast %cst_51 : f32 to vector<8x768xf32>
    %153 = arith.select %151, %152, %149 : vector<8x768xi1>, vector<8x768xf32>
    %154 = vector.broadcast %0 : f32 to vector<8x768xf32>
    %155 = arith.mulf %154, %130 : vector<8x768xf32>
    %cst_52 = arith.constant 1.000000e+00 : f32
    %156 = arith.subf %cst_52, %0 : f32
    %157 = vector.broadcast %156 : f32 to vector<8x768xf32>
    %158 = arith.mulf %157, %153 : vector<8x768xf32>
    %159 = arith.addf %155, %158 : vector<8x768xf32>
    %160 = arith.addi %1, %c3_i32 : i32
    %161 = arith.index_cast %160 : i32 to index
    %162 = memref.load %arg2[%161] : memref<8xf32, #tpu.memory_space<smem>>
    %cst_53 = arith.constant 1.000000e+00 : f32
    %163 = arith.maximumf %162, %cst_53 : f32
    %cst_54 = arith.constant dense<0.000000e+00> : vector<768xf32>
    %164 = vector.multi_reduction <add>, %159, %cst_54 [0] : vector<8x768xf32> to vector<768xf32>
    %165 = vector.shape_cast %164 : vector<768xf32> to vector<1x768xf32>
    %166 = vector.broadcast %163 : f32 to vector<1x768xf32>
    %167 = arith.divf %165, %166 : vector<1x768xf32>
    %168 = arith.index_cast %c3_i32 : i32 to index
    %c0_55 = arith.constant 0 : index
    %169 = vector.load %arg9[%168, %c0_55] : memref<8x768xf32, #tpu.memory_space<vmem>>, vector<1x768xf32>
    tpu.vector_store %arg9[%168, %c0_55], %167 {strides = array<i32>} : memref<8x768xf32, #tpu.memory_space<vmem>>, vector<1x768xf32>,
    %c4_i32 = arith.constant 4 : i32
    %170 = arith.index_cast %c4_i32 : i32 to index
    %c0_56 = arith.constant 0 : index
    %c0_57 = arith.constant 0 : index
    %171 = vector.load %arg3[%170, %c0_56, %c0_57] : memref<8x8x768xf32, #tpu.memory_space<vmem>>, vector<1x8x768xf32>
    %172 = vector.shape_cast %171 : vector<1x8x768xf32> to vector<8x768xf32>
    %173 = arith.index_cast %c4_i32 : i32 to index
    %c0_58 = arith.constant 0 : index
    %c0_59 = arith.constant 0 : index
    %174 = vector.load %arg4[%173, %c0_58, %c0_59] : memref<8x8x8xf32, #tpu.memory_space<vmem>>, vector<1x8x8xf32>
    %175 = vector.shape_cast %174 : vector<1x8x8xf32> to vector<8x8xf32>
    %176 = arith.index_cast %c4_i32 : i32 to index
    %c0_60 = arith.constant 0 : index
    %c0_61 = arith.constant 0 : index
    %177 = vector.load %arg5[%176, %c0_60, %c0_61] : memref<8x8x8xf32, #tpu.memory_space<vmem>>, vector<1x8x8xf32>
    %178 = vector.shape_cast %177 : vector<1x8x8xf32> to vector<8x8xf32>
    %179 = vector.shape_cast %178 : vector<8x8xf32> to vector<8x8x1xf32>
    %cst_62 = arith.constant 0.000000e+00 : f32
    %180 = vector.broadcast %cst_62 : f32 to vector<8x8x1xf32>
    %181 = arith.cmpf ogt, %179, %180 : vector<8x8x1xf32>
    %182 = vector.shape_cast %172 : vector<8x768xf32> to vector<8x1x768xf32>
    %183 = vector.shape_cast %175 : vector<8x8xf32> to vector<8x8x1xf32>
    %184 = vector.broadcast %182 : vector<8x1x768xf32> to vector<8x8x768xf32>
    %185 = vector.broadcast %183 : vector<8x8x1xf32> to vector<8x8x768xf32>
    %186 = arith.mulf %184, %185 : vector<8x8x768xf32>
    %187 = vector.shape_cast %181 : vector<8x8x1xi1> to vector<8x8x1xi1>
    %188 = vector.broadcast %187 : vector<8x8x1xi1> to vector<8x8x768xi1>
    %189 = vector.broadcast %cst : f32 to vector<8x8x768xf32>
    %190 = arith.select %188, %186, %189 : vector<8x8x768xi1>, vector<8x8x768xf32>
    %cst_63 = arith.constant dense<0xFF800000> : vector<8x768xf32>
    %191 = vector.multi_reduction <maximumf>, %190, %cst_63 [0] : vector<8x8x768xf32> to vector<8x768xf32>
    %cst_64 = arith.constant -9.99999968E+37 : f32
    %192 = vector.broadcast %cst_64 : f32 to vector<8x768xf32>
    %193 = arith.cmpf ole, %191, %192 : vector<8x768xf32>
    %cst_65 = arith.constant 0.000000e+00 : f32
    %194 = vector.broadcast %cst_65 : f32 to vector<8x768xf32>
    %195 = arith.select %193, %194, %191 : vector<8x768xi1>, vector<8x768xf32>
    %196 = vector.broadcast %0 : f32 to vector<8x768xf32>
    %197 = arith.mulf %196, %172 : vector<8x768xf32>
    %cst_66 = arith.constant 1.000000e+00 : f32
    %198 = arith.subf %cst_66, %0 : f32
    %199 = vector.broadcast %198 : f32 to vector<8x768xf32>
    %200 = arith.mulf %199, %195 : vector<8x768xf32>
    %201 = arith.addf %197, %200 : vector<8x768xf32>
    %202 = arith.addi %1, %c4_i32 : i32
    %203 = arith.index_cast %202 : i32 to index
    %204 = memref.load %arg2[%203] : memref<8xf32, #tpu.memory_space<smem>>
    %cst_67 = arith.constant 1.000000e+00 : f32
    %205 = arith.maximumf %204, %cst_67 : f32
    %cst_68 = arith.constant dense<0.000000e+00> : vector<768xf32>
    %206 = vector.multi_reduction <add>, %201, %cst_68 [0] : vector<8x768xf32> to vector<768xf32>
    %207 = vector.shape_cast %206 : vector<768xf32> to vector<1x768xf32>
    %208 = vector.broadcast %205 : f32 to vector<1x768xf32>
    %209 = arith.divf %207, %208 : vector<1x768xf32>
    %210 = arith.index_cast %c4_i32 : i32 to index
    %c0_69 = arith.constant 0 : index
    %211 = vector.load %arg9[%210, %c0_69] : memref<8x768xf32, #tpu.memory_space<vmem>>, vector<1x768xf32>
    tpu.vector_store %arg9[%210, %c0_69], %209 {strides = array<i32>} : memref<8x768xf32, #tpu.memory_space<vmem>>, vector<1x768xf32>,
    %c5_i32 = arith.constant 5 : i32
    %212 = arith.index_cast %c5_i32 : i32 to index
    %c0_70 = arith.constant 0 : index
    %c0_71 = arith.constant 0 : index
    %213 = vector.load %arg3[%212, %c0_70, %c0_71] : memref<8x8x768xf32, #tpu.memory_space<vmem>>, vector<1x8x768xf32>
    %214 = vector.shape_cast %213 : vector<1x8x768xf32> to vector<8x768xf32>
    %215 = arith.index_cast %c5_i32 : i32 to index
    %c0_72 = arith.constant 0 : index
    %c0_73 = arith.constant 0 : index
    %216 = vector.load %arg4[%215, %c0_72, %c0_73] : memref<8x8x8xf32, #tpu.memory_space<vmem>>, vector<1x8x8xf32>
    %217 = vector.shape_cast %216 : vector<1x8x8xf32> to vector<8x8xf32>
    %218 = arith.index_cast %c5_i32 : i32 to index
    %c0_74 = arith.constant 0 : index
    %c0_75 = arith.constant 0 : index
    %219 = vector.load %arg5[%218, %c0_74, %c0_75] : memref<8x8x8xf32, #tpu.memory_space<vmem>>, vector<1x8x8xf32>
    %220 = vector.shape_cast %219 : vector<1x8x8xf32> to vector<8x8xf32>
    %221 = vector.shape_cast %220 : vector<8x8xf32> to vector<8x8x1xf32>
    %cst_76 = arith.constant 0.000000e+00 : f32
    %222 = vector.broadcast %cst_76 : f32 to vector<8x8x1xf32>
    %223 = arith.cmpf ogt, %221, %222 : vector<8x8x1xf32>
    %224 = vector.shape_cast %214 : vector<8x768xf32> to vector<8x1x768xf32>
    %225 = vector.shape_cast %217 : vector<8x8xf32> to vector<8x8x1xf32>
    %226 = vector.broadcast %224 : vector<8x1x768xf32> to vector<8x8x768xf32>
    %227 = vector.broadcast %225 : vector<8x8x1xf32> to vector<8x8x768xf32>
    %228 = arith.mulf %226, %227 : vector<8x8x768xf32>
    %229 = vector.shape_cast %223 : vector<8x8x1xi1> to vector<8x8x1xi1>
    %230 = vector.broadcast %229 : vector<8x8x1xi1> to vector<8x8x768xi1>
    %231 = vector.broadcast %cst : f32 to vector<8x8x768xf32>
    %232 = arith.select %230, %228, %231 : vector<8x8x768xi1>, vector<8x8x768xf32>
    %cst_77 = arith.constant dense<0xFF800000> : vector<8x768xf32>
    %233 = vector.multi_reduction <maximumf>, %232, %cst_77 [0] : vector<8x8x768xf32> to vector<8x768xf32>
    %cst_78 = arith.constant -9.99999968E+37 : f32
    %234 = vector.broadcast %cst_78 : f32 to vector<8x768xf32>
    %235 = arith.cmpf ole, %233, %234 : vector<8x768xf32>
    %cst_79 = arith.constant 0.000000e+00 : f32
    %236 = vector.broadcast %cst_79 : f32 to vector<8x768xf32>
    %237 = arith.select %235, %236, %233 : vector<8x768xi1>, vector<8x768xf32>
    %238 = vector.broadcast %0 : f32 to vector<8x768xf32>
    %239 = arith.mulf %238, %214 : vector<8x768xf32>
    %cst_80 = arith.constant 1.000000e+00 : f32
    %240 = arith.subf %cst_80, %0 : f32
    %241 = vector.broadcast %240 : f32 to vector<8x768xf32>
    %242 = arith.mulf %241, %237 : vector<8x768xf32>
    %243 = arith.addf %239, %242 : vector<8x768xf32>
    %244 = arith.addi %1, %c5_i32 : i32
    %245 = arith.index_cast %244 : i32 to index
    %246 = memref.load %arg2[%245] : memref<8xf32, #tpu.memory_space<smem>>
    %cst_81 = arith.constant 1.000000e+00 : f32
    %247 = arith.maximumf %246, %cst_81 : f32
    %cst_82 = arith.constant dense<0.000000e+00> : vector<768xf32>
    %248 = vector.multi_reduction <add>, %243, %cst_82 [0] : vector<8x768xf32> to vector<768xf32>
    %249 = vector.shape_cast %248 : vector<768xf32> to vector<1x768xf32>
    %250 = vector.broadcast %247 : f32 to vector<1x768xf32>
    %251 = arith.divf %249, %250 : vector<1x768xf32>
    %252 = arith.index_cast %c5_i32 : i32 to index
    %c0_83 = arith.constant 0 : index
    %253 = vector.load %arg9[%252, %c0_83] : memref<8x768xf32, #tpu.memory_space<vmem>>, vector<1x768xf32>
    tpu.vector_store %arg9[%252, %c0_83], %251 {strides = array<i32>} : memref<8x768xf32, #tpu.memory_space<vmem>>, vector<1x768xf32>,
    %c6_i32 = arith.constant 6 : i32
    %254 = arith.index_cast %c6_i32 : i32 to index
    %c0_84 = arith.constant 0 : index
    %c0_85 = arith.constant 0 : index
    %255 = vector.load %arg3[%254, %c0_84, %c0_85] : memref<8x8x768xf32, #tpu.memory_space<vmem>>, vector<1x8x768xf32>
    %256 = vector.shape_cast %255 : vector<1x8x768xf32> to vector<8x768xf32>
    %257 = arith.index_cast %c6_i32 : i32 to index
    %c0_86 = arith.constant 0 : index
    %c0_87 = arith.constant 0 : index
    %258 = vector.load %arg4[%257, %c0_86, %c0_87] : memref<8x8x8xf32, #tpu.memory_space<vmem>>, vector<1x8x8xf32>
    %259 = vector.shape_cast %258 : vector<1x8x8xf32> to vector<8x8xf32>
    %260 = arith.index_cast %c6_i32 : i32 to index
    %c0_88 = arith.constant 0 : index
    %c0_89 = arith.constant 0 : index
    %261 = vector.load %arg5[%260, %c0_88, %c0_89] : memref<8x8x8xf32, #tpu.memory_space<vmem>>, vector<1x8x8xf32>
    %262 = vector.shape_cast %261 : vector<1x8x8xf32> to vector<8x8xf32>
    %263 = vector.shape_cast %262 : vector<8x8xf32> to vector<8x8x1xf32>
    %cst_90 = arith.constant 0.000000e+00 : f32
    %264 = vector.broadcast %cst_90 : f32 to vector<8x8x1xf32>
    %265 = arith.cmpf ogt, %263, %264 : vector<8x8x1xf32>
    %266 = vector.shape_cast %256 : vector<8x768xf32> to vector<8x1x768xf32>
    %267 = vector.shape_cast %259 : vector<8x8xf32> to vector<8x8x1xf32>
    %268 = vector.broadcast %266 : vector<8x1x768xf32> to vector<8x8x768xf32>
    %269 = vector.broadcast %267 : vector<8x8x1xf32> to vector<8x8x768xf32>
    %270 = arith.mulf %268, %269 : vector<8x8x768xf32>
    %271 = vector.shape_cast %265 : vector<8x8x1xi1> to vector<8x8x1xi1>
    %272 = vector.broadcast %271 : vector<8x8x1xi1> to vector<8x8x768xi1>
    %273 = vector.broadcast %cst : f32 to vector<8x8x768xf32>
    %274 = arith.select %272, %270, %273 : vector<8x8x768xi1>, vector<8x8x768xf32>
    %cst_91 = arith.constant dense<0xFF800000> : vector<8x768xf32>
    %275 = vector.multi_reduction <maximumf>, %274, %cst_91 [0] : vector<8x8x768xf32> to vector<8x768xf32>
    %cst_92 = arith.constant -9.99999968E+37 : f32
    %276 = vector.broadcast %cst_92 : f32 to vector<8x768xf32>
    %277 = arith.cmpf ole, %275, %276 : vector<8x768xf32>
    %cst_93 = arith.constant 0.000000e+00 : f32
    %278 = vector.broadcast %cst_93 : f32 to vector<8x768xf32>
    %279 = arith.select %277, %278, %275 : vector<8x768xi1>, vector<8x768xf32>
    %280 = vector.broadcast %0 : f32 to vector<8x768xf32>
    %281 = arith.mulf %280, %256 : vector<8x768xf32>
    %cst_94 = arith.constant 1.000000e+00 : f32
    %282 = arith.subf %cst_94, %0 : f32
    %283 = vector.broadcast %282 : f32 to vector<8x768xf32>
    %284 = arith.mulf %283, %279 : vector<8x768xf32>
    %285 = arith.addf %281, %284 : vector<8x768xf32>
    %286 = arith.addi %1, %c6_i32 : i32
    %287 = arith.index_cast %286 : i32 to index
    %288 = memref.load %arg2[%287] : memref<8xf32, #tpu.memory_space<smem>>
    %cst_95 = arith.constant 1.000000e+00 : f32
    %289 = arith.maximumf %288, %cst_95 : f32
    %cst_96 = arith.constant dense<0.000000e+00> : vector<768xf32>
    %290 = vector.multi_reduction <add>, %285, %cst_96 [0] : vector<8x768xf32> to vector<768xf32>
    %291 = vector.shape_cast %290 : vector<768xf32> to vector<1x768xf32>
    %292 = vector.broadcast %289 : f32 to vector<1x768xf32>
    %293 = arith.divf %291, %292 : vector<1x768xf32>
    %294 = arith.index_cast %c6_i32 : i32 to index
    %c0_97 = arith.constant 0 : index
    %295 = vector.load %arg9[%294, %c0_97] : memref<8x768xf32, #tpu.memory_space<vmem>>, vector<1x768xf32>
    tpu.vector_store %arg9[%294, %c0_97], %293 {strides = array<i32>} : memref<8x768xf32, #tpu.memory_space<vmem>>, vector<1x768xf32>,
    %c7_i32 = arith.constant 7 : i32
    %296 = arith.index_cast %c7_i32 : i32 to index
    %c0_98 = arith.constant 0 : index
    %c0_99 = arith.constant 0 : index
    %297 = vector.load %arg3[%296, %c0_98, %c0_99] : memref<8x8x768xf32, #tpu.memory_space<vmem>>, vector<1x8x768xf32>
    %298 = vector.shape_cast %297 : vector<1x8x768xf32> to vector<8x768xf32>
    %299 = arith.index_cast %c7_i32 : i32 to index
    %c0_100 = arith.constant 0 : index
    %c0_101 = arith.constant 0 : index
    %300 = vector.load %arg4[%299, %c0_100, %c0_101] : memref<8x8x8xf32, #tpu.memory_space<vmem>>, vector<1x8x8xf32>
    %301 = vector.shape_cast %300 : vector<1x8x8xf32> to vector<8x8xf32>
    %302 = arith.index_cast %c7_i32 : i32 to index
    %c0_102 = arith.constant 0 : index
    %c0_103 = arith.constant 0 : index
    %303 = vector.load %arg5[%302, %c0_102, %c0_103] : memref<8x8x8xf32, #tpu.memory_space<vmem>>, vector<1x8x8xf32>
    %304 = vector.shape_cast %303 : vector<1x8x8xf32> to vector<8x8xf32>
    %305 = vector.shape_cast %304 : vector<8x8xf32> to vector<8x8x1xf32>
    %cst_104 = arith.constant 0.000000e+00 : f32
    %306 = vector.broadcast %cst_104 : f32 to vector<8x8x1xf32>
    %307 = arith.cmpf ogt, %305, %306 : vector<8x8x1xf32>
    %308 = vector.shape_cast %298 : vector<8x768xf32> to vector<8x1x768xf32>
    %309 = vector.shape_cast %301 : vector<8x8xf32> to vector<8x8x1xf32>
    %310 = vector.broadcast %308 : vector<8x1x768xf32> to vector<8x8x768xf32>
    %311 = vector.broadcast %309 : vector<8x8x1xf32> to vector<8x8x768xf32>
    %312 = arith.mulf %310, %311 : vector<8x8x768xf32>
    %313 = vector.shape_cast %307 : vector<8x8x1xi1> to vector<8x8x1xi1>
    %314 = vector.broadcast %313 : vector<8x8x1xi1> to vector<8x8x768xi1>
    %315 = vector.broadcast %cst : f32 to vector<8x8x768xf32>
    %316 = arith.select %314, %312, %315 : vector<8x8x768xi1>, vector<8x8x768xf32>
    %cst_105 = arith.constant dense<0xFF800000> : vector<8x768xf32>
    %317 = vector.multi_reduction <maximumf>, %316, %cst_105 [0] : vector<8x8x768xf32> to vector<8x768xf32>
    %cst_106 = arith.constant -9.99999968E+37 : f32
    %318 = vector.broadcast %cst_106 : f32 to vector<8x768xf32>
    %319 = arith.cmpf ole, %317, %318 : vector<8x768xf32>
    %cst_107 = arith.constant 0.000000e+00 : f32
    %320 = vector.broadcast %cst_107 : f32 to vector<8x768xf32>
    %321 = arith.select %319, %320, %317 : vector<8x768xi1>, vector<8x768xf32>
    %322 = vector.broadcast %0 : f32 to vector<8x768xf32>
    %323 = arith.mulf %322, %298 : vector<8x768xf32>
    %cst_108 = arith.constant 1.000000e+00 : f32
    %324 = arith.subf %cst_108, %0 : f32
    %325 = vector.broadcast %324 : f32 to vector<8x768xf32>
    %326 = arith.mulf %325, %321 : vector<8x768xf32>
    %327 = arith.addf %323, %326 : vector<8x768xf32>
    %328 = arith.addi %1, %c7_i32 : i32
    %329 = arith.index_cast %328 : i32 to index
    %330 = memref.load %arg2[%329] : memref<8xf32, #tpu.memory_space<smem>>
    %cst_109 = arith.constant 1.000000e+00 : f32
    %331 = arith.maximumf %330, %cst_109 : f32
    %cst_110 = arith.constant dense<0.000000e+00> : vector<768xf32>
    %332 = vector.multi_reduction <add>, %327, %cst_110 [0] : vector<8x768xf32> to vector<768xf32>
    %333 = vector.shape_cast %332 : vector<768xf32> to vector<1x768xf32>
    %334 = vector.broadcast %331 : f32 to vector<1x768xf32>
    %335 = arith.divf %333, %334 : vector<1x768xf32>
    %336 = arith.index_cast %c7_i32 : i32 to index
    %c0_111 = arith.constant 0 : index
    %337 = vector.load %arg9[%336, %c0_111] : memref<8x768xf32, #tpu.memory_space<vmem>>, vector<1x768xf32>
    tpu.vector_store %arg9[%336, %c0_111], %335 {strides = array<i32>} : memref<8x768xf32, #tpu.memory_space<vmem>>, vector<1x768xf32>,
    %c8_i32_112 = arith.constant 8 : i32
    %c0_113 = arith.constant 0 : index
    %c0_114 = arith.constant 0 : index
    %338 = vector.load %arg9[%c0_113, %c0_114] : memref<8x768xf32, #tpu.memory_space<vmem>>, vector<8x768xf32>
    %339 = arith.truncf %338 : vector<8x768xf32> to vector<8x768xbf16>
    %c0_115 = arith.constant 0 : index
    %c0_116 = arith.constant 0 : index
    %340 = vector.load %arg6[%c0_115, %c0_116] : memref<768x768xbf16, #tpu.memory_space<vmem>>, vector<768x768xbf16>
    %cst_117 = arith.constant dense<0.000000e+00> : vector<8x768xf32>
    %341 = tpu.matmul %339, %340, %cst_117 {dimension_numbers = #tpu.dot_dimension_numbers<[1], [0], [0], [1], [0, 0, 1, 1], [], []>} : vector<8x768xbf16>, vector<768x768xbf16>, vector<8x768xf32> -> vector<8x768xf32>
    %c0_118 = arith.constant 0 : index
    %c0_119 = arith.constant 0 : index
    %342 = vector.load %arg7[%c0_118, %c0_119] : memref<1x768xf32, #tpu.memory_space<vmem>>, vector<1x768xf32>
    %343 = vector.broadcast %342 : vector<1x768xf32> to vector<8x768xf32>
    %344 = arith.addf %341, %343 : vector<8x768xf32>
    %345 = arith.negf %344 : vector<8x768xf32>
    %346 = math.exp %345 : vector<8x768xf32>
    %cst_120 = arith.constant 1.000000e+00 : f32
    %347 = vector.broadcast %cst_120 : f32 to vector<8x768xf32>
    %348 = arith.addf %347, %346 : vector<8x768xf32>
    %349 = arith.divf %347, %348 : vector<8x768xf32>
    %c0_121 = arith.constant 0 : index
    %c0_122 = arith.constant 0 : index
    %350 = vector.load %arg8[%c0_121, %c0_122] : memref<8x768xf32, #tpu.memory_space<vmem>>, vector<8x768xf32>
    tpu.vector_store %arg8[%c0_121, %c0_122], %349 {strides = array<i32>} : memref<8x768xf32, #tpu.memory_space<vmem>>, vector<8x768xf32>,
    return
  }
  func.func @transform_0(%arg0: i32) -> i32 {
    %c0_i32 = arith.constant 0 : i32
    %c0_i32_0 = arith.constant 0 : i32
    return %c0_i32 : i32
  }
  func.func @transform_1(%arg0: i32) -> i32 {
    %c0_i32 = arith.constant 0 : i32
    %c0_i32_0 = arith.constant 0 : i32
    return %c0_i32 : i32
  }
  func.func @transform_2(%arg0: i32) -> (i32, i32, i32) {
    %c0_i32 = arith.constant 0 : i32
    %c0_i32_0 = arith.constant 0 : i32
    %c0_i32_1 = arith.constant 0 : i32
    return %arg0, %c0_i32, %c0_i32_0 : i32, i32, i32
  }
  func.func @transform_3(%arg0: i32) -> (i32, i32, i32) {
    %c0_i32 = arith.constant 0 : i32
    %c0_i32_0 = arith.constant 0 : i32
    %c0_i32_1 = arith.constant 0 : i32
    return %arg0, %c0_i32, %c0_i32_0 : i32, i32, i32
  }
  func.func @transform_4(%arg0: i32) -> (i32, i32, i32) {
    %c0_i32 = arith.constant 0 : i32
    %c0_i32_0 = arith.constant 0 : i32
    %c0_i32_1 = arith.constant 0 : i32
    return %arg0, %c0_i32, %c0_i32_0 : i32, i32, i32
  }
  func.func @transform_5(%arg0: i32) -> (i32, i32) {
    %c0_i32 = arith.constant 0 : i32
    %c0_i32_0 = arith.constant 0 : i32
    %c0_i32_1 = arith.constant 0 : i32
    return %c0_i32, %c0_i32_0 : i32, i32
  }
  func.func @transform_6(%arg0: i32) -> (i32, i32) {
    %c0_i32 = arith.constant 0 : i32
    %c0_i32_0 = arith.constant 0 : i32
    %c0_i32_1 = arith.constant 0 : i32
    return %c0_i32, %c0_i32_0 : i32, i32
  }
  func.func @transform_7(%arg0: i32) -> (i32, i32) {
    %c0_i32 = arith.constant 0 : i32
    %c0_i32_0 = arith.constant 0 : i32
    return %arg0, %c0_i32 : i32, i32
  }
}

</mosaic_0001>

<bundles_post_ra>
// kernel: tpu_custom_call.1
= control target key start
LH: loop header
LB: loop body
LE: loop exit
PB: predicated region body
PF: predicated region fallthrough
CT: control target
= control target key end

     0   :  { %13 = vsyncpa [#allocation7], 0  ;;  %s15096_s0 = inlined_call_operand.<no memory space> [shape: f32[1], index: 0, kind: input, shape index: {}]   ;;  %s15097_s1 = inlined_call_operand.hbm [shape: f32[8], index: 1, kind: input, shape index: {}]   ;;  %s15098_s2 = inlined_call_operand.hbm [shape: f32[8,8,768], index: 2, kind: input, shape index: {}]   ;;  %s15099_s3 = inlined_call_operand.hbm [shape: f32[8,8,8], index: 3, kind: input, shape index: {}]   ;;  %s15100_s4 = inlined_call_operand.hbm [shape: f32[8,8,8], index: 4, kind: input, shape index: {}]   ;;  %s15101_s5 = inlined_call_operand.hbm [shape: bf16[768,768], index: 5, kind: input, shape index: {}]   ;;  %s15102_s6 = inlined_call_operand.hbm [shape: f32[1,768], index: 6, kind: input, shape index: {}]   ;;  %s15103_s7 = inlined_call_operand.hbm [shape: f32[8,768], index: 7, kind: output, shape index: {}]  }
   0x1   :  { %14 = vsyncpa [#allocation5], 0 }
   0x2   :  { %15 = vsyncpa [#allocation10], 0 }
   0x3   :  { %16 = vsyncpa [#allocation13], 0 }
   0x4   :  { %17 = vsyncpa [#allocation6], 0  ;;  %s9656_s24 = smov [#allocation9]   ;;  %s9504_s28 = scalar_lea.hbm %s15099_s3, 1024 }
   0x5   :  { %s45_s25 = sshll.u32 %s9656_s24, 4  ;;  %p9505_p0 = scmp.ne.s32.totalorder %s15099_s3, %s9504_s28  ;;  %s46_s25 = int_to_ptr.vmem [resolvable:$true] %s45_s25 }
   0x6   :  { %p9508_p1 = scmp.lt.u32.totalorder %s9504_s28, %s15099_s3 }
   0x8   :  { %p9510_p2 = pnand %p9508_p1, %p9505_p0 }
   0xa   :  { %9513 = shalt.err (!%p9510_p2)
}
   0xb   :  { %s9514_s10 = scalar_lea.vmem %s46_s25, 1024  ;;  %p9519_p4 = scmp.lt.s32.totalorder %s46_s25, %s46_s25 }
   0xc   :  { %p9515_p3 = scmp.ne.s32.totalorder %s46_s25, %s9514_s10  ;;  %p9520_p5 = scmp.lt.s32.totalorder %s9514_s10, %s9514_s10 }
   0xe   :  { %p9521_p6 = por %p9520_p5, %p9519_p4 }
  0x10   :  { %p9522_p7 = pnand %p9521_p6, %p9515_p3 }
  0x12   :  { %9525 = shalt.err (!%p9522_p7)
}
  0x13   :  { %s9657_s11 = smov 128   ;;  %s9658_s12 = smov 8  }
  0x14   :  { %51 = dma.hbm_to_vmem [thread:$0]  %s15099_s3, 1024, %s46_s25, [#allocation10], %s9657_s11, %s9657_s11, %s9658_s12  }
  0x15   :  { %s9659_s15 = smov [#allocation12]   ;;  %s9526_s19 = scalar_lea.hbm %s15101_s5, 36864 }
  0x16   :  { %s69_s16 = sshll.u32 %s9659_s15, 4  ;;  %p9527_p8 = scmp.ne.s32.totalorder %s15101_s5, %s9526_s19  ;;  %s70_s16 = int_to_ptr.vmem [resolvable:$true] %s69_s16 }
  0x17   :  { %p9530_p9 = scmp.lt.u32.totalorder %s9526_s19, %s15101_s5 }
  0x19   :  { %p9532_p10 = pnand %p9530_p9, %p9527_p8 }
  0x1b   :  { %9535 = shalt.err (!%p9532_p10)
}
  0x1c   :  { %s9536_s24 = scalar_lea.vmem %s70_s16, 36864  ;;  %p9541_p12 = scmp.lt.s32.totalorder %s70_s16, %s70_s16 }
  0x1d   :  { %p9537_p11 = scmp.ne.s32.totalorder %s70_s16, %s9536_s24  ;;  %p9542_p13 = scmp.lt.s32.totalorder %s9536_s24, %s9536_s24 }
  0x1f   :  { %p9543_p0 = por %p9542_p13, %p9541_p12 }
  0x21   :  { %p9544_p1 = pnand %p9543_p0, %p9537_p11 }
  0x23   :  { %9547 = shalt.err (!%p9544_p1)
}
  0x24   :  { %s9660_s3 = smov 384   ;;  %s9661_s25 = smov 24  }
  0x25   :  { %75 = dma.hbm_to_vmem [thread:$0]  %s15101_s5, 36864, %s70_s16, [#allocation13], %s9660_s3, %s9660_s3, %s9661_s25  }
  0x26   :  { %s9548_s30 = scalar_lea.hbm %s15097_s1, 16 }
  0x27   :  { %p9549_p2 = scmp.ne.s32.totalorder %s15097_s1, %s9548_s30  ;;  %p9552_p3 = scmp.lt.u32.totalorder %s9548_s30, %s15097_s1 }
  0x29   :  { %p9554_p4 = pnand %p9552_p3, %p9549_p2 }
  0x2b   :  { %9557 = shalt.err (!%p9554_p4)
}
  0x2c   :  { %s9662_s14 = smov [#allocation4]   ;;  %s9663_s5 = smov [#allocation8]  }
  0x2d   :  { %27 = dma.hbm_to_smem %s15097_s1, 16, %s9662_s14, [#allocation7]  }
  0x2e   :  { %s33_s16 = sshll.u32 %s9663_s5, 4  ;;  %s9558_s20 = scalar_lea.hbm %s15098_s2, 6144  ;;  %s34_s16 = int_to_ptr.vmem [resolvable:$true] %s33_s16 }
  0x2f   :  { %p9559_p5 = scmp.ne.s32.totalorder %s15098_s2, %s9558_s20  ;;  %p9562_p6 = scmp.lt.u32.totalorder %s9558_s20, %s15098_s2 }
  0x31   :  { %p9564_p7 = pnand %p9562_p6, %p9559_p5 }
  0x33   :  { %9567 = shalt.err (!%p9564_p7)
}
  0x34   :  { %s9568_s3 = scalar_lea.vmem %s34_s16, 6144  ;;  %p9573_p9 = scmp.lt.s32.totalorder %s34_s16, %s34_s16 }
  0x35   :  { %p9569_p8 = scmp.ne.s32.totalorder %s34_s16, %s9568_s3  ;;  %p9574_p10 = scmp.lt.s32.totalorder %s9568_s3, %s9568_s3 }
  0x37   :  { %p9575_p11 = por %p9574_p10, %p9573_p9 }
  0x39   :  { %p9576_p12 = pnand %p9575_p11, %p9569_p8 }
  0x3b   :  { %9579 = shalt.err (!%p9576_p12)
}
  0x3c   :  { %s9664_s1 = smov 768   ;;  %s9665_s25 = smov 48  }
  0x3d   :  { %39 = dma.hbm_to_vmem [thread:$0]  %s15098_s2, 6144, %s34_s16, [#allocation5], %s9664_s1, %s9664_s1, %s9665_s25  }
  0x3e   :  { %s9666_s28 = smov [#allocation11]   ;;  %s9667_s30 = smov [#allocation14]  }
  0x3f   :  { %s57_s29 = sshll.u32 %s9666_s28, 4  ;;  %s82_s8 = sshll.u32 %s9667_s30, 4  ;;  %s58_s29 = int_to_ptr.vmem [resolvable:$true] %s57_s29  ;;  %s83_s8 = int_to_ptr.vmem [resolvable:$true] %s82_s8 }
  0x40   :  { %s9580_s13 = scalar_lea.hbm %s15100_s4, 1024 }
  0x41   :  { %p9581_p13 = scmp.ne.s32.totalorder %s15100_s4, %s9580_s13  ;;  %p9584_p0 = scmp.lt.u32.totalorder %s9580_s13, %s15100_s4 }
  0x43   :  { %p9586_p1 = pnand %p9584_p0, %p9581_p13 }
  0x45   :  { %9589 = shalt.err (!%p9586_p1)
}
  0x46   :  { %s9590_s2 = scalar_lea.vmem %s58_s29, 1024  ;;  %p9595_p3 = scmp.lt.s32.totalorder %s58_s29, %s58_s29 }
  0x47   :  { %p9591_p2 = scmp.ne.s32.totalorder %s58_s29, %s9590_s2  ;;  %p9596_p4 = scmp.lt.s32.totalorder %s9590_s2, %s9590_s2 }
  0x49   :  { %p9597_p5 = por %p9596_p4, %p9595_p3 }
  0x4b   :  { %p9598_p6 = pnand %p9597_p5, %p9591_p2 }
  0x4d   :  { %9601 = shalt.err (!%p9598_p6)
}
  0x4e   :  { %63 = dma.hbm_to_vmem [thread:$0]  %s15100_s4, 1024, %s58_s29, [#allocation10], %s9657_s11, %s9657_s11, %s9658_s12  }
  0x4f   :  { %s9602_s21 = scalar_lea.hbm %s15102_s6, 96 }
  0x50   :  { %p9603_p7 = scmp.ne.s32.totalorder %s15102_s6, %s9602_s21  ;;  %p9606_p8 = scmp.lt.u32.totalorder %s9602_s21, %s15102_s6 }
  0x52   :  { %p9608_p9 = pnand %p9606_p8, %p9603_p7 }
  0x54   :  { %9611 = shalt.err (!%p9608_p9)
}
  0x55   :  { %s9612_s1 = scalar_lea.vmem %s83_s8, 96  ;;  %p9617_p11 = scmp.lt.s32.totalorder %s83_s8, %s83_s8 }
  0x56   :  { %p9613_p10 = scmp.ne.s32.totalorder %s83_s8, %s9612_s1  ;;  %p9618_p12 = scmp.lt.s32.totalorder %s9612_s1, %s9612_s1 }
  0x58   :  { %p9619_p13 = por %p9618_p12, %p9617_p11 }
  0x5a   :  { %p9620_p0 = pnand %p9619_p13, %p9613_p10 }
  0x5c   :  { %9623 = shalt.err (!%p9620_p0)
}
  0x5d   :  { %85 = dma.hbm_to_vmem [thread:$0]  %s15102_s6, 96, %s83_s8, [#allocation13]  }
  0x5e   :  { %9646 = dma.done.wait [#allocation7], 16  }
  0x5f   :  { %9647 = vsyncadd [#allocation7], 4294967280 }
  0x60   :  { %9648 = dma.done.wait [#allocation5], 6144  }
  0x61   :  { %9649 = vsyncadd [#allocation5], 4294961152 }
  0x62   :  { %9650 = dma.done.wait [#allocation10], 2048  }
  0x63   :  { %9651 = vsyncadd [#allocation10], 4294965248 }
  0x64   :  { %9652 = dma.done.wait [#allocation13], 36960  }
  0x65   :  { %9653 = vsyncadd [#allocation13], 4294930336 }
  0x66   :  { %104 = sfence }
  0x67   :  { %v15104_v0 = vlaneseq  ;;  %v9792_v2 = vld [vmem:[#allocation9 + $0x8] sm:$0xff]  ;;  %v9794_v3 = vld [vmem:[#allocation9] sm:$0xff]  ;;  %v9810_v10 = vld [vmem:[#allocation9 + $0x10] sm:$0xff]  ;;  %v9668_v13 = vmov 1966171168   ;;  %s772_s25 = ssub.f32 1.0, %s15096_s0 }
  0x68   :  { %15508 = vst [vmem:[#allocation21_spill] sm:$0xff] %v9792_v2  ;;  %15509 = vst [vmem:[#allocation22_spill] sm:$0xff] %v9794_v3  ;;  %v192_v14 = vunpack.c.l.s4 %v9668_v13  ;;  %v9816_v15 = vld [vmem:[#allocation9 + $0x18] sm:$0xff]  ;;  %v9822_v18 = vld [vmem:[#allocation9 + $0x20] sm:$0xff]  ;;  %s14435_s26 = sld [smem:[#allocation4 + $0x1]]  ;;  %s14470_s29 = sld [smem:[#allocation4]] }
  0x69   :  { %v9790_v1 = vshrl.u32 %v15104_v0, 7  ;;  %15510 = vst [vmem:[#allocation23_spill] sm:$0xff] %v9810_v10  ;;  %15511 = vst [vmem:[#allocation24_spill] sm:$0xff] %v9816_v15  ;;  %v9824_v19 = vld [vmem:[#allocation9 + $0x28] sm:$0xff]  ;;  %v9826_v21 = vld [vmem:[#allocation9 + $0x30] sm:$0xff]  ;;  %s14628_s9 = sld [smem:[#allocation4 + $0x3]] }
  0x6a   :  { %15512 = vst [vmem:[#allocation25_spill] sm:$0xff] %v9822_v18  ;;  %15513 = vst [vmem:[#allocation26_spill] sm:$0xff] %v9824_v19  ;;  %v193_v20 = vunpack.c.0.s8 %v192_v14  ;;  %v9828_v22 = vld [vmem:[#allocation9 + $0x38] sm:$0xff]  ;;  %v9830_v23 = vld [vmem:[#allocation11] sm:$0xff]  ;;  %s14686_s13 = sld [smem:[#allocation4 + $0x2]]  ;;  %s14770_s15 = sld [smem:[#allocation4 + $0x5]] }
  0x6b   :  { %v9797_v4 = vsub.s32 0, %v9790_v1  ;;  %v9800_v5 = vsub.s32 1, %v9790_v1  ;;  %v9836_v26 = vld [vmem:[#allocation11 + $0x8] sm:$0xff]  ;;  %v9838_v27 = vld [vmem:[#allocation11 + $0x10] sm:$0xff]  ;;  %v9840_v28 = vld [vmem:[#allocation11 + $0x18] sm:$0xff]  ;;  %v9854_v34 = vsub.s32 2, %v9790_v1 }
  0x6c   :  { %v9843_v29 = vsub.s32 %v193_v20, %v9790_v1  ;;  %v9847_v31 = vld [vmem:[#allocation11 + $0x20] sm:$0xff]  ;;  %v9849_v32 = vld [vmem:[#allocation11 + $0x28] sm:$0xff]  ;;  %v9851_v33 = vld [vmem:[#allocation11 + $0x30] sm:$0xff]  ;;  %s14862_s5 = sld [smem:[#allocation4 + $0x4]]  ;;  %s14915_s16 = sld [smem:[#allocation4 + $0x7]] }
  0x6d   :  { %v1087_v6 = vrot.slane %v9792_v2, %v9797_v4  ;;  %v306_v7 = vrot.slane %v9794_v3, %v9797_v4  ;;  %v1094_v8 = vrot.slane %v9792_v2, %v9800_v5  ;;  %v313_v9 = vrot.slane %v9794_v3, %v9800_v5  ;;  %15515 = vst [vmem:[#allocation28_spill] sm:$0xff] %v9847_v31  ;;  %v9878_v46 = vld [vmem:[#allocation11 + $0x38] sm:$0xff]  ;;  %v107_v51 = vld [vmem:[#allocation8] sm:$0xff]  ;;  %v108_v52 = vld [vmem:[#allocation8 + $0x8] sm:$0xff]  ;;  %s15002_s19 = sld [smem:[#allocation4 + $0x6]]  ;;  %s9670_s21 = smov [#allocation15]  }
  0x6e   :  { %v1870_v11 = vrot.slane %v9810_v10, %v9800_v5  ;;  %v1863_v12 = vrot.slane %v9810_v10, %v9797_v4  ;;  %v2646_v16 = vrot.slane %v9816_v15, %v9800_v5  ;;  %v2639_v17 = vrot.slane %v9816_v15, %v9797_v4  ;;  %15514 = vst [vmem:[#allocation27_spill] sm:$0xff] %v9843_v29  ;;  %v109_v53 = vld [vmem:[#allocation8 + $0x10] sm:$0xff]  ;;  %v110_v54 = vld [vmem:[#allocation8 + $0x18] sm:$0xff]  ;;  %v111_v59 = vld [vmem:[#allocation8 + $0x20] sm:$0xff]  ;;  %s8506_s22 = sshll.u32 %s9670_s21, 4  ;;  %s8507_s22 = int_to_ptr.vmem [resolvable:$true] %s8506_s22 }
  0x6f   :  { %1089 = vbcast.lane.b32.xlu1 %v1087_v6, 256  ;;  %308 = vbcast.lane.b32.xlu0 %v306_v7, 256  ;;  %v3422_v24 = vrot.slane %v9822_v18, %v9800_v5  ;;  %v3415_v25 = vrot.slane %v9822_v18, %v9797_v4  ;;  %v4198_v30 = vrot.slane %v9824_v19, %v9800_v5  ;;  %v112_v60 = vld [vmem:[#allocation8 + $0x28] sm:$0xff]  ;;  %v887_v13 = vld [vmem:[#allocation8 + $0x38] sm:$0xff]  ;;  %v3994_v62 = vld [vmem:[#allocation8 + $0x110] sm:$0xff]  ;;  %s9624_s23 = scalar_lea.vmem %s8507_s22, 768  ;;  %p9629_p2 = scmp.lt.s32.totalorder %s8507_s22, %s8507_s22 }
  0x70   :  { %15516 = vst [vmem:[#allocation29_spill] sm:$0xff] %v9849_v32  ;;  %15517 = vst [vmem:[#allocation30_spill] sm:$0xff] %v9851_v33  ;;  %v4191_v35 = vrot.slane %v9824_v19, %v9797_v4  ;;  %v4974_v36 = vrot.slane %v9826_v21, %v9800_v5  ;;  %v4967_v37 = vrot.slane %v9826_v21, %v9797_v4  ;;  %v3217_v6 = vld [vmem:[#allocation8 + $0xd8] sm:$0xff]  ;;  %p9625_p1 = scmp.ne.s32.totalorder %s8507_s22, %s9624_s23  ;;  %p9630_p3 = scmp.lt.s32.totalorder %s9624_s23, %s9624_s23 }
  0x71   :  { %v5750_v38 = vrot.slane %v9828_v22, %v9800_v5  ;;  %v5743_v39 = vrot.slane %v9828_v22, %v9797_v4  ;;  %v125_v40 = vrot.slane %v9830_v23, %v9800_v5  ;;  %v118_v41 = vrot.slane %v9830_v23, %v9797_v4  ;;  %15518 = vst [vmem:[#allocation31_spill] sm:$0xff] %v9878_v46  ;;  %v3995_v61 = vld [vmem:[#allocation8 + $0x118] sm:$0xff] }
  0x72   :  { %v906_v42 = vrot.slane %v9836_v26, %v9800_v5  ;;  %v899_v43 = vrot.slane %v9836_v26, %v9797_v4  ;;  %v1682_v44 = vrot.slane %v9838_v27, %v9800_v5  ;;  %v1675_v45 = vrot.slane %v9838_v27, %v9797_v4  ;;  %p9631_p4 = por %p9630_p3, %p9629_p2 }
  0x73   :  { %1096 = vbcast.lane.b32.xlu1 %v1094_v8, 256  ;;  %315 = vbcast.lane.b32.xlu0 %v313_v9, 256  ;;  %v2458_v47 = vrot.slane %v9840_v28, %v9800_v5  ;;  %v2451_v48 = vrot.slane %v9840_v28, %v9797_v4  ;;  %v3234_v49 = vrot.slane %v9847_v31, %v9800_v5  ;;  %v1666_v9 = vld [vmem:[#allocation8 + $0x80] sm:$0xff] }
  0x74   :  { %v3227_v50 = vrot.slane %v9847_v31, %v9797_v4  ;;  %v4010_v55 = vrot.slane %v9849_v32, %v9800_v5  ;;  %v4003_v56 = vrot.slane %v9849_v32, %v9797_v4  ;;  %v4786_v57 = vrot.slane %v9851_v33, %v9800_v5  ;;  %p9632_p5 = pnand %p9631_p4, %p9625_p1 }
  0x75   :  { %v4779_v58 = vrot.slane %v9851_v33, %v9797_v4  ;;  %v185_v14 = vcombine.low %v107_v51, %v108_v52  ;;  %v187_v8 = vcombine.low %v109_v53, %v110_v54  ;;  %v189_v7 = vcombine.low %v111_v59, %v112_v60  ;;  %v1664_v52 = vld [vmem:[#allocation8 + $0x70] sm:$0xff]  ;;  %v1665_v51 = vld [vmem:[#allocation8 + $0x78] sm:$0xff]  ;;  %v1667_v54 = vld [vmem:[#allocation8 + $0x88] sm:$0xff] }
  0x76   :  { %v1744_v20 = vcombine.low %v1664_v52, %v1665_v51  ;;  %v2441_v51 = vld [vmem:[#allocation8 + $0xa8] sm:$0xff] }
  0x77   :  { %1872 = vbcast.lane.b32.xlu1 %v1870_v11, 256  ;;  %1865 = vbcast.lane.b32.xlu0 %v1863_v12, 256  ;;  %v9911_v11 = vsub.s32 3, %v9790_v1  ;;  %v886_v12 = vld [vmem:[#allocation8 + $0x30] sm:$0xff]  ;;  %v211_v59 = vrot.slane %v187_v8, %v9843_v29  ;;  %v225_v53 = vrot.slane %v189_v7, %v9843_v29 }
  0x78   :  { %v1768_v52 = vrot.slane %v1744_v20, %v9843_v29  ;;  %v2442_v20 = vld [vmem:[#allocation8 + $0xb0] sm:$0xff] }
  0x7b   :  { %2648 = vbcast.lane.b32.xlu1 %v2646_v16, 256  ;;  %2641 = vbcast.lane.b32.xlu0 %v2639_v17, 256  ;;  %v1746_v17 = vcombine.low %v1666_v9, %v1667_v54  ;;  %v2439_v16 = vld [vmem:[#allocation8 + $0x98] sm:$0xff] }
  0x7d   :  { %v1782_v9 = vrot.slane %v1746_v17, %v9843_v29  ;;  %v2443_v17 = vld [vmem:[#allocation8 + $0xb8] sm:$0xff] }
  0x7e   :  { %v2522_v54 = vcombine.low %v2442_v20, %v2443_v17  ;;  %v3218_v17 = vld [vmem:[#allocation8 + $0xe0] sm:$0xff] }
  0x7f   :  { %3424 = vbcast.lane.b32.xlu1 %v3422_v24, 256  ;;  %3417 = vbcast.lane.b32.xlu0 %v3415_v25, 256  ;;  %v888_v24 = vld [vmem:[#allocation8 + $0x40] sm:$0xff]  ;;  %v889_v25 = vld [vmem:[#allocation8 + $0x48] sm:$0xff] }
  0x80   :  { %v968_v60 = vcombine.low %v888_v24, %v889_v25  ;;  %v1662_v25 = vld [vmem:[#allocation8 + $0x60] sm:$0xff] }
  0x83   :  { %4200 = vbcast.lane.b32.xlu1 %v4198_v30, 256  ;;  %4193 = vbcast.lane.b32.xlu0 %v4191_v35, 256  ;;  %v890_v30 = vld [vmem:[#allocation8 + $0x50] sm:$0xff]  ;;  %v891_v35 = vld [vmem:[#allocation8 + $0x58] sm:$0xff] }
  0x84   :  { %v970_v0 = vcombine.low %v890_v30, %v891_v35  ;;  %v1663_v30 = vld [vmem:[#allocation8 + $0x68] sm:$0xff] }
  0x85   :  { %v1742_v7 = vcombine.low %v1662_v25, %v1663_v30 }
  0x87   :  { %4976 = vbcast.lane.b32.xlu1 %v4974_v36, 256  ;;  %4969 = vbcast.lane.b32.xlu0 %v4967_v37, 256  ;;  %v966_v36 = vcombine.low %v886_v12, %v887_v13  ;;  %v197_v37 = vrot.slane %v185_v14, %v9843_v29  ;;  %v9965_v14 = vsub.s32 4, %v9790_v1  ;;  %v992_v12 = vrot.slane %v968_v60, %v9843_v29 }
  0x88   :  { %v1006_v13 = vrot.slane %v970_v0, %v9843_v29  ;;  %v10006_v0 = vrot.slane %v225_v53, %v9843_v29 }
  0x89   :  { %v234_v24 = vcombine.high %v197_v37, %v211_v59  ;;  %v233_v35 = vcombine.low %v197_v37, %v211_v59  ;;  %v978_v8 = vrot.slane %v966_v36, %v9843_v29 }
  0x8a   :  { %v1018_v59 = vcombine.high %v1006_v13, %v1006_v13 }
  0x8b   :  { %5752 = vbcast.lane.b32.xlu1 %v5750_v38, 256  ;;  %5745 = vbcast.lane.b32.xlu0 %v5743_v39, 256  ;;  %v237_v39 = vcombine.high %v225_v53, %v225_v53  ;;  %v1015_v37 = vcombine.high %v978_v8, %v992_v12  ;;  %v9995_v36 = vrot.slane %v234_v24, %v9843_v29 }
  0x8c   :  { %v10003_v38 = vrot.slane %v233_v35, %v9843_v29  ;;  %v10022_v25 = vrot.slane %v1018_v59, %v9843_v29  ;;  %v1014_v30 = vcombine.low %v978_v8, %v992_v12  ;;  %v2440_v35 = vld [vmem:[#allocation8 + $0xa0] sm:$0xff] }
  0x8d   :  { %v10019_v53 = vrot.slane %v1015_v37, %v9843_v29  ;;  %v1754_v37 = vrot.slane %v1742_v7, %v9843_v29  ;;  %v10057_v7 = vsub.s32 5, %v9790_v1  ;;  %v2520_v24 = vcombine.low %v2440_v35, %v2441_v51  ;;  %v3219_v51 = vld [vmem:[#allocation8 + $0xe8] sm:$0xff] }
  0x8e   :  { %v10038_v8 = vcombine.low %v10003_v38, %v10006_v0  ;;  %v1794_v35 = vcombine.high %v1782_v9, %v1782_v9 }
  0x8f   :  { %127 = vbcast.lane.b32.xlu1 %v125_v40, 256  ;;  %120 = vbcast.lane.b32.xlu0 %v118_v41, 256  ;;  %v9998_v40 = vrot.slane %v237_v39, %v9843_v29  ;;  %v2438_v39 = vld [vmem:[#allocation8 + $0x90] sm:$0xff]  ;;  %v10061_v59 = vcombine.low %v10019_v53, %v10022_v25  ;;  %v2544_v60 = vrot.slane %v2520_v24, %v9843_v29  ;;  %v3993_v24 = vld [vmem:[#allocation8 + $0x108] sm:$0xff] }
  0x90   :  { %v2518_v12 = vcombine.low %v2438_v39, %v2439_v16  ;;  %v3214_v39 = vld [vmem:[#allocation8 + $0xc0] sm:$0xff]  ;;  %v3215_v16 = vld [vmem:[#allocation8 + $0xc8] sm:$0xff]  ;;  %v10116_v20 = vrot.slane %v1794_v35, %v9843_v29 }
  0x91   :  { %15520 = vst [vmem:[#allocation33_spill] sm:$0xff] %v10061_v59  ;;  %v3294_v63 = vcombine.low %v3214_v39, %v3215_v16  ;;  %v3298_v16 = vcombine.low %v3218_v17, %v3219_v51  ;;  %v3990_v51 = vld [vmem:[#allocation8 + $0xf0] sm:$0xff]  ;;  %v3991_v17 = vld [vmem:[#allocation8 + $0xf8] sm:$0xff] }
  0x92   :  { %15523 = vst [vmem:[#allocation36_spill] sm:$0xff] %v10116_v20 }
  0x93   :  { %908 = vbcast.lane.b32.xlu1 %v906_v42, 256  ;;  %901 = vbcast.lane.b32.xlu0 %v899_v43, 256  ;;  %v10032_v43 = vcombine.low %v9995_v36, %v9998_v40  ;;  %v10046_v42 = vrot.slane %v1006_v13, %v9843_v29  ;;  %v10064_v13 = vrot.slane %v1014_v30, %v9843_v29 }
  0x94   :  { %v2530_v30 = vrot.slane %v2518_v12, %v9843_v29 }
  0x95   :  { %15519 = vst [vmem:[#allocation32_spill] sm:$0xff] %v10032_v43  ;;  %v10104_v41 = vcombine.low %v10064_v13, %v10046_v42 }
  0x97   :  { %1684 = vbcast.lane.b32.xlu1 %v1682_v44, 256  ;;  %1677 = vbcast.lane.b32.xlu0 %v1675_v45, 256  ;;  %v1791_v45 = vcombine.high %v1754_v37, %v1768_v52  ;;  %15521 = vst [vmem:[#allocation34_spill] sm:$0xff] %v10104_v41  ;;  %v2566_v44 = vcombine.low %v2530_v30, %v2544_v60 }
  0x9b   :  { %2460 = vbcast.lane.b32.xlu1 %v2458_v47, 256  ;;  %2453 = vbcast.lane.b32.xlu0 %v2451_v48, 256  ;;  %v1790_v47 = vcombine.low %v1754_v37, %v1768_v52  ;;  %v3216_v48 = vld [vmem:[#allocation8 + $0xd0] sm:$0xff]  ;;  %v10113_v37 = vrot.slane %v1791_v45, %v9843_v29  ;;  %v10134_v52 = vrot.slane %v1782_v9, %v9843_v29  ;;  %v3992_v45 = vld [vmem:[#allocation8 + $0x100] sm:$0xff] }
  0x9c   :  { %v3296_v12 = vcombine.low %v3216_v48, %v3217_v6  ;;  %v2567_v9 = vcombine.high %v2530_v30, %v2544_v60  ;;  %v3306_v6 = vrot.slane %v3294_v63, %v9843_v29  ;;  %v3334_v48 = vrot.slane %v3298_v16, %v9843_v29 }
  0x9d   :  { %15522 = vst [vmem:[#allocation35_spill] sm:$0xff] %v10113_v37  ;;  %v10131_v35 = vrot.slane %v1790_v47, %v9843_v29  ;;  %v10168_v47 = vrot.slane %v2566_v44, %v9843_v29  ;;  %v4074_v60 = vcombine.low %v3994_v62, %v3995_v61 }
  0x9f   :  { %3236 = vbcast.lane.b32.xlu1 %v3234_v49, 256  ;;  %3229 = vbcast.lane.b32.xlu0 %v3227_v50, 256  ;;  %v2558_v50 = vrot.slane %v2522_v54, %v9843_v29  ;;  %v10149_v49 = vcombine.low %v10113_v37, %v10116_v20  ;;  %v10163_v39 = vcombine.low %v10131_v35, %v10134_v52 }
  0xa0   :  { %v3320_v54 = vrot.slane %v3296_v12, %v9843_v29  ;;  %v4070_v12 = vcombine.low %v3990_v51, %v3991_v17  ;;  %v3346_v20 = vcombine.high %v3334_v48, %v3334_v48  ;;  %v4767_v51 = vld [vmem:[#allocation8 + $0x128] sm:$0xff]  ;;  %v4768_v17 = vld [vmem:[#allocation8 + $0x130] sm:$0xff] }
  0xa1   :  { %15524 = vst [vmem:[#allocation37_spill] sm:$0xff] %v10149_v49  ;;  %15525 = vst [vmem:[#allocation38_spill] sm:$0xff] %v10163_v39  ;;  %v4770_v49 = vld [vmem:[#allocation8 + $0x140] sm:$0xff] }
  0xa2   :  { %v3342_v30 = vcombine.low %v3306_v6, %v3320_v54  ;;  %v3343_v37 = vcombine.high %v3306_v6, %v3320_v54  ;;  %v4082_v63 = vrot.slane %v4070_v12, %v9843_v29  ;;  %v4110_v6 = vrot.slane %v4074_v60, %v9843_v29  ;;  %v5546_v60 = vld [vmem:[#allocation8 + $0x170] sm:$0xff] }
  0xa3   :  { %4012 = vbcast.lane.b32.xlu1 %v4010_v55, 256  ;;  %4005 = vbcast.lane.b32.xlu0 %v4003_v56, 256  ;;  %v2570_v55 = vcombine.high %v2558_v50, %v2558_v50  ;;  %v10171_v56 = vrot.slane %v2558_v50, %v9843_v29  ;;  %v4771_v50 = vld [vmem:[#allocation8 + $0x148] sm:$0xff]  ;;  %v10259_v12 = vrot.slane %v3346_v20, %v9843_v29 }
  0xa4   :  { %v10235_v54 = vrot.slane %v3342_v30, %v9843_v29  ;;  %v15532_v30 = vrot.slane %v9792_v2, %v9854_v34  ;;  %v4850_v59 = vcombine.low %v4770_v49, %v4771_v50  ;;  %v5543_v49 = vld [vmem:[#allocation8 + $0x158] sm:$0xff]  ;;  %v5544_v50 = vld [vmem:[#allocation8 + $0x160] sm:$0xff] }
  0xa5   :  { %v10202_v44 = vrot.slane %v2570_v55, %v9843_v29  ;;  %v10210_v16 = vcombine.low %v10168_v47, %v10171_v56  ;;  %v15529_v55 = vrot.slane %v9878_v46, %v9800_v5  ;;  %15535 = vst [vmem:[#allocation44_spill] sm:$0xff] %v10259_v12 }
  0xa7   :  { %4788 = vbcast.lane.b32.xlu1 %v4786_v57, 256  ;;  %4781 = vbcast.lane.b32.xlu0 %v4779_v58, 256  ;;  %v10199_v57 = vrot.slane %v2567_v9, %v9843_v29  ;;  %15527 = vst [vmem:[#allocation40_spill] sm:$0xff] %v10202_v44  ;;  %15528 = vst [vmem:[#allocation41_spill] sm:$0xff] %v10210_v16  ;;  %v4072_v9 = vcombine.low %v3992_v45, %v3993_v24  ;;  %v4766_v45 = vld [vmem:[#allocation8 + $0x120] sm:$0xff] }
  0xa8   :  { %v15530_v58 = vrot.slane %v9878_v46, %v9797_v4  ;;  %v4846_v20 = vcombine.low %v4766_v45, %v4767_v51  ;;  %v4886_v45 = vrot.slane %v4850_v59, %v9843_v29  ;;  %v15540_v24 = vrot.slane %v9824_v19, %v9854_v34 }
  0xa9   :  { %15526 = vst [vmem:[#allocation39_spill] sm:$0xff] %v10199_v57  ;;  %v10228_v61 = vcombine.low %v10199_v57, %v10202_v44  ;;  %v4096_v57 = vrot.slane %v4072_v9, %v9843_v29  ;;  %v10256_v44 = vrot.slane %v3343_v37, %v9843_v29  ;;  %v4122_v9 = vcombine.high %v4110_v6, %v4110_v6 }
  0xab   :  { %5564 = vbcast.lane.b32.xlu1 %v15529_v55, 256  ;;  %5557 = vbcast.lane.b32.xlu0 %v15530_v58, 256  ;;  %15531 = vst [vmem:[#allocation42_spill] sm:$0xff] %v10228_v61  ;;  %v4769_v58 = vld [vmem:[#allocation8 + $0x138] sm:$0xff]  ;;  %v10238_v55 = vrot.slane %v3334_v48, %v9843_v29  ;;  %v15533_v48 = vrot.slane %v9794_v3, %v9854_v34  ;;  %15534 = vst [vmem:[#allocation43_spill] sm:$0xff] %v10256_v44 }
  0xac   :  { %v4848_v62 = vcombine.low %v4768_v17, %v4769_v58  ;;  %v4119_v39 = vcombine.high %v4082_v63, %v4096_v57  ;;  %v10289_v51 = vcombine.low %v10256_v44, %v10259_v12  ;;  %v5542_v17 = vld [vmem:[#allocation8 + $0x150] sm:$0xff]  ;;  %v5545_v58 = vld [vmem:[#allocation8 + $0x168] sm:$0xff]  ;;  %v10300_v12 = vrot.slane %v4110_v6, %v9843_v29 }
  0xad   :  { %v10273_v37 = vcombine.low %v10235_v54, %v10238_v55  ;;  %v4858_v61 = vrot.slane %v4846_v20, %v9843_v29  ;;  %v15541_v6 = vrot.slane %v9822_v18, %v9854_v34  ;;  %v5622_v20 = vcombine.low %v5542_v17, %v5543_v49 }
  0xae   :  { %v4872_v41 = vrot.slane %v4848_v62, %v9843_v29  ;;  %v5624_v43 = vcombine.low %v5544_v50, %v5545_v58  ;;  %v4898_v49 = vcombine.high %v4886_v45, %v4886_v45  ;;  %v15544_v50 = vrot.slane %v9826_v21, %v9854_v34 }
  0xaf   :  { %1103 = vbcast.lane.b32.xlu1 %v15532_v30, 256  ;;  %322 = vbcast.lane.b32.xlu0 %v15533_v48, 256  ;;  %v15536_v30 = vrot.slane %v9816_v15, %v9854_v34  ;;  %v15537_v48 = vrot.slane %v9810_v10, %v9854_v34 }
  0xb0   :  { %v4894_v16 = vcombine.low %v4858_v61, %v4872_v41  ;;  %v4895_v17 = vcombine.high %v4858_v61, %v4872_v41  ;;  %v5634_v61 = vrot.slane %v5622_v20, %v9843_v29  ;;  %v15554_v41 = vrot.slane %v9840_v28, %v9854_v34 }
  0xb2   :  { %v10378_v20 = vrot.slane %v4895_v17, %v9843_v29  ;;  %v10427_v17 = vld [vmem:[#allocation11] sm:$0xff] }
  0xb3   :  { %2655 = vbcast.lane.b32.xlu1 %v15536_v30, 256  ;;  %1879 = vbcast.lane.b32.xlu0 %v15537_v48, 256  ;;  %v5547_v30 = vld [vmem:[#allocation8 + $0x178] sm:$0xff]  ;;  %v4118_v48 = vcombine.low %v4082_v63, %v4096_v57  ;;  %v10307_v63 = vrot.slane %v4119_v39, %v9843_v29  ;;  %v10310_v57 = vrot.slane %v4122_v9, %v9843_v29 }
  0xb4   :  { %v5626_v44 = vcombine.low %v5546_v60, %v5547_v30  ;;  %v15543_v60 = vrot.slane %v9828_v22, %v9854_v34  ;;  %v10352_v39 = vld [vmem:[#allocation9 + $0x38] sm:$0xff]  ;;  %v10364_v30 = vrot.slane %v4894_v16, %v9843_v29  ;;  %15548 = vst [vmem:[#allocation51_spill] sm:$0xff] %v10378_v20  ;;  %v10381_v16 = vrot.slane %v4898_v49, %v9843_v29 }
  0xb5   :  { %15538 = vst [vmem:[#allocation45_spill] sm:$0xff] %v10307_v63  ;;  %15539 = vst [vmem:[#allocation46_spill] sm:$0xff] %v10310_v57  ;;  %v10332_v62 = vrot.slane %v4118_v48, %v9843_v29  ;;  %v10338_v9 = vcombine.low %v10307_v63, %v10310_v57  ;;  %v10367_v48 = vrot.slane %v4886_v45, %v9843_v29 }
  0xb6   :  { %15545 = vst [vmem:[#allocation48_spill] sm:$0xff] %v10352_v39  ;;  %15549 = vst [vmem:[#allocation52_spill] sm:$0xff] %v10381_v16  ;;  %v15550_v45 = vrot.slane %v9836_v26, %v9854_v34 }
  0xb7   :  { %4207 = vbcast.lane.b32.xlu1 %v15540_v24, 256  ;;  %3431 = vbcast.lane.b32.xlu0 %v15541_v6, 256  ;;  %15542 = vst [vmem:[#allocation47_spill] sm:$0xff] %v10338_v9  ;;  %v10361_v58 = vcombine.low %v10332_v62, %v10300_v12  ;;  %v10369_v6 = vld [vmem:[#allocation9 + $0x30] sm:$0xff]  ;;  %v15551_v24 = vrot.slane %v9830_v23, %v9854_v34  ;;  %15557 = vst [vmem:[#allocation56_spill] sm:$0xff] %v10427_v17 }
  0xb8   :  { %15547 = vst [vmem:[#allocation50_spill] sm:$0xff] %v10369_v6  ;;  %v10451_v9 = vld [vmem:[#allocation11 + $0x10] sm:$0xff] }
  0xb9   :  { %15546 = vst [vmem:[#allocation49_spill] sm:$0xff] %v10361_v58  ;;  %15561 = vst [vmem:[#allocation60_spill] sm:$0xff] %v10451_v9  ;;  %v10482_v58 = vcombine.high %v10064_v13, %v10046_v42  ;;  %v10500_v13 = vld [vmem:[#allocation11 + $0x20] sm:$0xff]  ;;  %v10518_v42 = vcombine.high %v10168_v47, %v10171_v56  ;;  %v15578_v47 = vrot.slane %v9792_v2, %v9911_v11 }
  0xba   :  { %15568 = vst [vmem:[#allocation65_spill] sm:$0xff] %v10500_v13  ;;  %v10616_v56 = vcombine.high %v10332_v62, %v10300_v12  ;;  %v10634_v62 = vcombine.high %v10235_v54, %v10238_v55  ;;  %v15589_v54 = vrot.slane %v9824_v19, %v9911_v11  ;;  %v15590_v55 = vrot.slane %v9822_v18, %v9911_v11 }
  0xbb   :  { %5759 = vbcast.lane.b32.xlu1 %v15543_v60, 256  ;;  %4983 = vbcast.lane.b32.xlu0 %v15544_v50, 256  ;;  %v5648_v60 = vrot.slane %v5624_v43, %v9843_v29  ;;  %v5662_v50 = vrot.slane %v5626_v44, %v9843_v29  ;;  %v10405_v44 = vcombine.low %v10364_v30, %v10367_v48 }
  0xbc   :  { %15566 = vst [vmem:[#allocation63_spill] sm:$0xff] %v10482_v58  ;;  %15572 = vst [vmem:[#allocation69_spill] sm:$0xff] %v10518_v42 }
  0xbd   :  { %v5671_v43 = vcombine.high %v5634_v61, %v5648_v60  ;;  %v5674_v59 = vcombine.high %v5662_v50, %v5662_v50  ;;  %v5670_v63 = vcombine.low %v5634_v61, %v5648_v60  ;;  %15552 = vst [vmem:[#allocation53_spill] sm:$0xff] %v10405_v44  ;;  %v10415_v60 = vcombine.low %v10378_v20, %v10381_v16  ;;  %v10431_v20 = vld [vmem:[#allocation11 + $0x18] sm:$0xff]  ;;  %v10455_v16 = vld [vmem:[#allocation11 + $0x28] sm:$0xff] }
  0xbe   :  { %15558 = vst [vmem:[#allocation57_spill] sm:$0xff] %v10431_v20  ;;  %v10445_v49 = vrot.slane %v5662_v50, %v9843_v29  ;;  %15562 = vst [vmem:[#allocation61_spill] sm:$0xff] %v10455_v16  ;;  %v10504_v61 = vld [vmem:[#allocation11 + $0x38] sm:$0xff]  ;;  %v15575_v44 = vrot.slane %v9851_v33, %v9854_v34 }
  0xbf   :  { %915 = vbcast.lane.b32.xlu1 %v15550_v45, 256  ;;  %134 = vbcast.lane.b32.xlu0 %v15551_v24, 256  ;;  %15553 = vst [vmem:[#allocation54_spill] sm:$0xff] %v10415_v60  ;;  %v15555_v24 = vrot.slane %v9838_v27, %v9854_v34  ;;  %v10423_v45 = vld [vmem:[#allocation11 + $0x8] sm:$0xff]  ;;  %v10442_v57 = vrot.slane %v5670_v63, %v9843_v29  ;;  %15569 = vst [vmem:[#allocation66_spill] sm:$0xff] %v10504_v61 }
  0xc0   :  { %15556 = vst [vmem:[#allocation55_spill] sm:$0xff] %v10423_v45  ;;  %v10514_v63 = vcombine.high %v10003_v38, %v10006_v0  ;;  %v10530_v60 = vld [vmem:[#allocation9 + $0x8] sm:$0xff]  ;;  %v10534_v0 = vld [vmem:[#allocation9] sm:$0xff]  ;;  %v15583_v38 = vrot.slane %v9810_v10, %v9911_v11  ;;  %15584 = vst [vmem:[#allocation75_spill] sm:$0xff] %v10616_v56 }
  0xc1   :  { %v10494_v50 = vcombine.low %v10442_v57, %v10445_v49  ;;  %15576 = vst [vmem:[#allocation71_spill] sm:$0xff] %v10530_v60  ;;  %15577 = vst [vmem:[#allocation72_spill] sm:$0xff] %v10534_v0  ;;  %v10648_v12 = vcombine.high %v10442_v57, %v10445_v49  ;;  %v10753_v49 = vcombine.high %v9995_v36, %v9998_v40  ;;  %v15615_v61 = vld [vmem:[#allocation32_spill] sm:$0xff] }
  0xc2   :  { %15571 = vst [vmem:[#allocation68_spill] sm:$0xff] %v10514_v63  ;;  %15585 = vst [vmem:[#allocation76_spill] sm:$0xff] %v10634_v62  ;;  %v10638_v63 = vld [vmem:[#allocation9 + $0x28] sm:$0xff]  ;;  %v15602_v36 = vrot.slane %v10038_v8, %v9911_v11  ;;  %v15617_v13 = vrot.slane %v15615_v61, %v9800_v5 }
  0xc3   :  { %2467 = vbcast.lane.b32.xlu1 %v15554_v41, 256  ;;  %1691 = vbcast.lane.b32.xlu0 %v15555_v24, 256  ;;  %v10436_v41 = vrot.slane %v5671_v43, %v9843_v29  ;;  %v10439_v24 = vrot.slane %v5674_v59, %v9843_v29  ;;  %v15563_v43 = vrot.slane %v9849_v32, %v9854_v34  ;;  %v10478_v59 = vsub.s32 6, %v9790_v1 }
  0xc4   :  { %v15564_v29 = vrot.slane %v9847_v31, %v9854_v34  ;;  %15567 = vst [vmem:[#allocation64_spill] sm:$0xff] %v10494_v50  ;;  %v10592_v50 = vld [vmem:[#allocation9 + $0x18] sm:$0xff]  ;;  %15586 = vst [vmem:[#allocation77_spill] sm:$0xff] %v10638_v63 }
  0xc5   :  { %15559 = vst [vmem:[#allocation58_spill] sm:$0xff] %v10436_v41  ;;  %15560 = vst [vmem:[#allocation59_spill] sm:$0xff] %v10439_v24 }
  0xc6   :  { %15565 = vst [vmem:[#allocation62_spill] sm:$0xff] %v10478_v59  ;;  %15580 = vst [vmem:[#allocation73_spill] sm:$0xff] %v10592_v50 }
  0xc7   :  { %4019 = vbcast.lane.b32.xlu1 %v15563_v43, 256  ;;  %3243 = vbcast.lane.b32.xlu0 %v15564_v29, 256  ;;  %v10490_v29 = vcombine.low %v10436_v41, %v10439_v24  ;;  %v10508_v24 = vld [vmem:[#allocation11 + $0x30] sm:$0xff]  ;;  %v10522_v43 = vcombine.high %v10131_v35, %v10134_v52  ;;  %v15574_v41 = vrot.slane %v9878_v46, %v9854_v34 }
  0xc8   :  { %15570 = vst [vmem:[#allocation67_spill] sm:$0xff] %v10508_v24  ;;  %v15579_v52 = vrot.slane %v9794_v3, %v9911_v11  ;;  %v10596_v35 = vld [vmem:[#allocation9 + $0x10] sm:$0xff]  ;;  %15588 = vst [vmem:[#allocation79_spill] sm:$0xff] %v10648_v12  ;;  %v15619_v24 = vrot.slane %v15615_v61, %v9911_v11 }
  0xc9   :  { %15573 = vst [vmem:[#allocation70_spill] sm:$0xff] %v10522_v43  ;;  %15581 = vst [vmem:[#allocation74_spill] sm:$0xff] %v10596_v35 }
  0xca   :  { %15598 = vst [vmem:[#allocation83_spill] sm:$0xff] %v10753_v49 }
  0xcb   :  { %5571 = vbcast.lane.b32.xlu1 %v15574_v41, 256  ;;  %4795 = vbcast.lane.b32.xlu0 %v15575_v44, 256  ;;  %v15582_v41 = vrot.slane %v9816_v15, %v9911_v11  ;;  %v10642_v44 = vld [vmem:[#allocation9 + $0x20] sm:$0xff] }
  0xcc   :  { %15587 = vst [vmem:[#allocation78_spill] sm:$0xff] %v10642_v44  ;;  %v15802_v44 = vld [vmem:[#allocation28_spill] sm:$0xff] }
  0xcf   :  { %1110 = vbcast.lane.b32.xlu1 %v15578_v47, 256  ;;  %329 = vbcast.lane.b32.xlu0 %v15579_v52, 256  ;;  %v10662_v52 = vcombine.high %v10364_v30, %v10367_v48  ;;  %v15593_v30 = vrot.slane %v9826_v21, %v9911_v11  ;;  %v15600_v47 = vrot.slane %v10038_v8, %v9800_v5 }
  0xd1   :  { %15591 = vst [vmem:[#allocation80_spill] sm:$0xff] %v10662_v52 }
  0xd3   :  { %2662 = vbcast.lane.b32.xlu1 %v15582_v41, 256  ;;  %1886 = vbcast.lane.b32.xlu0 %v15583_v38, 256  ;;  %v15592_v41 = vrot.slane %v9828_v22, %v9911_v11  ;;  %v10715_v38 = vsub.s32 7, %v9790_v1  ;;  %v15596_v1 = vrot.slane %v9830_v23, %v9911_v11 }
  0xd5   :  { %15594 = vst [vmem:[#allocation81_spill] sm:$0xff] %v10715_v38 }
  0xd7   :  { %4214 = vbcast.lane.b32.xlu1 %v15589_v54, 256  ;;  %3438 = vbcast.lane.b32.xlu0 %v15590_v55, 256  ;;  %v15595_v54 = vrot.slane %v9836_v26, %v9911_v11  ;;  %v10749_v55 = vcombine.high %v10019_v53, %v10022_v25  ;;  %v15601_v53 = vrot.slane %v10038_v8, %v9854_v34 }
  0xd9   :  { %15597 = vst [vmem:[#allocation82_spill] sm:$0xff] %v10749_v55 }
  0xdb   :  { %5766 = vbcast.lane.b32.xlu1 %v15592_v41, 256  ;;  %4990 = vbcast.lane.b32.xlu0 %v15593_v30, 256  ;;  %v15603_v30 = vrot.slane %v9840_v28, %v9911_v11 }
  0xdf   :  { %922 = vbcast.lane.b32.xlu1 %v15595_v54, 256  ;;  %141 = vbcast.lane.b32.xlu0 %v15596_v1, 256  ;;  %v15599_v54 = vrot.slane %v10038_v8, %v9797_v4 }
  0xe1   :  { %v1090_v57 = vpop.permute.xlu1 %1089  ;;  %v309_v48 = vpop.permute.xlu0 %308 }
  0xe2   :  { %v10760_v1 = vmul.f32 %v15599_v54, %v309_v48  ;;  %v10765_v41 = vmul.f32 %v15600_v47, %v309_v48  ;;  %v10770_v25 = vmul.f32 %v15601_v53, %v309_v48  ;;  %v10775_v40 = vmul.f32 %v15602_v36, %v309_v48  ;;  %v15607_v36 = vld [vmem:[#allocation34_spill] sm:$0xff] }
  0xe3   :  { %2474 = vbcast.lane.b32.xlu1 %v15603_v30, 256  ;;  %v15604_v54 = vrot.slane %v9838_v27, %v9911_v11  ;;  %v15605_v47 = vrot.slane %v10038_v8, %v9965_v14  ;;  %v15606_v53 = vrot.slane %v10038_v8, %v10057_v7  ;;  %v15608_v62 = vrot.slane %v15607_v36, %v9797_v4 }
  0xe4   :  { %v15609_v30 = vrot.slane %v15607_v36, %v9800_v5  ;;  %v15611_v8 = vrot.slane %v15607_v36, %v9911_v11 }
  0xe5   :  { %1698 = vbcast.lane.b32.xlu0 %v15604_v54, 256  ;;  %v10786_v52 = vmul.f32 %v15605_v47, %v309_v48  ;;  %v10791_v12 = vmul.f32 %v15606_v53, %v309_v48  ;;  %v10796_v50 = vmul.f32 %v15608_v62, %v1090_v57  ;;  %v15610_v54 = vrot.slane %v15607_v36, %v9854_v34  ;;  %v1097_v59 = vpop.permute.xlu1 %1096  ;;  %v316_v60 = vpop.permute.xlu0 %315 }
  0xe6   :  { %v10801_v0 = vmul.f32 %v15609_v30, %v1090_v57  ;;  %v10811_v48 = vmul.f32 %v15611_v8, %v1090_v57  ;;  %v15612_v53 = vrot.slane %v15607_v36, %v9965_v14  ;;  %v15613_v30 = vrot.slane %v15607_v36, %v10057_v7 }
  0xe7   :  { %v10806_v47 = vmul.f32 %v15610_v54, %v1090_v57  ;;  %v10837_v36 = vmul.f32 %v15617_v13, %v316_v60  ;;  %v10847_v54 = vmul.f32 %v15619_v24, %v316_v60  ;;  %v15620_v8 = vrot.slane %v9849_v32, %v9911_v11  ;;  %v15624_v24 = vld [vmem:[#allocation33_spill] sm:$0xff] }
  0xe8   :  { %v10816_v62 = vmul.f32 %v15612_v53, %v1090_v57  ;;  %v10821_v56 = vmul.f32 %v15613_v30, %v1090_v57  ;;  %v15616_v53 = vrot.slane %v15615_v61, %v9797_v4  ;;  %v15618_v57 = vrot.slane %v15615_v61, %v9854_v34 }
  0xe9   :  { %4026 = vbcast.lane.b32.xlu1 %v15620_v8, 256  ;;  %v15622_v13 = vrot.slane %v15615_v61, %v9965_v14  ;;  %v15625_v20 = vrot.slane %v15624_v24, %v9797_v4  ;;  %v15626_v8 = vrot.slane %v15624_v24, %v9800_v5  ;;  %v1873_v45 = vpop.permute.xlu1 %1872  ;;  %v1866_v6 = vpop.permute.xlu0 %1865 }
  0xea   :  { %15614 = vst [vmem:[#allocation34_spill] sm:$0xff] %v10821_v56  ;;  %v10832_v43 = vmul.f32 %v15616_v53, %v316_v60  ;;  %v10842_v30 = vmul.f32 %v15618_v57, %v316_v60  ;;  %v15621_v53 = vrot.slane %v9847_v31, %v9911_v11  ;;  %v15623_v57 = vrot.slane %v15615_v61, %v10057_v7  ;;  %v15631_v31 = vld [vmem:[#allocation37_spill] sm:$0xff] }
  0xeb   :  { %v10858_v16 = vmul.f32 %v15622_v13, %v316_v60  ;;  %v10868_v42 = vmul.f32 %v15625_v20, %v1097_v59  ;;  %v10873_v17 = vmul.f32 %v15626_v8, %v1097_v59  ;;  %v15628_v61 = vrot.slane %v15624_v24, %v9911_v11 }
  0xec   :  { %3250 = vbcast.lane.b32.xlu0 %v15621_v53, 256  ;;  %v10863_v9 = vmul.f32 %v15623_v57, %v316_v60  ;;  %v15627_v53 = vrot.slane %v15624_v24, %v9854_v34  ;;  %v15629_v57 = vrot.slane %v15624_v24, %v9965_v14  ;;  %v15630_v8 = vrot.slane %v15624_v24, %v10057_v7 }
  0xed   :  { %v10883_v60 = vmul.f32 %v15628_v61, %v1097_v59  ;;  %v15633_v56 = vrot.slane %v15631_v31, %v9800_v5  ;;  %v15637_v58 = vrot.slane %v15631_v31, %v9911_v11  ;;  %v15639_v61 = vrot.slane %v9878_v46, %v9911_v11  ;;  %v2649_v46 = vpop.permute.xlu1 %2648 }
  0xee   :  { %v10878_v13 = vmul.f32 %v15627_v53, %v1097_v59  ;;  %v10888_v20 = vmul.f32 %v15629_v57, %v1097_v59  ;;  %v10893_v39 = vmul.f32 %v15630_v8, %v1097_v59  ;;  %v15632_v57 = vrot.slane %v15631_v31, %v9797_v4 }
  0xef   :  { %v10909_v24 = vmul.f32 %v15633_v56, %v1873_v45  ;;  %v15635_v59 = vrot.slane %v15631_v31, %v9854_v34  ;;  %v10919_v53 = vmul.f32 %v15637_v58, %v1873_v45  ;;  %5578 = vbcast.lane.b32.xlu1 %v15639_v61, 256  ;;  %v15641_v56 = vrot.slane %v15631_v31, %v9965_v14  ;;  %v15644_v58 = vld [vmem:[#allocation38_spill] sm:$0xff] }
  0xf0   :  { %v10904_v32 = vmul.f32 %v15632_v57, %v1873_v45  ;;  %v15640_v57 = vrot.slane %v9851_v33, %v9911_v11  ;;  %v15647_v61 = vrot.slane %v15644_v58, %v9800_v5 }
  0xf1   :  { %15634 = vst [vmem:[#allocation32_spill] sm:$0xff] %v10909_v24  ;;  %v10914_v8 = vmul.f32 %v15635_v59, %v1873_v45  ;;  %15638 = vst [vmem:[#allocation37_spill] sm:$0xff] %v10919_v53  ;;  %v10930_v55 = vmul.f32 %v15641_v56, %v1873_v45  ;;  %v15642_v59 = vrot.slane %v15631_v31, %v10057_v7 }
  0xf2   :  { %4802 = vbcast.lane.b32.xlu0 %v15640_v57, 256  ;;  %v15645_v53 = vrot.slane %v15644_v58, %v9797_v4  ;;  %v10945_v33 = vmul.f32 %v15647_v61, %v1866_v6  ;;  %v15649_v57 = vrot.slane %v15644_v58, %v9854_v34  ;;  %v15651_v31 = vrot.slane %v15644_v58, %v9911_v11 }
  0xf3   :  { %15636 = vst [vmem:[#allocation33_spill] sm:$0xff] %v10914_v8  ;;  %v10935_v8 = vmul.f32 %v15642_v59, %v1873_v45  ;;  %v15653_v59 = vrot.slane %v15644_v58, %v9965_v14  ;;  %v15655_v61 = vrot.slane %v15644_v58, %v10057_v7 }
  0xf4   :  { %v10940_v24 = vmul.f32 %v15645_v53, %v1866_v6  ;;  %15648 = vst [vmem:[#allocation85_spill] sm:$0xff] %v10945_v33  ;;  %v10950_v56 = vmul.f32 %v15649_v57, %v1866_v6  ;;  %v10955_v45 = vmul.f32 %v15651_v31, %v1866_v6  ;;  %v15665_v31 = vrot.slane %v9792_v2, %v9965_v14  ;;  %v3425_v2 = vpop.permute.xlu1 %3424 }
  0xf5   :  { %15643 = vst [vmem:[#allocation84_spill] sm:$0xff] %v10935_v8  ;;  %v10960_v53 = vmul.f32 %v15653_v59, %v1866_v6  ;;  %v10965_v33 = vmul.f32 %v15655_v61, %v1866_v6 }
  0xf6   :  { %15646 = vst [vmem:[#allocation38_spill] sm:$0xff] %v10940_v24  ;;  %15650 = vst [vmem:[#allocation86_spill] sm:$0xff] %v10950_v56  ;;  %v2642_v24 = vpop.permute.xlu0 %2641  ;;  %1117 = vbcast.lane.b32.xlu1 %v15665_v31, 256 }
  0xf7   :  { %15652 = vst [vmem:[#allocation87_spill] sm:$0xff] %v10955_v45  ;;  %15654 = vst [vmem:[#allocation88_spill] sm:$0xff] %v10960_v53  ;;  %v15656_v45 = vld [vmem:[#allocation42_spill] sm:$0xff] }
  0xf8   :  { %v15657_v59 = vrot.slane %v15656_v45, %v9797_v4  ;;  %v15659_v8 = vrot.slane %v15656_v45, %v9800_v5  ;;  %v15661_v6 = vrot.slane %v15656_v45, %v9854_v34  ;;  %v15663_v56 = vrot.slane %v15656_v45, %v9911_v11 }
  0xfa   :  { %v10976_v53 = vmul.f32 %v15657_v59, %v2649_v46  ;;  %v10981_v58 = vmul.f32 %v15659_v8, %v2649_v46  ;;  %v10986_v61 = vmul.f32 %v15661_v6, %v2649_v46  ;;  %v10991_v57 = vmul.f32 %v15663_v56, %v2649_v46  ;;  %v15669_v56 = vld [vmem:[#allocation41_spill] sm:$0xff] }
  0xfb   :  { %v15666_v59 = vrot.slane %v9794_v3, %v9965_v14  ;;  %v15667_v8 = vrot.slane %v15656_v45, %v9965_v14  ;;  %v15668_v6 = vrot.slane %v15656_v45, %v10057_v7  ;;  %v15672_v31 = vrot.slane %v15669_v56, %v9800_v5 }
  0xfc   :  { %15658 = vst [vmem:[#allocation42_spill] sm:$0xff] %v10976_v53  ;;  %15660 = vst [vmem:[#allocation89_spill] sm:$0xff] %v10981_v58  ;;  %v15676_v45 = vrot.slane %v15669_v56, %v9911_v11 }
  0xfd   :  { %15662 = vst [vmem:[#allocation90_spill] sm:$0xff] %v10986_v61  ;;  %15664 = vst [vmem:[#allocation91_spill] sm:$0xff] %v10991_v57  ;;  %336 = vbcast.lane.b32.xlu0 %v15666_v59, 256  ;;  %v11002_v58 = vmul.f32 %v15667_v8, %v2649_v46  ;;  %v11007_v61 = vmul.f32 %v15668_v6, %v2649_v46  ;;  %v15670_v57 = vrot.slane %v15669_v56, %v9797_v4  ;;  %v15818_v63 = vld [vmem:[#allocation86_spill] sm:$0xff] }
  0xfe   :  { %v11017_v3 = vmul.f32 %v15672_v31, %v2642_v24  ;;  %v15674_v59 = vrot.slane %v15669_v56, %v9854_v34  ;;  %v11027_v46 = vmul.f32 %v15676_v45, %v2642_v24  ;;  %v15678_v6 = vrot.slane %v15669_v56, %v9965_v14 }
  0xff   :  { %v11012_v53 = vmul.f32 %v15670_v57, %v2642_v24  ;;  %v15680_v31 = vrot.slane %v15669_v56, %v10057_v7  ;;  %v15689_v45 = vrot.slane %v9816_v15, %v9965_v14  ;;  %v4201_v15 = vpop.permute.xlu1 %4200 }
 0x100   :  { %15673 = vst [vmem:[#allocation92_spill] sm:$0xff] %v11017_v3  ;;  %v11022_v8 = vmul.f32 %v15674_v59, %v2642_v24  ;;  %15677 = vst [vmem:[#allocation94_spill] sm:$0xff] %v11027_v46  ;;  %v11032_v57 = vmul.f32 %v15678_v6, %v2642_v24  ;;  %v15681_v6 = vrot.slane %v10289_v51, %v9797_v4 }
 0x101   :  { %15671 = vst [vmem:[#allocation41_spill] sm:$0xff] %v11012_v53  ;;  %v3418_v53 = vpop.permute.xlu0 %3417  ;;  %v11037_v3 = vmul.f32 %v15680_v31, %v2642_v24  ;;  %v15683_v46 = vrot.slane %v10289_v51, %v9800_v5  ;;  %v15685_v24 = vrot.slane %v10289_v51, %v9854_v34  ;;  %2669 = vbcast.lane.b32.xlu1 %v15689_v45, 256 }
 0x102   :  { %15675 = vst [vmem:[#allocation93_spill] sm:$0xff] %v11022_v8  ;;  %15679 = vst [vmem:[#allocation95_spill] sm:$0xff] %v11032_v57  ;;  %v11048_v57 = vmul.f32 %v15681_v6, %v3425_v2  ;;  %v15687_v8 = vrot.slane %v10289_v51, %v9911_v11  ;;  %v15690_v6 = vrot.slane %v9810_v10, %v9965_v14 }
 0x103   :  { %v11053_v56 = vmul.f32 %v15683_v46, %v3425_v2  ;;  %v11058_v31 = vmul.f32 %v15685_v24, %v3425_v2  ;;  %v15691_v46 = vrot.slane %v10289_v51, %v9965_v14  ;;  %v15693_v24 = vrot.slane %v10289_v51, %v10057_v7 }
 0x104   :  { %15682 = vst [vmem:[#allocation96_spill] sm:$0xff] %v11048_v57  ;;  %v11063_v59 = vmul.f32 %v15687_v8, %v3425_v2  ;;  %1893 = vbcast.lane.b32.xlu0 %v15690_v6, 256  ;;  %v15695_v8 = vrot.slane %v10273_v37, %v9797_v4  ;;  %v15697_v45 = vrot.slane %v10273_v37, %v9800_v5 }
 0x105   :  { %15684 = vst [vmem:[#allocation97_spill] sm:$0xff] %v11053_v56  ;;  %15686 = vst [vmem:[#allocation98_spill] sm:$0xff] %v11058_v31  ;;  %v11074_v49 = vmul.f32 %v15691_v46, %v3425_v2  ;;  %v11079_v31 = vmul.f32 %v15693_v24, %v3425_v2  ;;  %v15699_v6 = vrot.slane %v10273_v37, %v9854_v34 }
 0x106   :  { %15688 = vst [vmem:[#allocation99_spill] sm:$0xff] %v11063_v59  ;;  %v11084_v59 = vmul.f32 %v15695_v8, %v3418_v53  ;;  %v11089_v10 = vmul.f32 %v15697_v45, %v3418_v53  ;;  %v15701_v51 = vrot.slane %v10273_v37, %v9911_v11  ;;  %v15703_v24 = vrot.slane %v10273_v37, %v9965_v14 }
 0x107   :  { %15692 = vst [vmem:[#allocation100_spill] sm:$0xff] %v11074_v49  ;;  %15694 = vst [vmem:[#allocation101_spill] sm:$0xff] %v11079_v31  ;;  %v11094_v46 = vmul.f32 %v15699_v6, %v3418_v53  ;;  %v15705_v45 = vrot.slane %v10273_v37, %v10057_v7  ;;  %v15707_v31 = vld [vmem:[#allocation39_spill] sm:$0xff] }
 0x108   :  { %15696 = vst [vmem:[#allocation102_spill] sm:$0xff] %v11084_v59  ;;  %15698 = vst [vmem:[#allocation103_spill] sm:$0xff] %v11089_v10  ;;  %v11099_v2 = vmul.f32 %v15701_v51, %v3418_v53  ;;  %v11104_v8 = vmul.f32 %v15703_v24, %v3418_v53  ;;  %v4194_v59 = vpop.permute.xlu0 %4193  ;;  %v15709_v51 = vld [vmem:[#allocation36_spill] sm:$0xff]  ;;  %v15712_v24 = vld [vmem:[#allocation47_spill] sm:$0xff] }
 0x109   :  { %15700 = vst [vmem:[#allocation104_spill] sm:$0xff] %v11094_v46  ;;  %v11109_v10 = vmul.f32 %v15705_v45, %v3418_v53  ;;  %v15706_v46 = vld [vmem:[#allocation40_spill] sm:$0xff]  ;;  %v15714_v37 = vrot.slane %v15712_v24, %v9800_v5  ;;  %v15715_v45 = vrot.slane %v15712_v24, %v9854_v34 }
 0x10a   :  { %15702 = vst [vmem:[#allocation105_spill] sm:$0xff] %v11099_v2  ;;  %15704 = vst [vmem:[#allocation106_spill] sm:$0xff] %v11104_v8  ;;  %v11115_v49 = vcombine.high %v15707_v31, %v15706_v46  ;;  %v15710_v2 = vld [vmem:[#allocation35_spill] sm:$0xff]  ;;  %v15713_v8 = vrot.slane %v15712_v24, %v9797_v4  ;;  %v15717_v31 = vrot.slane %v15712_v24, %v9911_v11 }
 0x10b   :  { %v11119_v56 = vcombine.high %v15710_v2, %v15709_v51  ;;  %v11129_v53 = vmul.f32 %v15714_v37, %v4201_v15  ;;  %v11134_v6 = vmul.f32 %v15715_v45, %v4201_v15  ;;  %v15719_v2 = vrot.slane %v9824_v19, %v9965_v14  ;;  %v4977_v19 = vpop.permute.xlu1 %4976 }
 0x10c   :  { %15708 = vst [vmem:[#allocation40_spill] sm:$0xff] %v11115_v49  ;;  %v11124_v57 = vmul.f32 %v15713_v8, %v4201_v15  ;;  %v11139_v46 = vmul.f32 %v15717_v31, %v4201_v15  ;;  %v15720_v8 = vrot.slane %v9822_v18, %v9965_v14  ;;  %v15721_v51 = vrot.slane %v15712_v24, %v9965_v14  ;;  %v15724_v31 = vld [vmem:[#allocation49_spill] sm:$0xff] }
 0x10d   :  { %15711 = vst [vmem:[#allocation39_spill] sm:$0xff] %v11119_v56  ;;  %15716 = vst [vmem:[#allocation36_spill] sm:$0xff] %v11134_v6  ;;  %4221 = vbcast.lane.b32.xlu1 %v15719_v2, 256  ;;  %v15722_v45 = vrot.slane %v15712_v24, %v10057_v7  ;;  %v15727_v2 = vrot.slane %v15724_v31, %v9800_v5  ;;  %v15731_v24 = vrot.slane %v15724_v31, %v9911_v11  ;;  %v15796_v56 = vld [vmem:[#allocation44_spill] sm:$0xff] }
 0x10e   :  { %15718 = vst [vmem:[#allocation35_spill] sm:$0xff] %v11139_v46  ;;  %3445 = vbcast.lane.b32.xlu0 %v15720_v8, 256  ;;  %v11150_v37 = vmul.f32 %v15721_v51, %v4201_v15  ;;  %v15725_v46 = vrot.slane %v15724_v31, %v9797_v4  ;;  %v15729_v8 = vrot.slane %v15724_v31, %v9854_v34 }
 0x10f   :  { %v11155_v35 = vmul.f32 %v15722_v45, %v4201_v15  ;;  %v11165_v18 = vmul.f32 %v15727_v2, %v4194_v59  ;;  %v11175_v15 = vmul.f32 %v15731_v24, %v4194_v59  ;;  %v15733_v45 = vrot.slane %v15724_v31, %v9965_v14 }
 0x110   :  { %v11160_v6 = vmul.f32 %v15725_v46, %v4194_v59  ;;  %v11170_v51 = vmul.f32 %v15729_v8, %v4194_v59  ;;  %v15735_v2 = vrot.slane %v15724_v31, %v10057_v7  ;;  %v15745_v24 = vrot.slane %v9828_v22, %v9965_v14 }
 0x111   :  { %15723 = vst [vmem:[#allocation47_spill] sm:$0xff] %v11155_v35  ;;  %15728 = vst [vmem:[#allocation107_spill] sm:$0xff] %v11165_v18  ;;  %v11180_v46 = vmul.f32 %v15733_v45, %v4194_v59 }
 0x112   :  { %15726 = vst [vmem:[#allocation49_spill] sm:$0xff] %v11160_v6  ;;  %15730 = vst [vmem:[#allocation108_spill] sm:$0xff] %v11170_v51  ;;  %v4970_v6 = vpop.permute.xlu0 %4969  ;;  %v11185_v18 = vmul.f32 %v15735_v2, %v4194_v59  ;;  %5773 = vbcast.lane.b32.xlu1 %v15745_v24, 256 }
 0x113   :  { %15732 = vst [vmem:[#allocation109_spill] sm:$0xff] %v11175_v15  ;;  %15734 = vst [vmem:[#allocation110_spill] sm:$0xff] %v11180_v46  ;;  %v15736_v15 = vld [vmem:[#allocation54_spill] sm:$0xff] }
 0x114   :  { %v15737_v45 = vrot.slane %v15736_v15, %v9797_v4  ;;  %v15739_v35 = vrot.slane %v15736_v15, %v9800_v5  ;;  %v15741_v59 = vrot.slane %v15736_v15, %v9854_v34  ;;  %v15743_v51 = vrot.slane %v15736_v15, %v9911_v11 }
 0x116   :  { %v11196_v46 = vmul.f32 %v15737_v45, %v4977_v19  ;;  %v11201_v31 = vmul.f32 %v15739_v35, %v4977_v19  ;;  %v11206_v2 = vmul.f32 %v15741_v59, %v4977_v19  ;;  %v11211_v8 = vmul.f32 %v15743_v51, %v4977_v19  ;;  %v15749_v51 = vld [vmem:[#allocation53_spill] sm:$0xff] }
 0x117   :  { %v15746_v45 = vrot.slane %v9826_v21, %v9965_v14  ;;  %v15747_v35 = vrot.slane %v15736_v15, %v9965_v14  ;;  %v15748_v59 = vrot.slane %v15736_v15, %v10057_v7  ;;  %v15752_v22 = vrot.slane %v15749_v51, %v9800_v5 }
 0x118   :  { %15738 = vst [vmem:[#allocation54_spill] sm:$0xff] %v11196_v46  ;;  %15740 = vst [vmem:[#allocation111_spill] sm:$0xff] %v11201_v31  ;;  %v15754_v24 = vrot.slane %v15749_v51, %v9854_v34  ;;  %v15756_v15 = vrot.slane %v15749_v51, %v9911_v11 }
 0x119   :  { %15742 = vst [vmem:[#allocation112_spill] sm:$0xff] %v11206_v2  ;;  %15744 = vst [vmem:[#allocation113_spill] sm:$0xff] %v11211_v8  ;;  %4997 = vbcast.lane.b32.xlu0 %v15746_v45, 256  ;;  %v11222_v31 = vmul.f32 %v15747_v35, %v4977_v19  ;;  %v11227_v2 = vmul.f32 %v15748_v59, %v4977_v19  ;;  %v15750_v8 = vrot.slane %v15749_v51, %v9797_v4  ;;  %v5753_v59 = vpop.permute.xlu1 %5752 }
 0x11a   :  { %v11237_v21 = vmul.f32 %v15752_v22, %v4970_v6  ;;  %v11242_v45 = vmul.f32 %v15754_v24, %v4970_v6  ;;  %v11247_v19 = vmul.f32 %v15756_v15, %v4970_v6  ;;  %v15758_v35 = vrot.slane %v15749_v51, %v9965_v14 }
 0x11b   :  { %v11232_v46 = vmul.f32 %v15750_v8, %v4970_v6  ;;  %v15760_v22 = vrot.slane %v15749_v51, %v10057_v7  ;;  %v15768_v15 = vrot.slane %v9836_v26, %v9965_v14 }
 0x11c   :  { %15753 = vst [vmem:[#allocation114_spill] sm:$0xff] %v11237_v21  ;;  %15755 = vst [vmem:[#allocation115_spill] sm:$0xff] %v11242_v45  ;;  %v11252_v8 = vmul.f32 %v15758_v35, %v4970_v6  ;;  %v15761_v35 = vrot.slane %v10490_v29, %v9797_v4  ;;  %v15766_v45 = vrot.slane %v10490_v29, %v9911_v11 }
 0x11d   :  { %15751 = vst [vmem:[#allocation53_spill] sm:$0xff] %v11232_v46  ;;  %15757 = vst [vmem:[#allocation116_spill] sm:$0xff] %v11247_v19  ;;  %v5746_v46 = vpop.permute.xlu0 %5745  ;;  %v11257_v21 = vmul.f32 %v15760_v22, %v4970_v6  ;;  %v15762_v19 = vrot.slane %v10490_v29, %v9800_v5  ;;  %v15764_v6 = vrot.slane %v10490_v29, %v9854_v34  ;;  %929 = vbcast.lane.b32.xlu1 %v15768_v15, 256 }
 0x11e   :  { %15759 = vst [vmem:[#allocation117_spill] sm:$0xff] %v11252_v8  ;;  %v11268_v8 = vmul.f32 %v15761_v35, %v5753_v59  ;;  %v11283_v24 = vmul.f32 %v15766_v45, %v5753_v59  ;;  %v15769_v35 = vrot.slane %v9830_v23, %v9965_v14  ;;  %v15772_v45 = vld [vmem:[#allocation64_spill] sm:$0xff] }
 0x11f   :  { %v11273_v51 = vmul.f32 %v15762_v19, %v5753_v59  ;;  %v11278_v22 = vmul.f32 %v15764_v6, %v5753_v59  ;;  %v15770_v19 = vrot.slane %v10490_v29, %v9965_v14  ;;  %v15771_v6 = vrot.slane %v10490_v29, %v10057_v7 }
 0x120   :  { %15767 = vst [vmem:[#allocation120_spill] sm:$0xff] %v11283_v24  ;;  %148 = vbcast.lane.b32.xlu0 %v15769_v35, 256  ;;  %v15773_v24 = vrot.slane %v15772_v45, %v9797_v4  ;;  %v15775_v26 = vrot.slane %v15772_v45, %v9800_v5  ;;  %v15777_v15 = vrot.slane %v15772_v45, %v9854_v34 }
 0x121   :  { %15763 = vst [vmem:[#allocation118_spill] sm:$0xff] %v11273_v51  ;;  %15765 = vst [vmem:[#allocation119_spill] sm:$0xff] %v11278_v22  ;;  %v11294_v49 = vmul.f32 %v15770_v19, %v5753_v59  ;;  %v11299_v22 = vmul.f32 %v15771_v6, %v5753_v59  ;;  %v15779_v29 = vrot.slane %v15772_v45, %v9911_v11  ;;  %v128_v6 = vpop.permute.xlu1 %127 }
 0x122   :  { %v11304_v51 = vmul.f32 %v15773_v24, %v5746_v46  ;;  %v11309_v23 = vmul.f32 %v15775_v26, %v5746_v46  ;;  %v11314_v35 = vmul.f32 %v15777_v15, %v5746_v46  ;;  %v15780_v19 = vrot.slane %v15772_v45, %v9965_v14 }
 0x123   :  { %v11319_v59 = vmul.f32 %v15779_v29, %v5746_v46  ;;  %v15782_v26 = vrot.slane %v15772_v45, %v10057_v7  ;;  %vm172_vm0 = vcmp.gt.f32.partialorder %v128_v6, 0.0  ;;  %v15792_v15 = vrot.slane %v9838_v27, %v9965_v14  ;;  %v15797_v27 = vld [vmem:[#allocation43_spill] sm:$0xff] }
 0x124   :  { %15774 = vst [vmem:[#allocation64_spill] sm:$0xff] %v11304_v51  ;;  %15776 = vst [vmem:[#allocation121_spill] sm:$0xff] %v11309_v23  ;;  %v11324_v24 = vmul.f32 %v15780_v19, %v5746_v46  ;;  %v121_v51 = vpop.permute.xlu0 %120  ;;  %v11345_v45 = vsel %vm172_vm0, %v10837_v36, -3e+38  ;;  %v11353_v6 = vsel %vm172_vm0, %v10847_v54, -3e+38 }
 0x125   :  { %15778 = vst [vmem:[#allocation122_spill] sm:$0xff] %v11314_v35  ;;  %v11329_v23 = vmul.f32 %v15782_v26, %v5746_v46  ;;  %vm171_vm1 = vcmp.gt.f32.partialorder %v121_v51, 0.0  ;;  %v11342_v46 = vsel %vm172_vm0, %v10832_v43, -3e+38  ;;  %v11348_v26 = vsel %vm172_vm0, %v10842_v30, -3e+38 }
 0x126   :  { %15781 = vst [vmem:[#allocation123_spill] sm:$0xff] %v11324_v24  ;;  %15783 = vst [vmem:[#allocation124_spill] sm:$0xff] %v11348_v26  ;;  %v11356_v19 = vsel %vm172_vm0, %v10858_v16, -3e+38  ;;  %v11359_v24 = vsel %vm172_vm0, %v10863_v9, -3e+38  ;;  %v909_v16 = vpop.permute.xlu1 %908  ;;  %v15791_v51 = vrot.slane %v9840_v28, %v9965_v14 }
 0x127   :  { %15784 = vst [vmem:[#allocation125_spill] sm:$0xff] %v11353_v6  ;;  %15785 = vst [vmem:[#allocation126_spill] sm:$0xff] %v11356_v19  ;;  %v11365_v36 = vsel %vm171_vm1, %v10760_v1, -3e+38  ;;  %v11369_v30 = vsel %vm171_vm1, %v10765_v41, -3e+38 }
 0x128   :  { %15786 = vst [vmem:[#allocation127_spill] sm:$0xff] %v11359_v24  ;;  %v11373_v54 = vsel %vm171_vm1, %v10770_v25, -3e+38  ;;  %v902_v29 = vpop.permute.xlu0 %901  ;;  %v11379_v43 = vsel %vm171_vm1, %v10775_v40, -3e+38  ;;  %2481 = vbcast.lane.b32.xlu1 %v15791_v51, 256 }
 0x129   :  { %15787 = vst [vmem:[#allocation128_spill] sm:$0xff] %v11373_v54  ;;  %15788 = vst [vmem:[#allocation129_spill] sm:$0xff] %v11379_v43  ;;  %v11383_v1 = vsel %vm171_vm1, %v10786_v52, -3e+38  ;;  %v11387_v41 = vsel %vm171_vm1, %v10791_v12, -3e+38 }
 0x12a   :  { %15789 = vst [vmem:[#allocation130_spill] sm:$0xff] %v11383_v1  ;;  %15790 = vst [vmem:[#allocation131_spill] sm:$0xff] %v11387_v41  ;;  %1705 = vbcast.lane.b32.xlu0 %v15792_v15, 256  ;;  %vm953_vm2 = vcmp.gt.f32.partialorder %v909_v16, 0.0  ;;  %vm952_vm3 = vcmp.gt.f32.partialorder %v902_v29, 0.0  ;;  %v15793_v9 = vld [vmem:[#allocation46_spill] sm:$0xff]  ;;  %v1685_v51 = vpop.permute.xlu1 %1684  ;;  %v11422_v15 = vcombine.high %v15797_v27, %v15796_v56 }
 0x12b   :  { %v15794_v35 = vld [vmem:[#allocation45_spill] sm:$0xff]  ;;  %v11412_v40 = vsel %vm953_vm2, %v10868_v42, -3e+38  ;;  %v11415_v52 = vsel %vm953_vm2, %v10873_v17, -3e+38  ;;  %vm1729_vm4 = vcmp.gt.f32.partialorder %v1685_v51, 0.0 }
 0x12c   :  { %v11409_v25 = vcombine.high %v15794_v35, %v15793_v9  ;;  %v11418_v28 = vsel %vm953_vm2, %v10878_v13, -3e+38  ;;  %v1678_v12 = vpop.permute.xlu0 %1677  ;;  %15798 = vst [vmem:[#allocation45_spill] sm:$0xff] %v11422_v15  ;;  %v11425_v16 = vsel %vm953_vm2, %v10883_v60, -3e+38  ;;  %v15800_v17 = vld [vmem:[#allocation29_spill] sm:$0xff] }
 0x12d   :  { %v11428_v35 = vsel %vm953_vm2, %v10888_v20, -3e+38  ;;  %v11431_v42 = vsel %vm953_vm2, %v10893_v39, -3e+38  ;;  %v11437_v13 = vsel %vm952_vm3, %v10796_v50, -3e+38  ;;  %v15801_v29 = vrot.slane %v15800_v17, %v9965_v14 }
 0x12e   :  { %15795 = vst [vmem:[#allocation46_spill] sm:$0xff] %v11409_v25  ;;  %v11441_v56 = vsel %vm952_vm3, %v10801_v0, -3e+38  ;;  %v11445_v60 = vsel %vm952_vm3, %v10806_v47, -3e+38  ;;  %v15799_v50 = vld [vmem:[#allocation34_spill] sm:$0xff]  ;;  %v15803_v47 = vrot.slane %v15802_v44, %v9965_v14 }
 0x12f   :  { %v11451_v39 = vsel %vm952_vm3, %v10811_v48, -3e+38  ;;  %v11455_v9 = vsel %vm952_vm3, %v10816_v62, -3e+38  ;;  %v11459_v27 = vsel %vm952_vm3, %v15799_v50, -3e+38  ;;  %v2461_v50 = vpop.permute.xlu1 %2460 }
 0x130   :  { %4033 = vbcast.lane.b32.xlu1 %v15801_v29, 256  ;;  %v2454_v38 = vpop.permute.xlu0 %2453  ;;  %3257 = vbcast.lane.b32.xlu0 %v15803_v47, 256  ;;  %vm1728_vm5 = vcmp.gt.f32.partialorder %v1678_v12, 0.0  ;;  %vm2505_vm6 = vcmp.gt.f32.partialorder %v2461_v50, 0.0  ;;  %v11480_v48 = vsel %vm1729_vm4, %v10904_v32, -3e+38 }
 0x131   :  { %15804 = vst [vmem:[#allocation44_spill] sm:$0xff] %v11480_v48  ;;  %v15805_v62 = vld [vmem:[#allocation32_spill] sm:$0xff]  ;;  %v15807_v17 = vld [vmem:[#allocation33_spill] sm:$0xff]  ;;  %v11494_v44 = vsel %vm1729_vm4, %v10930_v55, -3e+38  ;;  %v15820_v6 = vld [vmem:[#allocation87_spill] sm:$0xff] }
 0x132   :  { %v11483_v20 = vsel %vm1729_vm4, %v15805_v62, -3e+38  ;;  %v11486_v29 = vsel %vm1729_vm4, %v15807_v17, -3e+38  ;;  %v15809_v0 = vld [vmem:[#allocation37_spill] sm:$0xff]  ;;  %15811 = vst [vmem:[#allocation28_spill] sm:$0xff] %v11494_v44 }
 0x133   :  { %15806 = vst [vmem:[#allocation43_spill] sm:$0xff] %v11483_v20  ;;  %15808 = vst [vmem:[#allocation34_spill] sm:$0xff] %v11486_v29  ;;  %v11491_v24 = vsel %vm1729_vm4, %v15809_v0, -3e+38  ;;  %v15812_v51 = vld [vmem:[#allocation84_spill] sm:$0xff]  ;;  %v15814_v62 = vld [vmem:[#allocation38_spill] sm:$0xff]  ;;  %v3237_v55 = vpop.permute.xlu1 %3236 }
 0x134   :  { %15810 = vst [vmem:[#allocation29_spill] sm:$0xff] %v11491_v24  ;;  %v11497_v47 = vsel %vm1729_vm4, %v15812_v51, -3e+38  ;;  %v11503_v41 = vsel %vm1728_vm5, %v15814_v62, -3e+38  ;;  %v15816_v17 = vld [vmem:[#allocation85_spill] sm:$0xff]  ;;  %v3230_v1 = vpop.permute.xlu0 %3229 }
 0x135   :  { %15813 = vst [vmem:[#allocation32_spill] sm:$0xff] %v11497_v47  ;;  %15815 = vst [vmem:[#allocation33_spill] sm:$0xff] %v11503_v41  ;;  %v11507_v19 = vsel %vm1728_vm5, %v15816_v17, -3e+38  ;;  %v11511_v0 = vsel %vm1728_vm5, %v15818_v63, -3e+38 }
 0x136   :  { %15817 = vst [vmem:[#allocation37_spill] sm:$0xff] %v11507_v19  ;;  %15819 = vst [vmem:[#allocation84_spill] sm:$0xff] %v11511_v0  ;;  %v11517_v32 = vsel %vm1728_vm5, %v15820_v6, -3e+38  ;;  %v15822_v43 = vld [vmem:[#allocation88_spill] sm:$0xff]  ;;  %v15825_v54 = vld [vmem:[#allocation31_spill] sm:$0xff] }
 0x137   :  { %15821 = vst [vmem:[#allocation38_spill] sm:$0xff] %v11517_v32  ;;  %v11521_v62 = vsel %vm1728_vm5, %v15822_v43, -3e+38  ;;  %v11525_v17 = vsel %vm1728_vm5, %v10965_v33, -3e+38  ;;  %v15826_v12 = vrot.slane %v15825_v54, %v9965_v14  ;;  %v15827_v63 = vld [vmem:[#allocation30_spill] sm:$0xff] }
 0x138   :  { %15823 = vst [vmem:[#allocation85_spill] sm:$0xff] %v11521_v62  ;;  %15824 = vst [vmem:[#allocation86_spill] sm:$0xff] %v11525_v17  ;;  %v15828_v48 = vrot.slane %v15827_v63, %v9965_v14  ;;  %v15829_v26 = vld [vmem:[#allocation42_spill] sm:$0xff]  ;;  %v15830_v29 = vld [vmem:[#allocation89_spill] sm:$0xff]  ;;  %vm2504_vm7 = vcmp.gt.f32.partialorder %v2454_v38, 0.0  ;;  %v4013_v63 = vpop.permute.xlu1 %4012  ;;  %vm3281_vm8 = vcmp.gt.f32.partialorder %v3237_v55, 0.0 }
 0x139   :  { %5585 = vbcast.lane.b32.xlu1 %v15826_v12, 256  ;;  %v11547_v51 = vsel %vm2505_vm6, %v15829_v26, -3e+38  ;;  %v11551_v6 = vsel %vm2505_vm6, %v15830_v29, -3e+38  ;;  %v15831_v43 = vld [vmem:[#allocation90_spill] sm:$0xff]  ;;  %v11565_v26 = vpop.permute.xlu0 %4005 }
 0x13a   :  { %4809 = vbcast.lane.b32.xlu0 %v15828_v48, 256  ;;  %v11555_v54 = vsel %vm2505_vm6, %v15831_v43, -3e+38  ;;  %v15833_v12 = vld [vmem:[#allocation91_spill] sm:$0xff]  ;;  %v11563_v48 = vsel %vm2505_vm6, %v11002_v58, -3e+38 }
 0x13b   :  { %15832 = vst [vmem:[#allocation87_spill] sm:$0xff] %v11555_v54  ;;  %v11559_v33 = vsel %vm2505_vm6, %v15833_v12, -3e+38  ;;  %15835 = vst [vmem:[#allocation31_spill] sm:$0xff] %v11563_v48  ;;  %v11571_v38 = vsel %vm2505_vm6, %v11007_v61, -3e+38 }
 0x13c   :  { %15834 = vst [vmem:[#allocation88_spill] sm:$0xff] %v11559_v33  ;;  %15836 = vst [vmem:[#allocation30_spill] sm:$0xff] %v11571_v38  ;;  %v15837_v43 = vld [vmem:[#allocation41_spill] sm:$0xff]  ;;  %v15838_v17 = vld [vmem:[#allocation92_spill] sm:$0xff]  ;;  %v11593_v50 = vsel %vm2504_vm7, %v11037_v3, -3e+38 }
 0x13d   :  { %v11574_v47 = vsel %vm2504_vm7, %v15837_v43, -3e+38  ;;  %v11577_v12 = vsel %vm2504_vm7, %v15838_v17, -3e+38  ;;  %v15839_v44 = vld [vmem:[#allocation93_spill] sm:$0xff]  ;;  %v15841_v24 = vld [vmem:[#allocation94_spill] sm:$0xff]  ;;  %v11611_v43 = vpop.permute.xlu1 %4788  ;;  %v11613_v61 = vpop.permute.xlu0 %4781 }
 0x13e   :  { %v11582_v62 = vsel %vm2504_vm7, %v15839_v44, -3e+38  ;;  %v11585_v32 = vsel %vm2504_vm7, %v15841_v24, -3e+38  ;;  %v15843_v29 = vld [vmem:[#allocation95_spill] sm:$0xff]  ;;  %15845 = vst [vmem:[#allocation91_spill] sm:$0xff] %v11593_v50 }
 0x13f   :  { %15840 = vst [vmem:[#allocation42_spill] sm:$0xff] %v11582_v62  ;;  %15842 = vst [vmem:[#allocation89_spill] sm:$0xff] %v11585_v32  ;;  %v11588_v25 = vsel %vm2504_vm7, %v15843_v29, -3e+38  ;;  %v15846_v24 = vld [vmem:[#allocation21_spill] sm:$0xff]  ;;  %v15848_v29 = vld [vmem:[#allocation22_spill] sm:$0xff] }
 0x140   :  { %15844 = vst [vmem:[#allocation90_spill] sm:$0xff] %v11588_v25  ;;  %v15847_v58 = vrot.slane %v15846_v24, %v10057_v7  ;;  %v15849_v0 = vrot.slane %v15848_v29, %v10057_v7  ;;  %vm3280_vm9 = vcmp.gt.f32.partialorder %v3230_v1, 0.0  ;;  %v15850_v44 = vld [vmem:[#allocation96_spill] sm:$0xff]  ;;  %v15854_v29 = vld [vmem:[#allocation98_spill] sm:$0xff]  ;;  %v15856_v19 = vld [vmem:[#allocation99_spill] sm:$0xff]  ;;  %vm4057_vm10 = vcmp.gt.f32.partialorder %v4013_v63, 0.0 }
 0x141   :  { %v11616_v20 = vsel %vm3281_vm8, %v15850_v44, -3e+38  ;;  %v11627_v17 = vsel %vm3281_vm8, %v15856_v19, -3e+38  ;;  %v15858_v55 = vld [vmem:[#allocation100_spill] sm:$0xff]  ;;  %v15860_v38 = vld [vmem:[#allocation101_spill] sm:$0xff]  ;;  %v11667_v54 = vpop.permute.xlu0 %5557 }
 0x142   :  { %1124 = vbcast.lane.b32.xlu1 %v15847_v58, 256  ;;  %343 = vbcast.lane.b32.xlu0 %v15849_v0, 256  ;;  %15851 = vst [vmem:[#allocation41_spill] sm:$0xff] %v11616_v20  ;;  %v15852_v58 = vld [vmem:[#allocation97_spill] sm:$0xff]  ;;  %v11622_v0 = vsel %vm3281_vm8, %v15854_v29, -3e+38 }
 0x143   :  { %v11619_v24 = vsel %vm3281_vm8, %v15852_v58, -3e+38  ;;  %15855 = vst [vmem:[#allocation93_spill] sm:$0xff] %v11622_v0  ;;  %15857 = vst [vmem:[#allocation94_spill] sm:$0xff] %v11627_v17  ;;  %v11630_v41 = vsel %vm3281_vm8, %v15858_v55, -3e+38 }
 0x144   :  { %15853 = vst [vmem:[#allocation92_spill] sm:$0xff] %v11619_v24  ;;  %15859 = vst [vmem:[#allocation95_spill] sm:$0xff] %v11630_v41  ;;  %v11633_v50 = vsel %vm3281_vm8, %v15860_v38, -3e+38  ;;  %v15862_v58 = vld [vmem:[#allocation102_spill] sm:$0xff]  ;;  %v15864_v29 = vld [vmem:[#allocation103_spill] sm:$0xff] }
 0x145   :  { %15861 = vst [vmem:[#allocation21_spill] sm:$0xff] %v11633_v50  ;;  %v11639_v48 = vsel %vm3280_vm9, %v15862_v58, -3e+38  ;;  %v11643_v25 = vsel %vm3280_vm9, %v15864_v29, -3e+38  ;;  %v15866_v3 = vld [vmem:[#allocation104_spill] sm:$0xff]  ;;  %v11707_v50 = vpop.permute.xlu0 %322 }
 0x146   :  { %15863 = vst [vmem:[#allocation22_spill] sm:$0xff] %v11639_v48  ;;  %15865 = vst [vmem:[#allocation96_spill] sm:$0xff] %v11643_v25  ;;  %v11647_v19 = vsel %vm3280_vm9, %v15866_v3, -3e+38  ;;  %v15868_v38 = vld [vmem:[#allocation105_spill] sm:$0xff]  ;;  %v15870_v44 = vld [vmem:[#allocation106_spill] sm:$0xff]  ;;  %v11665_v3 = vpop.permute.xlu1 %5564 }
 0x147   :  { %15867 = vst [vmem:[#allocation97_spill] sm:$0xff] %v11647_v19  ;;  %v11653_v33 = vsel %vm3280_vm9, %v15868_v38, -3e+38  ;;  %v11657_v32 = vsel %vm3280_vm9, %v15870_v44, -3e+38  ;;  %v15873_v1 = vld [vmem:[#allocation24_spill] sm:$0xff] }
 0x148   :  { %15869 = vst [vmem:[#allocation98_spill] sm:$0xff] %v11653_v33  ;;  %15871 = vst [vmem:[#allocation99_spill] sm:$0xff] %v11657_v32  ;;  %v11661_v58 = vsel %vm3280_vm9, %v11109_v10, -3e+38  ;;  %v15874_v62 = vrot.slane %v15873_v1, %v10057_v7  ;;  %v15875_v20 = vld [vmem:[#allocation23_spill] sm:$0xff]  ;;  %vm4056_vm11 = vcmp.gt.f32.partialorder %v11565_v26, 0.0 }
 0x149   :  { %15872 = vst [vmem:[#allocation100_spill] sm:$0xff] %v11661_v58  ;;  %v15876_v48 = vrot.slane %v15875_v20, %v10057_v7  ;;  %vm4833_vm12 = vcmp.gt.f32.partialorder %v11611_v43, 0.0  ;;  %v11688_v44 = vsel %vm4057_vm10, %v11124_v57, -3e+38  ;;  %v11691_v10 = vsel %vm4057_vm10, %v11129_v53, -3e+38 }
 0x14a   :  { %2676 = vbcast.lane.b32.xlu1 %v15874_v62, 256  ;;  %15877 = vst [vmem:[#allocation101_spill] sm:$0xff] %v11691_v10  ;;  %v15878_v1 = vld [vmem:[#allocation36_spill] sm:$0xff]  ;;  %v15880_v38 = vld [vmem:[#allocation35_spill] sm:$0xff]  ;;  %v1104_v57 = vpop.permute.xlu1 %1103  ;;  %v15892_v53 = vld [vmem:[#allocation109_spill] sm:$0xff]  ;;  %vm4832_vm13 = vcmp.gt.f32.partialorder %v11613_v61, 0.0 }
 0x14b   :  { %1900 = vbcast.lane.b32.xlu0 %v15876_v48, 256  ;;  %v11694_v62 = vsel %vm4057_vm10, %v15878_v1, -3e+38  ;;  %v11699_v20 = vsel %vm4057_vm10, %v15880_v38, -3e+38  ;;  %v15883_v63 = vld [vmem:[#allocation47_spill] sm:$0xff] }
 0x14c   :  { %15879 = vst [vmem:[#allocation102_spill] sm:$0xff] %v11694_v62  ;;  %15881 = vst [vmem:[#allocation103_spill] sm:$0xff] %v11699_v20  ;;  %v11702_v48 = vsel %vm4057_vm10, %v11150_v37, -3e+38  ;;  %v11705_v55 = vsel %vm4057_vm10, %v15883_v63, -3e+38 }
 0x14d   :  { %15882 = vst [vmem:[#allocation104_spill] sm:$0xff] %v11702_v48  ;;  %15884 = vst [vmem:[#allocation105_spill] sm:$0xff] %v11705_v55  ;;  %v15885_v1 = vld [vmem:[#allocation49_spill] sm:$0xff]  ;;  %v15886_v29 = vld [vmem:[#allocation107_spill] sm:$0xff]  ;;  %v11800_v55 = vsel %vm4833_vm12, %v11227_v2, -3e+38 }
 0x14e   :  { %v11714_v58 = vsel %vm4056_vm11, %v15885_v1, -3e+38  ;;  %v11719_v38 = vsel %vm4056_vm11, %v15886_v29, -3e+38  ;;  %v15888_v37 = vld [vmem:[#allocation108_spill] sm:$0xff]  ;;  %v15890_v41 = vld [vmem:[#allocation63_spill] sm:$0xff] }
 0x14f   :  { %15887 = vst [vmem:[#allocation106_spill] sm:$0xff] %v11719_v38  ;;  %v11724_v63 = vsel %vm4056_vm11, %v15888_v37, -3e+38  ;;  %v15891_v32 = vrot.slane %v15890_v41, %v9797_v4  ;;  %v11734_v1 = vsel %vm4056_vm11, %v15892_v53, -3e+38  ;;  %v15894_v15 = vld [vmem:[#allocation110_spill] sm:$0xff]  ;;  %v15910_v61 = vrot.slane %v15890_v41, %v9800_v5 }
 0x150   :  { %15889 = vst [vmem:[#allocation24_spill] sm:$0xff] %v11724_v63  ;;  %15893 = vst [vmem:[#allocation23_spill] sm:$0xff] %v11734_v1  ;;  %v11739_v29 = vsel %vm4056_vm11, %v15894_v15, -3e+38  ;;  %v11744_v37 = vsel %vm4056_vm11, %v11185_v18, -3e+38 }
 0x151   :  { %v11729_v17 = vmul.f32 %v15891_v32, %v1104_v57  ;;  %15895 = vst [vmem:[#allocation36_spill] sm:$0xff] %v11739_v29  ;;  %15896 = vst [vmem:[#allocation35_spill] sm:$0xff] %v11744_v37  ;;  %v15897_v19 = vld [vmem:[#allocation26_spill] sm:$0xff]  ;;  %v15899_v33 = vld [vmem:[#allocation25_spill] sm:$0xff]  ;;  %v1393_v25 = vmul.f32 %v15910_v61, %v1104_v57  ;;  %v15916_v29 = vrot.slane %v15890_v41, %v9854_v34  ;;  %vm5609_vm14 = vcmp.gt.f32.partialorder %v11665_v3, 0.0 }
 0x152   :  { %v15898_v26 = vrot.slane %v15897_v19, %v10057_v7  ;;  %v15900_v24 = vrot.slane %v15899_v33, %v10057_v7  ;;  %v15901_v32 = vld [vmem:[#allocation54_spill] sm:$0xff]  ;;  %v15903_v0 = vld [vmem:[#allocation111_spill] sm:$0xff]  ;;  %v11775_v19 = vpop.permute.xlu1 %2655  ;;  %v15905_v18 = vld [vmem:[#allocation112_spill] sm:$0xff]  ;;  %15911 = vst [vmem:[#allocation109_spill] sm:$0xff] %v11800_v55  ;;  %vm5608_vm15 = vcmp.gt.f32.partialorder %v11667_v54, 0.0 }
 0x153   :  { %v11767_v53 = vsel %vm4833_vm12, %v15901_v32, -3e+38  ;;  %v11772_v15 = vsel %vm4833_vm12, %v15903_v0, -3e+38  ;;  %v11782_v33 = vsel %vm4833_vm12, %v15905_v18, -3e+38 }
 0x154   :  { %4228 = vbcast.lane.b32.xlu1 %v15898_v26, 256  ;;  %3452 = vbcast.lane.b32.xlu0 %v15900_v24, 256  ;;  %15902 = vst [vmem:[#allocation47_spill] sm:$0xff] %v11767_v53  ;;  %15904 = vst [vmem:[#allocation49_spill] sm:$0xff] %v11772_v15  ;;  %v11777_v26 = vpop.permute.xlu0 %1879  ;;  %v15907_v24 = vld [vmem:[#allocation113_spill] sm:$0xff]  ;;  %v15914_v48 = vld [vmem:[#allocation114_spill] sm:$0xff] }
 0x155   :  { %15906 = vst [vmem:[#allocation107_spill] sm:$0xff] %v11782_v33  ;;  %v11787_v32 = vsel %vm4833_vm12, %v15907_v24, -3e+38  ;;  %v11792_v0 = vsel %vm4833_vm12, %v11222_v31, -3e+38  ;;  %v15912_v18 = vld [vmem:[#allocation53_spill] sm:$0xff]  ;;  %v1394_v31 = vmul.f32 %v15916_v29, %v1104_v57  ;;  %v15933_v33 = vrot.slane %v15890_v41, %v9911_v11 }
 0x156   :  { %15908 = vst [vmem:[#allocation108_spill] sm:$0xff] %v11787_v32  ;;  %15909 = vst [vmem:[#allocation63_spill] sm:$0xff] %v11792_v0  ;;  %v11803_v37 = vsel %vm4832_vm13, %v15912_v18, -3e+38  ;;  %v11806_v24 = vsel %vm4832_vm13, %v15914_v48, -3e+38  ;;  %v11837_v2 = vpop.permute.xlu1 %4207 }
 0x157   :  { %15913 = vst [vmem:[#allocation110_spill] sm:$0xff] %v11803_v37  ;;  %15915 = vst [vmem:[#allocation26_spill] sm:$0xff] %v11806_v24  ;;  %v15917_v20 = vld [vmem:[#allocation115_spill] sm:$0xff]  ;;  %v15919_v62 = vld [vmem:[#allocation116_spill] sm:$0xff]  ;;  %v11823_v18 = vsel %vm4832_vm13, %v11257_v21, -3e+38  ;;  %v1395_v48 = vmul.f32 %v15933_v33, %v1104_v57 }
 0x158   :  { %v11812_v1 = vsel %vm4832_vm13, %v15917_v20, -3e+38  ;;  %v11815_v61 = vsel %vm4832_vm13, %v15919_v62, -3e+38  ;;  %v15921_v63 = vld [vmem:[#allocation117_spill] sm:$0xff]  ;;  %15923 = vst [vmem:[#allocation112_spill] sm:$0xff] %v11823_v18  ;;  %v11839_v21 = vpop.permute.xlu0 %3431 }
 0x159   :  { %15918 = vst [vmem:[#allocation25_spill] sm:$0xff] %v11812_v1  ;;  %15920 = vst [vmem:[#allocation54_spill] sm:$0xff] %v11815_v61  ;;  %v11818_v43 = vsel %vm4832_vm13, %v15921_v63, -3e+38  ;;  %v15924_v62 = vld [vmem:[#allocation48_spill] sm:$0xff]  ;;  %v15926_v63 = vld [vmem:[#allocation50_spill] sm:$0xff] }
 0x15a   :  { %15922 = vst [vmem:[#allocation111_spill] sm:$0xff] %v11818_v43  ;;  %v15925_v10 = vrot.slane %v15924_v62, %v10057_v7  ;;  %v15927_v38 = vrot.slane %v15926_v63, %v10057_v7  ;;  %v15929_v20 = vld [vmem:[#allocation118_spill] sm:$0xff]  ;;  %v15934_v0 = vld [vmem:[#allocation120_spill] sm:$0xff]  ;;  %v11863_v3 = vsel %vm5609_vm14, %v11294_v49, -3e+38  ;;  %v15941_v18 = vld [vmem:[#allocation121_spill] sm:$0xff] }
 0x15b   :  { %v11851_v32 = vsel %vm5609_vm14, %v15929_v20, -3e+38  ;;  %v11860_v43 = vsel %vm5609_vm14, %v15934_v0, -3e+38  ;;  %15936 = vst [vmem:[#allocation116_spill] sm:$0xff] %v11863_v3  ;;  %v15939_v55 = vld [vmem:[#allocation64_spill] sm:$0xff] }
 0x15c   :  { %5780 = vbcast.lane.b32.xlu1 %v15925_v10, 256  ;;  %5004 = vbcast.lane.b32.xlu0 %v15927_v38, 256  ;;  %v11848_v10 = vsel %vm5609_vm14, %v11268_v8, -3e+38  ;;  %15930 = vst [vmem:[#allocation53_spill] sm:$0xff] %v11851_v32  ;;  %v15931_v38 = vld [vmem:[#allocation119_spill] sm:$0xff]  ;;  %v15938_v8 = vrot.slane %v15890_v41, %v9965_v14  ;;  %v11888_v1 = vpop.permute.xlu0 %4983 }
 0x15d   :  { %15928 = vst [vmem:[#allocation113_spill] sm:$0xff] %v11848_v10  ;;  %v11854_v61 = vsel %vm5609_vm14, %v15931_v38, -3e+38  ;;  %15935 = vst [vmem:[#allocation115_spill] sm:$0xff] %v11860_v43  ;;  %v11866_v29 = vsel %vm5609_vm14, %v11299_v22, -3e+38  ;;  %v11886_v22 = vpop.permute.xlu1 %5759 }
 0x15e   :  { %15932 = vst [vmem:[#allocation114_spill] sm:$0xff] %v11854_v61  ;;  %15937 = vst [vmem:[#allocation117_spill] sm:$0xff] %v11866_v29  ;;  %v1396_v20 = vmul.f32 %v15938_v8, %v1104_v57  ;;  %v11874_v38 = vsel %vm5608_vm15, %v15939_v55, -3e+38  ;;  %v11879_v33 = vsel %vm5608_vm15, %v15941_v18, -3e+38  ;;  %v15946_v8 = vrot.slane %v15890_v41, %v10057_v7 }
 0x15f   :  { %15940 = vst [vmem:[#allocation118_spill] sm:$0xff] %v11874_v38  ;;  %15942 = vst [vmem:[#allocation119_spill] sm:$0xff] %v11879_v33  ;;  %v15943_v0 = vld [vmem:[#allocation122_spill] sm:$0xff]  ;;  %v11896_v55 = vsel %vm5608_vm15, %v11319_v59, -3e+38  ;;  %v15948_v18 = vld [vmem:[#allocation123_spill] sm:$0xff] }
 0x160   :  { %v11884_v49 = vsel %vm5608_vm15, %v15943_v0, -3e+38  ;;  %15945 = vst [vmem:[#allocation64_spill] sm:$0xff] %v11888_v1  ;;  %v1397_v15 = vmul.f32 %v15946_v8, %v1104_v57  ;;  %15947 = vst [vmem:[#allocation121_spill] sm:$0xff] %v11896_v55  ;;  %v11901_v24 = vsel %vm5608_vm15, %v15948_v18, -3e+38  ;;  %v135_v29 = vpop.permute.xlu0 %134 }
 0x161   :  { %15944 = vst [vmem:[#allocation120_spill] sm:$0xff] %v11884_v49  ;;  %15949 = vst [vmem:[#allocation122_spill] sm:$0xff] %v11901_v24  ;;  %v11906_v0 = vsel %vm5608_vm15, %v11329_v23, -3e+38  ;;  %v15951_v18 = vld [vmem:[#allocation55_spill] sm:$0xff]  ;;  %v15953_v53 = vld [vmem:[#allocation56_spill] sm:$0xff]  ;;  %v916_v23 = vpop.permute.xlu1 %915 }
 0x162   :  { %15950 = vst [vmem:[#allocation123_spill] sm:$0xff] %v11906_v0  ;;  %v15952_v54 = vrot.slane %v15951_v18, %v10057_v7  ;;  %v15954_v37 = vrot.slane %v15953_v53, %v10057_v7  ;;  %v15955_v41 = vld [vmem:[#allocation68_spill] sm:$0xff]  ;;  %v15962_v24 = vld [vmem:[#allocation69_spill] sm:$0xff]  ;;  %vm954_vm0 = vcmp.gt.f32.partialorder %v916_v23, 0.0  ;;  %vm173_vm1 = vcmp.gt.f32.partialorder %v135_v29, 0.0 }
 0x163   :  { %v15956_v59 = vrot.slane %v15955_v41, %v9797_v4  ;;  %v15957_v8 = vrot.slane %v15955_v41, %v9800_v5  ;;  %v15966_v32 = vld [vmem:[#allocation57_spill] sm:$0xff]  ;;  %v15968_v23 = vrot.slane %v15962_v24, %v9911_v11  ;;  %v15970_v10 = vld [vmem:[#allocation60_spill] sm:$0xff]  ;;  %v1458_v38 = vsel %vm954_vm0, %v1394_v31, -3e+38 }
 0x164   :  { %936 = vbcast.lane.b32.xlu1 %v15952_v54, 256  ;;  %155 = vbcast.lane.b32.xlu0 %v15954_v37, 256  ;;  %v15958_v54 = vrot.slane %v15955_v41, %v9854_v34  ;;  %v15959_v37 = vrot.slane %v15955_v41, %v9911_v11  ;;  %v1460_v1 = vsel %vm954_vm0, %v1396_v20, -3e+38  ;;  %v1461_v63 = vsel %vm954_vm0, %v1397_v15, -3e+38 }
 0x165   :  { %v611_v61 = vmul.f32 %v15956_v59, %v11707_v50  ;;  %v612_v57 = vmul.f32 %v15957_v8, %v11707_v50  ;;  %v15960_v59 = vrot.slane %v15955_v41, %v9965_v14  ;;  %v15961_v8 = vrot.slane %v15955_v41, %v10057_v7  ;;  %v15978_v20 = vld [vmem:[#allocation61_spill] sm:$0xff] }
 0x166   :  { %v613_v18 = vmul.f32 %v15958_v54, %v11707_v50  ;;  %v614_v53 = vmul.f32 %v15959_v37, %v11707_v50  ;;  %v15963_v54 = vrot.slane %v15962_v24, %v9797_v4  ;;  %v15964_v37 = vrot.slane %v15962_v24, %v9800_v5 }
 0x167   :  { %v615_v0 = vmul.f32 %v15960_v59, %v11707_v50  ;;  %v616_v3 = vmul.f32 %v15961_v8, %v11707_v50  ;;  %v15965_v59 = vrot.slane %v15962_v24, %v9854_v34  ;;  %v15967_v50 = vrot.slane %v15966_v32, %v10057_v7 }
 0x168   :  { %v2944_v43 = vmul.f32 %v15963_v54, %v11775_v19  ;;  %v2945_v55 = vmul.f32 %v15964_v37, %v11775_v19  ;;  %v1456_v41 = vsel %vm954_vm0, %v11729_v17, -3e+38  ;;  %v1457_v8 = vsel %vm954_vm0, %v1393_v25, -3e+38 }
 0x169   :  { %v2946_v49 = vmul.f32 %v15965_v59, %v11775_v19  ;;  %2488 = vbcast.lane.b32.xlu1 %v15967_v50, 256  ;;  %v2947_v54 = vmul.f32 %v15968_v23, %v11775_v19  ;;  %v15969_v37 = vrot.slane %v15962_v24, %v9965_v14  ;;  %v15971_v59 = vrot.slane %v15970_v10, %v10057_v7 }
 0x16a   :  { %v1459_v32 = vsel %vm954_vm0, %v1395_v48, -3e+38  ;;  %v15972_v17 = vmax.f32 %v11437_v13, %v11412_v40  ;;  %v15973_v50 = vmax.f32 %v11441_v56, %v11415_v52  ;;  %v15975_v31 = vmax.f32 %v11451_v39, %v11425_v16  ;;  %v2468_v40 = vpop.permute.xlu1 %2467  ;;  %v1692_v13 = vpop.permute.xlu0 %1691 }
 0x16b   :  { %v2948_v33 = vmul.f32 %v15969_v37, %v11775_v19  ;;  %1712 = vbcast.lane.b32.xlu0 %v15971_v59, 256  ;;  %v15974_v37 = vmax.f32 %v11445_v60, %v11418_v28  ;;  %v15977_v56 = vmax.f32 %v11459_v27, %v11431_v42  ;;  %v675_v28 = vsel %vm173_vm1, %v611_v61, -3e+38 }
 0x16c   :  { %v11980_v25 = vmax.f32 %v15972_v17, %v1456_v41  ;;  %v11985_v23 = vmax.f32 %v15973_v50, %v1457_v8  ;;  %v11995_v48 = vmax.f32 %v15975_v31, %v1459_v32  ;;  %v15976_v41 = vmax.f32 %v11455_v9, %v11428_v35  ;;  %v15994_v31 = vld [vmem:[#allocation131_spill] sm:$0xff] }
 0x16d   :  { %v11990_v62 = vmax.f32 %v15974_v37, %v1458_v38  ;;  %v12005_v15 = vmax.f32 %v15977_v56, %v1461_v63  ;;  %v676_v60 = vsel %vm173_vm1, %v612_v57, -3e+38  ;;  %v15979_v16 = vrot.slane %v15978_v20, %v10057_v7  ;;  %v15984_v57 = vld [vmem:[#allocation128_spill] sm:$0xff] }
 0x16e   :  { %v12000_v52 = vmax.f32 %v15976_v41, %v1460_v1  ;;  %v677_v39 = vsel %vm173_vm1, %v613_v18, -3e+38  ;;  %v678_v32 = vsel %vm173_vm1, %v614_v53, -3e+38  ;;  %v15980_v35 = vmax.f32 %v11365_v36, %v11342_v46  ;;  %v15982_v1 = vld [vmem:[#allocation65_spill] sm:$0xff]  ;;  %v15985_v53 = vld [vmem:[#allocation124_spill] sm:$0xff] }
 0x16f   :  { %4040 = vbcast.lane.b32.xlu1 %v15979_v16, 256  ;;  %v15981_v42 = vmax.f32 %v11369_v30, %v11345_v45  ;;  %v15983_v61 = vrot.slane %v15982_v1, %v10057_v7  ;;  %v679_v63 = vsel %vm173_vm1, %v615_v0, -3e+38  ;;  %v680_v38 = vsel %vm173_vm1, %v616_v3, -3e+38  ;;  %v15987_v46 = vld [vmem:[#allocation129_spill] sm:$0xff] }
 0x170   :  { %v12017_v9 = vmax.f32 %v15980_v35, %v675_v28  ;;  %v15986_v18 = vmax.f32 %v15984_v57, %v15985_v53  ;;  %v15988_v36 = vld [vmem:[#allocation125_spill] sm:$0xff]  ;;  %v15990_v45 = vld [vmem:[#allocation130_spill] sm:$0xff]  ;;  %v15995_v41 = vld [vmem:[#allocation127_spill] sm:$0xff]  ;;  %v15998_v3 = vrot.slane %v15962_v24, %v10057_v7  ;;  %vm2506_vm2 = vcmp.gt.f32.partialorder %v2468_v40, 0.0  ;;  %v12053_v28 = vpop.permute.xlu1 %4019 }
 0x171   :  { %v12022_v27 = vmax.f32 %v15981_v42, %v676_v60  ;;  %3264 = vbcast.lane.b32.xlu0 %v15983_v61, 256  ;;  %v15989_v59 = vmax.f32 %v15987_v46, %v15988_v36  ;;  %v15991_v30 = vld [vmem:[#allocation126_spill] sm:$0xff]  ;;  %v15996_v0 = vmax.f32 %v15994_v31, %v15995_v41  ;;  %v12055_v60 = vpop.permute.xlu0 %3243  ;;  %v3008_v16 = vsel %vm2506_vm2, %v2944_v43, -3e+38  ;;  %v16010_v36 = vld [vmem:[#allocation87_spill] sm:$0xff] }
 0x172   :  { %v12032_v8 = vmax.f32 %v15986_v18, %v677_v39  ;;  %v15992_v50 = vmax.f32 %v15990_v45, %v15991_v30  ;;  %v2949_v56 = vmul.f32 %v15998_v3, %v11775_v19  ;;  %v3009_v39 = vsel %vm2506_vm2, %v2945_v55, -3e+38  ;;  %v15999_v35 = vld [vmem:[#allocation70_spill] sm:$0xff]  ;;  %v16007_v55 = vld [vmem:[#allocation67_spill] sm:$0xff]  ;;  %v16014_v45 = vld [vmem:[#allocation88_spill] sm:$0xff] }
 0x173   :  { %v12037_v17 = vmax.f32 %v15989_v59, %v678_v32  ;;  %v12047_v29 = vmax.f32 %v15996_v0, %v680_v38  ;;  %v3010_v32 = vsel %vm2506_vm2, %v2946_v49, -3e+38  ;;  %v16000_v42 = vrot.slane %v15999_v35, %v9797_v4  ;;  %v16009_v46 = vld [vmem:[#allocation42_spill] sm:$0xff]  ;;  %v16021_v31 = vld [vmem:[#allocation91_spill] sm:$0xff] }
 0x174   :  { %v12042_v37 = vmax.f32 %v15992_v50, %v679_v63  ;;  %v16001_v63 = vld [vmem:[#allocation66_spill] sm:$0xff]  ;;  %v3011_v57 = vsel %vm2506_vm2, %v2947_v54, -3e+38  ;;  %v3012_v24 = vsel %vm2506_vm2, %v2948_v33, -3e+38  ;;  %v16003_v19 = vmax.f32 %v11574_v47, %v11547_v51  ;;  %v16013_v33 = vld [vmem:[#allocation89_spill] sm:$0xff] }
 0x175   :  { %15997 = vst [vmem:[#allocation69_spill] sm:$0xff] %v12047_v29  ;;  %v2168_v61 = vmul.f32 %v16000_v42, %v11777_v26  ;;  %v16002_v38 = vrot.slane %v16001_v63, %v10057_v7  ;;  %v16005_v43 = vmax.f32 %v11577_v12, %v11551_v6  ;;  %v16008_v53 = vrot.slane %v16007_v55, %v10057_v7  ;;  %v16017_v30 = vld [vmem:[#allocation90_spill] sm:$0xff]  ;;  %v16018_v50 = vld [vmem:[#allocation31_spill] sm:$0xff] }
 0x176   :  { %15993 = vst [vmem:[#allocation68_spill] sm:$0xff] %v12042_v37  ;;  %v12067_v40 = vmax.f32 %v16003_v19, %v3008_v16  ;;  %v3013_v18 = vsel %vm2506_vm2, %v2949_v56, -3e+38  ;;  %v16011_v59 = vmax.f32 %v16009_v46, %v16010_v36  ;;  %v16015_v47 = vmax.f32 %v16013_v33, %v16014_v45  ;;  %v16022_v41 = vld [vmem:[#allocation30_spill] sm:$0xff]  ;;  %v16030_v46 = vld [vmem:[#allocation75_spill] sm:$0xff] }
 0x177   :  { %5592 = vbcast.lane.b32.xlu1 %v16002_v38, 256  ;;  %v12072_v49 = vmax.f32 %v16005_v43, %v3009_v39  ;;  %4816 = vbcast.lane.b32.xlu0 %v16008_v53, 256  ;;  %v16019_v6 = vmax.f32 %v16017_v30, %v16018_v50  ;;  %v16023_v0 = vmax.f32 %v16021_v31, %v16022_v41  ;;  %vm1730_vm3 = vcmp.gt.f32.partialorder %v1692_v13, 0.0  ;;  %v16032_v33 = vld [vmem:[#allocation71_spill] sm:$0xff]  ;;  %v16033_v45 = vld [vmem:[#allocation62_spill] sm:$0xff] }
 0x178   :  { %16004 = vst [vmem:[#allocation60_spill] sm:$0xff] %v12067_v40  ;;  %v12080_v54 = vmax.f32 %v16011_v59, %v3010_v32  ;;  %v12085_v51 = vmax.f32 %v16015_v47, %v3011_v57  ;;  %v16025_v56 = vrot.slane %v15999_v35, %v9800_v5  ;;  %v16026_v39 = vrot.slane %v15999_v35, %v9854_v34  ;;  %v12109_v57 = vpop.permute.xlu1 %5571 }
 0x179   :  { %16006 = vst [vmem:[#allocation61_spill] sm:$0xff] %v12072_v49  ;;  %v12090_v12 = vmax.f32 %v16019_v6, %v3012_v24  ;;  %v12095_v3 = vmax.f32 %v16023_v0, %v3013_v18  ;;  %v16027_v42 = vrot.slane %v15999_v35, %v9911_v11  ;;  %v12111_v24 = vpop.permute.xlu0 %4795  ;;  %v16028_v19 = vrot.slane %v15999_v35, %v9965_v14 }
 0x17a   :  { %16012 = vst [vmem:[#allocation65_spill] sm:$0xff] %v12080_v54  ;;  %16016 = vst [vmem:[#allocation128_spill] sm:$0xff] %v12085_v51  ;;  %v2169_v16 = vmul.f32 %v16025_v56, %v11777_v26  ;;  %v2170_v32 = vmul.f32 %v16026_v39, %v11777_v26  ;;  %v16029_v53 = vrot.slane %v15999_v35, %v10057_v7  ;;  %v2232_v30 = vsel %vm1730_vm3, %v2168_v61, -3e+38  ;;  %v16037_v35 = vld [vmem:[#allocation72_spill] sm:$0xff]  ;;  %v16039_v39 = vld [vmem:[#allocation33_spill] sm:$0xff] }
 0x17b   :  { %16020 = vst [vmem:[#allocation124_spill] sm:$0xff] %v12090_v12  ;;  %16024 = vst [vmem:[#allocation129_spill] sm:$0xff] %v12095_v3  ;;  %v2171_v38 = vmul.f32 %v16027_v42, %v11777_v26  ;;  %v2172_v43 = vmul.f32 %v16028_v19, %v11777_v26  ;;  %v16031_v36 = vrot.slane %v16030_v46, %v9797_v4  ;;  %v16040_v42 = vld [vmem:[#allocation44_spill] sm:$0xff]  ;;  %v16043_v19 = vld [vmem:[#allocation37_spill] sm:$0xff]  ;;  %vm4058_vm4 = vcmp.gt.f32.partialorder %v12053_v28, 0.0 }
 0x17c   :  { %v2173_v18 = vmul.f32 %v16029_v53, %v11777_v26  ;;  %v16034_v47 = vrot.slane %v16032_v33, %v16033_v45  ;;  %v2233_v50 = vsel %vm1730_vm3, %v2169_v16, -3e+38  ;;  %v16035_v6 = vrot.slane %v16030_v46, %v9800_v5  ;;  %v16044_v53 = vld [vmem:[#allocation43_spill] sm:$0xff]  ;;  %v16047_v12 = vld [vmem:[#allocation84_spill] sm:$0xff] }
 0x17d   :  { %v4496_v59 = vmul.f32 %v16031_v36, %v11837_v2  ;;  %v16036_v26 = vrot.slane %v16030_v46, %v9854_v34  ;;  %v16038_v41 = vrot.slane %v16037_v35, %v16033_v45  ;;  %v2234_v0 = vsel %vm1730_vm3, %v2170_v32, -3e+38  ;;  %v16052_v32 = vld [vmem:[#allocation29_spill] sm:$0xff] }
 0x17e   :  { %1131 = vbcast.lane.b32.xlu1 %v16034_v47, 256  ;;  %v4497_v31 = vmul.f32 %v16035_v6, %v11837_v2  ;;  %v2235_v56 = vsel %vm1730_vm3, %v2171_v38, -3e+38  ;;  %v16041_v61 = vmax.f32 %v16039_v39, %v16040_v42  ;;  %v16045_v36 = vmax.f32 %v16043_v19, %v16044_v53  ;;  %v12159_v39 = vpop.permute.xlu1 %1110  ;;  %v16055_v42 = vld [vmem:[#allocation85_spill] sm:$0xff] }
 0x17f   :  { %v4498_v13 = vmul.f32 %v16036_v26, %v11837_v2  ;;  %350 = vbcast.lane.b32.xlu0 %v16038_v41, 256  ;;  %v2236_v6 = vsel %vm1730_vm3, %v2172_v43, -3e+38  ;;  %v2237_v3 = vsel %vm1730_vm3, %v2173_v18, -3e+38  ;;  %v16048_v26 = vld [vmem:[#allocation34_spill] sm:$0xff] }
 0x180   :  { %v12142_v16 = vmax.f32 %v16041_v61, %v2232_v30  ;;  %v12147_v47 = vmax.f32 %v16045_v36, %v2233_v50  ;;  %v16049_v51 = vmax.f32 %v16047_v12, %v16048_v26  ;;  %v16051_v41 = vld [vmem:[#allocation38_spill] sm:$0xff]  ;;  %v12161_v30 = vpop.permute.xlu0 %329  ;;  %v16056_v61 = vld [vmem:[#allocation28_spill] sm:$0xff]  ;;  %v16065_v26 = vld [vmem:[#allocation73_spill] sm:$0xff]  ;;  %vm3282_vm5 = vcmp.gt.f32.partialorder %v12055_v60, 0.0 }
 0x181   :  { %v16053_v38 = vmax.f32 %v16051_v41, %v16052_v32  ;;  %v16057_v50 = vmax.f32 %v16055_v42, %v16056_v61  ;;  %v16059_v43 = vld [vmem:[#allocation86_spill] sm:$0xff]  ;;  %v16060_v18 = vld [vmem:[#allocation32_spill] sm:$0xff]  ;;  %v16066_v41 = vrot.slane %v16065_v26, %v16033_v45  ;;  %vm5610_vm6 = vcmp.gt.f32.partialorder %v12109_v57, 0.0  ;;  %v16149_v57 = vld [vmem:[#allocation119_spill] sm:$0xff] }
 0x182   :  { %16042 = vst [vmem:[#allocation125_spill] sm:$0xff] %v12142_v16  ;;  %16046 = vst [vmem:[#allocation130_spill] sm:$0xff] %v12147_v47  ;;  %v12152_v54 = vmax.f32 %v16049_v51, %v2234_v0  ;;  %v16061_v53 = vmax.f32 %v16059_v43, %v16060_v18  ;;  %v16063_v51 = vrot.slane %v16030_v46, %v9911_v11  ;;  %v16068_v32 = vld [vmem:[#allocation76_spill] sm:$0xff]  ;;  %v16071_v43 = vld [vmem:[#allocation74_spill] sm:$0xff]  ;;  %vm4834_vm7 = vcmp.gt.f32.partialorder %v12111_v24, 0.0 }
 0x183   :  { %v12157_v49 = vmax.f32 %v16053_v38, %v2235_v56  ;;  %v12166_v19 = vmax.f32 %v16057_v50, %v2236_v6  ;;  %v16064_v56 = vrot.slane %v16030_v46, %v9965_v14  ;;  %2683 = vbcast.lane.b32.xlu1 %v16066_v41, 256  ;;  %v16067_v6 = vrot.slane %v16030_v46, %v10057_v7  ;;  %v16081_v47 = vld [vmem:[#allocation24_spill] sm:$0xff]  ;;  %v16086_v16 = vld [vmem:[#allocation103_spill] sm:$0xff] }
 0x184   :  { %16050 = vst [vmem:[#allocation126_spill] sm:$0xff] %v12152_v54  ;;  %v12171_v12 = vmax.f32 %v16061_v53, %v2237_v3  ;;  %v4499_v0 = vmul.f32 %v16063_v51, %v11837_v2  ;;  %v16069_v38 = vrot.slane %v16068_v32, %v9797_v4  ;;  %v16070_v61 = vrot.slane %v16068_v32, %v9800_v5 }
 0x185   :  { %16054 = vst [vmem:[#allocation131_spill] sm:$0xff] %v12157_v49  ;;  %16058 = vst [vmem:[#allocation127_spill] sm:$0xff] %v12166_v19  ;;  %v4500_v36 = vmul.f32 %v16064_v56, %v11837_v2  ;;  %v4501_v3 = vmul.f32 %v16067_v6, %v11837_v2  ;;  %v16072_v18 = vrot.slane %v16071_v43, %v16033_v45  ;;  %v4560_v53 = vsel %vm4058_vm4, %v4496_v59, -3e+38  ;;  %v12213_v59 = vpop.permute.xlu1 %2662  ;;  %v16077_v19 = vld [vmem:[#allocation106_spill] sm:$0xff] }
 0x186   :  { %16062 = vst [vmem:[#allocation70_spill] sm:$0xff] %v12171_v12  ;;  %v3720_v42 = vmul.f32 %v16069_v38, %v11839_v21  ;;  %v3721_v50 = vmul.f32 %v16070_v61, %v11839_v21  ;;  %v4561_v51 = vsel %vm4058_vm4, %v4497_v31, -3e+38  ;;  %v16073_v2 = vrot.slane %v16068_v32, %v9854_v34  ;;  %v12215_v31 = vpop.permute.xlu0 %1886 }
 0x187   :  { %1907 = vbcast.lane.b32.xlu0 %v16072_v18, 256  ;;  %v16074_v46 = vrot.slane %v16068_v32, %v9911_v11  ;;  %v4562_v41 = vsel %vm4058_vm4, %v4498_v13, -3e+38  ;;  %v4563_v6 = vsel %vm4058_vm4, %v4499_v0, -3e+38  ;;  %v16075_v61 = vmax.f32 %v11714_v58, %v11688_v44 }
 0x188   :  { %v3722_v28 = vmul.f32 %v16073_v2, %v11839_v21  ;;  %v4564_v38 = vsel %vm4058_vm4, %v4500_v36, -3e+38  ;;  %v4565_v18 = vsel %vm4058_vm4, %v4501_v3, -3e+38  ;;  %v16078_v2 = vld [vmem:[#allocation101_spill] sm:$0xff]  ;;  %v16085_v36 = vld [vmem:[#allocation23_spill] sm:$0xff] }
 0x189   :  { %v3723_v56 = vmul.f32 %v16074_v46, %v11839_v21  ;;  %v12211_v12 = vmax.f32 %v16075_v61, %v4560_v53  ;;  %v16079_v49 = vmax.f32 %v16077_v19, %v16078_v2  ;;  %v16082_v46 = vld [vmem:[#allocation102_spill] sm:$0xff]  ;;  %v16087_v58 = vmax.f32 %v16085_v36, %v16086_v16  ;;  %v16089_v53 = vld [vmem:[#allocation77_spill] sm:$0xff]  ;;  %v16091_v3 = vld [vmem:[#allocation36_spill] sm:$0xff] }
 0x18a   :  { %v16083_v13 = vmax.f32 %v16081_v47, %v16082_v46  ;;  %v16090_v61 = vrot.slane %v16089_v53, %v16033_v45  ;;  %v16099_v16 = vrot.slane %v16068_v32, %v9965_v14  ;;  %v16122_v53 = vld [vmem:[#allocation98_spill] sm:$0xff] }
 0x18b   :  { %16076 = vst [vmem:[#allocation66_spill] sm:$0xff] %v12211_v12  ;;  %v12220_v54 = vmax.f32 %v16079_v49, %v4561_v51  ;;  %v12230_v44 = vmax.f32 %v16087_v58, %v4563_v6  ;;  %v16092_v12 = vld [vmem:[#allocation104_spill] sm:$0xff]  ;;  %v16095_v49 = vld [vmem:[#allocation35_spill] sm:$0xff]  ;;  %v16096_v51 = vld [vmem:[#allocation105_spill] sm:$0xff]  ;;  %v16100_v6 = vrot.slane %v16068_v32, %v10057_v7 }
 0x18c   :  { %v12225_v0 = vmax.f32 %v16083_v13, %v4562_v41  ;;  %4235 = vbcast.lane.b32.xlu1 %v16090_v61, 256  ;;  %v16093_v43 = vmax.f32 %v16091_v3, %v16092_v12  ;;  %v16097_v2 = vmax.f32 %v16095_v49, %v16096_v51  ;;  %v3724_v41 = vmul.f32 %v16099_v16, %v11839_v21  ;;  %v16101_v13 = vld [vmem:[#allocation78_spill] sm:$0xff]  ;;  %v12275_v16 = vpop.permute.xlu0 %3438 }
 0x18d   :  { %16080 = vst [vmem:[#allocation67_spill] sm:$0xff] %v12220_v54  ;;  %16088 = vst [vmem:[#allocation87_spill] sm:$0xff] %v12230_v44  ;;  %v3725_v46 = vmul.f32 %v16100_v6, %v11839_v21  ;;  %v16102_v12 = vrot.slane %v16101_v13, %v16033_v45  ;;  %v3784_v61 = vsel %vm3282_vm5, %v3720_v42, -3e+38  ;;  %v3785_v3 = vsel %vm3282_vm5, %v3721_v50, -3e+38 }
 0x18e   :  { %16084 = vst [vmem:[#allocation42_spill] sm:$0xff] %v12225_v0  ;;  %v12238_v19 = vmax.f32 %v16093_v43, %v4564_v38  ;;  %v12243_v47 = vmax.f32 %v16097_v2, %v4565_v18  ;;  %v16103_v43 = vld [vmem:[#allocation79_spill] sm:$0xff]  ;;  %v3786_v49 = vsel %vm3282_vm5, %v3722_v28, -3e+38  ;;  %v12273_v2 = vpop.permute.xlu1 %4214  ;;  %16109 = vst [vmem:[#allocation31_spill] sm:$0xff] %v12275_v16  ;;  %v16114_v42 = vld [vmem:[#allocation96_spill] sm:$0xff] }
 0x18f   :  { %3459 = vbcast.lane.b32.xlu0 %v16102_v12, 256  ;;  %v16104_v38 = vrot.slane %v16103_v43, %v9797_v4  ;;  %v16105_v36 = vrot.slane %v16103_v43, %v9800_v5  ;;  %v16106_v21 = vrot.slane %v16103_v43, %v9854_v34  ;;  %v16107_v60 = vrot.slane %v16103_v43, %v9911_v11  ;;  %v16115_v50 = vld [vmem:[#allocation92_spill] sm:$0xff]  ;;  %v16118_v0 = vld [vmem:[#allocation97_spill] sm:$0xff]  ;;  %v16123_v16 = vld [vmem:[#allocation94_spill] sm:$0xff] }
 0x190   :  { %16094 = vst [vmem:[#allocation89_spill] sm:$0xff] %v12238_v19  ;;  %16098 = vst [vmem:[#allocation88_spill] sm:$0xff] %v12243_v47  ;;  %v3787_v6 = vsel %vm3282_vm5, %v3723_v56, -3e+38  ;;  %v3788_v12 = vsel %vm3282_vm5, %v3724_v41, -3e+38  ;;  %v16116_v28 = vmax.f32 %v16114_v42, %v16115_v50  ;;  %v16124_v56 = vmax.f32 %v16122_v53, %v16123_v16 }
 0x191   :  { %v6048_v18 = vmul.f32 %v16104_v38, %v11886_v22  ;;  %v6049_v58 = vmul.f32 %v16105_v36, %v11886_v22  ;;  %v6050_v32 = vmul.f32 %v16106_v21, %v11886_v22  ;;  %v6051_v51 = vmul.f32 %v16107_v60, %v11886_v22  ;;  %16108 = vst [vmem:[#allocation90_spill] sm:$0xff] %v12273_v2  ;;  %v16110_v36 = vld [vmem:[#allocation22_spill] sm:$0xff]  ;;  %v16111_v47 = vld [vmem:[#allocation41_spill] sm:$0xff]  ;;  %v16127_v2 = vld [vmem:[#allocation95_spill] sm:$0xff] }
 0x192   :  { %v3789_v38 = vsel %vm3282_vm5, %v3725_v46, -3e+38  ;;  %v16112_v19 = vmax.f32 %v16110_v36, %v16111_v47  ;;  %v12285_v21 = vmax.f32 %v16116_v28, %v3785_v3  ;;  %v16119_v54 = vld [vmem:[#allocation93_spill] sm:$0xff]  ;;  %v12295_v41 = vmax.f32 %v16124_v56, %v3787_v6  ;;  %v16126_v46 = vld [vmem:[#allocation99_spill] sm:$0xff]  ;;  %v16132_v3 = vld [vmem:[#allocation100_spill] sm:$0xff] }
 0x193   :  { %v16120_v60 = vmax.f32 %v16118_v0, %v16119_v54  ;;  %v16128_v47 = vmax.f32 %v16126_v46, %v16127_v2  ;;  %v16133_v42 = vld [vmem:[#allocation21_spill] sm:$0xff]  ;;  %v16136_v0 = vld [vmem:[#allocation50_spill] sm:$0xff]  ;;  %v16138_v53 = vrot.slane %v16103_v43, %v9965_v14  ;;  %v16139_v16 = vrot.slane %v16103_v43, %v10057_v7  ;;  %v16141_v56 = vld [vmem:[#allocation80_spill] sm:$0xff] }
 0x194   :  { %v12280_v44 = vmax.f32 %v16112_v19, %v3784_v61  ;;  %16117 = vst [vmem:[#allocation30_spill] sm:$0xff] %v12285_v21  ;;  %16125 = vst [vmem:[#allocation71_spill] sm:$0xff] %v12295_v41  ;;  %v16130_v61 = vld [vmem:[#allocation48_spill] sm:$0xff]  ;;  %v16134_v50 = vmax.f32 %v16132_v3, %v16133_v42  ;;  %v6113_v28 = vsel %vm5610_vm6, %v6049_v58, -3e+38  ;;  %v16142_v46 = vrot.slane %v16141_v56, %v9797_v4  ;;  %v16146_v43 = vld [vmem:[#allocation113_spill] sm:$0xff] }
 0x195   :  { %v12290_v13 = vmax.f32 %v16120_v60, %v3786_v49  ;;  %v12300_v19 = vmax.f32 %v16128_v47, %v3788_v12  ;;  %v16131_v36 = vrot.slane %v16130_v61, %v16033_v45  ;;  %v16137_v49 = vrot.slane %v16136_v0, %v16033_v45  ;;  %v16140_v60 = vld [vmem:[#allocation64_spill] sm:$0xff]  ;;  %v12326_v61 = vpop.permute.xlu1 %5766  ;;  %v16145_v0 = vld [vmem:[#allocation118_spill] sm:$0xff]  ;;  %v16280_v37 = vld [vmem:[#allocation31_spill] sm:$0xff] }
 0x196   :  { %16113 = vst [vmem:[#allocation91_spill] sm:$0xff] %v12280_v44  ;;  %v12308_v54 = vmax.f32 %v16134_v50, %v3789_v38  ;;  %v6052_v2 = vmul.f32 %v16138_v53, %v11886_v22  ;;  %v6053_v6 = vmul.f32 %v16139_v16, %v11886_v22  ;;  %v6112_v12 = vsel %vm5610_vm6, %v6048_v18, -3e+38  ;;  %16143 = vst [vmem:[#allocation33_spill] sm:$0xff] %v12326_v61  ;;  %v16150_v18 = vld [vmem:[#allocation53_spill] sm:$0xff]  ;;  %v16153_v53 = vld [vmem:[#allocation120_spill] sm:$0xff] }
 0x197   :  { %16121 = vst [vmem:[#allocation75_spill] sm:$0xff] %v12290_v13  ;;  %16129 = vst [vmem:[#allocation62_spill] sm:$0xff] %v12300_v19  ;;  %5787 = vbcast.lane.b32.xlu1 %v16131_v36, 256  ;;  %5011 = vbcast.lane.b32.xlu0 %v16137_v49, 256  ;;  %v6114_v38 = vsel %vm5610_vm6, %v6050_v32, -3e+38  ;;  %v5272_v47 = vmul.f32 %v16142_v46, %v16140_v60  ;;  %v12328_v36 = vpop.permute.xlu0 %4990  ;;  %v16147_v22 = vmax.f32 %v16145_v0, %v16146_v43 }
 0x198   :  { %16135 = vst [vmem:[#allocation72_spill] sm:$0xff] %v12308_v54  ;;  %16144 = vst [vmem:[#allocation44_spill] sm:$0xff] %v12328_v36  ;;  %v6115_v3 = vsel %vm5610_vm6, %v6051_v51, -3e+38  ;;  %v6116_v42 = vsel %vm5610_vm6, %v6052_v2, -3e+38  ;;  %v16151_v58 = vmax.f32 %v16149_v57, %v16150_v18 }
 0x199   :  { %v6117_v50 = vsel %vm5610_vm6, %v6053_v6, -3e+38  ;;  %v12333_v49 = vmax.f32 %v16147_v22, %v6112_v12  ;;  %v16154_v16 = vld [vmem:[#allocation114_spill] sm:$0xff]  ;;  %v16157_v61 = vld [vmem:[#allocation121_spill] sm:$0xff]  ;;  %v16158_v36 = vld [vmem:[#allocation115_spill] sm:$0xff] }
 0x19a   :  { %v12338_v32 = vmax.f32 %v16151_v58, %v6113_v28  ;;  %v16155_v46 = vmax.f32 %v16153_v53, %v16154_v16  ;;  %v16159_v51 = vmax.f32 %v16157_v61, %v16158_v36  ;;  %v16161_v6 = vld [vmem:[#allocation122_spill] sm:$0xff]  ;;  %v16162_v19 = vld [vmem:[#allocation116_spill] sm:$0xff]  ;;  %v16165_v43 = vld [vmem:[#allocation55_spill] sm:$0xff] }
 0x19b   :  { %16148 = vst [vmem:[#allocation37_spill] sm:$0xff] %v12333_v49  ;;  %v16163_v0 = vmax.f32 %v16161_v6, %v16162_v19  ;;  %v16166_v22 = vrot.slane %v16165_v43, %v16033_v45  ;;  %v16167_v28 = vld [vmem:[#allocation123_spill] sm:$0xff]  ;;  %v16168_v57 = vld [vmem:[#allocation117_spill] sm:$0xff]  ;;  %v16172_v19 = vrot.slane %v16141_v56, %v9854_v34  ;;  %v16174_v53 = vld [vmem:[#allocation56_spill] sm:$0xff] }
 0x19c   :  { %16152 = vst [vmem:[#allocation43_spill] sm:$0xff] %v12338_v32  ;;  %v12343_v54 = vmax.f32 %v16155_v46, %v6114_v38  ;;  %v12348_v2 = vmax.f32 %v16159_v51, %v6115_v3  ;;  %v16169_v18 = vmax.f32 %v16167_v28, %v16168_v57  ;;  %v16171_v38 = vrot.slane %v16141_v56, %v9800_v5 }
 0x19d   :  { %v12353_v12 = vmax.f32 %v16163_v0, %v6116_v42  ;;  %943 = vbcast.lane.b32.xlu1 %v16166_v22, 256  ;;  %v5274_v36 = vmul.f32 %v16172_v19, %v16140_v60  ;;  %v16173_v3 = vrot.slane %v16141_v56, %v9911_v11  ;;  %v16175_v16 = vrot.slane %v16174_v53, %v16033_v45  ;;  %v16178_v0 = vld [vmem:[#allocation82_spill] sm:$0xff] }
 0x19e   :  { %16156 = vst [vmem:[#allocation84_spill] sm:$0xff] %v12343_v54  ;;  %16160 = vst [vmem:[#allocation34_spill] sm:$0xff] %v12348_v2  ;;  %v12361_v58 = vmax.f32 %v16169_v18, %v6117_v50  ;;  %v5273_v61 = vmul.f32 %v16171_v38, %v16140_v60  ;;  %v16176_v50 = vrot.slane %v16141_v56, %v9965_v14  ;;  %v5336_v28 = vsel %vm4834_vm7, %v5272_v47, -3e+38  ;;  %v16190_v2 = vld [vmem:[#allocation107_spill] sm:$0xff] }
 0x19f   :  { %16164 = vst [vmem:[#allocation38_spill] sm:$0xff] %v12353_v12  ;;  %v5275_v42 = vmul.f32 %v16173_v3, %v16140_v60  ;;  %162 = vbcast.lane.b32.xlu0 %v16175_v16, 256  ;;  %v16177_v51 = vrot.slane %v16141_v56, %v10057_v7  ;;  %v16179_v43 = vrot.slane %v16178_v0, %v9797_v4  ;;  %v5338_v18 = vsel %vm4834_vm7, %v5274_v36, -3e+38  ;;  %v16181_v56 = vld [vmem:[#allocation110_spill] sm:$0xff]  ;;  %v16189_v36 = vld [vmem:[#allocation25_spill] sm:$0xff] }
 0x1a0   :  { %16170 = vst [vmem:[#allocation29_spill] sm:$0xff] %v12361_v58  ;;  %v5276_v46 = vmul.f32 %v16176_v50, %v16140_v60  ;;  %v5337_v57 = vsel %vm4834_vm7, %v5273_v61, -3e+38  ;;  %v16180_v38 = vrot.slane %v16178_v0, %v9800_v5  ;;  %v142_v58 = vpop.permute.xlu0 %141  ;;  %v16185_v12 = vld [vmem:[#allocation26_spill] sm:$0xff]  ;;  %v16191_v54 = vmax.f32 %v16189_v36, %v16190_v2 }
 0x1a1   :  { %v5277_v6 = vmul.f32 %v16177_v51, %v16140_v60  ;;  %v1398_v22 = vmul.f32 %v16179_v43, %v12159_v39  ;;  %v5339_v3 = vsel %vm4834_vm7, %v5275_v42, -3e+38  ;;  %v16182_v60 = vld [vmem:[#allocation47_spill] sm:$0xff]  ;;  %v923_v51 = vpop.permute.xlu1 %922  ;;  %v16186_v43 = vld [vmem:[#allocation49_spill] sm:$0xff]  ;;  %v16193_v42 = vld [vmem:[#allocation54_spill] sm:$0xff]  ;;  %v16210_v36 = vrot.slane %v16178_v0, %v9965_v14 }
 0x1a2   :  { %v1399_v19 = vmul.f32 %v16180_v38, %v12159_v39  ;;  %v5340_v53 = vsel %vm4834_vm7, %v5276_v46, -3e+38  ;;  %v16183_v50 = vmax.f32 %v16181_v56, %v16182_v60  ;;  %v16187_v47 = vmax.f32 %v16185_v12, %v16186_v43  ;;  %v16194_v46 = vld [vmem:[#allocation108_spill] sm:$0xff]  ;;  %v16197_v56 = vld [vmem:[#allocation111_spill] sm:$0xff]  ;;  %v16204_v43 = vld [vmem:[#allocation109_spill] sm:$0xff] }
 0x1a3   :  { %v5341_v16 = vsel %vm4834_vm7, %v5277_v6, -3e+38  ;;  %v12408_v32 = vmax.f32 %v16191_v54, %v5338_v18  ;;  %v16195_v6 = vmax.f32 %v16193_v42, %v16194_v46  ;;  %v16207_v54 = vrot.slane %v15970_v10, %v16033_v45  ;;  %v16212_v46 = vld [vmem:[#allocation83_spill] sm:$0xff] }
 0x1a4   :  { %v12398_v24 = vmax.f32 %v16183_v50, %v5336_v28  ;;  %v12403_v61 = vmax.f32 %v16187_v47, %v5337_v57  ;;  %v16198_v28 = vld [vmem:[#allocation63_spill] sm:$0xff]  ;;  %v16203_v57 = vld [vmem:[#allocation112_spill] sm:$0xff]  ;;  %v16208_v18 = vrot.slane %v16178_v0, %v9854_v34  ;;  %v16211_v10 = vrot.slane %v16178_v0, %v10057_v7 }
 0x1a5   :  { %16192 = vst [vmem:[#allocation86_spill] sm:$0xff] %v12408_v32  ;;  %v12413_v38 = vmax.f32 %v16195_v6, %v5339_v3  ;;  %v16199_v60 = vmax.f32 %v16197_v56, %v16198_v28  ;;  %v16205_v47 = vmax.f32 %v16203_v57, %v16204_v43  ;;  %1719 = vbcast.lane.b32.xlu0 %v16207_v54, 256  ;;  %vm955_vm8 = vcmp.gt.f32.partialorder %v923_v51, 0.0 }
 0x1a6   :  { %16184 = vst [vmem:[#allocation85_spill] sm:$0xff] %v12398_v24  ;;  %16188 = vst [vmem:[#allocation28_spill] sm:$0xff] %v12403_v61  ;;  %v16201_v24 = vld [vmem:[#allocation57_spill] sm:$0xff]  ;;  %v1400_v3 = vmul.f32 %v16208_v18, %v12159_v39  ;;  %v1403_v42 = vmul.f32 %v16211_v10, %v12159_v39  ;;  %vm174_vm9 = vcmp.gt.f32.partialorder %v142_v58, 0.0  ;;  %v16213_v6 = vrot.slane %v16212_v46, %v9797_v4 }
 0x1a7   :  { %16196 = vst [vmem:[#allocation32_spill] sm:$0xff] %v12413_v38  ;;  %v12418_v50 = vmax.f32 %v16199_v60, %v5340_v53  ;;  %v16202_v12 = vrot.slane %v16201_v24, %v16033_v45  ;;  %v12426_v2 = vmax.f32 %v16205_v47, %v5341_v16  ;;  %v16209_v53 = vrot.slane %v16178_v0, %v9911_v11  ;;  %v9412_v38 = vld [vmem:[#allocation8 + $0x58] sm:$0xff]  ;;  %v9415_v61 = vld [vmem:[#allocation8 + $0x10] sm:$0xff] }
 0x1a8   :  { %v1402_v16 = vmul.f32 %v16210_v36, %v12159_v39  ;;  %v617_v56 = vmul.f32 %v16213_v6, %v12161_v30  ;;  %v12451_v28 = vsel %vm955_vm8, %v1398_v22, -3e+38  ;;  %v12453_v60 = vsel %vm955_vm8, %v1399_v19, -3e+38 }
 0x1a9   :  { %16200 = vst [vmem:[#allocation73_spill] sm:$0xff] %v12418_v50  ;;  %2495 = vbcast.lane.b32.xlu1 %v16202_v12, 256  ;;  %16206 = vst [vmem:[#allocation76_spill] sm:$0xff] %v12426_v2  ;;  %v1401_v24 = vmul.f32 %v16209_v53, %v12159_v39  ;;  %v12455_v12 = vsel %vm955_vm8, %v1400_v3, -3e+38  ;;  %v16214_v57 = vrot.slane %v16212_v46, %v9800_v5  ;;  %v2475_v3 = vpop.permute.xlu1 %2474  ;;  %v9411_v50 = vld [vmem:[#allocation8 + $0x50] sm:$0xff] }
 0x1aa   :  { %v16215_v39 = vrot.slane %v15978_v20, %v16033_v45  ;;  %v12466_v51 = vsel %vm955_vm8, %v1402_v16, -3e+38  ;;  %v16216_v47 = vrot.slane %v15982_v1, %v16033_v45  ;;  %v12475_v54 = vsel %vm955_vm8, %v1403_v42, -3e+38 }
 0x1ab   :  { %v618_v43 = vmul.f32 %v16214_v57, %v12161_v30  ;;  %v12464_v0 = vsel %vm955_vm8, %v1401_v24, -3e+38  ;;  %v16217_v24 = vrot.slane %v16212_v46, %v9854_v34  ;;  %v16218_v36 = vrot.slane %v16212_v46, %v9911_v11 }
 0x1ac   :  { %3271 = vbcast.lane.b32.xlu0 %v16216_v47, 256  ;;  %v16219_v10 = vrot.slane %v16212_v46, %v9965_v14  ;;  %v16220_v6 = vrot.slane %v16212_v46, %v10057_v7  ;;  %vm2507_vm10 = vcmp.gt.f32.partialorder %v2475_v3, 0.0 }
 0x1ad   :  { %4047 = vbcast.lane.b32.xlu1 %v16215_v39, 256  ;;  %v619_v1 = vmul.f32 %v16217_v24, %v12161_v30  ;;  %v620_v16 = vmul.f32 %v16218_v36, %v12161_v30  ;;  %v12502_v39 = vsel %vm174_vm9, %v617_v56, -3e+38  ;;  %v12505_v47 = vsel %vm174_vm9, %v618_v43, -3e+38  ;;  %v16221_v24 = vld [vmem:[#allocation40_spill] sm:$0xff]  ;;  %v1699_v43 = vpop.permute.xlu0 %1698 }
 0x1ae   :  { %v621_v42 = vmul.f32 %v16219_v10, %v12161_v30  ;;  %v622_v57 = vmul.f32 %v16220_v6, %v12161_v30  ;;  %v16222_v36 = vrot.slane %v16221_v24, %v9797_v4  ;;  %v16223_v10 = vrot.slane %v16001_v63, %v16033_v45 }
 0x1af   :  { %v12515_v18 = vsel %vm174_vm9, %v619_v1, -3e+38  ;;  %v12518_v30 = vsel %vm174_vm9, %v620_v16, -3e+38  ;;  %v16224_v6 = vrot.slane %v16007_v55, %v16033_v45  ;;  %v16227_v55 = vrot.slane %v16221_v24, %v9800_v5  ;;  %v16232_v16 = vld [vmem:[#allocation81_spill] sm:$0xff] }
 0x1b0   :  { %v2950_v53 = vmul.f32 %v16222_v36, %v12213_v59  ;;  %v12528_v63 = vsel %vm174_vm9, %v621_v42, -3e+38  ;;  %v12531_v1 = vsel %vm174_vm9, %v622_v57, -3e+38  ;;  %v16228_v58 = vrot.slane %v16221_v24, %v9854_v34 }
 0x1b1   :  { %5599 = vbcast.lane.b32.xlu1 %v16223_v10, 256  ;;  %4823 = vbcast.lane.b32.xlu0 %v16224_v6, 256  ;;  %16225 = vst [vmem:[#allocation106_spill] sm:$0xff] %v12528_v63  ;;  %16226 = vst [vmem:[#allocation101_spill] sm:$0xff] %v12531_v1  ;;  %v2951_v45 = vmul.f32 %v16227_v55, %v12213_v59  ;;  %v16229_v57 = vrot.slane %v16221_v24, %v9911_v11  ;;  %vm1731_vm11 = vcmp.gt.f32.partialorder %v1699_v43, 0.0 }
 0x1b2   :  { %v2952_v42 = vmul.f32 %v16228_v58, %v12213_v59  ;;  %v16230_v10 = vrot.slane %v16221_v24, %v9965_v14  ;;  %v16231_v36 = vrot.slane %v16221_v24, %v10057_v7  ;;  %v16233_v46 = vrot.slane %v16032_v33, %v16232_v16 }
 0x1b3   :  { %v2953_v6 = vmul.f32 %v16229_v57, %v12213_v59  ;;  %v12564_v58 = vsel %vm2507_vm10, %v2950_v53, -3e+38  ;;  %v12566_v20 = vsel %vm2507_vm10, %v2951_v45, -3e+38  ;;  %v16236_v57 = vld [vmem:[#allocation39_spill] sm:$0xff]  ;;  %v16255_v53 = vld [vmem:[#allocation46_spill] sm:$0xff] }
 0x1b4   :  { %v2954_v56 = vmul.f32 %v16230_v10, %v12213_v59  ;;  %v2955_v55 = vmul.f32 %v16231_v36, %v12213_v59  ;;  %16234 = vst [vmem:[#allocation24_spill] sm:$0xff] %v12564_v58  ;;  %16235 = vst [vmem:[#allocation102_spill] sm:$0xff] %v12566_v20  ;;  %v16237_v19 = vrot.slane %v16236_v57, %v9797_v4  ;;  %v12579_v33 = vsel %vm2507_vm10, %v2952_v42, -3e+38 }
 0x1b5   :  { %1138 = vbcast.lane.b32.xlu1 %v16233_v46, 256  ;;  %v16238_v10 = vrot.slane %v16236_v57, %v9800_v5  ;;  %v16239_v59 = vrot.slane %v16037_v35, %v16232_v16  ;;  %16240 = vst [vmem:[#allocation23_spill] sm:$0xff] %v12579_v33  ;;  %v12581_v3 = vsel %vm2507_vm10, %v2953_v6, -3e+38  ;;  %v16250_v29 = vrot.slane %v16236_v57, %v9911_v11 }
 0x1b6   :  { %v2174_v22 = vmul.f32 %v16237_v19, %v12215_v31  ;;  %16241 = vst [vmem:[#allocation103_spill] sm:$0xff] %v12581_v3  ;;  %v4027_v19 = vpop.permute.xlu1 %4026  ;;  %v12587_v45 = vsel %vm2507_vm10, %v2954_v56, -3e+38  ;;  %v12589_v1 = vsel %vm2507_vm10, %v2955_v55, -3e+38  ;;  %v16249_v56 = vrot.slane %v16236_v57, %v9854_v34  ;;  %v16257_v3 = vld [vmem:[#allocation74_spill] sm:$0xff] }
 0x1b7   :  { %v2175_v24 = vmul.f32 %v16238_v10, %v12215_v31  ;;  %357 = vbcast.lane.b32.xlu0 %v16239_v59, 256  ;;  %16243 = vst [vmem:[#allocation36_spill] sm:$0xff] %v12587_v45  ;;  %16244 = vst [vmem:[#allocation104_spill] sm:$0xff] %v12589_v1  ;;  %v12595_v59 = vpop.permute.xlu0 %3250  ;;  %v2177_v36 = vmul.f32 %v16250_v29, %v12215_v31  ;;  %v16251_v42 = vrot.slane %v16065_v26, %v16232_v16 }
 0x1b8   :  { %v2176_v55 = vmul.f32 %v16249_v56, %v12215_v31  ;;  %v16252_v63 = vrot.slane %v16236_v57, %v9965_v14  ;;  %v16253_v58 = vrot.slane %v16236_v57, %v10057_v7  ;;  %v16254_v56 = vld [vmem:[#allocation90_spill] sm:$0xff]  ;;  %v16256_v6 = vrot.slane %v16255_v53, %v9797_v4 }
 0x1b9   :  { %2690 = vbcast.lane.b32.xlu1 %v16251_v42, 256  ;;  %v16258_v26 = vrot.slane %v16257_v3, %v16232_v16  ;;  %v12627_v42 = vsel %vm1731_vm11, %v2174_v22, -3e+38  ;;  %v12629_v35 = vsel %vm1731_vm11, %v2175_v24, -3e+38  ;;  %v16273_v24 = vld [vmem:[#allocation77_spill] sm:$0xff]  ;;  %v16275_v10 = vrot.slane %v16255_v53, %v9911_v11 }
 0x1ba   :  { %v2178_v45 = vmul.f32 %v16252_v63, %v12215_v31  ;;  %v2179_v1 = vmul.f32 %v16253_v58, %v12215_v31  ;;  %v4502_v29 = vmul.f32 %v16256_v6, %v16254_v56  ;;  %16259 = vst [vmem:[#allocation35_spill] sm:$0xff] %v12627_v42  ;;  %16260 = vst [vmem:[#allocation105_spill] sm:$0xff] %v12629_v35  ;;  %v12639_v58 = vsel %vm1731_vm11, %v2176_v55, -3e+38  ;;  %v12655_v55 = vpop.permute.xlu1 %5578  ;;  %v9398_v22 = vld [vmem:[#allocation9 + $0x38] sm:$0xff] }
 0x1bb   :  { %1914 = vbcast.lane.b32.xlu0 %v16258_v26, 256  ;;  %v16261_v63 = vrot.slane %v16255_v53, %v9800_v5  ;;  %v16262_v31 = vrot.slane %v16255_v53, %v9854_v34  ;;  %16263 = vst [vmem:[#allocation79_spill] sm:$0xff] %v12639_v58  ;;  %v12641_v6 = vsel %vm1731_vm11, %v2177_v36, -3e+38  ;;  %v4505_v20 = vmul.f32 %v16275_v10, %v16254_v56  ;;  %v12672_v46 = vpop.permute.xlu0 %4802 }
 0x1bc   :  { %16264 = vst [vmem:[#allocation22_spill] sm:$0xff] %v12641_v6  ;;  %v12643_v3 = vsel %vm1731_vm11, %v2178_v45, -3e+38  ;;  %v12647_v26 = vsel %vm1731_vm11, %v2179_v1, -3e+38  ;;  %v16274_v1 = vrot.slane %v16273_v24, %v16232_v16  ;;  %v16277_v45 = vld [vmem:[#allocation78_spill] sm:$0xff]  ;;  %v16279_v24 = vrot.slane %v16255_v53, %v10057_v7 }
 0x1bd   :  { %v4503_v57 = vmul.f32 %v16261_v63, %v16254_v56  ;;  %v4504_v43 = vmul.f32 %v16262_v31, %v16254_v56  ;;  %16265 = vst [vmem:[#allocation41_spill] sm:$0xff] %v12643_v3  ;;  %16267 = vst [vmem:[#allocation96_spill] sm:$0xff] %v12647_v26  ;;  %v16276_v31 = vrot.slane %v16255_v53, %v9965_v14  ;;  %vm4059_vm12 = vcmp.gt.f32.partialorder %v4027_v19, 0.0  ;;  %v16281_v26 = vld [vmem:[#allocation45_spill] sm:$0xff]  ;;  %v16291_v63 = vld [vmem:[#allocation66_spill] sm:$0xff] }
 0x1be   :  { %4242 = vbcast.lane.b32.xlu1 %v16274_v1, 256  ;;  %v16278_v3 = vrot.slane %v16277_v45, %v16232_v16  ;;  %v4507_v1 = vmul.f32 %v16279_v24, %v16254_v56  ;;  %v16282_v10 = vrot.slane %v16281_v26, %v9797_v4  ;;  %v12689_v58 = vsel %vm4059_vm12, %v4502_v29, -3e+38 }
 0x1bf   :  { %v4506_v6 = vmul.f32 %v16276_v31, %v16254_v56  ;;  %v16283_v31 = vrot.slane %v16281_v26, %v9800_v5  ;;  %16284 = vst [vmem:[#allocation92_spill] sm:$0xff] %v12689_v58  ;;  %v12691_v45 = vsel %vm4059_vm12, %v4503_v57, -3e+38  ;;  %v16287_v53 = vrot.slane %v16281_v26, %v9854_v34  ;;  %v12736_v33 = vpop.permute.xlu0 %336 }
 0x1c0   :  { %3466 = vbcast.lane.b32.xlu0 %v16278_v3, 256  ;;  %v3726_v40 = vmul.f32 %v16282_v10, %v16280_v37  ;;  %16285 = vst [vmem:[#allocation97_spill] sm:$0xff] %v12691_v45  ;;  %v12693_v3 = vsel %vm4059_vm12, %v4504_v43, -3e+38  ;;  %v12699_v56 = vsel %vm4059_vm12, %v4505_v20, -3e+38  ;;  %v16298_v57 = vrot.slane %v16281_v26, %v9965_v14 }
 0x1c1   :  { %v3727_v36 = vmul.f32 %v16283_v31, %v16280_v37  ;;  %16286 = vst [vmem:[#allocation93_spill] sm:$0xff] %v12693_v3  ;;  %v3728_v19 = vmul.f32 %v16287_v53, %v16280_v37  ;;  %16288 = vst [vmem:[#allocation98_spill] sm:$0xff] %v12699_v56  ;;  %v12701_v24 = vsel %vm4059_vm12, %v4506_v6, -3e+38  ;;  %v12703_v10 = vsel %vm4059_vm12, %v4507_v1, -3e+38  ;;  %v12729_v56 = vpop.permute.xlu1 %1117 }
 0x1c2   :  { %16289 = vst [vmem:[#allocation94_spill] sm:$0xff] %v12701_v24  ;;  %16290 = vst [vmem:[#allocation99_spill] sm:$0xff] %v12703_v10  ;;  %v16297_v1 = vrot.slane %v16281_v26, %v9911_v11  ;;  %v3730_v45 = vmul.f32 %v16298_v57, %v16280_v37  ;;  %v16299_v42 = vrot.slane %v16281_v26, %v10057_v7  ;;  %vm3283_vm13 = vcmp.gt.f32.partialorder %v12595_v59, 0.0  ;;  %v9399_v10 = vld [vmem:[#allocation9 + $0x30] sm:$0xff]  ;;  %v16300_v6 = vld [vmem:[#allocation59_spill] sm:$0xff] }
 0x1c3   :  { %v5792_v20 = vrot.slane %v9398_v22, %v16232_v16  ;;  %v16301_v24 = vld [vmem:[#allocation58_spill] sm:$0xff]  ;;  %v12738_v57 = vsel %vm3283_vm13, %v3726_v40, -3e+38  ;;  %v12740_v3 = vsel %vm3283_vm13, %v3727_v36, -3e+38  ;;  %v16306_v26 = vld [vmem:[#allocation51_spill] sm:$0xff] }
 0x1c4   :  { %v3729_v31 = vmul.f32 %v16297_v1, %v16280_v37  ;;  %v3731_v35 = vmul.f32 %v16299_v42, %v16280_v37  ;;  %v5016_v1 = vrot.slane %v9399_v10, %v16232_v16  ;;  %v5737_v53 = vcombine.high %v16301_v24, %v16300_v6  ;;  %16302 = vst [vmem:[#allocation95_spill] sm:$0xff] %v12738_v57  ;;  %v16305_v42 = vld [vmem:[#allocation52_spill] sm:$0xff] }
 0x1c5   :  { %16303 = vst [vmem:[#allocation48_spill] sm:$0xff] %v12740_v3  ;;  %v12742_v37 = vsel %vm3283_vm13, %v3728_v19, -3e+38  ;;  %v4961_v59 = vcombine.high %v16306_v26, %v16305_v42  ;;  %v12748_v22 = vsel %vm3283_vm13, %v3730_v45, -3e+38  ;;  %5794 = vbcast.lane.b32.xlu1 %v5792_v20, 256  ;;  %v12777_v45 = vpop.permute.xlu0 %1893 }
 0x1c6   :  { %16304 = vst [vmem:[#allocation100_spill] sm:$0xff] %v12742_v37  ;;  %v12746_v43 = vsel %vm3283_vm13, %v3729_v31, -3e+38  ;;  %16308 = vst [vmem:[#allocation50_spill] sm:$0xff] %v12748_v22  ;;  %v12750_v29 = vsel %vm3283_vm13, %v3731_v35, -3e+38  ;;  %v5871_v6 = vrot.slane %v5737_v53, %v9797_v4  ;;  %v5875_v42 = vrot.slane %v5737_v53, %v9800_v5  ;;  %v12771_v31 = vpop.permute.xlu1 %2669 }
 0x1c7   :  { %16307 = vst [vmem:[#allocation21_spill] sm:$0xff] %v12746_v43  ;;  %16309 = vst [vmem:[#allocation64_spill] sm:$0xff] %v12750_v29  ;;  %5018 = vbcast.lane.b32.xlu0 %v5016_v1, 256  ;;  %v5879_v26 = vrot.slane %v5737_v53, %v9854_v34  ;;  %v5883_v40 = vrot.slane %v5737_v53, %v9911_v11  ;;  %v5887_v36 = vrot.slane %v5737_v53, %v9965_v14  ;;  %v16312_v20 = vld [vmem:[#allocation33_spill] sm:$0xff] }
 0x1c8   :  { %v5891_v19 = vrot.slane %v5737_v53, %v10057_v7  ;;  %vm5611_vm14 = vcmp.gt.f32.partialorder %v12655_v55, 0.0  ;;  %v6054_v24 = vmul.f32 %v5871_v6, %v16312_v20  ;;  %v6055_v1 = vmul.f32 %v5875_v42, %v16312_v20 }
 0x1c9   :  { %v6056_v35 = vmul.f32 %v5879_v26, %v16312_v20  ;;  %v5095_v29 = vrot.slane %v4961_v59, %v9797_v4  ;;  %v6057_v22 = vmul.f32 %v5883_v40, %v16312_v20  ;;  %v6058_v10 = vmul.f32 %v5887_v36, %v16312_v20 }
 0x1ca   :  { %v6059_v53 = vmul.f32 %v5891_v19, %v16312_v20  ;;  %v5099_v43 = vrot.slane %v4961_v59, %v9800_v5  ;;  %v12785_v41 = vsel %vm5611_vm14, %v6054_v24, -3e+38  ;;  %v12789_v6 = vsel %vm5611_vm14, %v6055_v1, -3e+38  ;;  %v16324_v20 = vld [vmem:[#allocation44_spill] sm:$0xff] }
 0x1cb   :  { %16313 = vst [vmem:[#allocation80_spill] sm:$0xff] %v12785_v41  ;;  %16314 = vst [vmem:[#allocation118_spill] sm:$0xff] %v12789_v6  ;;  %v12793_v42 = vsel %vm5611_vm14, %v6056_v35, -3e+38  ;;  %v5103_v40 = vrot.slane %v4961_v59, %v9854_v34  ;;  %v12798_v36 = vsel %vm5611_vm14, %v6057_v22, -3e+38  ;;  %v5111_v57 = vrot.slane %v4961_v59, %v9965_v14  ;;  %v12823_v41 = vpop.permute.xlu1 %4221 }
 0x1cc   :  { %16315 = vst [vmem:[#allocation113_spill] sm:$0xff] %v12793_v42  ;;  %16316 = vst [vmem:[#allocation119_spill] sm:$0xff] %v12798_v36  ;;  %v12802_v19 = vsel %vm5611_vm14, %v6058_v10, -3e+38  ;;  %v12806_v24 = vsel %vm5611_vm14, %v6059_v53, -3e+38  ;;  %v5107_v53 = vrot.slane %v4961_v59, %v9911_v11  ;;  %v5115_v26 = vrot.slane %v4961_v59, %v10057_v7  ;;  %v12829_v10 = vpop.permute.xlu0 %3445 }
 0x1cd   :  { %16317 = vst [vmem:[#allocation53_spill] sm:$0xff] %v12802_v19  ;;  %16318 = vst [vmem:[#allocation120_spill] sm:$0xff] %v12806_v24  ;;  %v5278_v6 = vmul.f32 %v5095_v29, %v16324_v20  ;;  %v5279_v37 = vmul.f32 %v5099_v43, %v16324_v20  ;;  %v5280_v13 = vmul.f32 %v5103_v40, %v16324_v20  ;;  %vm4835_vm15 = vcmp.gt.f32.partialorder %v12672_v46, 0.0  ;;  %v9400_v19 = vld [vmem:[#allocation11 + $0x8] sm:$0xff]  ;;  %v9401_v40 = vld [vmem:[#allocation11] sm:$0xff] }
 0x1ce   :  { %16325 = vst [vmem:[#allocation114_spill] sm:$0xff] %v12829_v10  ;;  %v5281_v55 = vmul.f32 %v5107_v53, %v16324_v20  ;;  %v5282_v24 = vmul.f32 %v5111_v57, %v16324_v20  ;;  %v5283_v21 = vmul.f32 %v5115_v26, %v16324_v20  ;;  %v948_v59 = vrot.slane %v9400_v19, %v16232_v16  ;;  %v9406_v19 = vld [vmem:[#allocation8 + $0x38] sm:$0xff]  ;;  %v9417_v57 = vld [vmem:[#allocation8 + $0x20] sm:$0xff] }
 0x1cf   :  { %v12835_v3 = vsel %vm4835_vm15, %v5278_v6, -3e+38  ;;  %v12837_v29 = vsel %vm4835_vm15, %v5279_v37, -3e+38  ;;  %v12839_v43 = vsel %vm4835_vm15, %v5280_v13, -3e+38  ;;  %v167_v46 = vrot.slane %v9401_v40, %v16232_v16  ;;  %v12862_v6 = vpop.permute.xlu1 %5773 }
 0x1d0   :  { %16326 = vst [vmem:[#allocation121_spill] sm:$0xff] %v12835_v3  ;;  %16327 = vst [vmem:[#allocation115_spill] sm:$0xff] %v12837_v29  ;;  %v12842_v36 = vsel %vm4835_vm15, %v5281_v55, -3e+38  ;;  %v12844_v22 = vsel %vm4835_vm15, %v5282_v24, -3e+38  ;;  %v12865_v13 = vpop.permute.xlu0 %4997 }
 0x1d1   :  { %16328 = vst [vmem:[#allocation122_spill] sm:$0xff] %v12839_v43  ;;  %16329 = vst [vmem:[#allocation116_spill] sm:$0xff] %v12842_v36  ;;  %v12846_v53 = vsel %vm4835_vm15, %v5283_v21, -3e+38  ;;  %950 = vbcast.lane.b32.xlu1 %v948_v59, 256  ;;  %169 = vbcast.lane.b32.xlu0 %v167_v46, 256  ;;  %v971_v43 = vcombine.high %v9411_v50, %v9412_v38 }
 0x1d2   :  { %16330 = vst [vmem:[#allocation55_spill] sm:$0xff] %v12844_v22  ;;  %16331 = vst [vmem:[#allocation123_spill] sm:$0xff] %v12846_v53  ;;  %v9402_v24 = vld [vmem:[#allocation11 + $0x18] sm:$0xff]  ;;  %v9403_v55 = vld [vmem:[#allocation11 + $0x10] sm:$0xff] }
 0x1d3   :  { %v2500_v20 = vrot.slane %v9402_v24, %v16232_v16  ;;  %v1724_v40 = vrot.slane %v9403_v55, %v16232_v16  ;;  %16333 = vst [vmem:[#allocation117_spill] sm:$0xff] %v12862_v6  ;;  %v9404_v37 = vld [vmem:[#allocation11 + $0x28] sm:$0xff]  ;;  %16334 = vst [vmem:[#allocation56_spill] sm:$0xff] %v12865_v13  ;;  %v9405_v36 = vld [vmem:[#allocation8 + $0x30] sm:$0xff] }
 0x1d4   :  { %v4052_v26 = vrot.slane %v9404_v37, %v16232_v16  ;;  %v967_v59 = vcombine.high %v9405_v36, %v9406_v19  ;;  %v9407_v22 = vld [vmem:[#allocation11 + $0x20] sm:$0xff]  ;;  %v12868_v46 = vld [vmem:[#allocation11 + $0x38] sm:$0xff]  ;;  %v9410_v55 = vld [vmem:[#allocation8 + $0x48] sm:$0xff] }
 0x1d5   :  { %v3276_v21 = vrot.slane %v9407_v22, %v16232_v16  ;;  %v9409_v53 = vld [vmem:[#allocation8 + $0x40] sm:$0xff]  ;;  %2502 = vbcast.lane.b32.xlu1 %v2500_v20, 256  ;;  %v9414_v36 = vld [vmem:[#allocation8 + $0x8] sm:$0xff]  ;;  %v9416_v22 = vld [vmem:[#allocation8 + $0x18] sm:$0xff]  ;;  %1726 = vbcast.lane.b32.xlu0 %v1724_v40, 256 }
 0x1d6   :  { %v969_v2 = vcombine.high %v9409_v53, %v9410_v55  ;;  %v16335_v37 = vld [vmem:[#allocation27_spill] sm:$0xff]  ;;  %v188_v3 = vcombine.high %v9415_v61, %v9416_v22  ;;  %v9419_v38 = vld [vmem:[#allocation8 + $0x90] sm:$0xff]  ;;  %v9420_v50 = vld [vmem:[#allocation8 + $0x98] sm:$0xff]  ;;  %v12896_v22 = vpop.permute.xlu1 %929 }
 0x1d7   :  { %v12873_v32 = vrot.slane %v967_v59, %v16335_v37  ;;  %v9413_v29 = vld [vmem:[#allocation8] sm:$0xff]  ;;  %v9418_v13 = vld [vmem:[#allocation8 + $0x28] sm:$0xff]  ;;  %v12879_v53 = vrot.slane %v971_v43, %v16335_v37  ;;  %v2519_v20 = vcombine.high %v9419_v38, %v9420_v50  ;;  %v12905_v50 = vpop.permute.xlu0 %148  ;;  %vm956_vm0 = vcmp.gt.f32.partialorder %v12896_v22, 0.0 }
 0x1d8   :  { %v186_v19 = vcombine.high %v9413_v29, %v9414_v36  ;;  %v190_v42 = vcombine.high %v9417_v57, %v9418_v13  ;;  %v12876_v24 = vrot.slane %v969_v2, %v16335_v37  ;;  %v9421_v59 = vld [vmem:[#allocation8 + $0xa0] sm:$0xff]  ;;  %v9422_v55 = vld [vmem:[#allocation8 + $0xa8] sm:$0xff]  ;;  %v12885_v61 = vrot.slane %v188_v3, %v16335_v37  ;;  %v9423_v2 = vld [vmem:[#allocation8 + $0xb0] sm:$0xff] }
 0x1d9   :  { %16336 = vst [vmem:[#allocation82_spill] sm:$0xff] %v12873_v32  ;;  %16338 = vst [vmem:[#allocation47_spill] sm:$0xff] %v12879_v53  ;;  %v2521_v1 = vcombine.high %v9421_v59, %v9422_v55  ;;  %v9424_v13 = vld [vmem:[#allocation8 + $0xb8] sm:$0xff]  ;;  %v12894_v36 = vrot.slane %v12879_v53, %v16335_v37  ;;  %4054 = vbcast.lane.b32.xlu1 %v4052_v26, 256  ;;  %3278 = vbcast.lane.b32.xlu0 %v3276_v21, 256  ;;  %v9428_v53 = vld [vmem:[#allocation8 + $0x70] sm:$0xff] }
 0x1da   :  { %16337 = vst [vmem:[#allocation110_spill] sm:$0xff] %v12876_v24  ;;  %v12882_v29 = vrot.slane %v186_v19, %v16335_v37  ;;  %16340 = vst [vmem:[#allocation49_spill] sm:$0xff] %v12885_v61  ;;  %v12888_v57 = vrot.slane %v190_v42, %v16335_v37  ;;  %v2523_v40 = vcombine.high %v9423_v2, %v9424_v13  ;;  %v9425_v42 = vld [vmem:[#allocation11 + $0x30] sm:$0xff]  ;;  %v9427_v13 = vld [vmem:[#allocation8 + $0x68] sm:$0xff]  ;;  %vm175_vm1 = vcmp.gt.f32.partialorder %v12905_v50, 0.0  ;;  %v12973_v35 = vpop.permute.xlu1 %2481 }
 0x1db   :  { %v1016_v43 = vcombine.low %v12873_v32, %v12876_v24  ;;  %16342 = vst [vmem:[#allocation107_spill] sm:$0xff] %v12894_v36  ;;  %v12899_v19 = vrot.slane %v2519_v20, %v16335_v37  ;;  %v12902_v3 = vrot.slane %v2521_v1, %v16335_v37  ;;  %v4828_v38 = vrot.slane %v9425_v42, %v16232_v16  ;;  %v9426_v20 = vld [vmem:[#allocation8 + $0x60] sm:$0xff]  ;;  %v9429_v32 = vld [vmem:[#allocation8 + $0x78] sm:$0xff] }
 0x1dc   :  { %16339 = vst [vmem:[#allocation26_spill] sm:$0xff] %v12882_v29  ;;  %16341 = vst [vmem:[#allocation25_spill] sm:$0xff] %v12888_v57  ;;  %v235_v59 = vcombine.low %v12882_v29, %v12885_v61  ;;  %v12911_v55 = vrot.slane %v12888_v57, %v16335_v37  ;;  %v12914_v2 = vrot.slane %v2523_v40, %v16335_v37  ;;  %v9430_v40 = vld [vmem:[#allocation8 + $0x80] sm:$0xff]  ;;  %vm2508_vm2 = vcmp.gt.f32.partialorder %v12973_v35, 0.0 }
 0x1dd   :  { %16343 = vst [vmem:[#allocation54_spill] sm:$0xff] %v12899_v19  ;;  %16344 = vst [vmem:[#allocation108_spill] sm:$0xff] %v12902_v3  ;;  %v12917_v1 = vrot.slane %v1016_v43, %v16335_v37  ;;  %v2568_v26 = vcombine.low %v12899_v19, %v12902_v3  ;;  %v1743_v42 = vcombine.high %v9426_v20, %v9427_v13  ;;  %v9431_v43 = vld [vmem:[#allocation8 + $0x88] sm:$0xff]  ;;  %4830 = vbcast.lane.b32.xlu0 %v4828_v38, 256 }
 0x1de   :  { %16345 = vst [vmem:[#allocation111_spill] sm:$0xff] %v12911_v55  ;;  %16346 = vst [vmem:[#allocation63_spill] sm:$0xff] %v12914_v2  ;;  %v1745_v29 = vcombine.high %v9428_v53, %v9429_v32  ;;  %v12923_v57 = vrot.slane %v235_v59, %v16335_v37  ;;  %v12927_v21 = vrot.slane %v12914_v2, %v16335_v37 }
 0x1df   :  { %16347 = vst [vmem:[#allocation57_spill] sm:$0xff] %v12917_v1  ;;  %v1747_v61 = vcombine.high %v9430_v40, %v9431_v43  ;;  %v1078_v19 = vcombine.low %v12917_v1, %v12894_v36  ;;  %v12933_v20 = vrot.slane %v2568_v26, %v16335_v37  ;;  %v12936_v32 = vrot.slane %v1743_v42, %v16335_v37  ;;  %v12949_v43 = vld [vmem:[#allocation8 + $0xf0] sm:$0xff]  ;;  %v12951_v26 = vld [vmem:[#allocation8 + $0xf8] sm:$0xff]  ;;  %v12955_v1 = vld [vmem:[#allocation8 + $0x100] sm:$0xff] }
 0x1e0   :  { %16348 = vst [vmem:[#allocation112_spill] sm:$0xff] %v12923_v57  ;;  %16349 = vst [vmem:[#allocation109_spill] sm:$0xff] %v12927_v21  ;;  %v12939_v53 = vrot.slane %v1745_v29, %v16335_v37  ;;  %v16351_v59 = vrot.slane %v12868_v46, %v16232_v16  ;;  %v297_v13 = vcombine.low %v12923_v57, %v12911_v55  ;;  %v12957_v29 = vld [vmem:[#allocation8 + $0x108] sm:$0xff] }
 0x1e1   :  { %16350 = vst [vmem:[#allocation83_spill] sm:$0xff] %v12933_v20  ;;  %v12947_v40 = vrot.slane %v1747_v61, %v16335_v37  ;;  %v1239_v46 = vrot.slane %v1078_v19, %v9797_v4  ;;  %v1243_v61 = vrot.slane %v1078_v19, %v9800_v5  ;;  %v1251_v57 = vrot.slane %v1078_v19, %v9911_v11 }
 0x1e2   :  { %5606 = vbcast.lane.b32.xlu1 %v16351_v59, 256  ;;  %v1247_v59 = vrot.slane %v1078_v19, %v9854_v34  ;;  %v1255_v55 = vrot.slane %v1078_v19, %v9965_v14  ;;  %v1259_v42 = vrot.slane %v1078_v19, %v10057_v7  ;;  %v458_v36 = vrot.slane %v297_v13, %v9797_v4 }
 0x1e3   :  { %v462_v2 = vrot.slane %v297_v13, %v9800_v5  ;;  %v1404_v3 = vmul.f32 %v1239_v46, %v12729_v56  ;;  %v1405_v38 = vmul.f32 %v1243_v61, %v12729_v56  ;;  %v1407_v24 = vmul.f32 %v1251_v57, %v12729_v56 }
 0x1e4   :  { %v1406_v16 = vmul.f32 %v1247_v59, %v12729_v56  ;;  %v1408_v49 = vmul.f32 %v1255_v55, %v12729_v56  ;;  %v1409_v6 = vmul.f32 %v1259_v42, %v12729_v56  ;;  %v466_v19 = vrot.slane %v297_v13, %v9854_v34 }
 0x1e5   :  { %v470_v44 = vrot.slane %v297_v13, %v9911_v11  ;;  %v1468_v10 = vsel %vm956_vm0, %v1404_v3, -3e+38  ;;  %v1469_v46 = vsel %vm956_vm0, %v1405_v38, -3e+38  ;;  %v474_v57 = vrot.slane %v297_v13, %v9965_v14 }
 0x1e6   :  { %v1470_v61 = vsel %vm956_vm0, %v1406_v16, -3e+38  ;;  %v1471_v55 = vsel %vm956_vm0, %v1407_v24, -3e+38  ;;  %v1472_v56 = vsel %vm956_vm0, %v1408_v49, -3e+38  ;;  %v16352_v3 = vmax.f32 %v11980_v25, %v12451_v28 }
 0x1e7   :  { %v1473_v42 = vsel %vm956_vm0, %v1409_v6, -3e+38  ;;  %v16353_v16 = vmax.f32 %v11985_v23, %v12453_v60  ;;  %v16354_v24 = vmax.f32 %v11990_v62, %v12455_v12  ;;  %v16356_v49 = vmax.f32 %v11995_v48, %v12464_v0 }
 0x1e8   :  { %v12995_v59 = vmax.f32 %v16352_v3, %v1468_v10  ;;  %v16358_v25 = vmax.f32 %v12000_v52, %v12466_v51  ;;  %v16360_v23 = vmax.f32 %v12005_v15, %v12475_v54  ;;  %v478_v10 = vrot.slane %v297_v13, %v10057_v7 }
 0x1e9   :  { %v13001_v38 = vmax.f32 %v16353_v16, %v1469_v46  ;;  %v13006_v58 = vmax.f32 %v16354_v24, %v1470_v61  ;;  %v13011_v6 = vmax.f32 %v16356_v49, %v1471_v55  ;;  %v623_v62 = vmul.f32 %v458_v36, %v12736_v33  ;;  %v16374_v49 = vld [vmem:[#allocation69_spill] sm:$0xff] }
 0x1ea   :  { %v13016_v28 = vmax.f32 %v16358_v25, %v1472_v56  ;;  %v13021_v60 = vmax.f32 %v16360_v23, %v1473_v42  ;;  %v624_v12 = vmul.f32 %v462_v2, %v12736_v33  ;;  %v625_v48 = vmul.f32 %v466_v19, %v12736_v33  ;;  %v13038_v2 = vpop.permute.xlu0 %1705  ;;  %v16375_v25 = vld [vmem:[#allocation101_spill] sm:$0xff] }
 0x1eb   :  { %16355 = vst [vmem:[#allocation40_spill] sm:$0xff] %v13006_v58  ;;  %16357 = vst [vmem:[#allocation81_spill] sm:$0xff] %v13011_v6  ;;  %v626_v0 = vmul.f32 %v470_v44, %v12736_v33  ;;  %v627_v22 = vmul.f32 %v474_v57, %v12736_v33  ;;  %v2630_v52 = vcombine.low %v12933_v20, %v12927_v21  ;;  %v687_v15 = vsel %vm175_vm1, %v623_v62, -3e+38 }
 0x1ec   :  { %16359 = vst [vmem:[#allocation39_spill] sm:$0xff] %v13016_v28  ;;  %16361 = vst [vmem:[#allocation90_spill] sm:$0xff] %v13021_v60  ;;  %v628_v51 = vmul.f32 %v478_v10, %v12736_v33  ;;  %v688_v54 = vsel %vm175_vm1, %v624_v12, -3e+38  ;;  %v1792_v36 = vcombine.low %v12936_v32, %v12939_v53  ;;  %v689_v44 = vsel %vm175_vm1, %v625_v48, -3e+38 }
 0x1ed   :  { %v690_v13 = vsel %vm175_vm1, %v626_v0, -3e+38  ;;  %v691_v33 = vsel %vm175_vm1, %v627_v22, -3e+38  ;;  %v16362_v19 = vmax.f32 %v12017_v9, %v12502_v39  ;;  %v16364_v57 = vmax.f32 %v12022_v27, %v12505_v47  ;;  %v16370_v9 = vld [vmem:[#allocation68_spill] sm:$0xff]  ;;  %v16371_v39 = vld [vmem:[#allocation106_spill] sm:$0xff] }
 0x1ee   :  { %v692_v61 = vsel %vm175_vm1, %v628_v51, -3e+38  ;;  %v16366_v56 = vmax.f32 %v12032_v8, %v12515_v18  ;;  %v16368_v3 = vmax.f32 %v12037_v17, %v12518_v30  ;;  %v16372_v24 = vmax.f32 %v16370_v9, %v16371_v39  ;;  %v16381_v9 = vld [vmem:[#allocation24_spill] sm:$0xff] }
 0x1ef   :  { %v13049_v46 = vmax.f32 %v16362_v19, %v687_v15  ;;  %v13056_v55 = vmax.f32 %v16364_v57, %v688_v54  ;;  %v16376_v27 = vmax.f32 %v16374_v49, %v16375_v25  ;;  %v2791_v23 = vrot.slane %v2630_v52, %v9797_v4  ;;  %v16383_v25 = vld [vmem:[#allocation61_spill] sm:$0xff] }
 0x1f0   :  { %v13061_v42 = vmax.f32 %v16366_v56, %v689_v44  ;;  %v13066_v16 = vmax.f32 %v16368_v3, %v690_v13  ;;  %v13071_v50 = vmax.f32 %v16372_v24, %v691_v33  ;;  %v2795_v8 = vrot.slane %v2630_v52, %v9800_v5  ;;  %v9436_v13 = vld [vmem:[#allocation8 + $0x110] sm:$0xff]  ;;  %v9437_v33 = vld [vmem:[#allocation8 + $0x118] sm:$0xff] }
 0x1f1   :  { %16363 = vst [vmem:[#allocation46_spill] sm:$0xff] %v13049_v46  ;;  %16365 = vst [vmem:[#allocation74_spill] sm:$0xff] %v13056_v55  ;;  %v13076_v47 = vmax.f32 %v16376_v27, %v692_v61  ;;  %vm1732_vm3 = vcmp.gt.f32.partialorder %v13038_v2, 0.0  ;;  %v2799_v17 = vrot.slane %v2630_v52, %v9854_v34  ;;  %v2803_v18 = vrot.slane %v2630_v52, %v9911_v11  ;;  %v13104_v61 = vpop.permute.xlu1 %4033  ;;  %v16380_v3 = vld [vmem:[#allocation60_spill] sm:$0xff]  ;;  %v16384_v27 = vld [vmem:[#allocation102_spill] sm:$0xff] }
 0x1f2   :  { %16367 = vst [vmem:[#allocation77_spill] sm:$0xff] %v13061_v42  ;;  %16369 = vst [vmem:[#allocation78_spill] sm:$0xff] %v13066_v16  ;;  %v2807_v30 = vrot.slane %v2630_v52, %v9965_v14  ;;  %v2811_v10 = vrot.slane %v2630_v52, %v10057_v7  ;;  %v2956_v62 = vmul.f32 %v2791_v23, %v12771_v31  ;;  %vm4060_vm4 = vcmp.gt.f32.partialorder %v13104_v61, 0.0  ;;  %v16442_v42 = vld [vmem:[#allocation42_spill] sm:$0xff]  ;;  %v16443_v55 = vld [vmem:[#allocation93_spill] sm:$0xff] }
 0x1f3   :  { %16373 = vst [vmem:[#allocation31_spill] sm:$0xff] %v13071_v50  ;;  %16377 = vst [vmem:[#allocation45_spill] sm:$0xff] %v13076_v47  ;;  %v2957_v12 = vmul.f32 %v2795_v8, %v12771_v31  ;;  %v13088_v48 = vrot.slane %v1792_v36, %v16335_v37  ;;  %v13092_v0 = vrot.slane %v12947_v40, %v16335_v37  ;;  %v16439_v50 = vld [vmem:[#allocation97_spill] sm:$0xff] }
 0x1f4   :  { %v2958_v22 = vmul.f32 %v2799_v17, %v12771_v31  ;;  %v2959_v51 = vmul.f32 %v2803_v18, %v12771_v31  ;;  %v2960_v15 = vmul.f32 %v2807_v30, %v12771_v31  ;;  %v2961_v54 = vmul.f32 %v2811_v10, %v12771_v31  ;;  %v16387_v17 = vld [vmem:[#allocation65_spill] sm:$0xff]  ;;  %v16388_v18 = vld [vmem:[#allocation23_spill] sm:$0xff] }
 0x1f5   :  { %16378 = vst [vmem:[#allocation66_spill] sm:$0xff] %v13088_v48  ;;  %16379 = vst [vmem:[#allocation59_spill] sm:$0xff] %v13092_v0  ;;  %v3020_v52 = vsel %vm2508_vm2, %v2956_v62, -3e+38  ;;  %v3021_v44 = vsel %vm2508_vm2, %v2957_v12, -3e+38  ;;  %v1854_v36 = vcombine.low %v13088_v48, %v13092_v0  ;;  %v4075_v19 = vcombine.high %v9436_v13, %v9437_v33  ;;  %v3258_v0 = vpop.permute.xlu0 %3257 }
 0x1f6   :  { %v3022_v57 = vsel %vm2508_vm2, %v2958_v22, -3e+38  ;;  %v3023_v31 = vsel %vm2508_vm2, %v2959_v51, -3e+38  ;;  %v3024_v56 = vsel %vm2508_vm2, %v2960_v15, -3e+38  ;;  %v16382_v39 = vmax.f32 %v16380_v3, %v16381_v9 }
 0x1f7   :  { %v3025_v49 = vsel %vm2508_vm2, %v2961_v54, -3e+38  ;;  %v16385_v23 = vmax.f32 %v16383_v25, %v16384_v27  ;;  %v16389_v30 = vmax.f32 %v16387_v17, %v16388_v18  ;;  %v16391_v62 = vld [vmem:[#allocation128_spill] sm:$0xff]  ;;  %v16392_v12 = vld [vmem:[#allocation103_spill] sm:$0xff]  ;;  %v16399_v54 = vld [vmem:[#allocation129_spill] sm:$0xff]  ;;  %v2015_v9 = vrot.slane %v1854_v36, %v9797_v4 }
 0x1f8   :  { %v13115_v24 = vmax.f32 %v16382_v39, %v3020_v52  ;;  %v16393_v22 = vmax.f32 %v16391_v62, %v16392_v12  ;;  %v16395_v15 = vld [vmem:[#allocation124_spill] sm:$0xff]  ;;  %v2023_v39 = vrot.slane %v1854_v36, %v9854_v34  ;;  %v2027_v25 = vrot.slane %v1854_v36, %v9911_v11 }
 0x1f9   :  { %v13122_v8 = vmax.f32 %v16385_v23, %v3021_v44  ;;  %v13127_v10 = vmax.f32 %v16389_v30, %v3022_v57  ;;  %v16396_v52 = vld [vmem:[#allocation36_spill] sm:$0xff]  ;;  %v2019_v57 = vrot.slane %v1854_v36, %v9800_v5  ;;  %v2035_v27 = vrot.slane %v1854_v36, %v10057_v7 }
 0x1fa   :  { %v13132_v51 = vmax.f32 %v16393_v22, %v3023_v31  ;;  %v16397_v13 = vmax.f32 %v16395_v15, %v16396_v52  ;;  %v16400_v33 = vld [vmem:[#allocation104_spill] sm:$0xff]  ;;  %v2031_v31 = vrot.slane %v1854_v36, %v9965_v14  ;;  %v16404_v18 = vcombine.high %v12955_v1, %v12957_v29  ;;  %v13168_v15 = vpop.permute.xlu1 %5585 }
 0x1fb   :  { %16386 = vst [vmem:[#allocation58_spill] sm:$0xff] %v13122_v8  ;;  %16390 = vst [vmem:[#allocation52_spill] sm:$0xff] %v13127_v10  ;;  %v16401_v3 = vmax.f32 %v16399_v54, %v16400_v33  ;;  %v2181_v23 = vmul.f32 %v2019_v57, %v12777_v45  ;;  %v2182_v62 = vmul.f32 %v2023_v39, %v12777_v45  ;;  %v16405_v54 = vld [vmem:[#allocation125_spill] sm:$0xff]  ;;  %v16406_v33 = vld [vmem:[#allocation35_spill] sm:$0xff]  ;;  %vm3284_vm5 = vcmp.gt.f32.partialorder %v3258_v0, 0.0 }
 0x1fc   :  { %16394 = vst [vmem:[#allocation51_spill] sm:$0xff] %v13132_v51  ;;  %v13137_v35 = vmax.f32 %v16397_v13, %v3024_v56  ;;  %v2180_v56 = vmul.f32 %v2015_v9, %v12777_v45  ;;  %v13162_v30 = vrot.slane %v16404_v18, %v16335_v37  ;;  %v2183_v36 = vmul.f32 %v2027_v25, %v12777_v45  ;;  %v16409_v57 = vld [vmem:[#allocation130_spill] sm:$0xff]  ;;  %v16410_v39 = vld [vmem:[#allocation105_spill] sm:$0xff]  ;;  %v16417_v18 = vld [vmem:[#allocation131_spill] sm:$0xff] }
 0x1fd   :  { %v13142_v44 = vmax.f32 %v16401_v3, %v3025_v49  ;;  %v16403_v49 = vcombine.high %v12949_v43, %v12951_v26  ;;  %v2184_v12 = vmul.f32 %v2031_v31, %v12777_v45  ;;  %v2185_v22 = vmul.f32 %v2035_v27, %v12777_v45  ;;  %v16413_v27 = vld [vmem:[#allocation126_spill] sm:$0xff]  ;;  %v16478_v0 = vld [vmem:[#allocation21_spill] sm:$0xff] }
 0x1fe   :  { %16398 = vst [vmem:[#allocation33_spill] sm:$0xff] %v13137_v35  ;;  %v2244_v43 = vsel %vm1732_vm3, %v2180_v56, -3e+38  ;;  %v2245_v26 = vsel %vm1732_vm3, %v2181_v23, -3e+38  ;;  %v13175_v1 = vrot.slane %v4075_v19, %v16335_v37  ;;  %v16407_v3 = vmax.f32 %v16405_v54, %v16406_v33  ;;  %v16414_v56 = vld [vmem:[#allocation79_spill] sm:$0xff] }
 0x1ff   :  { %16402 = vst [vmem:[#allocation44_spill] sm:$0xff] %v13142_v44  ;;  %v13156_v17 = vrot.slane %v16403_v49, %v16335_v37  ;;  %v2246_v52 = vsel %vm1732_vm3, %v2182_v62, -3e+38  ;;  %v2247_v45 = vsel %vm1732_vm3, %v2183_v36, -3e+38  ;;  %v16411_v25 = vmax.f32 %v16409_v57, %v16410_v39  ;;  %v16418_v62 = vld [vmem:[#allocation22_spill] sm:$0xff] }
 0x200   :  { %v2248_v13 = vsel %vm1732_vm3, %v2184_v12, -3e+38  ;;  %v13188_v9 = vmax.f32 %v16407_v3, %v2244_v43  ;;  %v2249_v19 = vsel %vm1732_vm3, %v2185_v22, -3e+38  ;;  %v16415_v23 = vmax.f32 %v16413_v27, %v16414_v56  ;;  %v16421_v43 = vld [vmem:[#allocation127_spill] sm:$0xff]  ;;  %v16422_v54 = vld [vmem:[#allocation41_spill] sm:$0xff] }
 0x201   :  { %v4120_v29 = vcombine.low %v13156_v17, %v13162_v30  ;;  %v13195_v31 = vmax.f32 %v16411_v25, %v2245_v26  ;;  %v16419_v36 = vmax.f32 %v16417_v18, %v16418_v62  ;;  %v16423_v33 = vmax.f32 %v16421_v43, %v16422_v54  ;;  %v16425_v22 = vld [vmem:[#allocation70_spill] sm:$0xff]  ;;  %v16426_v3 = vld [vmem:[#allocation96_spill] sm:$0xff] }
 0x202   :  { %16408 = vst [vmem:[#allocation68_spill] sm:$0xff] %v13188_v9  ;;  %v13200_v49 = vmax.f32 %v16415_v23, %v2246_v52  ;;  %v16427_v57 = vmax.f32 %v16425_v22, %v16426_v3  ;;  %v13222_v52 = vrot.slane %v13175_v1, %v16335_v37  ;;  %v9438_v25 = vld [vmem:[#allocation8 + $0xc0] sm:$0xff]  ;;  %v9440_v56 = vld [vmem:[#allocation8 + $0xd0] sm:$0xff]  ;;  %v9441_v23 = vld [vmem:[#allocation8 + $0xd8] sm:$0xff]  ;;  %v16444_v46 = vmax.f32 %v16442_v42, %v16443_v55 }
 0x203   :  { %16412 = vst [vmem:[#allocation106_spill] sm:$0xff] %v13195_v31  ;;  %v13205_v12 = vmax.f32 %v16419_v36, %v2247_v45  ;;  %v13210_v2 = vmax.f32 %v16423_v33, %v2248_v13  ;;  %v13218_v39 = vrot.slane %v4120_v29, %v16335_v37  ;;  %v9439_v45 = vld [vmem:[#allocation8 + $0xc8] sm:$0xff]  ;;  %v3297_v18 = vcombine.high %v9440_v56, %v9441_v23  ;;  %v9442_v13 = vld [vmem:[#allocation8 + $0xe0] sm:$0xff]  ;;  %v9444_v29 = vld [vmem:[#allocation8 + $0x150] sm:$0xff] }
 0x204   :  { %16416 = vst [vmem:[#allocation69_spill] sm:$0xff] %v13200_v49  ;;  %v13215_v26 = vmax.f32 %v16427_v57, %v2249_v19  ;;  %16430 = vst [vmem:[#allocation102_spill] sm:$0xff] %v13222_v52  ;;  %v3295_v27 = vcombine.high %v9438_v25, %v9439_v45  ;;  %v9443_v62 = vld [vmem:[#allocation8 + $0xe8] sm:$0xff]  ;;  %v9445_v43 = vld [vmem:[#allocation8 + $0x158] sm:$0xff]  ;;  %v13227_v57 = vpop.permute.xlu1 %1124  ;;  %vm5612_vm6 = vcmp.gt.f32.partialorder %v13168_v15, 0.0 }
 0x205   :  { %16420 = vst [vmem:[#allocation101_spill] sm:$0xff] %v13205_v12  ;;  %16424 = vst [vmem:[#allocation60_spill] sm:$0xff] %v13210_v2  ;;  %v3299_v36 = vcombine.high %v9442_v13, %v9443_v62  ;;  %v4182_v19 = vcombine.low %v13218_v39, %v13222_v52  ;;  %v5623_v54 = vcombine.high %v9444_v29, %v9445_v43  ;;  %v9446_v33 = vld [vmem:[#allocation8 + $0x160] sm:$0xff]  ;;  %v9447_v22 = vld [vmem:[#allocation8 + $0x168] sm:$0xff] }
 0x206   :  { %16428 = vst [vmem:[#allocation24_spill] sm:$0xff] %v13215_v26  ;;  %16429 = vst [vmem:[#allocation61_spill] sm:$0xff] %v13218_v39  ;;  %v5625_v3 = vcombine.high %v9446_v33, %v9447_v22  ;;  %v13230_v25 = vrot.slane %v3295_v27, %v16335_v37  ;;  %v13233_v45 = vrot.slane %v3297_v18, %v16335_v37  ;;  %v9448_v23 = vld [vmem:[#allocation8 + $0x170] sm:$0xff]  ;;  %v9449_v13 = vld [vmem:[#allocation8 + $0x178] sm:$0xff] }
 0x207   :  { %v13236_v56 = vrot.slane %v3299_v36, %v16335_v37  ;;  %v5627_v62 = vcombine.high %v9448_v23, %v9449_v13  ;;  %v4343_v39 = vrot.slane %v4182_v19, %v9797_v4  ;;  %v4347_v29 = vrot.slane %v4182_v19, %v9800_v5  ;;  %v16446_v26 = vld [vmem:[#allocation87_spill] sm:$0xff]  ;;  %v16451_v12 = vld [vmem:[#allocation94_spill] sm:$0xff] }
 0x208   :  { %v4351_v43 = vrot.slane %v4182_v19, %v9854_v34  ;;  %v4355_v33 = vrot.slane %v4182_v19, %v9911_v11  ;;  %v4359_v27 = vrot.slane %v4182_v19, %v9965_v14  ;;  %v4363_v22 = vrot.slane %v4182_v19, %v10057_v7 }
 0x209   :  { %v3344_v18 = vcombine.low %v13230_v25, %v13233_v45  ;;  %v13248_v36 = vrot.slane %v13236_v56, %v16335_v37  ;;  %v4508_v23 = vmul.f32 %v4343_v39, %v12823_v41  ;;  %v4509_v13 = vmul.f32 %v4347_v29, %v12823_v41 }
 0x20a   :  { %v4510_v52 = vmul.f32 %v4351_v43, %v12823_v41  ;;  %v4511_v48 = vmul.f32 %v4355_v33, %v12823_v41  ;;  %v4512_v20 = vmul.f32 %v4359_v27, %v12823_v41  ;;  %v4513_v19 = vmul.f32 %v4363_v22, %v12823_v41  ;;  %v13271_v27 = vpop.permute.xlu1 %2676 }
 0x20b   :  { %16431 = vst [vmem:[#allocation65_spill] sm:$0xff] %v13248_v36  ;;  %v13257_v21 = vrot.slane %v3344_v18, %v16335_v37  ;;  %v13260_v47 = vrot.slane %v5623_v54, %v16335_v37  ;;  %v4572_v39 = vsel %vm4060_vm4, %v4508_v23, -3e+38  ;;  %v4573_v29 = vsel %vm4060_vm4, %v4509_v13, -3e+38  ;;  %v16435_v18 = vld [vmem:[#allocation92_spill] sm:$0xff] }
 0x20c   :  { %v4574_v43 = vsel %vm4060_vm4, %v4510_v52, -3e+38  ;;  %v13269_v33 = vrot.slane %v5625_v3, %v16335_v37  ;;  %v4575_v41 = vsel %vm4060_vm4, %v4511_v48, -3e+38  ;;  %v4576_v54 = vsel %vm4060_vm4, %v4512_v20, -3e+38 }
 0x20d   :  { %16432 = vst [vmem:[#allocation23_spill] sm:$0xff] %v13257_v21  ;;  %16433 = vst [vmem:[#allocation128_spill] sm:$0xff] %v13260_v47  ;;  %v4577_v22 = vsel %vm4060_vm4, %v4513_v19, -3e+38  ;;  %v16436_v23 = vmax.f32 %v16291_v63, %v16435_v18  ;;  %v16438_v52 = vld [vmem:[#allocation67_spill] sm:$0xff]  ;;  %v13292_v48 = vmax.f32 %v16444_v46, %v4574_v43  ;;  %v16447_v20 = vld [vmem:[#allocation98_spill] sm:$0xff]  ;;  %v3406_v55 = vcombine.low %v13257_v21, %v13248_v36 }
 0x20e   :  { %16434 = vst [vmem:[#allocation103_spill] sm:$0xff] %v13269_v33  ;;  %v16440_v3 = vmax.f32 %v16438_v52, %v16439_v50  ;;  %v16448_v2 = vmax.f32 %v16446_v26, %v16447_v20  ;;  %v16450_v19 = vld [vmem:[#allocation89_spill] sm:$0xff]  ;;  %v16454_v18 = vld [vmem:[#allocation88_spill] sm:$0xff]  ;;  %v13312_v46 = vrot.slane %v5627_v62, %v16335_v37  ;;  %v5672_v42 = vcombine.low %v13260_v47, %v13269_v33  ;;  %v9454_v52 = vld [vmem:[#allocation8 + $0x140] sm:$0xff]  ;;  %v13316_v20 = vpop.permute.xlu0 %4809 }
 0x20f   :  { %v13282_v13 = vmax.f32 %v16436_v23, %v4572_v39  ;;  %16445 = vst [vmem:[#allocation129_spill] sm:$0xff] %v13292_v48  ;;  %v16452_v63 = vmax.f32 %v16450_v19, %v16451_v12  ;;  %v16455_v23 = vld [vmem:[#allocation99_spill] sm:$0xff]  ;;  %v9452_v43 = vld [vmem:[#allocation8 + $0x130] sm:$0xff]  ;;  %v3567_v19 = vrot.slane %v3406_v55, %v9797_v4  ;;  %v3571_v62 = vrot.slane %v3406_v55, %v9800_v5 }
 0x210   :  { %v13287_v16 = vmax.f32 %v16440_v3, %v4573_v29  ;;  %v13297_v61 = vmax.f32 %v16448_v2, %v4575_v41  ;;  %v16456_v50 = vmax.f32 %v16454_v18, %v16455_v23  ;;  %16458 = vst [vmem:[#allocation130_spill] sm:$0xff] %v13312_v46  ;;  %v9450_v2 = vld [vmem:[#allocation8 + $0x120] sm:$0xff]  ;;  %v9451_v26 = vld [vmem:[#allocation8 + $0x128] sm:$0xff]  ;;  %v9453_v41 = vld [vmem:[#allocation8 + $0x138] sm:$0xff]  ;;  %v3579_v18 = vrot.slane %v3406_v55, %v9911_v11 }
 0x211   :  { %16437 = vst [vmem:[#allocation124_spill] sm:$0xff] %v13282_v13  ;;  %v13302_v39 = vmax.f32 %v16452_v63, %v4576_v54  ;;  %v4847_v12 = vcombine.high %v9450_v2, %v9451_v26  ;;  %v4849_v54 = vcombine.high %v9452_v43, %v9453_v41  ;;  %v9455_v3 = vld [vmem:[#allocation8 + $0x148] sm:$0xff]  ;;  %v3575_v63 = vrot.slane %v3406_v55, %v9854_v34  ;;  %v13332_v43 = vpop.permute.xlu1 %4228  ;;  %v16462_v41 = vld [vmem:[#allocation114_spill] sm:$0xff] }
 0x212   :  { %16441 = vst [vmem:[#allocation36_spill] sm:$0xff] %v13287_v16  ;;  %16449 = vst [vmem:[#allocation104_spill] sm:$0xff] %v13297_v61  ;;  %v13307_v29 = vmax.f32 %v16456_v50, %v4577_v22  ;;  %v4851_v22 = vcombine.high %v9454_v52, %v9455_v3  ;;  %v3583_v23 = vrot.slane %v3406_v55, %v9965_v14  ;;  %v16474_v61 = vld [vmem:[#allocation100_spill] sm:$0xff]  ;;  %v8912_v13 = vld [vmem:[#allocation12 + $0x304] ss:$24 sps:$4 sm:$0xff]   ;;  %vm4836_vm7 = vcmp.gt.f32.partialorder %v13316_v20, 0.0 }
 0x213   :  { %16453 = vst [vmem:[#allocation125_spill] sm:$0xff] %v13302_v39  ;;  %v3587_v50 = vrot.slane %v3406_v55, %v10057_v7  ;;  %v13326_v2 = vrot.slane %v5672_v42, %v16335_v37  ;;  %v13330_v26 = vrot.slane %v13312_v46, %v16335_v37  ;;  %16461 = vst [vmem:[#allocation79_spill] sm:$0xff] %v13332_v43  ;;  %8130 = vmatprep.subr.bf16.mxu0 %v8912_v13  ;;  %v16510_v43 = vld [vmem:[#allocation38_spill] sm:$0xff] }
 0x214   :  { %16457 = vst [vmem:[#allocation35_spill] sm:$0xff] %v13307_v29  ;;  %v3732_v52 = vmul.f32 %v3567_v19, %v16462_v41  ;;  %v3733_v3 = vmul.f32 %v3571_v62, %v16462_v41  ;;  %v3734_v21 = vmul.f32 %v3575_v63, %v16462_v41  ;;  %v3735_v36 = vmul.f32 %v3579_v18, %v16462_v41  ;;  %v13359_v29 = vpop.permute.xlu0 %343 }
 0x215   :  { %16459 = vst [vmem:[#allocation105_spill] sm:$0xff] %v13326_v2  ;;  %16460 = vst [vmem:[#allocation126_spill] sm:$0xff] %v13330_v26  ;;  %v3736_v47 = vmul.f32 %v3583_v23, %v16462_v41  ;;  %v3737_v55 = vmul.f32 %v3587_v50, %v16462_v41  ;;  %v5734_v42 = vcombine.low %v13326_v2, %v13330_v26  ;;  %v16465_v41 = vld [vmem:[#allocation91_spill] sm:$0xff] }
 0x216   :  { %v13343_v46 = vrot.slane %v4847_v12, %v16335_v37  ;;  %v3796_v33 = vsel %vm3284_vm5, %v3732_v52, -3e+38  ;;  %v3797_v19 = vsel %vm3284_vm5, %v3733_v3, -3e+38  ;;  %v3798_v62 = vsel %vm3284_vm5, %v3734_v21, -3e+38 }
 0x217   :  { %v13349_v63 = vrot.slane %v4849_v54, %v16335_v37  ;;  %v3799_v18 = vsel %vm3284_vm5, %v3735_v36, -3e+38  ;;  %v3800_v23 = vsel %vm3284_vm5, %v3736_v47, -3e+38  ;;  %v3801_v50 = vsel %vm3284_vm5, %v3737_v55, -3e+38 }
 0x218   :  { %16463 = vst [vmem:[#allocation131_spill] sm:$0xff] %v13343_v46  ;;  %v16466_v2 = vld [vmem:[#allocation95_spill] sm:$0xff]  ;;  %v16469_v52 = vld [vmem:[#allocation30_spill] sm:$0xff]  ;;  %v16470_v3 = vld [vmem:[#allocation48_spill] sm:$0xff] }
 0x219   :  { %16464 = vst [vmem:[#allocation22_spill] sm:$0xff] %v13349_v63  ;;  %v16467_v26 = vmax.f32 %v16465_v41, %v16466_v2  ;;  %v16471_v39 = vmax.f32 %v16469_v52, %v16470_v3  ;;  %v16473_v54 = vld [vmem:[#allocation75_spill] sm:$0xff]  ;;  %v16481_v2 = vld [vmem:[#allocation62_spill] sm:$0xff] }
 0x21a   :  { %v16475_v48 = vmax.f32 %v16473_v54, %v16474_v61  ;;  %v16477_v47 = vld [vmem:[#allocation71_spill] sm:$0xff]  ;;  %v8914_v52 = vld [vmem:[#allocation12] ss:$24 sps:$4 sm:$0xff]   ;;  %v5899_v61 = vrot.slane %v5734_v42, %v9800_v5 }
 0x21b   :  { %v13357_v12 = vmax.f32 %v16467_v26, %v3796_v33  ;;  %v13364_v21 = vmax.f32 %v16471_v39, %v3797_v19  ;;  %v16479_v55 = vmax.f32 %v16477_v47, %v16478_v0  ;;  %v16482_v33 = vld [vmem:[#allocation50_spill] sm:$0xff]  ;;  %v16485_v39 = vld [vmem:[#allocation72_spill] sm:$0xff]  ;;  %v5911_v0 = vrot.slane %v5734_v42, %v9965_v14 }
 0x21c   :  { %v13369_v36 = vmax.f32 %v16475_v48, %v3798_v62  ;;  %v16483_v26 = vmax.f32 %v16481_v2, %v16482_v33  ;;  %v16486_v19 = vld [vmem:[#allocation64_spill] sm:$0xff]  ;;  %v5895_v48 = vrot.slane %v5734_v42, %v9797_v4  ;;  %v5903_v62 = vrot.slane %v5734_v42, %v9854_v34  ;;  %v8915_v54 = vld [vmem:[#allocation12 + $0x300] ss:$24 sps:$4 sm:$0xff]  }
 0x21d   :  { %16468 = vst [vmem:[#allocation127_spill] sm:$0xff] %v13357_v12  ;;  %16472 = vst [vmem:[#allocation41_spill] sm:$0xff] %v13364_v21  ;;  %v13374_v16 = vmax.f32 %v16479_v55, %v3799_v18  ;;  %v8910_v12 = vld [vmem:[#allocation12 + $0x4] ss:$24 sps:$4 sm:$0xff]   ;;  %v16487_v3 = vmax.f32 %v16485_v39, %v16486_v19  ;;  %v13389_v18 = vpop.permute.xlu1 %5780  ;;  %v8916_v47 = vld [vmem:[#allocation12 + $0x34] ss:$24 sps:$4 sm:$0xff]   ;;  %v5915_v55 = vrot.slane %v5734_v42, %v10057_v7  ;;  %8131 = vmatpush1.bf16.msra.mxu0 %v8915_v54 }
 0x21e   :  { %16476 = vst [vmem:[#allocation70_spill] sm:$0xff] %v13369_v36  ;;  %v13379_v41 = vmax.f32 %v16483_v26, %v3800_v23  ;;  %16489 = vst [vmem:[#allocation97_spill] sm:$0xff] %v13389_v18  ;;  %v5907_v23 = vrot.slane %v5734_v42, %v9911_v11  ;;  %v13395_v2 = vrot.slane %v4851_v22, %v16335_v37  ;;  %8089 = vmatprep.subr.bf16.mxu1 %v8910_v12  ;;  %v16491_v33 = vld [vmem:[#allocation117_spill] sm:$0xff]  ;;  %v8920_v12 = vld [vmem:[#allocation12 + $0x30] ss:$24 sps:$4 sm:$0xff]  }
 0x21f   :  { %16480 = vst [vmem:[#allocation96_spill] sm:$0xff] %v13374_v16  ;;  %v13384_v21 = vmax.f32 %v16487_v3, %v3801_v50  ;;  %v8918_v50 = vld [vmem:[#allocation12 + $0x334] ss:$24 sps:$4 sm:$0xff]   ;;  %v6060_v26 = vmul.f32 %v5895_v48, %v16491_v33  ;;  %v6061_v39 = vmul.f32 %v5899_v61, %v16491_v33  ;;  %v6062_v19 = vmul.f32 %v5903_v62, %v16491_v33  ;;  %v8921_v48 = vld [vmem:[#allocation12 + $0x330] ss:$24 sps:$4 sm:$0xff]  }
 0x220   :  { %16484 = vst [vmem:[#allocation92_spill] sm:$0xff] %v13379_v41  ;;  %16490 = vst [vmem:[#allocation42_spill] sm:$0xff] %v13395_v2  ;;  %v4896_v3 = vcombine.low %v13343_v46, %v13349_v63  ;;  %v6063_v18 = vmul.f32 %v5907_v23, %v16491_v33  ;;  %v6065_v42 = vmul.f32 %v5915_v55, %v16491_v33  ;;  %8090 = vmatpush1.bf16.msra.mxu1 %v8914_v52  ;;  %v16499_v46 = vld [vmem:[#allocation118_spill] sm:$0xff]  ;;  %v16503_v41 = vld [vmem:[#allocation113_spill] sm:$0xff] }
 0x221   :  { %16488 = vst [vmem:[#allocation67_spill] sm:$0xff] %v13384_v21  ;;  %v6064_v21 = vmul.f32 %v5911_v0, %v16491_v33  ;;  %v13407_v22 = vrot.slane %v13395_v2, %v16335_v37  ;;  %v6124_v61 = vsel %vm5612_vm6, %v6060_v26, -3e+38  ;;  %v6125_v62 = vsel %vm5612_vm6, %v6061_v39, -3e+38  ;;  %v13418_v0 = vpop.permute.xlu0 %1900  ;;  %8091 = vmatprep.subr.bf16.mxu1 %v8916_v47  ;;  %v16494_v26 = vld [vmem:[#allocation37_spill] sm:$0xff]  ;;  %8132 = vmatprep.subr.bf16.mxu0 %v8918_v50  ;;  %v13451_v50 = vpop.permute.xlu1 %936 }
 0x222   :  { %v6126_v13 = vsel %vm5612_vm6, %v6062_v19, -3e+38  ;;  %v13416_v23 = vrot.slane %v4896_v3, %v16335_v37  ;;  %v6127_v52 = vsel %vm5612_vm6, %v6063_v18, -3e+38  ;;  %v6129_v33 = vsel %vm5612_vm6, %v6065_v42, -3e+38  ;;  %8133 = vmatpush1.bf16.msra.mxu0 %v8921_v48 }
 0x223   :  { %16492 = vst [vmem:[#allocation93_spill] sm:$0xff] %v13407_v22  ;;  %v6128_v55 = vsel %vm5612_vm6, %v6064_v21, -3e+38  ;;  %v16495_v39 = vld [vmem:[#allocation80_spill] sm:$0xff]  ;;  %v16498_v3 = vld [vmem:[#allocation43_spill] sm:$0xff]  ;;  %v16506_v21 = vld [vmem:[#allocation34_spill] sm:$0xff] }
 0x224   :  { %16493 = vst [vmem:[#allocation87_spill] sm:$0xff] %v13416_v23  ;;  %v16496_v2 = vmax.f32 %v16494_v26, %v16495_v39  ;;  %v16500_v63 = vmax.f32 %v16498_v3, %v16499_v46  ;;  %v16502_v47 = vld [vmem:[#allocation84_spill] sm:$0xff]  ;;  %v16507_v36 = vld [vmem:[#allocation119_spill] sm:$0xff]  ;;  %v16511_v26 = vld [vmem:[#allocation53_spill] sm:$0xff]  ;;  %8092 = vmatpush1.bf16.msra.mxu1 %v8920_v12  ;;  %vm957_vm8 = vcmp.gt.f32.partialorder %v13451_v50, 0.0 }
 0x225   :  { %v16504_v18 = vmax.f32 %v16502_v47, %v16503_v41  ;;  %v16508_v15 = vmax.f32 %v16506_v21, %v16507_v36  ;;  %v16514_v46 = vld [vmem:[#allocation29_spill] sm:$0xff]  ;;  %v4958_v41 = vcombine.low %v13416_v23, %v13407_v22  ;;  %v16519_v3 = vld [vmem:[#allocation82_spill] sm:$0xff]  ;;  %v2489_v50 = vpop.permute.xlu1 %2488 }
 0x226   :  { %v13429_v19 = vmax.f32 %v16496_v2, %v6124_v61  ;;  %v13434_v54 = vmax.f32 %v16500_v63, %v6125_v62  ;;  %v16512_v2 = vmax.f32 %v16510_v43, %v16511_v26  ;;  %v16515_v63 = vld [vmem:[#allocation120_spill] sm:$0xff]  ;;  %v16522_v47 = vld [vmem:[#allocation26_spill] sm:$0xff]  ;;  %vm2509_vm10 = vcmp.gt.f32.partialorder %v2489_v50, 0.0 }
 0x227   :  { %v13439_v16 = vmax.f32 %v16504_v18, %v6126_v13  ;;  %v13444_v42 = vmax.f32 %v16508_v15, %v6127_v52  ;;  %v16516_v62 = vmax.f32 %v16514_v46, %v16515_v63  ;;  %v16518_v13 = vld [vmem:[#allocation110_spill] sm:$0xff]  ;;  %v16520_v52 = vld [vmem:[#allocation47_spill] sm:$0xff]  ;;  %v5119_v21 = vrot.slane %v4958_v41, %v9797_v4  ;;  %v13474_v46 = vpop.permute.xlu0 %3452 }
 0x228   :  { %16497 = vst [vmem:[#allocation98_spill] sm:$0xff] %v13429_v19  ;;  %16501 = vst [vmem:[#allocation89_spill] sm:$0xff] %v13434_v54  ;;  %v13449_v61 = vmax.f32 %v16512_v2, %v6128_v55  ;;  %v1017_v36 = vcombine.high %v16519_v3, %v16518_v13  ;;  %v1019_v43 = vcombine.high %v16520_v52, %v16520_v52  ;;  %v16521_v55 = vld [vmem:[#allocation49_spill] sm:$0xff]  ;;  %v16542_v19 = vld [vmem:[#allocation55_spill] sm:$0xff] }
 0x229   :  { %16505 = vst [vmem:[#allocation94_spill] sm:$0xff] %v13439_v16  ;;  %16509 = vst [vmem:[#allocation88_spill] sm:$0xff] %v13444_v42  ;;  %v13456_v39 = vmax.f32 %v16516_v62, %v6129_v33  ;;  %v236_v18 = vcombine.high %v16522_v47, %v16521_v55  ;;  %v5123_v33 = vrot.slane %v4958_v41, %v9800_v5  ;;  %v16525_v62 = vld [vmem:[#allocation56_spill] sm:$0xff] }
 0x22a   :  { %16513 = vst [vmem:[#allocation99_spill] sm:$0xff] %v13449_v61  ;;  %v5127_v15 = vrot.slane %v4958_v41, %v9854_v34  ;;  %v5131_v26 = vrot.slane %v4958_v41, %v9911_v11  ;;  %v5135_v12 = vrot.slane %v4958_v41, %v9965_v14  ;;  %v5139_v2 = vrot.slane %v4958_v41, %v10057_v7  ;;  %v16535_v61 = vld [vmem:[#allocation122_spill] sm:$0xff]  ;;  %v16537_v16 = vld [vmem:[#allocation32_spill] sm:$0xff] }
 0x22b   :  { %16517 = vst [vmem:[#allocation114_spill] sm:$0xff] %v13456_v39  ;;  %v13477_v63 = vrot.slane %v1017_v36, %v16335_v37  ;;  %v13480_v48 = vrot.slane %v1019_v43, %v16335_v37  ;;  %v5284_v13 = vmul.f32 %v5119_v21, %v16525_v62  ;;  %v5285_v3 = vmul.f32 %v5123_v33, %v16525_v62  ;;  %v16526_v36 = vld [vmem:[#allocation25_spill] sm:$0xff] }
 0x22c   :  { %v5286_v52 = vmul.f32 %v5127_v15, %v16525_v62  ;;  %v5287_v55 = vmul.f32 %v5131_v26, %v16525_v62  ;;  %v5288_v47 = vmul.f32 %v5135_v12, %v16525_v62  ;;  %v5289_v41 = vmul.f32 %v5139_v2, %v16525_v62  ;;  %v16528_v62 = vld [vmem:[#allocation85_spill] sm:$0xff] }
 0x22d   :  { %16523 = vst [vmem:[#allocation91_spill] sm:$0xff] %v13477_v63  ;;  %16524 = vst [vmem:[#allocation95_spill] sm:$0xff] %v13480_v48  ;;  %v1082_v23 = vcombine.low %v13477_v63, %v13480_v48  ;;  %v238_v22 = vcombine.high %v16526_v36, %v16526_v36  ;;  %v5348_v43 = vsel %vm4836_vm7, %v5284_v13, -3e+38  ;;  %v5349_v21 = vsel %vm4836_vm7, %v5285_v3, -3e+38 }
 0x22e   :  { %v5350_v33 = vsel %vm4836_vm7, %v5286_v52, -3e+38  ;;  %v13499_v15 = vrot.slane %v236_v18, %v16335_v37  ;;  %v5351_v26 = vsel %vm4836_vm7, %v5287_v55, -3e+38  ;;  %v5352_v12 = vsel %vm4836_vm7, %v5288_v47, -3e+38 }
 0x22f   :  { %v5353_v2 = vsel %vm4836_vm7, %v5289_v41, -3e+38  ;;  %v16529_v13 = vld [vmem:[#allocation121_spill] sm:$0xff]  ;;  %v16531_v3 = vld [vmem:[#allocation28_spill] sm:$0xff]  ;;  %v16532_v48 = vld [vmem:[#allocation115_spill] sm:$0xff] }
 0x230   :  { %16527 = vst [vmem:[#allocation30_spill] sm:$0xff] %v13499_v15  ;;  %v16530_v36 = vmax.f32 %v16528_v62, %v16529_v13  ;;  %v16533_v52 = vmax.f32 %v16531_v3, %v16532_v48  ;;  %v16534_v18 = vld [vmem:[#allocation86_spill] sm:$0xff]  ;;  %v16538_v47 = vld [vmem:[#allocation116_spill] sm:$0xff]  ;;  %v16541_v41 = vld [vmem:[#allocation73_spill] sm:$0xff]  ;;  %v13537_v3 = vpop.permute.xlu0 %5004 }
 0x231   :  { %v16536_v42 = vmax.f32 %v16534_v18, %v16535_v61  ;;  %v16539_v54 = vmax.f32 %v16537_v16, %v16538_v47  ;;  %v16543_v62 = vmax.f32 %v16541_v41, %v16542_v19  ;;  %v16545_v13 = vld [vmem:[#allocation76_spill] sm:$0xff]  ;;  %v1267_v61 = vrot.slane %v1082_v23, %v9800_v5  ;;  %v16551_v47 = vld [vmem:[#allocation54_spill] sm:$0xff] }
 0x232   :  { %v13510_v63 = vmax.f32 %v16530_v36, %v5348_v43  ;;  %v13515_v39 = vmax.f32 %v16533_v52, %v5349_v21  ;;  %v16546_v36 = vld [vmem:[#allocation123_spill] sm:$0xff]  ;;  %v1271_v16 = vrot.slane %v1082_v23, %v9854_v34  ;;  %v1283_v19 = vrot.slane %v1082_v23, %v10057_v7  ;;  %v16550_v18 = vld [vmem:[#allocation108_spill] sm:$0xff] }
 0x233   :  { %v13520_v55 = vmax.f32 %v16536_v42, %v5350_v33  ;;  %v13525_v20 = vmax.f32 %v16539_v54, %v5351_v26  ;;  %v13530_v43 = vmax.f32 %v16543_v62, %v5352_v12  ;;  %v16547_v48 = vmax.f32 %v16545_v13, %v16546_v36 }
 0x234   :  { %v1263_v42 = vrot.slane %v1082_v23, %v9797_v4  ;;  %v1275_v54 = vrot.slane %v1082_v23, %v9911_v11  ;;  %v1279_v33 = vrot.slane %v1082_v23, %v9965_v14  ;;  %v13546_v26 = vrot.slane %v238_v22, %v16335_v37 }
 0x235   :  { %16540 = vst [vmem:[#allocation48_spill] sm:$0xff] %v13525_v20  ;;  %16544 = vst [vmem:[#allocation75_spill] sm:$0xff] %v13530_v43  ;;  %v13535_v21 = vmax.f32 %v16547_v48, %v5353_v2  ;;  %v1411_v2 = vmul.f32 %v1267_v61, %v13227_v57  ;;  %v1412_v52 = vmul.f32 %v1271_v16, %v13227_v57  ;;  %v16553_v61 = vld [vmem:[#allocation63_spill] sm:$0xff] }
 0x236   :  { %16549 = vst [vmem:[#allocation71_spill] sm:$0xff] %v13546_v26  ;;  %v1410_v12 = vmul.f32 %v1263_v42, %v13227_v57  ;;  %v2569_v41 = vcombine.high %v16551_v47, %v16550_v18  ;;  %v1413_v62 = vmul.f32 %v1275_v54, %v13227_v57  ;;  %v1414_v13 = vmul.f32 %v1279_v33, %v13227_v57  ;;  %v13594_v47 = vpop.permute.xlu0 %155 }
 0x237   :  { %16548 = vst [vmem:[#allocation100_spill] sm:$0xff] %v13535_v21  ;;  %v1415_v36 = vmul.f32 %v1283_v19, %v13227_v57  ;;  %v301_v23 = vcombine.low %v13499_v15, %v13546_v26  ;;  %v13564_v48 = vsel %vm957_vm8, %v1411_v2, -3e+38  ;;  %v13568_v42 = vsel %vm957_vm8, %v1412_v52, -3e+38 }
 0x238   :  { %v13560_v22 = vsel %vm957_vm8, %v1410_v12, -3e+38  ;;  %16552 = vst [vmem:[#allocation21_spill] sm:$0xff] %v13568_v42  ;;  %v2571_v16 = vcombine.high %v16553_v61, %v16553_v61  ;;  %v13574_v57 = vsel %vm957_vm8, %v1413_v62, -3e+38  ;;  %v13604_v52 = vrot.slane %v2569_v41, %v16335_v37 }
 0x239   :  { %16554 = vst [vmem:[#allocation62_spill] sm:$0xff] %v13574_v57  ;;  %v13578_v54 = vsel %vm957_vm8, %v1414_v13, -3e+38  ;;  %v13582_v33 = vsel %vm957_vm8, %v1415_v36, -3e+38  ;;  %v482_v13 = vrot.slane %v301_v23, %v9797_v4  ;;  %v486_v36 = vrot.slane %v301_v23, %v9800_v5 }
 0x23a   :  { %16555 = vst [vmem:[#allocation50_spill] sm:$0xff] %v13578_v54  ;;  %16556 = vst [vmem:[#allocation72_spill] sm:$0xff] %v13582_v33  ;;  %v490_v61 = vrot.slane %v301_v23, %v9854_v34  ;;  %v494_v2 = vrot.slane %v301_v23, %v9911_v11  ;;  %v498_v12 = vrot.slane %v301_v23, %v9965_v14  ;;  %vm176_vm9 = vcmp.gt.f32.partialorder %v13594_v47, 0.0 }
 0x23b   :  { %16557 = vst [vmem:[#allocation64_spill] sm:$0xff] %v13604_v52  ;;  %v502_v18 = vrot.slane %v301_v23, %v10057_v7  ;;  %v13608_v19 = vrot.slane %v2571_v16, %v16335_v37  ;;  %v629_v62 = vmul.f32 %v482_v13, %v13359_v29  ;;  %v630_v15 = vmul.f32 %v486_v36, %v13359_v29  ;;  %v13618_v23 = vpop.permute.xlu0 %1712  ;;  %v13620_v16 = vpop.permute.xlu1 %4040 }
 0x23c   :  { %v631_v26 = vmul.f32 %v490_v61, %v13359_v29  ;;  %v632_v60 = vmul.f32 %v494_v2, %v13359_v29  ;;  %v633_v41 = vmul.f32 %v498_v12, %v13359_v29  ;;  %v1795_v57 = vcombine.high %v12947_v40, %v12947_v40 }
 0x23d   :  { %16558 = vst [vmem:[#allocation117_spill] sm:$0xff] %v13608_v19  ;;  %v2634_v33 = vcombine.low %v13604_v52, %v13608_v19  ;;  %v13623_v54 = vmul.f32 %v502_v18, %v13359_v29  ;;  %v13627_v13 = vsel %vm176_vm9, %v629_v62, -3e+38  ;;  %v13631_v36 = vsel %vm176_vm9, %v630_v15, -3e+38 }
 0x23e   :  { %v13635_v2 = vsel %vm176_vm9, %v631_v26, -3e+38  ;;  %v13639_v12 = vsel %vm176_vm9, %v632_v60, -3e+38  ;;  %v1793_v26 = vcombine.high %v12936_v32, %v12939_v53  ;;  %v13670_v40 = vrot.slane %v1795_v57, %v16335_v37  ;;  %v8926_v57 = vld [vmem:[#allocation12 + $0x60] ss:$24 sps:$4 sm:$0xff]  }
 0x23f   :  { %v2815_v61 = vrot.slane %v2634_v33, %v9797_v4  ;;  %v2819_v29 = vrot.slane %v2634_v33, %v9800_v5  ;;  %v2823_v18 = vrot.slane %v2634_v33, %v9854_v34  ;;  %v2827_v62 = vrot.slane %v2634_v33, %v9911_v11  ;;  %v16649_v21 = vld [vmem:[#allocation21_spill] sm:$0xff] }
 0x240   :  { %v2831_v52 = vrot.slane %v2634_v33, %v9965_v14  ;;  %v2835_v15 = vrot.slane %v2634_v33, %v10057_v7  ;;  %v13658_v33 = vrot.slane %v1793_v26, %v16335_v37  ;;  %16562 = vst [vmem:[#allocation118_spill] sm:$0xff] %v13670_v40  ;;  %v8924_v26 = vld [vmem:[#allocation12 + $0x364] ss:$24 sps:$4 sm:$0xff]   ;;  %vm1733_vm11 = vcmp.gt.f32.partialorder %v13618_v23, 0.0 }
 0x241   :  { %v2962_v19 = vmul.f32 %v2815_v61, %v13271_v27  ;;  %v2963_v60 = vmul.f32 %v2819_v29, %v13271_v27  ;;  %v2964_v28 = vmul.f32 %v2823_v18, %v13271_v27  ;;  %v2965_v6 = vmul.f32 %v2827_v62, %v13271_v27  ;;  %v13672_v29 = vpop.permute.xlu0 %3264  ;;  %8134 = vmatprep.subr.bf16.mxu0 %v8924_v26  ;;  %v16579_v23 = vld [vmem:[#allocation79_spill] sm:$0xff] }
 0x242   :  { %v2966_v42 = vmul.f32 %v2831_v52, %v13271_v27  ;;  %v2967_v58 = vmul.f32 %v2835_v15, %v13271_v27  ;;  %16559 = vst [vmem:[#allocation37_spill] sm:$0xff] %v13658_v33  ;;  %v13674_v52 = vpop.permute.xlu1 %5592  ;;  %v4121_v62 = vcombine.high %v13156_v17, %v13162_v30  ;;  %v8927_v15 = vld [vmem:[#allocation12 + $0x360] ss:$24 sps:$4 sm:$0xff]   ;;  %vm4061_vm12 = vcmp.gt.f32.partialorder %v13620_v16, 0.0 }
 0x243   :  { %v13661_v32 = vsel %vm2509_vm10, %v2962_v19, -3e+38  ;;  %v13664_v53 = vsel %vm2509_vm10, %v2963_v60, -3e+38  ;;  %v13667_v61 = vsel %vm2509_vm10, %v2964_v28, -3e+38  ;;  %v1858_v60 = vcombine.low %v13658_v33, %v13670_v40  ;;  %8135 = vmatpush1.bf16.msra.mxu0 %v8927_v15 }
 0x244   :  { %16560 = vst [vmem:[#allocation80_spill] sm:$0xff] %v13664_v53  ;;  %16561 = vst [vmem:[#allocation43_spill] sm:$0xff] %v13667_v61  ;;  %v13677_v27 = vsel %vm2509_vm10, %v2965_v6, -3e+38  ;;  %v13680_v18 = vsel %vm2509_vm10, %v2966_v42, -3e+38  ;;  %v4123_v6 = vcombine.high %v13175_v1, %v13175_v1  ;;  %v3347_v28 = vcombine.high %v13236_v56, %v13236_v56 }
 0x245   :  { %16563 = vst [vmem:[#allocation84_spill] sm:$0xff] %v13677_v27  ;;  %16564 = vst [vmem:[#allocation113_spill] sm:$0xff] %v13680_v18  ;;  %v13683_v19 = vsel %vm2509_vm10, %v2967_v58, -3e+38  ;;  %v8922_v42 = vld [vmem:[#allocation12 + $0x64] ss:$24 sps:$4 sm:$0xff]   ;;  %v2039_v50 = vrot.slane %v1858_v60, %v9797_v4  ;;  %v2043_v33 = vrot.slane %v1858_v60, %v9800_v5  ;;  %v2047_v17 = vrot.slane %v1858_v60, %v9854_v34 }
 0x246   :  { %16565 = vst [vmem:[#allocation34_spill] sm:$0xff] %v13683_v19  ;;  %v13697_v58 = vsel %vm176_vm9, %v633_v41, -3e+38  ;;  %v3345_v41 = vcombine.high %v13230_v25, %v13233_v45  ;;  %8093 = vmatprep.subr.bf16.mxu1 %v8922_v42  ;;  %v2051_v30 = vrot.slane %v1858_v60, %v9911_v11  ;;  %v2055_v1 = vrot.slane %v1858_v60, %v9965_v14  ;;  %v13725_v42 = vpop.permute.xlu0 %4816  ;;  %v13727_v26 = vpop.permute.xlu1 %1131  ;;  %v16636_v53 = vld [vmem:[#allocation94_spill] sm:$0xff] }
 0x247   :  { %8094 = vmatpush1.bf16.msra.mxu1 %v8926_v57  ;;  %v2059_v25 = vrot.slane %v1858_v60, %v10057_v7  ;;  %v13720_v45 = vrot.slane %v4121_v62, %v16335_v37  ;;  %v13723_v56 = vrot.slane %v4123_v6, %v16335_v37  ;;  %v2186_v40 = vmul.f32 %v2039_v50, %v13418_v0 }
 0x248   :  { %v2187_v19 = vmul.f32 %v2043_v33, %v13418_v0  ;;  %v2188_v57 = vmul.f32 %v2047_v17, %v13418_v0  ;;  %v2189_v44 = vmul.f32 %v2051_v30, %v13418_v0  ;;  %v2190_v60 = vmul.f32 %v2055_v1, %v13418_v0 }
 0x249   :  { %16566 = vst [vmem:[#allocation119_spill] sm:$0xff] %v13720_v45  ;;  %16567 = vst [vmem:[#allocation38_spill] sm:$0xff] %v13723_v56  ;;  %v2191_v62 = vmul.f32 %v2059_v25, %v13418_v0  ;;  %v4186_v6 = vcombine.low %v13720_v45, %v13723_v56  ;;  %v13738_v18 = vrot.slane %v3345_v41, %v16335_v37  ;;  %v13742_v15 = vsel %vm1733_vm11, %v2186_v40, -3e+38 }
 0x24a   :  { %16569 = vst [vmem:[#allocation29_spill] sm:$0xff] %v13742_v15  ;;  %v13746_v33 = vsel %vm1733_vm11, %v2187_v19, -3e+38  ;;  %v13750_v50 = vsel %vm1733_vm11, %v2188_v57, -3e+38  ;;  %v13753_v0 = vrot.slane %v3347_v28, %v16335_v37  ;;  %v13782_v56 = vpop.permute.xlu0 %350  ;;  %v13784_v30 = vpop.permute.xlu1 %2683  ;;  %vm3285_vm13 = vcmp.gt.f32.partialorder %v13672_v29, 0.0 }
 0x24b   :  { %16568 = vst [vmem:[#allocation53_spill] sm:$0xff] %v13738_v18  ;;  %16570 = vst [vmem:[#allocation120_spill] sm:$0xff] %v13746_v33  ;;  %v13757_v17 = vsel %vm1733_vm11, %v2189_v44, -3e+38  ;;  %v13761_v41 = vsel %vm1733_vm11, %v2190_v60, -3e+38  ;;  %v4371_v45 = vrot.slane %v4186_v6, %v9800_v5  ;;  %v4375_v19 = vrot.slane %v4186_v6, %v9854_v34 }
 0x24c   :  { %16571 = vst [vmem:[#allocation110_spill] sm:$0xff] %v13750_v50  ;;  %16572 = vst [vmem:[#allocation82_spill] sm:$0xff] %v13753_v0  ;;  %v13765_v40 = vsel %vm1733_vm11, %v2191_v62, -3e+38  ;;  %v4367_v62 = vrot.slane %v4186_v6, %v9797_v4  ;;  %v4379_v28 = vrot.slane %v4186_v6, %v9911_v11  ;;  %v4383_v1 = vrot.slane %v4186_v6, %v9965_v14 }
 0x24d   :  { %16573 = vst [vmem:[#allocation47_spill] sm:$0xff] %v13757_v17  ;;  %16574 = vst [vmem:[#allocation49_spill] sm:$0xff] %v13761_v41  ;;  %v4387_v17 = vrot.slane %v4186_v6, %v10057_v7  ;;  %v3410_v57 = vcombine.low %v13738_v18, %v13753_v0  ;;  %v4515_v60 = vmul.f32 %v4371_v45, %v16579_v23  ;;  %vm5613_vm14 = vcmp.gt.f32.partialorder %v13674_v52, 0.0 }
 0x24e   :  { %16575 = vst [vmem:[#allocation26_spill] sm:$0xff] %v13765_v40  ;;  %v4514_v40 = vmul.f32 %v4367_v62, %v16579_v23  ;;  %v4516_v41 = vmul.f32 %v4375_v19, %v16579_v23  ;;  %v4517_v25 = vmul.f32 %v4379_v28, %v16579_v23  ;;  %v4518_v44 = vmul.f32 %v4383_v1, %v16579_v23  ;;  %v13834_v15 = vpop.permute.xlu0 %1907  ;;  %v13836_v16 = vpop.permute.xlu1 %4235  ;;  %v16628_v1 = vld [vmem:[#allocation111_spill] sm:$0xff] }
 0x24f   :  { %v4519_v50 = vmul.f32 %v4387_v17, %v16579_v23  ;;  %v3591_v49 = vrot.slane %v3410_v57, %v9797_v4  ;;  %v13805_v62 = vsel %vm4061_vm12, %v4515_v60, -3e+38  ;;  %v3595_v19 = vrot.slane %v3410_v57, %v9800_v5  ;;  %16591 = vst [vmem:[#allocation86_spill] sm:$0xff] %v13834_v15  ;;  %16592 = vst [vmem:[#allocation122_spill] sm:$0xff] %v13836_v16  ;;  %v16629_v16 = vld [vmem:[#allocation112_spill] sm:$0xff] }
 0x250   :  { %v13801_v6 = vsel %vm4061_vm12, %v4514_v40, -3e+38  ;;  %16581 = vst [vmem:[#allocation25_spill] sm:$0xff] %v13805_v62  ;;  %v13809_v45 = vsel %vm4061_vm12, %v4516_v41, -3e+38  ;;  %v3599_v60 = vrot.slane %v3410_v57, %v9854_v34  ;;  %v3603_v23 = vrot.slane %v3410_v57, %v9911_v11 }
 0x251   :  { %16580 = vst [vmem:[#allocation56_spill] sm:$0xff] %v13801_v6  ;;  %16582 = vst [vmem:[#allocation85_spill] sm:$0xff] %v13809_v45  ;;  %v13814_v28 = vsel %vm4061_vm12, %v4517_v25, -3e+38  ;;  %v13818_v17 = vsel %vm4061_vm12, %v4518_v44, -3e+38  ;;  %v3607_v62 = vrot.slane %v3410_v57, %v9965_v14  ;;  %v3611_v0 = vrot.slane %v3410_v57, %v10057_v7 }
 0x252   :  { %16583 = vst [vmem:[#allocation121_spill] sm:$0xff] %v13814_v28  ;;  %16584 = vst [vmem:[#allocation28_spill] sm:$0xff] %v13818_v17  ;;  %v13822_v40 = vsel %vm4061_vm12, %v4519_v50, -3e+38  ;;  %v3738_v33 = vmul.f32 %v3591_v49, %v13474_v46  ;;  %v3739_v28 = vmul.f32 %v3595_v19, %v13474_v46  ;;  %v16594_v44 = vld [vmem:[#allocation103_spill] sm:$0xff]  ;;  %v16595_v17 = vld [vmem:[#allocation128_spill] sm:$0xff]  ;;  %v3740_v25 = vmul.f32 %v3599_v60, %v13474_v46 }
 0x253   :  { %16585 = vst [vmem:[#allocation115_spill] sm:$0xff] %v13822_v40  ;;  %v5673_v31 = vcombine.high %v16595_v17, %v16594_v44  ;;  %v3741_v45 = vmul.f32 %v3603_v23, %v13474_v46  ;;  %v3742_v9 = vmul.f32 %v3607_v62, %v13474_v46  ;;  %v16596_v40 = vld [vmem:[#allocation130_spill] sm:$0xff]  ;;  %v3743_v18 = vmul.f32 %v3611_v0, %v13474_v46  ;;  %v13889_v44 = vpop.permute.xlu0 %3459 }
 0x254   :  { %v5675_v50 = vcombine.high %v16596_v40, %v16596_v40  ;;  %v13856_v57 = vsel %vm3285_vm13, %v3738_v33, -3e+38  ;;  %v13860_v49 = vsel %vm3285_vm13, %v3739_v28, -3e+38  ;;  %v13867_v17 = vsel %vm3285_vm13, %v3740_v25, -3e+38 }
 0x255   :  { %16597 = vst [vmem:[#allocation32_spill] sm:$0xff] %v13856_v57  ;;  %16598 = vst [vmem:[#allocation116_spill] sm:$0xff] %v13860_v49  ;;  %v13863_v19 = vrot.slane %v5673_v31, %v16335_v37  ;;  %v13871_v62 = vsel %vm3285_vm13, %v3741_v45, -3e+38  ;;  %v13875_v46 = vsel %vm3285_vm13, %v3742_v9, -3e+38  ;;  %v13891_v9 = vpop.permute.xlu1 %5787  ;;  %v13949_v35 = vcombine.high %v16629_v16, %v16628_v1 }
 0x256   :  { %16600 = vst [vmem:[#allocation55_spill] sm:$0xff] %v13867_v17  ;;  %16601 = vst [vmem:[#allocation76_spill] sm:$0xff] %v13871_v62  ;;  %v13881_v28 = vsel %vm3285_vm13, %v3743_v18, -3e+38  ;;  %v13896_v0 = vsel %vm176_vm9, %v13623_v54, -3e+38  ;;  %v13903_v23 = vrot.slane %v5675_v50, %v16335_v37 }
 0x257   :  { %16599 = vst [vmem:[#allocation73_spill] sm:$0xff] %v13863_v19  ;;  %16602 = vst [vmem:[#allocation123_spill] sm:$0xff] %v13875_v46  ;;  %v16613_v25 = vld [vmem:[#allocation46_spill] sm:$0xff]  ;;  %v16616_v31 = vld [vmem:[#allocation131_spill] sm:$0xff]  ;;  %vm4837_vm15 = vcmp.gt.f32.partialorder %v13725_v42, 0.0 }
 0x258   :  { %16604 = vst [vmem:[#allocation108_spill] sm:$0xff] %v13881_v28  ;;  %16608 = vst [vmem:[#allocation54_spill] sm:$0xff] %v13889_v44  ;;  %v16614_v45 = vld [vmem:[#allocation74_spill] sm:$0xff]  ;;  %v16618_v18 = vld [vmem:[#allocation77_spill] sm:$0xff]  ;;  %v5738_v62 = vcombine.low %v13863_v19, %v13903_v23 }
 0x259   :  { %16609 = vst [vmem:[#allocation63_spill] sm:$0xff] %v13891_v9  ;;  %16612 = vst [vmem:[#allocation79_spill] sm:$0xff] %v13903_v23  ;;  %v16615_v60 = vld [vmem:[#allocation22_spill] sm:$0xff]  ;;  %v16620_v50 = vld [vmem:[#allocation31_spill] sm:$0xff]  ;;  %v13942_v33 = vpop.permute.xlu1 %943 }
 0x25a   :  { %v4897_v47 = vcombine.high %v16616_v31, %v16615_v60  ;;  %v16617_v54 = vld [vmem:[#allocation42_spill] sm:$0xff]  ;;  %v16621_v17 = vld [vmem:[#allocation45_spill] sm:$0xff]  ;;  %v5923_v28 = vrot.slane %v5738_v62, %v9800_v5  ;;  %v5927_v40 = vrot.slane %v5738_v62, %v9854_v34  ;;  %v5931_v46 = vrot.slane %v5738_v62, %v9911_v11  ;;  %v16625_v57 = vld [vmem:[#allocation107_spill] sm:$0xff] }
 0x25b   :  { %v4899_v9 = vcombine.high %v16617_v54, %v16617_v54  ;;  %v16619_v49 = vld [vmem:[#allocation78_spill] sm:$0xff]  ;;  %v5919_v54 = vrot.slane %v5738_v62, %v9797_v4  ;;  %v5935_v19 = vrot.slane %v5738_v62, %v9965_v14  ;;  %v5939_v29 = vrot.slane %v5738_v62, %v10057_v7  ;;  %v16627_v44 = vld [vmem:[#allocation97_spill] sm:$0xff] }
 0x25c   :  { %v13925_v31 = vrot.slane %v4897_v47, %v16335_v37  ;;  %v13938_v47 = vpop.permute.xlu0 %5011  ;;  %v6067_v6 = vmul.f32 %v5923_v28, %v16627_v44  ;;  %v6068_v62 = vmul.f32 %v5927_v40, %v16627_v44  ;;  %vm958_vm0 = vcmp.gt.f32.partialorder %v13942_v33, 0.0 }
 0x25d   :  { %v13928_v60 = vrot.slane %v4899_v9, %v16335_v37  ;;  %16624 = vst [vmem:[#allocation130_spill] sm:$0xff] %v13938_v47  ;;  %v16626_v9 = vld [vmem:[#allocation57_spill] sm:$0xff]  ;;  %v6066_v41 = vmul.f32 %v5919_v54, %v16627_v44  ;;  %v526_v33 = vrot.slane %v13949_v35, %v10057_v7 }
 0x25e   :  { %16622 = vst [vmem:[#allocation103_spill] sm:$0xff] %v13925_v31  ;;  %v1079_v37 = vcombine.high %v16626_v9, %v16625_v57  ;;  %v6071_v57 = vmul.f32 %v5939_v29, %v16627_v44  ;;  %v13965_v1 = vsel %vm5613_vm14, %v6067_v6, -3e+38  ;;  %v13969_v16 = vsel %vm5613_vm14, %v6068_v62, -3e+38  ;;  %v16640_v62 = vld [vmem:[#allocation114_spill] sm:$0xff] }
 0x25f   :  { %16623 = vst [vmem:[#allocation128_spill] sm:$0xff] %v13928_v60  ;;  %v4962_v23 = vcombine.low %v13925_v31, %v13928_v60  ;;  %v6069_v31 = vmul.f32 %v5931_v46, %v16627_v44  ;;  %v6070_v60 = vmul.f32 %v5935_v19, %v16627_v44  ;;  %v13957_v9 = vsel %vm5613_vm14, %v6066_v41, -3e+38  ;;  %16631 = vst [vmem:[#allocation74_spill] sm:$0xff] %v13969_v16 }
 0x260   :  { %16630 = vst [vmem:[#allocation46_spill] sm:$0xff] %v13957_v9  ;;  %v1287_v19 = vrot.slane %v1079_v37, %v9797_v4  ;;  %v1291_v41 = vrot.slane %v1079_v37, %v9800_v5  ;;  %v13983_v6 = vsel %vm5613_vm14, %v6071_v57, -3e+38  ;;  %v1295_v44 = vrot.slane %v1079_v37, %v9854_v34  ;;  %v13991_v61 = vpop.permute.xlu0 %162 }
 0x261   :  { %v5143_v28 = vrot.slane %v4962_v23, %v9797_v4  ;;  %v5147_v54 = vrot.slane %v4962_v23, %v9800_v5  ;;  %v5151_v47 = vrot.slane %v4962_v23, %v9854_v34  ;;  %v13975_v46 = vsel %vm5613_vm14, %v6069_v31, -3e+38  ;;  %16633 = vst [vmem:[#allocation131_spill] sm:$0xff] %v13983_v6 }
 0x262   :  { %v13979_v40 = vsel %vm5613_vm14, %v6070_v60, -3e+38  ;;  %v5155_v27 = vrot.slane %v4962_v23, %v9911_v11  ;;  %v5159_v51 = vrot.slane %v4962_v23, %v9965_v14  ;;  %v5163_v31 = vrot.slane %v4962_v23, %v10057_v7  ;;  %v16635_v60 = vld [vmem:[#allocation89_spill] sm:$0xff] }
 0x263   :  { %16632 = vst [vmem:[#allocation22_spill] sm:$0xff] %v13979_v40  ;;  %v5290_v52 = vmul.f32 %v5143_v28, %v13537_v3  ;;  %v5291_v57 = vmul.f32 %v5147_v54, %v13537_v3  ;;  %v5292_v15 = vmul.f32 %v5151_v47, %v13537_v3  ;;  %v1299_v23 = vrot.slane %v1079_v37, %v9911_v11 }
 0x264   :  { %v5293_v9 = vmul.f32 %v5155_v27, %v13537_v3  ;;  %v5294_v29 = vmul.f32 %v5159_v51, %v13537_v3  ;;  %v5295_v8 = vmul.f32 %v5163_v31, %v13537_v3  ;;  %vm177_vm1 = vcmp.gt.f32.partialorder %v13991_v61, 0.0  ;;  %v16637_v51 = vld [vmem:[#allocation88_spill] sm:$0xff] }
 0x265   :  { %v14006_v10 = vsel %vm4837_vm15, %v5290_v52, -3e+38  ;;  %v14010_v28 = vsel %vm4837_vm15, %v5291_v57, -3e+38  ;;  %v14014_v47 = vsel %vm4837_vm15, %v5292_v15, -3e+38  ;;  %v1303_v54 = vrot.slane %v1079_v37, %v9965_v14 }
 0x266   :  { %v14021_v3 = vsel %vm4837_vm15, %v5293_v9, -3e+38  ;;  %v1307_v31 = vrot.slane %v1079_v37, %v10057_v7  ;;  %v16639_v52 = vld [vmem:[#allocation99_spill] sm:$0xff]  ;;  %v14031_v16 = vsel %vm4837_vm15, %v5294_v29, -3e+38  ;;  %v1416_v40 = vmul.f32 %v1287_v19, %v13727_v26 }
 0x267   :  { %16638 = vst [vmem:[#allocation42_spill] sm:$0xff] %v14021_v3  ;;  %16641 = vst [vmem:[#allocation77_spill] sm:$0xff] %v14031_v16  ;;  %v14035_v27 = vsel %vm4837_vm15, %v5295_v8, -3e+38  ;;  %v1417_v29 = vmul.f32 %v1291_v41, %v13727_v26  ;;  %v1418_v42 = vmul.f32 %v1295_v44, %v13727_v26  ;;  %v1419_v8 = vmul.f32 %v1299_v23, %v13727_v26  ;;  %v16652_v3 = vld [vmem:[#allocation62_spill] sm:$0xff] }
 0x268   :  { %16642 = vst [vmem:[#allocation78_spill] sm:$0xff] %v14035_v27  ;;  %v1420_v6 = vmul.f32 %v1303_v54, %v13727_v26  ;;  %v1421_v9 = vmul.f32 %v1307_v31, %v13727_v26  ;;  %v1480_v37 = vsel %vm958_vm0, %v1416_v40, -3e+38  ;;  %v506_v57 = vrot.slane %v13949_v35, %v9797_v4  ;;  %v16648_v27 = vld [vmem:[#allocation40_spill] sm:$0xff] }
 0x269   :  { %v1481_v41 = vsel %vm958_vm0, %v1417_v29, -3e+38  ;;  %v1482_v44 = vsel %vm958_vm0, %v1418_v42, -3e+38  ;;  %v510_v23 = vrot.slane %v13949_v35, %v9800_v5  ;;  %v1483_v40 = vsel %vm958_vm0, %v1419_v8, -3e+38 }
 0x26a   :  { %v1484_v54 = vsel %vm958_vm0, %v1420_v6, -3e+38  ;;  %v1485_v31 = vsel %vm958_vm0, %v1421_v9, -3e+38  ;;  %v16643_v29 = vmax.f32 %v12995_v59, %v13560_v22  ;;  %v514_v42 = vrot.slane %v13949_v35, %v9854_v34  ;;  %v16646_v22 = vld [vmem:[#allocation109_spill] sm:$0xff]  ;;  %v16647_v9 = vld [vmem:[#allocation83_spill] sm:$0xff] }
 0x26b   :  { %v518_v26 = vrot.slane %v13949_v35, %v9911_v11  ;;  %v522_v8 = vrot.slane %v13949_v35, %v9965_v14  ;;  %v16645_v6 = vmax.f32 %v13001_v38, %v13564_v48  ;;  %v635_v59 = vmul.f32 %v506_v57, %v13782_v56 }
 0x26c   :  { %v14074_v19 = vmax.f32 %v16643_v29, %v1480_v37  ;;  %v2631_v37 = vcombine.high %v16647_v9, %v16646_v22  ;;  %v2496_v29 = vpop.permute.xlu1 %2495  ;;  %v16650_v16 = vmax.f32 %v16648_v27, %v16649_v21  ;;  %v636_v48 = vmul.f32 %v510_v23, %v13782_v56  ;;  %v16655_v27 = vld [vmem:[#allocation50_spill] sm:$0xff]  ;;  %v16658_v23 = vld [vmem:[#allocation72_spill] sm:$0xff] }
 0x26d   :  { %v14085_v15 = vmax.f32 %v16645_v6, %v1481_v41  ;;  %v637_v35 = vmul.f32 %v514_v42, %v13782_v56  ;;  %v638_v57 = vmul.f32 %v518_v26, %v13782_v56  ;;  %v639_v41 = vmul.f32 %v522_v8, %v13782_v56 }
 0x26e   :  { %16644 = vst [vmem:[#allocation31_spill] sm:$0xff] %v14074_v19  ;;  %v14095_v43 = vmax.f32 %v16650_v16, %v1482_v44  ;;  %v16651_v19 = vld [vmem:[#allocation81_spill] sm:$0xff]  ;;  %v699_v6 = vsel %vm177_vm1, %v635_v59, -3e+38  ;;  %v2839_v21 = vrot.slane %v2631_v37, %v9797_v4  ;;  %v16654_v16 = vld [vmem:[#allocation39_spill] sm:$0xff]  ;;  %vm2510_vm2 = vcmp.gt.f32.partialorder %v2496_v29, 0.0 }
 0x26f   :  { %v16653_v20 = vmax.f32 %v16651_v19, %v16652_v3  ;;  %v16656_v44 = vmax.f32 %v16654_v16, %v16655_v27  ;;  %v700_v3 = vsel %vm177_vm1, %v636_v48, -3e+38  ;;  %v16657_v19 = vld [vmem:[#allocation90_spill] sm:$0xff]  ;;  %v701_v42 = vsel %vm177_vm1, %v637_v35, -3e+38  ;;  %v16663_v27 = vld [vmem:[#allocation59_spill] sm:$0xff] }
 0x270   :  { %v16659_v26 = vmax.f32 %v16657_v19, %v16658_v23  ;;  %v702_v8 = vsel %vm177_vm1, %v638_v57, -3e+38  ;;  %v2847_v9 = vrot.slane %v2631_v37, %v9854_v34  ;;  %v16661_v48 = vmax.f32 %v16614_v45, %v13631_v36  ;;  %v1720_v45 = vpop.permute.xlu0 %1719  ;;  %v16686_v29 = vld [vmem:[#allocation33_spill] sm:$0xff] }
 0x271   :  { %v14100_v38 = vmax.f32 %v16653_v20, %v1483_v40  ;;  %v14112_v22 = vmax.f32 %v16656_v44, %v1484_v54  ;;  %v640_v20 = vmul.f32 %v526_v33, %v13782_v56  ;;  %v703_v54 = vsel %vm177_vm1, %v639_v41, -3e+38  ;;  %v16664_v44 = vld [vmem:[#allocation66_spill] sm:$0xff] }
 0x272   :  { %v14120_v40 = vmax.f32 %v16659_v26, %v1485_v31  ;;  %v16660_v33 = vmax.f32 %v16613_v25, %v13627_v13  ;;  %v2843_v31 = vrot.slane %v2631_v37, %v9800_v5  ;;  %v14140_v35 = vmax.f32 %v16661_v48, %v700_v3  ;;  %v16671_v48 = vld [vmem:[#allocation58_spill] sm:$0xff] }
 0x273   :  { %v704_v56 = vsel %vm177_vm1, %v640_v20, -3e+38  ;;  %v2851_v57 = vrot.slane %v2631_v37, %v9911_v11  ;;  %v2855_v41 = vrot.slane %v2631_v37, %v9965_v14  ;;  %v2968_v61 = vmul.f32 %v2839_v21, %v13784_v30 }
 0x274   :  { %v14133_v59 = vmax.f32 %v16660_v33, %v699_v6  ;;  %v16662_v13 = vmax.f32 %v16618_v18, %v13635_v2  ;;  %v2859_v6 = vrot.slane %v2631_v37, %v10057_v7  ;;  %v2969_v16 = vmul.f32 %v2843_v31, %v13784_v30  ;;  %v14177_v31 = vpop.permute.xlu1 %4047 }
 0x275   :  { %v1855_v36 = vcombine.high %v16664_v44, %v16663_v27  ;;  %v16665_v20 = vmax.f32 %v16619_v49, %v13639_v12  ;;  %v2970_v21 = vmul.f32 %v2847_v9, %v13784_v30  ;;  %v2971_v19 = vmul.f32 %v2851_v57, %v13784_v30  ;;  %v8928_v57 = vld [vmem:[#allocation12 + $0x94] ss:$24 sps:$4 sm:$0xff]   ;;  %v8933_v27 = vld [vmem:[#allocation12 + $0x390] ss:$24 sps:$4 sm:$0xff]   ;;  %v16675_v44 = vld [vmem:[#allocation86_spill] sm:$0xff] }
 0x276   :  { %v14148_v25 = vmax.f32 %v16662_v13, %v701_v42  ;;  %v3032_v2 = vsel %vm2510_vm2, %v2968_v61, -3e+38  ;;  %v16666_v18 = vmax.f32 %v16620_v50, %v13697_v58  ;;  %v2972_v23 = vmul.f32 %v2855_v41, %v13784_v30  ;;  %v8930_v41 = vld [vmem:[#allocation12 + $0x394] ss:$24 sps:$4 sm:$0xff]   ;;  %8095 = vmatprep.subr.bf16.mxu1 %v8928_v57 }
 0x277   :  { %v14157_v3 = vmax.f32 %v16665_v20, %v702_v8  ;;  %v3033_v26 = vsel %vm2510_vm2, %v2969_v16, -3e+38  ;;  %v2063_v42 = vrot.slane %v1855_v36, %v9797_v4  ;;  %v16667_v12 = vmax.f32 %v16621_v17, %v13896_v0  ;;  %v16672_v17 = vld [vmem:[#allocation80_spill] sm:$0xff]  ;;  %8136 = vmatprep.subr.bf16.mxu0 %v8930_v41 }
 0x278   :  { %v14165_v37 = vmax.f32 %v16666_v18, %v703_v54  ;;  %v3034_v8 = vsel %vm2510_vm2, %v2970_v21, -3e+38  ;;  %v3035_v33 = vsel %vm2510_vm2, %v2971_v19, -3e+38  ;;  %vm1734_vm3 = vcmp.gt.f32.partialorder %v1720_v45, 0.0  ;;  %v16676_v21 = vld [vmem:[#allocation102_spill] sm:$0xff]  ;;  %8137 = vmatpush1.bf16.msra.mxu0 %v8933_v27 }
 0x279   :  { %v14173_v49 = vmax.f32 %v16667_v12, %v704_v56  ;;  %v2973_v58 = vmul.f32 %v2859_v6, %v13784_v30  ;;  %v3036_v50 = vsel %vm2510_vm2, %v2972_v23, -3e+38  ;;  %v16669_v54 = vmax.f32 %v13115_v24, %v13661_v32  ;;  %v8932_v16 = vld [vmem:[#allocation12 + $0x90] ss:$24 sps:$4 sm:$0xff]   ;;  %v16677_v19 = vld [vmem:[#allocation61_spill] sm:$0xff] }
 0x27a   :  { %v16673_v0 = vmax.f32 %v16671_v48, %v16672_v17  ;;  %v2067_v61 = vrot.slane %v1855_v36, %v9800_v5  ;;  %v2071_v13 = vrot.slane %v1855_v36, %v9854_v34  ;;  %v2075_v30 = vrot.slane %v1855_v36, %v9911_v11  ;;  %v16678_v18 = vld [vmem:[#allocation52_spill] sm:$0xff]  ;;  %v16679_v23 = vld [vmem:[#allocation43_spill] sm:$0xff]  ;;  %8096 = vmatpush1.bf16.msra.mxu1 %v8932_v16 }
 0x27b   :  { %16668 = vst [vmem:[#allocation45_spill] sm:$0xff] %v14173_v49  ;;  %v14184_v9 = vmax.f32 %v16669_v54, %v3032_v2  ;;  %v2079_v6 = vrot.slane %v1855_v36, %v9965_v14  ;;  %v3037_v24 = vsel %vm2510_vm2, %v2973_v58, -3e+38  ;;  %v2083_v32 = vrot.slane %v1855_v36, %v10057_v7  ;;  %v16682_v54 = vld [vmem:[#allocation51_spill] sm:$0xff]  ;;  %v16683_v48 = vld [vmem:[#allocation84_spill] sm:$0xff]  ;;  %v16687_v58 = vld [vmem:[#allocation113_spill] sm:$0xff] }
 0x27c   :  { %v14189_v56 = vmax.f32 %v16673_v0, %v3033_v26  ;;  %v2192_v20 = vmul.f32 %v2063_v42, %v16675_v44  ;;  %v4183_v2 = vcombine.high %v16677_v19, %v16676_v21  ;;  %v16680_v26 = vmax.f32 %v16678_v18, %v16679_v23  ;;  %v16690_v19 = vld [vmem:[#allocation44_spill] sm:$0xff] }
 0x27d   :  { %16670 = vst [vmem:[#allocation107_spill] sm:$0xff] %v14184_v9  ;;  %v16684_v17 = vmax.f32 %v16682_v54, %v16683_v48  ;;  %v16688_v36 = vmax.f32 %v16686_v29, %v16687_v58  ;;  %v2193_v42 = vmul.f32 %v2067_v61, %v16675_v44  ;;  %v2194_v57 = vmul.f32 %v2071_v13, %v16675_v44  ;;  %v14228_v61 = vpop.permute.xlu1 %5599  ;;  %v16694_v54 = vld [vmem:[#allocation68_spill] sm:$0xff]  ;;  %v16766_v9 = vld [vmem:[#allocation123_spill] sm:$0xff] }
 0x27e   :  { %16674 = vst [vmem:[#allocation57_spill] sm:$0xff] %v14189_v56  ;;  %v14203_v12 = vmax.f32 %v16680_v26, %v3034_v8  ;;  %v2195_v41 = vmul.f32 %v2075_v30, %v16675_v44  ;;  %v2256_v8 = vsel %vm1734_vm3, %v2192_v20, -3e+38  ;;  %v4391_v21 = vrot.slane %v4183_v2, %v9797_v4 }
 0x27f   :  { %v14208_v0 = vmax.f32 %v16684_v17, %v3035_v33  ;;  %v14213_v56 = vmax.f32 %v16688_v36, %v3036_v50  ;;  %v16691_v33 = vld [vmem:[#allocation34_spill] sm:$0xff]  ;;  %v2196_v50 = vmul.f32 %v2079_v6, %v16675_v44  ;;  %v2197_v26 = vmul.f32 %v2083_v32, %v16675_v44  ;;  %v16695_v6 = vld [vmem:[#allocation29_spill] sm:$0xff] }
 0x280   :  { %16681 = vst [vmem:[#allocation97_spill] sm:$0xff] %v14203_v12  ;;  %v16692_v18 = vmax.f32 %v16690_v19, %v16691_v33  ;;  %vm4062_vm4 = vcmp.gt.f32.partialorder %v14177_v31, 0.0  ;;  %v2257_v13 = vsel %vm1734_vm3, %v2193_v42, -3e+38  ;;  %v2258_v30 = vsel %vm1734_vm3, %v2194_v57, -3e+38 }
 0x281   :  { %16685 = vst [vmem:[#allocation111_spill] sm:$0xff] %v14208_v0  ;;  %16689 = vst [vmem:[#allocation112_spill] sm:$0xff] %v14213_v56  ;;  %v2259_v16 = vsel %vm1734_vm3, %v2195_v41, -3e+38  ;;  %v4395_v27 = vrot.slane %v4183_v2, %v9800_v5  ;;  %v2260_v20 = vsel %vm1734_vm3, %v2196_v50, -3e+38  ;;  %v16696_v48 = vmax.f32 %v16694_v54, %v16695_v6  ;;  %v3272_v56 = vpop.permute.xlu0 %3271 }
 0x282   :  { %v14223_v23 = vmax.f32 %v16692_v18, %v3037_v24  ;;  %v2261_v24 = vsel %vm1734_vm3, %v2197_v26, -3e+38  ;;  %v4399_v44 = vrot.slane %v4183_v2, %v9854_v34  ;;  %v4403_v17 = vrot.slane %v4183_v2, %v9911_v11  ;;  %v16698_v36 = vld [vmem:[#allocation122_spill] sm:$0xff]  ;;  %v16700_v41 = vld [vmem:[#allocation120_spill] sm:$0xff]  ;;  %v16703_v33 = vld [vmem:[#allocation69_spill] sm:$0xff] }
 0x283   :  { %v14239_v32 = vmax.f32 %v16696_v48, %v2256_v8  ;;  %v4407_v29 = vrot.slane %v4183_v2, %v9965_v14  ;;  %v4411_v58 = vrot.slane %v4183_v2, %v10057_v7  ;;  %v4520_v42 = vmul.f32 %v4391_v21, %v16698_v36  ;;  %v16699_v57 = vld [vmem:[#allocation106_spill] sm:$0xff]  ;;  %v16707_v26 = vld [vmem:[#allocation101_spill] sm:$0xff]  ;;  %v16708_v54 = vld [vmem:[#allocation47_spill] sm:$0xff] }
 0x284   :  { %16693 = vst [vmem:[#allocation89_spill] sm:$0xff] %v14223_v23  ;;  %v16701_v19 = vmax.f32 %v16699_v57, %v16700_v41  ;;  %v16704_v18 = vld [vmem:[#allocation110_spill] sm:$0xff]  ;;  %v16709_v6 = vmax.f32 %v16707_v26, %v16708_v54  ;;  %v16712_v23 = vld [vmem:[#allocation23_spill] sm:$0xff]  ;;  %v16713_v21 = vld [vmem:[#allocation60_spill] sm:$0xff]  ;;  %v4522_v41 = vmul.f32 %v4399_v44, %v16698_v36  ;;  %vm3286_vm5 = vcmp.gt.f32.partialorder %v3272_v56, 0.0 }
 0x285   :  { %16697 = vst [vmem:[#allocation94_spill] sm:$0xff] %v14239_v32  ;;  %v16705_v50 = vmax.f32 %v16703_v33, %v16704_v18  ;;  %v16711_v32 = vld [vmem:[#allocation65_spill] sm:$0xff]  ;;  %v4525_v33 = vmul.f32 %v4411_v58, %v16698_v36  ;;  %vm5614_vm6 = vcmp.gt.f32.partialorder %v14228_v61, 0.0  ;;  %v16755_v56 = vld [vmem:[#allocation116_spill] sm:$0xff] }
 0x286   :  { %v14249_v45 = vmax.f32 %v16701_v19, %v2257_v13  ;;  %v14259_v48 = vmax.f32 %v16709_v6, %v2259_v16  ;;  %v3407_v2 = vcombine.high %v16712_v23, %v16711_v32  ;;  %v16714_v0 = vld [vmem:[#allocation49_spill] sm:$0xff]  ;;  %v4521_v13 = vmul.f32 %v4395_v27, %v16698_v36  ;;  %v14276_v32 = vpop.permute.xlu1 %1138 }
 0x287   :  { %v14254_v8 = vmax.f32 %v16705_v50, %v2258_v30  ;;  %v16715_v12 = vmax.f32 %v16713_v21, %v16714_v0  ;;  %v4584_v30 = vsel %vm4062_vm4, %v4520_v42, -3e+38  ;;  %v4523_v19 = vmul.f32 %v4403_v17, %v16698_v36  ;;  %v16717_v0 = vld [vmem:[#allocation24_spill] sm:$0xff] }
 0x288   :  { %16702 = vst [vmem:[#allocation88_spill] sm:$0xff] %v14249_v45  ;;  %16710 = vst [vmem:[#allocation114_spill] sm:$0xff] %v14259_v48  ;;  %v4524_v16 = vmul.f32 %v4407_v29, %v16698_v36  ;;  %v3615_v23 = vrot.slane %v3407_v2, %v9797_v4  ;;  %v4585_v27 = vsel %vm4062_vm4, %v4521_v13, -3e+38  ;;  %v4586_v44 = vsel %vm4062_vm4, %v4522_v41, -3e+38 }
 0x289   :  { %16706 = vst [vmem:[#allocation99_spill] sm:$0xff] %v14254_v8  ;;  %v14266_v57 = vmax.f32 %v16715_v12, %v2260_v20  ;;  %v16718_v12 = vld [vmem:[#allocation26_spill] sm:$0xff]  ;;  %v4587_v17 = vsel %vm4062_vm4, %v4523_v19, -3e+38  ;;  %v4589_v58 = vsel %vm4062_vm4, %v4525_v33, -3e+38  ;;  %v3619_v26 = vrot.slane %v3407_v2, %v9800_v5 }
 0x28a   :  { %v16719_v20 = vmax.f32 %v16717_v0, %v16718_v12  ;;  %v4588_v29 = vsel %vm4062_vm4, %v4524_v16, -3e+38  ;;  %v16721_v36 = vld [vmem:[#allocation124_spill] sm:$0xff]  ;;  %v3623_v54 = vrot.slane %v3407_v2, %v9854_v34  ;;  %v3627_v6 = vrot.slane %v3407_v2, %v9911_v11  ;;  %v16726_v41 = vld [vmem:[#allocation25_spill] sm:$0xff]  ;;  %v16729_v33 = vld [vmem:[#allocation54_spill] sm:$0xff] }
 0x28b   :  { %16716 = vst [vmem:[#allocation109_spill] sm:$0xff] %v14266_v57  ;;  %v16722_v42 = vld [vmem:[#allocation56_spill] sm:$0xff]  ;;  %v3631_v21 = vrot.slane %v3407_v2, %v9965_v14  ;;  %v3635_v31 = vrot.slane %v3407_v2, %v10057_v7  ;;  %v3744_v0 = vmul.f32 %v3615_v23, %v16729_v33  ;;  %v16730_v12 = vld [vmem:[#allocation126_spill] sm:$0xff]  ;;  %v16737_v48 = vld [vmem:[#allocation121_spill] sm:$0xff]  ;;  %v3745_v23 = vmul.f32 %v3619_v26, %v16729_v33 }
 0x28c   :  { %v14281_v18 = vmax.f32 %v16719_v20, %v2261_v24  ;;  %v16723_v24 = vmax.f32 %v16721_v36, %v16722_v42  ;;  %v16725_v13 = vld [vmem:[#allocation36_spill] sm:$0xff]  ;;  %v14311_v36 = vpop.permute.xlu0 %4823  ;;  %v16732_v42 = vld [vmem:[#allocation129_spill] sm:$0xff] }
 0x28d   :  { %v16727_v19 = vmax.f32 %v16725_v13, %v16726_v41  ;;  %v16736_v57 = vld [vmem:[#allocation104_spill] sm:$0xff]  ;;  %v3809_v26 = vsel %vm3286_vm5, %v3745_v23, -3e+38  ;;  %vm4838_vm7 = vcmp.gt.f32.partialorder %v14311_v36, 0.0 }
 0x28e   :  { %16720 = vst [vmem:[#allocation83_spill] sm:$0xff] %v14281_v18  ;;  %v14296_v50 = vmax.f32 %v16723_v24, %v4584_v30  ;;  %v16731_v30 = vld [vmem:[#allocation105_spill] sm:$0xff]  ;;  %v16738_v8 = vmax.f32 %v16736_v57, %v16737_v48  ;;  %v16741_v41 = vld [vmem:[#allocation28_spill] sm:$0xff]  ;;  %v16745_v48 = vld [vmem:[#allocation35_spill] sm:$0xff] }
 0x28f   :  { %v14305_v16 = vmax.f32 %v16727_v19, %v4585_v27  ;;  %v5735_v20 = vcombine.high %v16731_v30, %v16730_v12  ;;  %v16733_v24 = vld [vmem:[#allocation85_spill] sm:$0xff]  ;;  %v3746_v12 = vmul.f32 %v3623_v54, %v16729_v33  ;;  %v3747_v30 = vmul.f32 %v3627_v6, %v16729_v33  ;;  %v16765_v45 = vld [vmem:[#allocation92_spill] sm:$0xff] }
 0x290   :  { %16724 = vst [vmem:[#allocation40_spill] sm:$0xff] %v14296_v50  ;;  %v16734_v50 = vmax.f32 %v16732_v42, %v16733_v24  ;;  %v14321_v13 = vmax.f32 %v16738_v8, %v4587_v17  ;;  %v16740_v27 = vld [vmem:[#allocation125_spill] sm:$0xff]  ;;  %v3808_v42 = vsel %vm3286_vm5, %v3744_v0, -3e+38  ;;  %v16746_v8 = vld [vmem:[#allocation115_spill] sm:$0xff]  ;;  %v3749_v24 = vmul.f32 %v3635_v31, %v16729_v33 }
 0x291   :  { %16728 = vst [vmem:[#allocation21_spill] sm:$0xff] %v14305_v16  ;;  %v16742_v2 = vmax.f32 %v16740_v27, %v16741_v41  ;;  %v16747_v57 = vmax.f32 %v16745_v48, %v16746_v8  ;;  %v3810_v54 = vsel %vm3286_vm5, %v3746_v12, -3e+38  ;;  %v3811_v6 = vsel %vm3286_vm5, %v3747_v30, -3e+38  ;;  %v16753_v30 = vld [vmem:[#allocation63_spill] sm:$0xff] }
 0x292   :  { %v14316_v18 = vmax.f32 %v16734_v50, %v4586_v44  ;;  %16739 = vst [vmem:[#allocation62_spill] sm:$0xff] %v14321_v13  ;;  %v5943_v44 = vrot.slane %v5735_v20, %v9797_v4  ;;  %v14333_v50 = vpop.permute.xlu1 %2690  ;;  %v5947_v0 = vrot.slane %v5735_v20, %v9800_v5  ;;  %v3813_v41 = vsel %vm3286_vm5, %v3749_v24, -3e+38  ;;  %v16764_v16 = vld [vmem:[#allocation87_spill] sm:$0xff] }
 0x293   :  { %v14326_v19 = vmax.f32 %v16742_v2, %v4588_v29  ;;  %16744 = vst [vmem:[#allocation50_spill] sm:$0xff] %v14333_v50  ;;  %v14338_v17 = vmax.f32 %v16747_v57, %v4589_v58  ;;  %v3748_v29 = vmul.f32 %v3631_v21, %v16729_v33  ;;  %v16749_v58 = vld [vmem:[#allocation127_spill] sm:$0xff]  ;;  %v16750_v2 = vld [vmem:[#allocation32_spill] sm:$0xff]  ;;  %v5951_v31 = vrot.slane %v5735_v20, %v9854_v34  ;;  %v14359_v57 = vpop.permute.xlu0 %357 }
 0x294   :  { %16735 = vst [vmem:[#allocation81_spill] sm:$0xff] %v14316_v18  ;;  %v16751_v48 = vmax.f32 %v16749_v58, %v16750_v2  ;;  %v5955_v33 = vrot.slane %v5735_v20, %v9911_v11  ;;  %v5959_v23 = vrot.slane %v5735_v20, %v9965_v14  ;;  %v5963_v12 = vrot.slane %v5735_v20, %v10057_v7  ;;  %v16757_v58 = vld [vmem:[#allocation70_spill] sm:$0xff]  ;;  %v16763_v20 = vld [vmem:[#allocation93_spill] sm:$0xff] }
 0x295   :  { %16743 = vst [vmem:[#allocation39_spill] sm:$0xff] %v14326_v19  ;;  %16748 = vst [vmem:[#allocation90_spill] sm:$0xff] %v14338_v17  ;;  %v3812_v27 = vsel %vm3286_vm5, %v3748_v29, -3e+38  ;;  %v6072_v8 = vmul.f32 %v5943_v44, %v16753_v30  ;;  %v16754_v29 = vld [vmem:[#allocation41_spill] sm:$0xff]  ;;  %v16761_v19 = vld [vmem:[#allocation76_spill] sm:$0xff]  ;;  %v4959_v44 = vcombine.high %v16764_v16, %v16763_v20  ;;  %v16767_v50 = vmax.f32 %v16765_v45, %v16766_v9 }
 0x296   :  { %v14352_v21 = vmax.f32 %v16751_v48, %v3808_v42  ;;  %v16756_v24 = vmax.f32 %v16754_v29, %v16755_v56  ;;  %v16758_v42 = vld [vmem:[#allocation55_spill] sm:$0xff]  ;;  %v6074_v29 = vmul.f32 %v5951_v31, %v16753_v30  ;;  %v14387_v56 = vpop.permute.xlu1 %4242  ;;  %v6077_v16 = vmul.f32 %v5963_v12, %v16753_v30  ;;  %v16769_v45 = vld [vmem:[#allocation108_spill] sm:$0xff]  ;;  %v16771_v12 = vld [vmem:[#allocation98_spill] sm:$0xff] }
 0x297   :  { %v16759_v2 = vmax.f32 %v16757_v58, %v16758_v42  ;;  %v14381_v49 = vmax.f32 %v16767_v50, %v3812_v27  ;;  %v16768_v9 = vld [vmem:[#allocation67_spill] sm:$0xff]  ;;  %v5175_v58 = vrot.slane %v4959_v44, %v9854_v34  ;;  %v5179_v42 = vrot.slane %v4959_v44, %v9911_v11  ;;  %v14418_v20 = vpop.permute.xlu0 %1914 }
 0x298   :  { %16752 = vst [vmem:[#allocation72_spill] sm:$0xff] %v14352_v21  ;;  %v14364_v17 = vmax.f32 %v16756_v24, %v3809_v26  ;;  %v16760_v21 = vld [vmem:[#allocation96_spill] sm:$0xff]  ;;  %v6073_v26 = vmul.f32 %v5947_v0, %v16753_v30  ;;  %v16770_v50 = vmax.f32 %v16768_v9, %v16769_v45  ;;  %v5171_v24 = vrot.slane %v4959_v44, %v9800_v5  ;;  %v16779_v45 = vld [vmem:[#allocation22_spill] sm:$0xff] }
 0x299   :  { %v14369_v48 = vmax.f32 %v16759_v2, %v3810_v54  ;;  %v16762_v13 = vmax.f32 %v16760_v21, %v16761_v19  ;;  %v6136_v54 = vsel %vm5614_vm6, %v6072_v8, -3e+38  ;;  %v6076_v19 = vmul.f32 %v5959_v23, %v16753_v30 }
 0x29a   :  { %v14396_v27 = vmax.f32 %v16770_v50, %v3813_v41  ;;  %v6137_v0 = vsel %vm5614_vm6, %v6073_v26, -3e+38  ;;  %v6138_v21 = vsel %vm5614_vm6, %v6074_v29, -3e+38  ;;  %v6141_v23 = vsel %vm5614_vm6, %v6077_v16, -3e+38 }
 0x29b   :  { %v14374_v18 = vmax.f32 %v16762_v13, %v3811_v6  ;;  %v6075_v13 = vmul.f32 %v5955_v33, %v16753_v30  ;;  %v5167_v6 = vrot.slane %v4959_v44, %v9797_v4  ;;  %v6140_v33 = vsel %vm5614_vm6, %v6076_v19, -3e+38  ;;  %v16772_v41 = vld [vmem:[#allocation46_spill] sm:$0xff] }
 0x29c   :  { %v16773_v30 = vmax.f32 %v16771_v12, %v16772_v41  ;;  %v5183_v2 = vrot.slane %v4959_v44, %v9965_v14  ;;  %v16774_v26 = vmax.f32 %v16635_v60, %v13965_v1  ;;  %v16775_v29 = vld [vmem:[#allocation74_spill] sm:$0xff]  ;;  %v5187_v19 = vrot.slane %v4959_v44, %v10057_v7  ;;  %v16782_v44 = vld [vmem:[#allocation131_spill] sm:$0xff]  ;;  %v14453_v12 = vpop.permute.xlu1 %5794 }
 0x29d   :  { %v6139_v31 = vsel %vm5614_vm6, %v6075_v13, -3e+38  ;;  %v16776_v13 = vmax.f32 %v16636_v53, %v16775_v29  ;;  %v16777_v16 = vld [vmem:[#allocation130_spill] sm:$0xff]  ;;  %v16778_v1 = vmax.f32 %v16637_v51, %v13975_v46  ;;  %v16780_v53 = vmax.f32 %v16639_v52, %v16779_v45  ;;  %v16786_v52 = vld [vmem:[#allocation91_spill] sm:$0xff] }
 0x29e   :  { %v14412_v8 = vmax.f32 %v16773_v30, %v6136_v54  ;;  %v14423_v61 = vmax.f32 %v16774_v26, %v6137_v0  ;;  %v5296_v9 = vmul.f32 %v5167_v6, %v16777_v16  ;;  %v16783_v0 = vmax.f32 %v16640_v62, %v16782_v44 }
 0x29f   :  { %v14428_v54 = vmax.f32 %v16776_v13, %v6138_v21  ;;  %v14440_v60 = vmax.f32 %v16778_v1, %v6139_v31  ;;  %v14445_v50 = vmax.f32 %v16780_v53, %v6140_v33  ;;  %v5297_v21 = vmul.f32 %v5171_v24, %v16777_v16  ;;  %v16785_v31 = vld [vmem:[#allocation95_spill] sm:$0xff]  ;;  %v14496_v1 = vpop.permute.xlu0 %3466 }
 0x2a0   :  { %v14450_v6 = vmax.f32 %v16783_v0, %v6141_v23  ;;  %v5298_v41 = vmul.f32 %v5175_v58, %v16777_v16  ;;  %v5299_v46 = vmul.f32 %v5179_v42, %v16777_v16  ;;  %v5360_v51 = vsel %vm4838_vm7, %v5296_v9, -3e+38 }
 0x2a1   :  { %16781 = vst [vmem:[#allocation59_spill] sm:$0xff] %v14445_v50  ;;  %v1083_v33 = vcombine.high %v16786_v52, %v16785_v31  ;;  %v5300_v30 = vmul.f32 %v5183_v2, %v16777_v16  ;;  %v5301_v62 = vmul.f32 %v5187_v19, %v16777_v16  ;;  %v5361_v23 = vsel %vm4838_vm7, %v5297_v21, -3e+38  ;;  %v951_v31 = vpop.permute.xlu1 %950 }
 0x2a2   :  { %16784 = vst [vmem:[#allocation66_spill] sm:$0xff] %v14450_v6  ;;  %v14468_v24 = vstv %s15096_s0  ;;  %v5362_v58 = vsel %vm4838_vm7, %v5298_v41, -3e+38  ;;  %v5363_v42 = vsel %vm4838_vm7, %v5299_v46, -3e+38  ;;  %v16787_v2 = vmax.f32 %v13510_v63, %v14006_v10  ;;  %s9669_s0 = smov 1.0  }
 0x2a3   :  { %v14481_v29 = vstv %s772_s25  ;;  %v14485_v13 = vsel %vm4838_vm7, %v5300_v30, -3e+38  ;;  %v14489_v19 = vsel %vm4838_vm7, %v5301_v62, -3e+38  ;;  %v16791_v16 = vmax.f32 %v13515_v39, %v14010_v28  ;;  %v16795_v39 = vld [vmem:[#allocation48_spill] sm:$0xff]  ;;  %v16796_v28 = vld [vmem:[#allocation42_spill] sm:$0xff]  ;;  %s1566_s30 = smax.f32 %s9669_s0, %s14435_s26  ;;  %s14532_s8 = smax.f32 %s9669_s0, %s14470_s29 }
 0x2a4   :  { %v14479_v26 = vmax.f32 %v16787_v2, %v5360_v51  ;;  %16789 = vst [vmem:[#allocation80_spill] sm:$0xff] %v14485_v13  ;;  %16790 = vst [vmem:[#allocation86_spill] sm:$0xff] %v14489_v19  ;;  %v1311_v10 = vrot.slane %v1083_v33, %v9797_v4  ;;  %v1315_v63 = vrot.slane %v1083_v33, %v9800_v5  ;;  %v9456_v62 = vld [vmem:[#allocation8 + $0x30] sm:$0xff]  ;;  %v9458_v2 = vld [vmem:[#allocation8 + $0x40] sm:$0xff]  ;;  %vm959_vm8 = vcmp.gt.f32.partialorder %v951_v31, 0.0  ;;  %s14640_s10 = smax.f32 %s9669_s0, %s14628_s9  ;;  %s2342_s14 = smax.f32 %s9669_s0, %s14686_s13 }
 0x2a5   :  { %v14494_v9 = vmax.f32 %v16791_v16, %v5361_v23  ;;  %v1319_v45 = vrot.slane %v1083_v33, %v9854_v34  ;;  %v1323_v53 = vrot.slane %v1083_v33, %v9911_v11  ;;  %v1327_v36 = vrot.slane %v1083_v33, %v9965_v14  ;;  %v8934_v19 = vld [vmem:[#allocation12 + $0xc4] ss:$24 sps:$4 sm:$0xff]   ;;  %s14798_s17 = smax.f32 %s9669_s0, %s14770_s15  ;;  %s3894_s2 = smax.f32 %s9669_s0, %s14862_s5 }
 0x2a6   :  { %16788 = vst [vmem:[#allocation58_spill] sm:$0xff] %v14479_v26  ;;  %v16793_v44 = vmax.f32 %v13520_v55, %v14014_v47  ;;  %v16797_v21 = vmax.f32 %v16795_v39, %v16796_v28  ;;  %v1331_v46 = vrot.slane %v1083_v33, %v10057_v7  ;;  %v1422_v51 = vmul.f32 %v1311_v10, %v14276_v32  ;;  %v9457_v55 = vld [vmem:[#allocation8 + $0x38] sm:$0xff]  ;;  %v9459_v10 = vld [vmem:[#allocation8 + $0x48] sm:$0xff]  ;;  %s14933_s18 = smax.f32 %s9669_s0, %s14915_s16  ;;  %s15017_s20 = smax.f32 %s9669_s0, %s15002_s19 }
 0x2a7   :  { %16792 = vst [vmem:[#allocation102_spill] sm:$0xff] %v14494_v9  ;;  %v1423_v52 = vmul.f32 %v1315_v63, %v14276_v32  ;;  %v1424_v30 = vmul.f32 %v1319_v45, %v14276_v32  ;;  %v1546_v23 = vmul.f32 %v9456_v62, %v14468_v24  ;;  %v1547_v47 = vmul.f32 %v9457_v55, %v14468_v24  ;;  %v9460_v45 = vld [vmem:[#allocation8 + $0x50] sm:$0xff]  ;;  %v9461_v39 = vld [vmem:[#allocation8 + $0x58] sm:$0xff] }
 0x2a8   :  { %v14506_v0 = vmax.f32 %v16793_v44, %v5362_v58  ;;  %v14511_v41 = vmax.f32 %v16797_v21, %v5363_v42  ;;  %v1425_v58 = vmul.f32 %v1323_v53, %v14276_v32  ;;  %v1426_v33 = vmul.f32 %v1327_v36, %v14276_v32  ;;  %v14528_v21 = vpop.permute.xlu0 %5018  ;;  %8097 = vmatprep.subr.bf16.mxu1 %v8934_v19 }
 0x2a9   :  { %v1427_v42 = vmul.f32 %v1331_v46, %v14276_v32  ;;  %v1548_v16 = vmul.f32 %v9458_v2, %v14468_v24  ;;  %v1549_v63 = vmul.f32 %v9459_v10, %v14468_v24  ;;  %v1550_v44 = vmul.f32 %v9460_v45, %v14468_v24  ;;  %16799 = vst [vmem:[#allocation43_spill] sm:$0xff] %v14528_v21  ;;  %v16800_v10 = vld [vmem:[#allocation31_spill] sm:$0xff] }
 0x2aa   :  { %16794 = vst [vmem:[#allocation61_spill] sm:$0xff] %v14506_v0  ;;  %16798 = vst [vmem:[#allocation52_spill] sm:$0xff] %v14511_v41  ;;  %v1551_v28 = vmul.f32 %v9461_v39, %v14468_v24  ;;  %v1603_v53 = vstv %s1566_s30  ;;  %v1486_v36 = vsel %vm959_vm8, %v1422_v51, -3e+38  ;;  %v1487_v62 = vsel %vm959_vm8, %v1423_v52, -3e+38 }
 0x2ab   :  { %v1488_v55 = vsel %vm959_vm8, %v1424_v30, -3e+38  ;;  %v1489_v32 = vsel %vm959_vm8, %v1425_v58, -3e+38  ;;  %v1490_v46 = vsel %vm959_vm8, %v1426_v33, -3e+38  ;;  %v1498_v41 = vmax.f32 %v16800_v10, %v1486_v36 }
 0x2ac   :  { %v1491_v2 = vsel %vm959_vm8, %v1427_v42, -3e+38  ;;  %v1505_v45 = vmax.f32 %v14085_v15, %v1487_v62  ;;  %v1512_v39 = vmax.f32 %v14095_v43, %v1488_v55  ;;  %v1519_v31 = vmax.f32 %v14100_v38, %v1489_v32  ;;  %v16801_v30 = vld [vmem:[#allocation71_spill] sm:$0xff]  ;;  %v16802_v58 = vld [vmem:[#allocation30_spill] sm:$0xff] }
 0x2ad   :  { %v1526_v0 = vmax.f32 %v14112_v22, %v1490_v46  ;;  %9342 = vrcp.f32 %v1603_v53  ;;  %v1533_v51 = vmax.f32 %v14120_v40, %v1491_v2  ;;  %vm1534_vm9 = vcmp.le.f32.partialorder %v1498_v41, -1e+38  ;;  %v14545_v53 = vpop.permute.xlu0 %169 }
 0x2ae   :  { %vm1535_vm10 = vcmp.le.f32.partialorder %v1505_v45, -1e+38  ;;  %vm1536_vm11 = vcmp.le.f32.partialorder %v1512_v39, -1e+38  ;;  %vm1537_vm12 = vcmp.le.f32.partialorder %v1519_v31, -1e+38  ;;  %v14543_v33 = vcombine.high %v16802_v58, %v16801_v30 }
 0x2af   :  { %vm1538_vm13 = vcmp.le.f32.partialorder %v1526_v0, -1e+38  ;;  %vm1539_vm14 = vcmp.le.f32.partialorder %v1533_v51, -1e+38  ;;  %v1540_v15 = vsel %vm1534_vm9, 0.0, %v1498_v41  ;;  %v1541_v43 = vsel %vm1535_vm10, 0.0, %v1505_v45 }
 0x2b0   :  { %v1542_v42 = vsel %vm1536_vm11, 0.0, %v1512_v39  ;;  %v1543_v38 = vsel %vm1537_vm12, 0.0, %v1519_v31  ;;  %v1544_v36 = vsel %vm1538_vm13, 0.0, %v1526_v0  ;;  %v1545_v22 = vsel %vm1539_vm14, 0.0, %v1533_v51 }
 0x2b1   :  { %v1552_v40 = vmul.f32 %v1540_v15, %v14481_v29  ;;  %v1553_v62 = vmul.f32 %v1541_v43, %v14481_v29  ;;  %v1554_v55 = vmul.f32 %v1542_v42, %v14481_v29  ;;  %v1555_v32 = vmul.f32 %v1543_v38, %v14481_v29 }
 0x2b2   :  { %v1556_v46 = vmul.f32 %v1544_v36, %v14481_v29  ;;  %v1557_v2 = vmul.f32 %v1545_v22, %v14481_v29  ;;  %v530_v41 = vrot.slane %v14543_v33, %v9797_v4  ;;  %v534_v0 = vrot.slane %v14543_v33, %v9800_v5 }
 0x2b3   :  { %v1558_v10 = vadd.f32 %v1552_v40, %v1546_v23  ;;  %v1559_v45 = vadd.f32 %v1553_v62, %v1547_v47  ;;  %v1560_v39 = vadd.f32 %v1554_v55, %v1548_v16  ;;  %v1561_v31 = vadd.f32 %v1555_v32, %v1549_v63 }
 0x2b4   :  { %vm178_vm15 = vcmp.gt.f32.partialorder %v14545_v53, 0.0  ;;  %v1562_v51 = vadd.f32 %v1556_v46, %v1550_v44  ;;  %v1563_v30 = vadd.f32 %v1557_v2, %v1551_v28  ;;  %v538_v58 = vrot.slane %v14543_v33, %v9854_v34 }
 0x2b5   :  { %v542_v15 = vrot.slane %v14543_v33, %v9911_v11  ;;  %v1567_v43 = vrot.slane %v1558_v10, 4  ;;  %v1573_v42 = vrot.slane %v1559_v45, 4  ;;  %v1579_v38 = vrot.slane %v1560_v39, 4 }
 0x2b6   :  { %v1585_v36 = vrot.slane %v1561_v31, 4  ;;  %v1591_v22 = vrot.slane %v1562_v51, 4  ;;  %v1597_v52 = vrot.slane %v1563_v30, 4  ;;  %v546_v23 = vrot.slane %v14543_v33, %v9965_v14 }
 0x2b7   :  { %v550_v47 = vrot.slane %v14543_v33, %v10057_v7  ;;  %v9343_v16 = vpop.eup %9342  ;;  %v1568_v63 = vadd.f32 %v1567_v43, %v1558_v10  ;;  %v1574_v44 = vadd.f32 %v1573_v42, %v1559_v45  ;;  %v1580_v28 = vadd.f32 %v1579_v38, %v1560_v39  ;;  %v8936_v45 = vld [vmem:[#allocation12 + $0x3c4] ss:$24 sps:$4 sm:$0xff]  }
 0x2b8   :  { %v1586_v40 = vadd.f32 %v1585_v36, %v1561_v31  ;;  %v1592_v62 = vadd.f32 %v1591_v22, %v1562_v51  ;;  %v1598_v55 = vadd.f32 %v1597_v52, %v1563_v30  ;;  %v641_v32 = vmul.f32 %v530_v41, %v14359_v57  ;;  %v8938_v41 = vld [vmem:[#allocation12 + $0xc0] ss:$24 sps:$4 sm:$0xff]   ;;  %8138 = vmatprep.subr.bf16.mxu0 %v8936_v45 }
 0x2b9   :  { %v642_v46 = vmul.f32 %v534_v0, %v14359_v57  ;;  %v1569_v2 = vrot.slane %v1568_v63, 2  ;;  %v1575_v9 = vrot.slane %v1574_v44, 2  ;;  %v1581_v26 = vrot.slane %v1580_v28, 2  ;;  %v8939_v30 = vld [vmem:[#allocation12 + $0x3c0] ss:$24 sps:$4 sm:$0xff]   ;;  %8098 = vmatpush1.bf16.msra.mxu1 %v8938_v41 }
 0x2ba   :  { %v1587_v21 = vrot.slane %v1586_v40, 2  ;;  %v1593_v13 = vrot.slane %v1592_v62, 2  ;;  %v1599_v6 = vrot.slane %v1598_v55, 2  ;;  %v643_v33 = vmul.f32 %v538_v58, %v14359_v57  ;;  %8139 = vmatpush1.bf16.msra.mxu0 %v8939_v30 }
 0x2bb   :  { %v644_v10 = vmul.f32 %v542_v15, %v14359_v57  ;;  %v1570_v39 = vadd.f32 %v1569_v2, %v1568_v63  ;;  %v1576_v31 = vadd.f32 %v1575_v9, %v1574_v44  ;;  %v1582_v51 = vadd.f32 %v1581_v26, %v1580_v28  ;;  %v9014_v2 = vld [vmem:[#allocation12 + $0x634] ss:$24 sps:$4 sm:$0xff]  }
 0x2bc   :  { %v1588_v52 = vadd.f32 %v1587_v21, %v1586_v40  ;;  %v1594_v0 = vadd.f32 %v1593_v13, %v1592_v62  ;;  %v1600_v43 = vadd.f32 %v1599_v6, %v1598_v55  ;;  %v645_v42 = vmul.f32 %v546_v23, %v14359_v57 }
 0x2bd   :  { %v646_v38 = vmul.f32 %v550_v47, %v14359_v57  ;;  %v1571_v36 = vrot.slane %v1570_v39, 1  ;;  %v1577_v22 = vrot.slane %v1576_v31, 1  ;;  %v1583_v58 = vrot.slane %v1582_v51, 1 }
 0x2be   :  { %v1589_v50 = vrot.slane %v1588_v52, 1  ;;  %v1595_v15 = vrot.slane %v1594_v0, 1  ;;  %v1601_v9 = vrot.slane %v1600_v43, 1  ;;  %v705_v26 = vsel %vm178_vm15, %v641_v32, -3e+38 }
 0x2bf   :  { %v706_v13 = vsel %vm178_vm15, %v642_v46, -3e+38  ;;  %v1572_v6 = vadd.f32 %v1571_v36, %v1570_v39  ;;  %v1578_v19 = vadd.f32 %v1577_v22, %v1576_v31  ;;  %v1584_v21 = vadd.f32 %v1583_v58, %v1582_v51  ;;  %v16807_v36 = vld [vmem:[#allocation45_spill] sm:$0xff] }
 0x2c0   :  { %v1590_v23 = vadd.f32 %v1589_v50, %v1588_v52  ;;  %v1596_v57 = vadd.f32 %v1595_v15, %v1594_v0  ;;  %v1602_v47 = vadd.f32 %v1601_v9, %v1600_v43  ;;  %v707_v63 = vsel %vm178_vm15, %v643_v33, -3e+38 }
 0x2c1   :  { %v708_v44 = vsel %vm178_vm15, %v644_v10, -3e+38  ;;  %v1605_v28 = vmul.f32 %v9343_v16, %v1572_v6  ;;  %v1606_v40 = vmul.f32 %v9343_v16, %v1578_v19  ;;  %v1607_v62 = vmul.f32 %v9343_v16, %v1584_v21  ;;  %v9463_v6 = vld [vmem:[#allocation8 + $0x8] sm:$0xff]  ;;  %v9464_v21 = vld [vmem:[#allocation8 + $0x10] sm:$0xff] }
 0x2c2   :  { %v1608_v55 = vmul.f32 %v9343_v16, %v1590_v23  ;;  %v16803_v32 = vlaneseq  ;;  %v1609_v46 = vmul.f32 %v9343_v16, %v1596_v57  ;;  %v1610_v45 = vmul.f32 %v9343_v16, %v1602_v47  ;;  %v16806_v16 = vld [vmem:[#allocation27_spill] sm:$0xff]  ;;  %v9465_v57 = vld [vmem:[#allocation8 + $0x18] sm:$0xff] }
 0x2c3   :  { %v709_v50 = vsel %vm178_vm15, %v645_v42, -3e+38  ;;  %v710_v33 = vsel %vm178_vm15, %v646_v38, -3e+38  ;;  %v1617_v39 = vcombine.low %v1605_v28, %v1606_v40  ;;  %v717_v10 = vmax.f32 %v14133_v59, %v705_v26  ;;  %v9462_v26 = vld [vmem:[#allocation8] sm:$0xff]  ;;  %v9467_v40 = vld [vmem:[#allocation8 + $0x28] sm:$0xff] }
 0x2c4   :  { %vm14581_vm0 = vcmp.lt.s32.totalorder %v16803_v32, 768  ;;  %v1618_v31 = vcombine.low %v1607_v62, %v1608_v55  ;;  %v724_v51 = vmax.f32 %v14140_v35, %v706_v13  ;;  %v1619_v52 = vcombine.low %v1609_v46, %v1610_v45 }
 0x2c5   :  { %v731_v41 = vmax.f32 %v14148_v25, %v707_v63  ;;  %v738_v30 = vmax.f32 %v14157_v3, %v708_v44  ;;  %v745_v0 = vmax.f32 %v14165_v37, %v709_v50  ;;  %v1626_v43 = vrot.slane %v1617_v39, %v16806_v16  ;;  %v9466_v63 = vld [vmem:[#allocation8 + $0x20] sm:$0xff] }
 0x2c6   :  { %v1633_v42 = vrot.slane %v1618_v31, %v16806_v16  ;;  %v752_v53 = vmax.f32 %v16807_v36, %v710_v33  ;;  %vm753_vm1 = vcmp.le.f32.partialorder %v717_v10, -1e+38  ;;  %v1640_v38 = vrot.slane %v1619_v52, %v16806_v16  ;;  %v16810_v52 = vld [vmem:[#allocation64_spill] sm:$0xff] }
 0x2c7   :  { %vm754_vm2 = vcmp.le.f32.partialorder %v724_v51, -1e+38  ;;  %vm755_vm3 = vcmp.le.f32.partialorder %v731_v41, -1e+38  ;;  %vm756_vm4 = vcmp.le.f32.partialorder %v738_v30, -1e+38  ;;  %v766_v13 = vmul.f32 %v9462_v26, %v14468_v24 }
 0x2c8   :  { %v1641_v59 = vcombine.low %v1626_v43, %v1633_v42  ;;  %vm757_vm5 = vcmp.le.f32.partialorder %v745_v0, -1e+38  ;;  %vm758_vm6 = vcmp.le.f32.partialorder %v752_v53, -1e+38  ;;  %v759_v35 = vsel %vm753_vm1, 0.0, %v717_v10 }
 0x2c9   :  { %v1655_v25 = vrot.slane %v1640_v38, %v16806_v16  ;;  %v760_v3 = vsel %vm754_vm2, 0.0, %v724_v51  ;;  %v761_v37 = vsel %vm755_vm3, 0.0, %v731_v41  ;;  %v762_v22 = vsel %vm756_vm4, 0.0, %v738_v30  ;;  %v16809_v51 = vld [vmem:[#allocation117_spill] sm:$0xff] }
 0x2ca   :  { %v1648_v58 = vrot.slane %v1641_v59, %v16806_v16  ;;  %v763_v15 = vsel %vm757_vm5, 0.0, %v745_v0  ;;  %v764_v9 = vsel %vm758_vm6, 0.0, %v752_v53  ;;  %v767_v19 = vmul.f32 %v9463_v6, %v14468_v24  ;;  %v9468_v59 = vld [vmem:[#allocation8 + $0x90] sm:$0xff] }
 0x2cb   :  { %v768_v23 = vmul.f32 %v9464_v21, %v14468_v24  ;;  %v769_v47 = vmul.f32 %v9465_v57, %v14468_v24  ;;  %v770_v44 = vmul.f32 %v9466_v63, %v14468_v24  ;;  %v771_v62 = vmul.f32 %v9467_v40, %v14468_v24 }
 0x2cc   :  { %v1656_v28 = vcombine.low %v1648_v58, %v1655_v25  ;;  %v774_v55 = vmul.f32 %v14481_v29, %v759_v35  ;;  %v775_v32 = vmul.f32 %v14481_v29, %v760_v3  ;;  %v776_v46 = vmul.f32 %v14481_v29, %v761_v37 }
 0x2cd   :  { %v777_v45 = vmul.f32 %v14481_v29, %v762_v22  ;;  %v778_v50 = vmul.f32 %v14481_v29, %v763_v15  ;;  %v779_v33 = vmul.f32 %v14481_v29, %v764_v9  ;;  %v16808_v39 = vstv %s14532_s8 }
 0x2ce   :  { %1659 = vst.msk [vmem:[#allocation2 + $0x1] ss:$8 sm:$0xf] %vm14581_vm0, %v1656_v28  ;;  %1660 = vst.msk [vmem:[#allocation2 + $0x1] ss:$8 sm:$0x30] %vm14581_vm0, %v1656_v28  ;;  %9344 = vrcp.f32 %v16808_v39  ;;  %v780_v31 = vadd.f32 %v774_v55, %v766_v13  ;;  %v781_v10 = vadd.f32 %v775_v32, %v767_v19  ;;  %v2635_v41 = vcombine.high %v16810_v52, %v16809_v51 }
 0x2cf   :  { %v782_v30 = vadd.f32 %v776_v46, %v768_v23  ;;  %v783_v0 = vadd.f32 %v777_v45, %v769_v47  ;;  %v784_v43 = vadd.f32 %v778_v50, %v770_v44  ;;  %v785_v42 = vadd.f32 %v779_v33, %v771_v62  ;;  %v16811_v45 = vld [vmem:[#allocation50_spill] sm:$0xff] }
 0x2d0   :  { %v788_v36 = vrot.slane %v780_v31, 4  ;;  %v794_v53 = vrot.slane %v781_v10, 4  ;;  %v2863_v38 = vrot.slane %v2635_v41, %v9797_v4  ;;  %v14622_v35 = vmul.f32 %v9468_v59, %v14468_v24 }
 0x2d1   :  { %v800_v25 = vrot.slane %v782_v30, 4  ;;  %v806_v3 = vrot.slane %v783_v0, 4  ;;  %v812_v37 = vrot.slane %v784_v43, 4  ;;  %v818_v22 = vrot.slane %v785_v42, 4 }
 0x2d2   :  { %v789_v58 = vadd.f32 %v788_v36, %v780_v31  ;;  %v795_v15 = vadd.f32 %v794_v53, %v781_v10  ;;  %v2867_v9 = vrot.slane %v2635_v41, %v9800_v5  ;;  %v2871_v26 = vrot.slane %v2635_v41, %v9854_v34 }
 0x2d3   :  { %v801_v13 = vadd.f32 %v800_v25, %v782_v30  ;;  %v807_v6 = vadd.f32 %v806_v3, %v783_v0  ;;  %v813_v19 = vadd.f32 %v812_v37, %v784_v43  ;;  %v819_v21 = vadd.f32 %v818_v22, %v785_v42 }
 0x2d4   :  { %v790_v23 = vrot.slane %v789_v58, 2  ;;  %v796_v57 = vrot.slane %v795_v15, 2  ;;  %v2875_v47 = vrot.slane %v2635_v41, %v9911_v11  ;;  %v2879_v63 = vrot.slane %v2635_v41, %v9965_v14 }
 0x2d5   :  { %v802_v44 = vrot.slane %v801_v13, 2  ;;  %v808_v28 = vrot.slane %v807_v6, 2  ;;  %v814_v40 = vrot.slane %v813_v19, 2  ;;  %v820_v62 = vrot.slane %v819_v21, 2 }
 0x2d6   :  { %v791_v55 = vadd.f32 %v790_v23, %v789_v58  ;;  %v797_v32 = vadd.f32 %v796_v57, %v795_v15  ;;  %v2883_v46 = vrot.slane %v2635_v41, %v10057_v7  ;;  %v2974_v50 = vmul.f32 %v2863_v38, %v16811_v45 }
 0x2d7   :  { %v803_v33 = vadd.f32 %v802_v44, %v801_v13  ;;  %v809_v39 = vadd.f32 %v808_v28, %v807_v6  ;;  %v815_v31 = vadd.f32 %v814_v40, %v813_v19  ;;  %v821_v10 = vadd.f32 %v820_v62, %v819_v21  ;;  %v2503_v21 = vpop.permute.xlu1 %2502  ;;  %v9471_v62 = vld [vmem:[#allocation8 + $0xa8] sm:$0xff] }
 0x2d8   :  { %v9345_v51 = vpop.eup %9344  ;;  %v792_v52 = vrot.slane %v791_v55, 1  ;;  %v798_v30 = vrot.slane %v797_v32, 1  ;;  %v2975_v0 = vmul.f32 %v2867_v9, %v16811_v45  ;;  %v2976_v43 = vmul.f32 %v2871_v26, %v16811_v45  ;;  %v9469_v26 = vld [vmem:[#allocation8 + $0x98] sm:$0xff] }
 0x2d9   :  { %v804_v42 = vrot.slane %v803_v33, 1  ;;  %v810_v36 = vrot.slane %v809_v39, 1  ;;  %v816_v53 = vrot.slane %v815_v31, 1  ;;  %v822_v59 = vrot.slane %v821_v10, 1 }
 0x2da   :  { %v793_v25 = vadd.f32 %v792_v52, %v791_v55  ;;  %v799_v3 = vadd.f32 %v798_v30, %v797_v32  ;;  %v2977_v41 = vmul.f32 %v2875_v47, %v16811_v45  ;;  %v2978_v38 = vmul.f32 %v2879_v63, %v16811_v45  ;;  %v9470_v63 = vld [vmem:[#allocation8 + $0xa0] sm:$0xff]  ;;  %v9472_v32 = vld [vmem:[#allocation8 + $0xb0] sm:$0xff] }
 0x2db   :  { %v805_v37 = vadd.f32 %v804_v42, %v803_v33  ;;  %v811_v22 = vadd.f32 %v810_v36, %v809_v39  ;;  %v817_v58 = vadd.f32 %v816_v53, %v815_v31  ;;  %v823_v15 = vadd.f32 %v822_v59, %v821_v10  ;;  %v9473_v39 = vld [vmem:[#allocation8 + $0xb8] sm:$0xff] }
 0x2dc   :  { %v826_v13 = vmul.f32 %v9345_v51, %v793_v25  ;;  %v827_v6 = vmul.f32 %v9345_v51, %v799_v3  ;;  %v2979_v9 = vmul.f32 %v2883_v46, %v16811_v45  ;;  %v3099_v19 = vmul.f32 %v9469_v26, %v14468_v24  ;;  %v16814_v26 = vld [vmem:[#allocation97_spill] sm:$0xff] }
 0x2dd   :  { %v828_v23 = vmul.f32 %v9345_v51, %v805_v37  ;;  %v829_v57 = vmul.f32 %v9345_v51, %v811_v22  ;;  %v830_v44 = vmul.f32 %v9345_v51, %v817_v58  ;;  %v831_v28 = vmul.f32 %v9345_v51, %v823_v15  ;;  %v16812_v37 = vld [vmem:[#allocation107_spill] sm:$0xff]  ;;  %v16813_v58 = vld [vmem:[#allocation57_spill] sm:$0xff] }
 0x2de   :  { %v838_v47 = vcombine.low %v826_v13, %v827_v6  ;;  %v3100_v40 = vmul.f32 %v9470_v63, %v14468_v24  ;;  %v3101_v55 = vmul.f32 %v9471_v62, %v14468_v24  ;;  %v3102_v46 = vmul.f32 %v9472_v32, %v14468_v24 }
 0x2df   :  { %v839_v45 = vcombine.low %v828_v23, %v829_v57  ;;  %v840_v33 = vcombine.low %v830_v44, %v831_v28  ;;  %v3103_v31 = vmul.f32 %v9473_v39, %v14468_v24  ;;  %vm2511_vm7 = vcmp.gt.f32.partialorder %v2503_v21, 0.0  ;;  %v16815_v23 = vld [vmem:[#allocation111_spill] sm:$0xff]  ;;  %v16817_v44 = vld [vmem:[#allocation89_spill] sm:$0xff] }
 0x2e0   :  { %v847_v10 = vrot.slane %v838_v47, %v16806_v16  ;;  %v3155_v51 = vstv %s14640_s10  ;;  %v3038_v52 = vsel %vm2511_vm7, %v2974_v50, -3e+38  ;;  %v3039_v30 = vsel %vm2511_vm7, %v2975_v0, -3e+38  ;;  %v16816_v0 = vld [vmem:[#allocation112_spill] sm:$0xff] }
 0x2e1   :  { %v854_v42 = vrot.slane %v839_v45, %v16806_v16  ;;  %v861_v36 = vrot.slane %v840_v33, %v16806_v16  ;;  %v3040_v53 = vsel %vm2511_vm7, %v2976_v43, -3e+38  ;;  %v3041_v59 = vsel %vm2511_vm7, %v2977_v41, -3e+38 }
 0x2e2   :  { %v3042_v25 = vsel %vm2511_vm7, %v2978_v38, -3e+38  ;;  %v3043_v3 = vsel %vm2511_vm7, %v2979_v9, -3e+38  ;;  %v3050_v22 = vmax.f32 %v16812_v37, %v3038_v52  ;;  %v3057_v15 = vmax.f32 %v16813_v58, %v3039_v30 }
 0x2e3   :  { %v862_v13 = vcombine.low %v847_v10, %v854_v42  ;;  %v876_v6 = vrot.slane %v861_v36, %v16806_v16  ;;  %v3064_v21 = vmax.f32 %v16814_v26, %v3040_v53  ;;  %v3071_v50 = vmax.f32 %v16815_v23, %v3041_v59  ;;  %v16818_v42 = vld [vmem:[#allocation118_spill] sm:$0xff]  ;;  %v16819_v36 = vld [vmem:[#allocation37_spill] sm:$0xff] }
 0x2e4   :  { %v3078_v57 = vmax.f32 %v16816_v0, %v3042_v25  ;;  %v3085_v28 = vmax.f32 %v16817_v44, %v3043_v3  ;;  %vm3086_vm8 = vcmp.le.f32.partialorder %v3050_v22, -1e+38  ;;  %vm3087_vm9 = vcmp.le.f32.partialorder %v3057_v15, -1e+38 }
 0x2e5   :  { %v869_v43 = vrot.slane %v862_v13, %v16806_v16  ;;  %vm3088_vm10 = vcmp.le.f32.partialorder %v3064_v21, -1e+38  ;;  %vm3089_vm11 = vcmp.le.f32.partialorder %v3071_v50, -1e+38  ;;  %v3092_v41 = vsel %vm3086_vm8, 0.0, %v3050_v22  ;;  %v9474_v13 = vld [vmem:[#allocation8 + $0x60] sm:$0xff] }
 0x2e6   :  { %vm3090_vm12 = vcmp.le.f32.partialorder %v3078_v57, -1e+38  ;;  %vm3091_vm13 = vcmp.le.f32.partialorder %v3085_v28, -1e+38  ;;  %v3093_v38 = vsel %vm3087_vm9, 0.0, %v3057_v15  ;;  %v3094_v9 = vsel %vm3088_vm10, 0.0, %v3064_v21 }
 0x2e7   :  { %v877_v47 = vcombine.low %v869_v43, %v876_v6  ;;  %v3095_v63 = vsel %vm3089_vm11, 0.0, %v3071_v50  ;;  %v3096_v62 = vsel %vm3090_vm12, 0.0, %v3078_v57  ;;  %v3097_v32 = vsel %vm3091_vm13, 0.0, %v3085_v28 }
 0x2e8   :  { %v3104_v45 = vmul.f32 %v3092_v41, %v14481_v29  ;;  %v3105_v33 = vmul.f32 %v3093_v38, %v14481_v29  ;;  %v3106_v39 = vmul.f32 %v3094_v9, %v14481_v29  ;;  %v3107_v10 = vmul.f32 %v3095_v63, %v14481_v29 }
 0x2e9   :  { %883 = vst.msk [vmem:[#allocation2] ss:$8 sm:$0xf] %vm14581_vm0, %v877_v47  ;;  %884 = vst.msk [vmem:[#allocation2] ss:$8 sm:$0x30] %vm14581_vm0, %v877_v47  ;;  %9346 = vrcp.f32 %v3155_v51  ;;  %v3108_v52 = vmul.f32 %v3096_v62, %v14481_v29  ;;  %v3109_v30 = vmul.f32 %v3097_v32, %v14481_v29  ;;  %v14670_v53 = vcombine.high %v16819_v36, %v16818_v42 }
 0x2ea   :  { %v3110_v59 = vadd.f32 %v3104_v45, %v14622_v35  ;;  %v3111_v25 = vadd.f32 %v3105_v33, %v3099_v19  ;;  %v3112_v3 = vadd.f32 %v3106_v39, %v3100_v40  ;;  %v3113_v37 = vadd.f32 %v3107_v10, %v3101_v55  ;;  %v8940_v33 = vld [vmem:[#allocation12 + $0xf4] ss:$24 sps:$4 sm:$0xff]   ;;  %v8944_v36 = vld [vmem:[#allocation12 + $0xf0] ss:$24 sps:$4 sm:$0xff]  }
 0x2eb   :  { %v3114_v22 = vadd.f32 %v3108_v52, %v3102_v46  ;;  %v3115_v58 = vadd.f32 %v3109_v30, %v3103_v31  ;;  %v2087_v15 = vrot.slane %v14670_v53, %v9797_v4  ;;  %v14676_v51 = vmul.f32 %v9474_v13, %v14468_v24  ;;  %v8942_v39 = vld [vmem:[#allocation12 + $0x3f4] ss:$24 sps:$4 sm:$0xff]   ;;  %8099 = vmatprep.subr.bf16.mxu1 %v8940_v33  ;;  %v1727_v33 = vpop.permute.xlu0 %1726 }
 0x2ec   :  { %v3119_v6 = vrot.slane %v3110_v59, 4  ;;  %v3125_v26 = vrot.slane %v3111_v25, 4  ;;  %v3131_v21 = vrot.slane %v3112_v3, 4  ;;  %v3137_v23 = vrot.slane %v3113_v37, 4  ;;  %8140 = vmatprep.subr.bf16.mxu0 %v8942_v39  ;;  %8100 = vmatpush1.bf16.msra.mxu1 %v8944_v36  ;;  %v8954_v36 = vld [vmem:[#allocation12 + $0x454] ss:$24 sps:$4 sm:$0xff]  }
 0x2ed   :  { %v3143_v50 = vrot.slane %v3114_v22, 4  ;;  %v3149_v0 = vrot.slane %v3115_v58, 4  ;;  %v2091_v35 = vrot.slane %v14670_v53, %v9800_v5  ;;  %v2095_v19 = vrot.slane %v14670_v53, %v9854_v34 }
 0x2ee   :  { %v3120_v40 = vadd.f32 %v3119_v6, %v3110_v59  ;;  %v3126_v55 = vadd.f32 %v3125_v26, %v3111_v25  ;;  %v3132_v46 = vadd.f32 %v3131_v21, %v3112_v3  ;;  %v3138_v31 = vadd.f32 %v3137_v23, %v3113_v37  ;;  %v8945_v59 = vld [vmem:[#allocation12 + $0x3f0] ss:$24 sps:$4 sm:$0xff]  }
 0x2ef   :  { %v3144_v57 = vadd.f32 %v3143_v50, %v3114_v22  ;;  %v3150_v44 = vadd.f32 %v3149_v0, %v3115_v58  ;;  %v2099_v28 = vrot.slane %v14670_v53, %v9911_v11  ;;  %v2103_v43 = vrot.slane %v14670_v53, %v9965_v14  ;;  %8141 = vmatpush1.bf16.msra.mxu0 %v8945_v59  ;;  %v8946_v0 = vld [vmem:[#allocation12 + $0x124] ss:$24 sps:$4 sm:$0xff]  }
 0x2f0   :  { %v3121_v41 = vrot.slane %v3120_v40, 2  ;;  %v3127_v38 = vrot.slane %v3126_v55, 2  ;;  %v3133_v9 = vrot.slane %v3132_v46, 2  ;;  %v3139_v47 = vrot.slane %v3138_v31, 2  ;;  %8101 = vmatprep.subr.bf16.mxu1 %v8946_v0 }
 0x2f1   :  { %v3145_v63 = vrot.slane %v3144_v57, 2  ;;  %v3151_v62 = vrot.slane %v3150_v44, 2  ;;  %v2107_v32 = vrot.slane %v14670_v53, %v10057_v7  ;;  %v14691_v45 = vmul.f32 %v2087_v15, %v14418_v20 }
 0x2f2   :  { %v3122_v10 = vadd.f32 %v3121_v41, %v3120_v40  ;;  %v3128_v52 = vadd.f32 %v3127_v38, %v3126_v55  ;;  %v3134_v30 = vadd.f32 %v3133_v9, %v3132_v46  ;;  %v3140_v42 = vadd.f32 %v3139_v47, %v3138_v31  ;;  %v8950_v31 = vld [vmem:[#allocation12 + $0x120] ss:$24 sps:$4 sm:$0xff]   ;;  %v9475_v9 = vld [vmem:[#allocation8 + $0x68] sm:$0xff] }
 0x2f3   :  { %v9347_v25 = vpop.eup %9346  ;;  %v3146_v3 = vadd.f32 %v3145_v63, %v3144_v57  ;;  %v3152_v37 = vadd.f32 %v3151_v62, %v3150_v44  ;;  %v2199_v22 = vmul.f32 %v2091_v35, %v14418_v20  ;;  %v14695_v58 = vmul.f32 %v2095_v19, %v14418_v20  ;;  %v8948_v35 = vld [vmem:[#allocation12 + $0x424] ss:$24 sps:$4 sm:$0xff]   ;;  %v8951_v57 = vld [vmem:[#allocation12 + $0x420] ss:$24 sps:$4 sm:$0xff]   ;;  %8102 = vmatpush1.bf16.msra.mxu1 %v8950_v31 }
 0x2f4   :  { %v3123_v53 = vrot.slane %v3122_v10, 1  ;;  %v3129_v15 = vrot.slane %v3128_v52, 1  ;;  %v3135_v13 = vrot.slane %v3134_v30, 1  ;;  %v3141_v6 = vrot.slane %v3140_v42, 1  ;;  %8142 = vmatprep.subr.bf16.mxu0 %v8948_v35 }
 0x2f5   :  { %v3147_v26 = vrot.slane %v3146_v3, 1  ;;  %v3153_v21 = vrot.slane %v3152_v37, 1  ;;  %v2201_v23 = vmul.f32 %v2099_v28, %v14418_v20  ;;  %v2202_v50 = vmul.f32 %v2103_v43, %v14418_v20  ;;  %8143 = vmatpush1.bf16.msra.mxu0 %v8951_v57 }
 0x2f6   :  { %v3124_v40 = vadd.f32 %v3123_v53, %v3122_v10  ;;  %v3130_v19 = vadd.f32 %v3129_v15, %v3128_v52  ;;  %v3136_v55 = vadd.f32 %v3135_v13, %v3134_v30  ;;  %v3142_v46 = vadd.f32 %v3141_v6, %v3140_v42  ;;  %v9476_v52 = vld [vmem:[#allocation8 + $0x70] sm:$0xff]  ;;  %8144 = vmatprep.subr.bf16.mxu0 %v8954_v36 }
 0x2f7   :  { %v3148_v44 = vadd.f32 %v3147_v26, %v3146_v3  ;;  %v3154_v41 = vadd.f32 %v3153_v21, %v3152_v37  ;;  %v2203_v38 = vmul.f32 %v2107_v32, %v14418_v20  ;;  %v14701_v47 = vmul.f32 %v9475_v9, %v14468_v24  ;;  %v9477_v20 = vld [vmem:[#allocation8 + $0x78] sm:$0xff]  ;;  %v8952_v42 = vld [vmem:[#allocation12 + $0x154] ss:$24 sps:$4 sm:$0xff]   ;;  %v9478_v37 = vld [vmem:[#allocation8 + $0x80] sm:$0xff] }
 0x2f8   :  { %v3157_v28 = vmul.f32 %v9347_v25, %v3124_v40  ;;  %v3158_v43 = vmul.f32 %v9347_v25, %v3130_v19  ;;  %v3159_v63 = vmul.f32 %v9347_v25, %v3136_v55  ;;  %v3160_v62 = vmul.f32 %v9347_v25, %v3142_v46  ;;  %v8957_v13 = vld [vmem:[#allocation12 + $0x450] ss:$24 sps:$4 sm:$0xff]   ;;  %8103 = vmatprep.subr.bf16.mxu1 %v8952_v42  ;;  %v16820_v9 = vld [vmem:[#allocation94_spill] sm:$0xff] }
 0x2f9   :  { %v3161_v39 = vmul.f32 %v9347_v25, %v3148_v44  ;;  %v3162_v10 = vmul.f32 %v9347_v25, %v3154_v41  ;;  %v14706_v30 = vmul.f32 %v9476_v52, %v14468_v24  ;;  %v14709_v32 = vmul.f32 %v9477_v20, %v14468_v24  ;;  %v8956_v25 = vld [vmem:[#allocation12 + $0x150] ss:$24 sps:$4 sm:$0xff]   ;;  %8145 = vmatpush1.bf16.msra.mxu0 %v8957_v13  ;;  %v16824_v20 = vld [vmem:[#allocation109_spill] sm:$0xff] }
 0x2fa   :  { %v3169_v59 = vcombine.low %v3157_v28, %v3158_v43  ;;  %v3170_v3 = vcombine.low %v3159_v63, %v3160_v62  ;;  %v14712_v53 = vmul.f32 %v9478_v37, %v14468_v24  ;;  %v2379_v15 = vstv %s2342_s14  ;;  %v9479_v26 = vld [vmem:[#allocation8 + $0x88] sm:$0xff]  ;;  %8104 = vmatpush1.bf16.msra.mxu1 %v8956_v25  ;;  %v8958_v62 = vld [vmem:[#allocation12 + $0x184] ss:$24 sps:$4 sm:$0xff]  }
 0x2fb   :  { %v3171_v6 = vcombine.low %v3161_v39, %v3162_v10  ;;  %v14715_v21 = vmul.f32 %v9479_v26, %v14468_v24  ;;  %9348 = vrcp.f32 %v2379_v15  ;;  %vm1735_vm14 = vcmp.gt.f32.partialorder %v1727_v33, 0.0  ;;  %v16821_v43 = vld [vmem:[#allocation88_spill] sm:$0xff]  ;;  %v8960_v33 = vld [vmem:[#allocation12 + $0x484] ss:$24 sps:$4 sm:$0xff]   ;;  %8105 = vmatprep.subr.bf16.mxu1 %v8958_v62 }
 0x2fc   :  { %v3178_v0 = vrot.slane %v3169_v59, %v16806_v16  ;;  %v3185_v35 = vrot.slane %v3170_v3, %v16806_v16  ;;  %v2262_v40 = vsel %vm1735_vm14, %v14691_v45, -3e+38  ;;  %v2263_v19 = vsel %vm1735_vm14, %v2199_v22, -3e+38  ;;  %v16822_v45 = vld [vmem:[#allocation99_spill] sm:$0xff]  ;;  %v16823_v10 = vld [vmem:[#allocation114_spill] sm:$0xff]  ;;  %8146 = vmatprep.subr.bf16.mxu0 %v8960_v33 }
 0x2fd   :  { %v3192_v55 = vrot.slane %v3171_v6, %v16806_v16  ;;  %v2264_v46 = vsel %vm1735_vm14, %v14695_v58, -3e+38  ;;  %v2265_v31 = vsel %vm1735_vm14, %v2201_v23, -3e+38  ;;  %v2266_v57 = vsel %vm1735_vm14, %v2202_v50, -3e+38 }
 0x2fe   :  { %v3193_v44 = vcombine.low %v3178_v0, %v3185_v35  ;;  %v2267_v41 = vsel %vm1735_vm14, %v2203_v38, -3e+38  ;;  %v2274_v28 = vmax.f32 %v16820_v9, %v2262_v40  ;;  %v2281_v63 = vmax.f32 %v16821_v43, %v2263_v19  ;;  %v8962_v23 = vld [vmem:[#allocation12 + $0x180] ss:$24 sps:$4 sm:$0xff]   ;;  %v16825_v38 = vld [vmem:[#allocation83_spill] sm:$0xff] }
 0x2ff   :  { %v3207_v39 = vrot.slane %v3192_v55, %v16806_v16  ;;  %v2288_v22 = vmax.f32 %v16822_v45, %v2264_v46  ;;  %v2295_v52 = vmax.f32 %v16823_v10, %v2265_v31  ;;  %v2302_v58 = vmax.f32 %v16824_v20, %v2266_v57  ;;  %v8963_v50 = vld [vmem:[#allocation12 + $0x480] ss:$24 sps:$4 sm:$0xff]   ;;  %v16827_v3 = vld [vmem:[#allocation119_spill] sm:$0xff]  ;;  %8106 = vmatpush1.bf16.msra.mxu1 %v8962_v23 }
 0x300   :  { %v3200_v42 = vrot.slane %v3193_v44, %v16806_v16  ;;  %v2309_v36 = vmax.f32 %v16825_v38, %v2267_v41  ;;  %vm2310_vm15 = vcmp.le.f32.partialorder %v2274_v28, -1e+38  ;;  %vm2311_vm1 = vcmp.le.f32.partialorder %v2281_v63, -1e+38  ;;  %v16826_v59 = vld [vmem:[#allocation38_spill] sm:$0xff]  ;;  %8147 = vmatpush1.bf16.msra.mxu0 %v8963_v50 }
 0x301   :  { %vm2312_vm2 = vcmp.le.f32.partialorder %v2288_v22, -1e+38  ;;  %vm2313_vm3 = vcmp.le.f32.partialorder %v2295_v52, -1e+38  ;;  %vm2314_vm4 = vcmp.le.f32.partialorder %v2302_v58, -1e+38  ;;  %v14732_v37 = vcombine.high %v16827_v3, %v16826_v59 }
 0x302   :  { %v3208_v15 = vcombine.low %v3200_v42, %v3207_v39  ;;  %vm2315_vm5 = vcmp.le.f32.partialorder %v2309_v36, -1e+38  ;;  %v2316_v25 = vsel %vm2310_vm15, 0.0, %v2274_v28  ;;  %v2317_v13 = vsel %vm2311_vm1, 0.0, %v2281_v63  ;;  %v8964_v6 = vld [vmem:[#allocation12 + $0x1b4] ss:$24 sps:$4 sm:$0xff]  }
 0x303   :  { %v2318_v26 = vsel %vm2312_vm2, 0.0, %v2288_v22  ;;  %v2319_v0 = vsel %vm2313_vm3, 0.0, %v2295_v52  ;;  %v2320_v35 = vsel %vm2314_vm4, 0.0, %v2302_v58  ;;  %v2321_v40 = vsel %vm2315_vm5, 0.0, %v2309_v36  ;;  %v8966_v19 = vld [vmem:[#allocation12 + $0x4b4] ss:$24 sps:$4 sm:$0xff]   ;;  %8107 = vmatprep.subr.bf16.mxu1 %v8964_v6 }
 0x304   :  { %3211 = vst.msk [vmem:[#allocation2 + $0x3] ss:$8 sm:$0xf] %vm14581_vm0, %v3208_v15  ;;  %3212 = vst.msk [vmem:[#allocation2 + $0x3] ss:$8 sm:$0x30] %vm14581_vm0, %v3208_v15  ;;  %v2328_v55 = vmul.f32 %v2316_v25, %v14481_v29  ;;  %v2329_v46 = vmul.f32 %v2317_v13, %v14481_v29  ;;  %v2330_v31 = vmul.f32 %v2318_v26, %v14481_v29  ;;  %8148 = vmatprep.subr.bf16.mxu0 %v8966_v19 }
 0x305   :  { %v2331_v57 = vmul.f32 %v2319_v0, %v14481_v29  ;;  %v8968_v44 = vld [vmem:[#allocation12 + $0x1b0] ss:$24 sps:$4 sm:$0xff]   ;;  %v14742_v9 = vpop.eup %9348  ;;  %v2332_v28 = vmul.f32 %v2320_v35, %v14481_v29  ;;  %v2333_v43 = vmul.f32 %v2321_v40, %v14481_v29  ;;  %v4415_v63 = vrot.slane %v14732_v37, %v9797_v4  ;;  %v8970_v33 = vld [vmem:[#allocation12 + $0x1e4] ss:$24 sps:$4 sm:$0xff]   ;;  %v8974_v20 = vld [vmem:[#allocation12 + $0x1e0] ss:$24 sps:$4 sm:$0xff]  }
 0x306   :  { %v8969_v41 = vld [vmem:[#allocation12 + $0x4b0] ss:$24 sps:$4 sm:$0xff]   ;;  %v4419_v62 = vrot.slane %v14732_v37, %v9800_v5  ;;  %v8972_v39 = vld [vmem:[#allocation12 + $0x4e4] ss:$24 sps:$4 sm:$0xff]   ;;  %v2334_v45 = vadd.f32 %v2328_v55, %v14676_v51  ;;  %v2335_v22 = vadd.f32 %v2329_v46, %v14701_v47  ;;  %v2336_v10 = vadd.f32 %v2330_v31, %v14706_v30  ;;  %8108 = vmatpush1.bf16.msra.mxu1 %v8968_v44  ;;  %v8975_v51 = vld [vmem:[#allocation12 + $0x4e0] ss:$24 sps:$4 sm:$0xff]  }
 0x307   :  { %v2337_v52 = vadd.f32 %v2331_v57, %v14709_v32  ;;  %v2338_v58 = vadd.f32 %v2332_v28, %v14712_v53  ;;  %v2339_v23 = vadd.f32 %v2333_v43, %v14715_v21  ;;  %v4423_v50 = vrot.slane %v14732_v37, %v9854_v34  ;;  %8149 = vmatpush1.bf16.msra.mxu0 %v8969_v41  ;;  %v8976_v3 = vld [vmem:[#allocation12 + $0x214] ss:$24 sps:$4 sm:$0xff]   ;;  %v8980_v0 = vld [vmem:[#allocation12 + $0x210] ss:$24 sps:$4 sm:$0xff]  }
 0x308   :  { %v4427_v42 = vrot.slane %v14732_v37, %v9911_v11  ;;  %v2343_v38 = vrot.slane %v2334_v45, 4  ;;  %v2349_v47 = vrot.slane %v2335_v22, 4  ;;  %v2355_v36 = vrot.slane %v2336_v10, 4  ;;  %8109 = vmatprep.subr.bf16.mxu1 %v8970_v33  ;;  %8150 = vmatprep.subr.bf16.mxu0 %v8972_v39  ;;  %v8978_v15 = vld [vmem:[#allocation12 + $0x514] ss:$24 sps:$4 sm:$0xff]  }
 0x309   :  { %v2361_v30 = vrot.slane %v2337_v52, 4  ;;  %v2367_v32 = vrot.slane %v2338_v58, 4  ;;  %v2373_v59 = vrot.slane %v2339_v23, 4  ;;  %v4431_v53 = vrot.slane %v14732_v37, %v9965_v14  ;;  %v8984_v33 = vld [vmem:[#allocation12 + $0x544] ss:$24 sps:$4 sm:$0xff]  }
 0x30a   :  { %v4435_v21 = vrot.slane %v14732_v37, %v10057_v7  ;;  %v2344_v25 = vadd.f32 %v2343_v38, %v2334_v45  ;;  %v2350_v13 = vadd.f32 %v2349_v47, %v2335_v22  ;;  %v2356_v6 = vadd.f32 %v2355_v36, %v2336_v10  ;;  %8110 = vmatpush1.bf16.msra.mxu1 %v8974_v20  ;;  %v8981_v37 = vld [vmem:[#allocation12 + $0x510] ss:$24 sps:$4 sm:$0xff]  }
 0x30b   :  { %v2362_v26 = vadd.f32 %v2361_v30, %v2337_v52  ;;  %v2368_v35 = vadd.f32 %v2367_v32, %v2338_v58  ;;  %v2374_v40 = vadd.f32 %v2373_v59, %v2339_v23  ;;  %v14765_v19 = vmul.f32 %v4415_v63, %v14387_v56  ;;  %8151 = vmatpush1.bf16.msra.mxu0 %v8975_v51  ;;  %v8986_v52 = vld [vmem:[#allocation12 + $0x240] ss:$24 sps:$4 sm:$0xff]   ;;  %v8988_v30 = vld [vmem:[#allocation12 + $0x274] ss:$24 sps:$4 sm:$0xff]  }
 0x30c   :  { %v14768_v55 = vmul.f32 %v4419_v62, %v14387_v56  ;;  %v2345_v46 = vrot.slane %v2344_v25, 2  ;;  %v2351_v31 = vrot.slane %v2350_v13, 2  ;;  %v2357_v57 = vrot.slane %v2356_v6, 2  ;;  %8111 = vmatprep.subr.bf16.mxu1 %v8976_v3  ;;  %8152 = vmatprep.subr.bf16.mxu0 %v8978_v15  ;;  %v8982_v62 = vld [vmem:[#allocation12 + $0x244] ss:$24 sps:$4 sm:$0xff]   ;;  %v9480_v3 = vld [vmem:[#allocation8 + $0xf0] sm:$0xff] }
 0x30d   :  { %v2363_v44 = vrot.slane %v2362_v26, 2  ;;  %v2369_v41 = vrot.slane %v2368_v35, 2  ;;  %v2375_v28 = vrot.slane %v2374_v40, 2  ;;  %v14773_v43 = vmul.f32 %v4423_v50, %v14387_v56  ;;  %v8987_v50 = vld [vmem:[#allocation12 + $0x540] ss:$24 sps:$4 sm:$0xff]  }
 0x30e   :  { %v14776_v63 = vmul.f32 %v4427_v42, %v14387_v56  ;;  %v2346_v39 = vadd.f32 %v2345_v46, %v2344_v25  ;;  %v2352_v45 = vadd.f32 %v2351_v31, %v2350_v13  ;;  %v2358_v22 = vadd.f32 %v2357_v57, %v2356_v6  ;;  %8112 = vmatpush1.bf16.msra.mxu1 %v8980_v0  ;;  %v8992_v0 = vld [vmem:[#allocation12 + $0x270] ss:$24 sps:$4 sm:$0xff]  }
 0x30f   :  { %v2364_v10 = vadd.f32 %v2363_v44, %v2362_v26  ;;  %v2370_v20 = vadd.f32 %v2369_v41, %v2368_v35  ;;  %v2376_v58 = vadd.f32 %v2375_v28, %v2374_v40  ;;  %v14779_v23 = vmul.f32 %v4431_v53, %v14387_v56  ;;  %8153 = vmatpush1.bf16.msra.mxu0 %v8981_v37  ;;  %v9481_v53 = vld [vmem:[#allocation8 + $0xf8] sm:$0xff]  ;;  %v9482_v37 = vld [vmem:[#allocation8 + $0x100] sm:$0xff]  ;;  %v9483_v31 = vld [vmem:[#allocation8 + $0x108] sm:$0xff]  ;;  %v4055_v44 = vpop.permute.xlu1 %4054 }
 0x310   :  { %v14782_v51 = vmul.f32 %v4435_v21, %v14387_v56  ;;  %v2347_v42 = vrot.slane %v2346_v39, 1  ;;  %v2353_v38 = vrot.slane %v2352_v45, 1  ;;  %v2359_v47 = vrot.slane %v2358_v22, 1  ;;  %8113 = vmatprep.subr.bf16.mxu1 %v8982_v62  ;;  %8154 = vmatprep.subr.bf16.mxu0 %v8984_v33  ;;  %v8990_v21 = vld [vmem:[#allocation12 + $0x574] ss:$24 sps:$4 sm:$0xff]  }
 0x311   :  { %v2365_v36 = vrot.slane %v2364_v10, 1  ;;  %v2371_v32 = vrot.slane %v2370_v20, 1  ;;  %v2377_v59 = vrot.slane %v2376_v58, 1  ;;  %v14785_v15 = vmul.f32 %v9480_v3, %v14468_v24  ;;  %v8993_v41 = vld [vmem:[#allocation12 + $0x570] ss:$24 sps:$4 sm:$0xff]  }
 0x312   :  { %v14788_v56 = vmul.f32 %v9481_v53, %v14468_v24  ;;  %v2348_v25 = vadd.f32 %v2347_v42, %v2346_v39  ;;  %v2354_v13 = vadd.f32 %v2353_v38, %v2352_v45  ;;  %v2360_v6 = vadd.f32 %v2359_v47, %v2358_v22  ;;  %8114 = vmatpush1.bf16.msra.mxu1 %v8986_v52  ;;  %v8994_v28 = vld [vmem:[#allocation12 + $0x2a4] ss:$24 sps:$4 sm:$0xff]   ;;  %v8998_v38 = vld [vmem:[#allocation12 + $0x2a0] ss:$24 sps:$4 sm:$0xff]  }
 0x313   :  { %v2366_v26 = vadd.f32 %v2365_v36, %v2364_v10  ;;  %v2372_v35 = vadd.f32 %v2371_v32, %v2370_v20  ;;  %v2378_v40 = vadd.f32 %v2377_v59, %v2376_v58  ;;  %v14791_v46 = vmul.f32 %v9482_v37, %v14468_v24  ;;  %8155 = vmatpush1.bf16.msra.mxu0 %v8987_v50  ;;  %v8996_v22 = vld [vmem:[#allocation12 + $0x5a4] ss:$24 sps:$4 sm:$0xff]   ;;  %v9484_v20 = vld [vmem:[#allocation8 + $0x110] sm:$0xff] }
 0x314   :  { %v14794_v57 = vmul.f32 %v9483_v31, %v14468_v24  ;;  %v2381_v62 = vmul.f32 %v14742_v9, %v2348_v25  ;;  %v2382_v33 = vmul.f32 %v14742_v9, %v2354_v13  ;;  %v2383_v39 = vmul.f32 %v14742_v9, %v2360_v6  ;;  %8115 = vmatprep.subr.bf16.mxu1 %v8988_v30  ;;  %v9485_v50 = vld [vmem:[#allocation8 + $0x118] sm:$0xff]  ;;  %v9000_v59 = vld [vmem:[#allocation12 + $0x2d4] ss:$24 sps:$4 sm:$0xff]  }
 0x315   :  { %v2384_v45 = vmul.f32 %v14742_v9, %v2366_v26  ;;  %v2385_v10 = vmul.f32 %v14742_v9, %v2372_v35  ;;  %v2386_v52 = vmul.f32 %v14742_v9, %v2378_v40  ;;  %v14807_v58 = vmul.f32 %v9484_v20, %v14468_v24  ;;  %8156 = vmatprep.subr.bf16.mxu0 %v8990_v21  ;;  %v8999_v30 = vld [vmem:[#allocation12 + $0x5a0] ss:$24 sps:$4 sm:$0xff]  }
 0x316   :  { %v14810_v42 = vmul.f32 %v9485_v50, %v14468_v24  ;;  %v2393_v47 = vcombine.low %v2381_v62, %v2382_v33  ;;  %v4707_v32 = vstv %s14798_s17  ;;  %vm4063_vm6 = vcmp.gt.f32.partialorder %v4055_v44, 0.0  ;;  %8116 = vmatpush1.bf16.msra.mxu1 %v8992_v0  ;;  %v16829_v40 = vld [vmem:[#allocation21_spill] sm:$0xff]  ;;  %v16831_v62 = vld [vmem:[#allocation62_spill] sm:$0xff] }
 0x317   :  { %v2394_v36 = vcombine.low %v2383_v39, %v2384_v45  ;;  %v2395_v3 = vcombine.low %v2385_v10, %v2386_v52  ;;  %v4590_v9 = vsel %vm4063_vm6, %v14765_v19, -3e+38  ;;  %v4591_v53 = vsel %vm4063_vm6, %v14768_v55, -3e+38  ;;  %8157 = vmatpush1.bf16.msra.mxu0 %v8993_v41  ;;  %8117 = vmatprep.subr.bf16.mxu1 %v8994_v28  ;;  %v9002_v19 = vld [vmem:[#allocation12 + $0x5d4] ss:$24 sps:$4 sm:$0xff]  }
 0x318   :  { %v4592_v25 = vsel %vm4063_vm6, %v14773_v43, -3e+38  ;;  %v2402_v21 = vrot.slane %v2393_v47, %v16806_v16  ;;  %v4593_v6 = vsel %vm4063_vm6, %v14776_v63, -3e+38  ;;  %v4594_v26 = vsel %vm4063_vm6, %v14779_v23, -3e+38  ;;  %8158 = vmatprep.subr.bf16.mxu0 %v8996_v22 }
 0x319   :  { %v2409_v13 = vrot.slane %v2394_v36, %v16806_v16  ;;  %v2416_v0 = vrot.slane %v2395_v3, %v16806_v16  ;;  %v4595_v55 = vsel %vm4063_vm6, %v14782_v51, -3e+38  ;;  %v16828_v43 = vld [vmem:[#allocation40_spill] sm:$0xff]  ;;  %v4609_v37 = vmax.f32 %v16829_v40, %v4591_v53  ;;  %v16830_v41 = vld [vmem:[#allocation81_spill] sm:$0xff]  ;;  %v16832_v63 = vld [vmem:[#allocation39_spill] sm:$0xff] }
 0x31a   :  { %v4602_v35 = vmax.f32 %v16828_v43, %v4590_v9  ;;  %v4616_v28 = vmax.f32 %v16830_v41, %v4592_v25  ;;  %v4623_v33 = vmax.f32 %v16831_v62, %v4593_v6  ;;  %v4630_v39 = vmax.f32 %v16832_v63, %v4594_v26  ;;  %8118 = vmatpush1.bf16.msra.mxu1 %v8998_v38  ;;  %v9004_v23 = vld [vmem:[#allocation12 + $0x2d0] ss:$24 sps:$4 sm:$0xff]   ;;  %v9008_v22 = vld [vmem:[#allocation12 + $0x604] ss:$24 sps:$4 sm:$0xff]  }
 0x31b   :  { %v2417_v31 = vcombine.low %v2402_v21, %v2409_v13  ;;  %v9005_v45 = vld [vmem:[#allocation12 + $0x5d0] ss:$24 sps:$4 sm:$0xff]   ;;  %v2431_v10 = vrot.slane %v2416_v0, %v16806_v16  ;;  %v16833_v52 = vld [vmem:[#allocation90_spill] sm:$0xff]  ;;  %vm4639_vm8 = vcmp.le.f32.partialorder %v4609_v37, -1e+38  ;;  %8159 = vmatpush1.bf16.msra.mxu0 %v8999_v30  ;;  %8119 = vmatprep.subr.bf16.mxu1 %v9000_v59  ;;  %9350 = vrcp.f32 %v4707_v32 }
 0x31c   :  { %v4637_v44 = vmax.f32 %v16833_v52, %v4595_v55  ;;  %vm4638_vm7 = vcmp.le.f32.partialorder %v4602_v35, -1e+38  ;;  %v9011_v51 = vld [vmem:[#allocation12 + $0xc] ss:$24 sps:$4 sm:$0xff]   ;;  %vm4640_vm9 = vcmp.le.f32.partialorder %v4616_v28, -1e+38  ;;  %8160 = vmatprep.subr.bf16.mxu0 %v9002_v19 }
 0x31d   :  { %v2424_v20 = vrot.slane %v2417_v31, %v16806_v16  ;;  %vm4641_vm10 = vcmp.le.f32.partialorder %v4623_v33, -1e+38  ;;  %vm4642_vm11 = vcmp.le.f32.partialorder %v4630_v39, -1e+38  ;;  %v4644_v50 = vsel %vm4638_vm7, 0.0, %v4602_v35  ;;  %v16834_v26 = vld [vmem:[#allocation82_spill] sm:$0xff] }
 0x31e   :  { %vm4643_vm12 = vcmp.le.f32.partialorder %v4637_v44, -1e+38  ;;  %v4645_v38 = vsel %vm4639_vm8, 0.0, %v4609_v37  ;;  %v4646_v47 = vsel %vm4640_vm9, 0.0, %v4616_v28  ;;  %v4647_v3 = vsel %vm4641_vm10, 0.0, %v4623_v33  ;;  %8120 = vmatpush1.bf16.msra.mxu1 %v9004_v23  ;;  %v16835_v19 = vld [vmem:[#allocation53_spill] sm:$0xff] }
 0x31f   :  { %v2432_v36 = vcombine.low %v2424_v20, %v2431_v10  ;;  %v4648_v9 = vsel %vm4642_vm11, 0.0, %v4630_v39  ;;  %v4649_v53 = vsel %vm4643_vm12, 0.0, %v4637_v44  ;;  %v4656_v25 = vmul.f32 %v4644_v50, %v14481_v29  ;;  %8161 = vmatpush1.bf16.msra.mxu0 %v9005_v45  ;;  %8212 = vmatprep.subr.bf16.mxu1 %v9011_v51  ;;  %v9486_v41 = vld [vmem:[#allocation8 + $0xc0] sm:$0xff] }
 0x320   :  { %v4657_v30 = vmul.f32 %v4645_v38, %v14481_v29  ;;  %v4658_v59 = vmul.f32 %v4646_v47, %v14481_v29  ;;  %v4659_v21 = vmul.f32 %v4647_v3, %v14481_v29  ;;  %v4660_v13 = vmul.f32 %v4648_v9, %v14481_v29  ;;  %8171 = vmatprep.subr.bf16.mxu0 %v9008_v22 }
 0x321   :  { %2435 = vst.msk [vmem:[#allocation2 + $0x2] ss:$8 sm:$0xf] %vm14581_vm0, %v2432_v36  ;;  %2436 = vst.msk [vmem:[#allocation2 + $0x2] ss:$8 sm:$0x30] %vm14581_vm0, %v2432_v36  ;;  %v4661_v6 = vmul.f32 %v4649_v53, %v14481_v29  ;;  %v3411_v0 = vcombine.high %v16835_v19, %v16834_v26  ;;  %v4662_v55 = vadd.f32 %v4656_v25, %v14785_v15 }
 0x322   :  { %v4663_v43 = vadd.f32 %v4657_v30, %v14788_v56  ;;  %v4664_v35 = vadd.f32 %v4658_v59, %v14791_v46  ;;  %v4665_v40 = vadd.f32 %v4659_v21, %v14794_v57  ;;  %v4666_v37 = vadd.f32 %v4660_v13, %v14807_v58 }
 0x323   :  { %v4667_v32 = vadd.f32 %v4661_v6, %v14810_v42  ;;  %v3639_v31 = vrot.slane %v3411_v0, %v9797_v4  ;;  %v14856_v28 = vmul.f32 %v9486_v41, %v14468_v24  ;;  %v4671_v62 = vrot.slane %v4662_v55, 4 }
 0x324   :  { %v4677_v33 = vrot.slane %v4663_v43, 4  ;;  %v4683_v15 = vrot.slane %v4664_v35, 4  ;;  %v4689_v63 = vrot.slane %v4665_v40, 4  ;;  %v4695_v56 = vrot.slane %v4666_v37, 4 }
 0x325   :  { %v4701_v39 = vrot.slane %v4667_v32, 4  ;;  %v3643_v46 = vrot.slane %v3411_v0, %v9800_v5  ;;  %v3647_v57 = vrot.slane %v3411_v0, %v9854_v34  ;;  %v4672_v23 = vadd.f32 %v4671_v62, %v4662_v55  ;;  %v9351_v21 = vpop.eup %9350 }
 0x326   :  { %v4678_v58 = vadd.f32 %v4677_v33, %v4663_v43  ;;  %v4684_v45 = vadd.f32 %v4683_v15, %v4664_v35  ;;  %v4690_v42 = vadd.f32 %v4689_v63, %v4665_v40  ;;  %v4696_v22 = vadd.f32 %v4695_v56, %v4666_v37 }
 0x327   :  { %v4702_v10 = vadd.f32 %v4701_v39, %v4667_v32  ;;  %v3651_v52 = vrot.slane %v3411_v0, %v9911_v11  ;;  %v3655_v44 = vrot.slane %v3411_v0, %v9965_v14  ;;  %v4673_v51 = vrot.slane %v4672_v23, 2 }
 0x328   :  { %v4679_v20 = vrot.slane %v4678_v58, 2  ;;  %v4685_v50 = vrot.slane %v4684_v45, 2  ;;  %v4691_v38 = vrot.slane %v4690_v42, 2  ;;  %v4697_v47 = vrot.slane %v4696_v22, 2 }
 0x329   :  { %v4703_v36 = vrot.slane %v4702_v10, 2  ;;  %v3659_v3 = vrot.slane %v3411_v0, %v10057_v7  ;;  %v3750_v9 = vmul.f32 %v3639_v31, %v14496_v1  ;;  %v4674_v53 = vadd.f32 %v4673_v51, %v4672_v23 }
 0x32a   :  { %v4680_v25 = vadd.f32 %v4679_v20, %v4678_v58  ;;  %v4686_v30 = vadd.f32 %v4685_v50, %v4684_v45  ;;  %v4692_v59 = vadd.f32 %v4691_v38, %v4690_v42  ;;  %v4698_v13 = vadd.f32 %v4697_v47, %v4696_v22  ;;  %v3279_v22 = vpop.permute.xlu0 %3278  ;;  %v9489_v20 = vld [vmem:[#allocation8 + $0xd8] sm:$0xff]  ;;  %v9490_v47 = vld [vmem:[#allocation8 + $0xe0] sm:$0xff] }
 0x32b   :  { %v4704_v6 = vadd.f32 %v4703_v36, %v4702_v10  ;;  %v3751_v26 = vmul.f32 %v3643_v46, %v14496_v1  ;;  %v3752_v19 = vmul.f32 %v3647_v57, %v14496_v1  ;;  %v4675_v55 = vrot.slane %v4674_v53, 1  ;;  %v9487_v46 = vld [vmem:[#allocation8 + $0xc8] sm:$0xff] }
 0x32c   :  { %v4681_v43 = vrot.slane %v4680_v25, 1  ;;  %v4687_v35 = vrot.slane %v4686_v30, 1  ;;  %v4693_v40 = vrot.slane %v4692_v59, 1  ;;  %v4699_v37 = vrot.slane %v4698_v13, 1 }
 0x32d   :  { %v4705_v0 = vrot.slane %v4704_v6, 1  ;;  %v3753_v32 = vmul.f32 %v3651_v52, %v14496_v1  ;;  %v3754_v31 = vmul.f32 %v3655_v44, %v14496_v1  ;;  %v4676_v41 = vadd.f32 %v4675_v55, %v4674_v53  ;;  %v9488_v44 = vld [vmem:[#allocation8 + $0xd0] sm:$0xff] }
 0x32e   :  { %v4682_v62 = vadd.f32 %v4681_v43, %v4680_v25  ;;  %v4688_v33 = vadd.f32 %v4687_v35, %v4686_v30  ;;  %v4694_v15 = vadd.f32 %v4693_v40, %v4692_v59  ;;  %v4700_v63 = vadd.f32 %v4699_v37, %v4698_v13  ;;  %v9491_v25 = vld [vmem:[#allocation8 + $0xe8] sm:$0xff] }
 0x32f   :  { %v4706_v56 = vadd.f32 %v4705_v0, %v4704_v6  ;;  %v3755_v39 = vmul.f32 %v3659_v3, %v14496_v1  ;;  %v14872_v57 = vmul.f32 %v9487_v46, %v14468_v24  ;;  %v4709_v23 = vmul.f32 %v9351_v21, %v4676_v41  ;;  %v16836_v41 = vld [vmem:[#allocation72_spill] sm:$0xff] }
 0x330   :  { %v4710_v58 = vmul.f32 %v9351_v21, %v4682_v62  ;;  %v4711_v45 = vmul.f32 %v9351_v21, %v4688_v33  ;;  %v4712_v42 = vmul.f32 %v9351_v21, %v4694_v15  ;;  %v4713_v10 = vmul.f32 %v9351_v21, %v4700_v63 }
 0x331   :  { %v4714_v52 = vmul.f32 %v9351_v21, %v4706_v56  ;;  %v3876_v51 = vmul.f32 %v9488_v44, %v14468_v24  ;;  %v3877_v50 = vmul.f32 %v9489_v20, %v14468_v24  ;;  %v3878_v36 = vmul.f32 %v9490_v47, %v14468_v24 }
 0x332   :  { %v4721_v1 = vcombine.low %v4709_v23, %v4710_v58  ;;  %v4722_v38 = vcombine.low %v4711_v45, %v4712_v42  ;;  %v3931_v3 = vstv %s3894_s2  ;;  %v3879_v30 = vmul.f32 %v9491_v25, %v14468_v24 }
 0x333   :  { %v4723_v53 = vcombine.low %v4713_v10, %v4714_v52  ;;  %9352 = vrcp.f32 %v3931_v3  ;;  %vm3287_vm13 = vcmp.gt.f32.partialorder %v3279_v22, 0.0 }
 0x334   :  { %v4730_v59 = vrot.slane %v4721_v1, %v16806_v16  ;;  %v4737_v21 = vrot.slane %v4722_v38, %v16806_v16  ;;  %v3814_v13 = vsel %vm3287_vm13, %v3750_v9, -3e+38  ;;  %v3815_v6 = vsel %vm3287_vm13, %v3751_v26, -3e+38 }
 0x335   :  { %v4744_v55 = vrot.slane %v4723_v53, %v16806_v16  ;;  %v3816_v43 = vsel %vm3287_vm13, %v3752_v19, -3e+38  ;;  %v3817_v35 = vsel %vm3287_vm13, %v3753_v32, -3e+38  ;;  %v3818_v40 = vsel %vm3287_vm13, %v3754_v31, -3e+38 }
 0x336   :  { %v4745_v37 = vcombine.low %v4730_v59, %v4737_v21  ;;  %v3819_v0 = vsel %vm3287_vm13, %v3755_v39, -3e+38  ;;  %v3826_v62 = vmax.f32 %v16836_v41, %v3814_v13  ;;  %v3833_v33 = vmax.f32 %v14364_v17, %v3815_v6  ;;  %v16837_v32 = vld [vmem:[#allocation79_spill] sm:$0xff]  ;;  %v16838_v31 = vld [vmem:[#allocation73_spill] sm:$0xff] }
 0x337   :  { %v4759_v15 = vrot.slane %v4744_v55, %v16806_v16  ;;  %v3840_v63 = vmax.f32 %v14369_v48, %v3816_v43  ;;  %v3847_v56 = vmax.f32 %v14374_v18, %v3817_v35  ;;  %v3854_v9 = vmax.f32 %v14381_v49, %v3818_v40 }
 0x338   :  { %v4752_v26 = vrot.slane %v4745_v37, %v16806_v16  ;;  %v3861_v19 = vmax.f32 %v14396_v27, %v3819_v0  ;;  %vm3862_vm14 = vcmp.le.f32.partialorder %v3826_v62, -1e+38  ;;  %vm3863_vm15 = vcmp.le.f32.partialorder %v3833_v33, -1e+38 }
 0x339   :  { %vm3864_vm1 = vcmp.le.f32.partialorder %v3840_v63, -1e+38  ;;  %vm3865_vm2 = vcmp.le.f32.partialorder %v3847_v56, -1e+38  ;;  %vm3866_vm3 = vcmp.le.f32.partialorder %v3854_v9, -1e+38  ;;  %v5739_v17 = vcombine.high %v16838_v31, %v16837_v32 }
 0x33a   :  { %v4760_v39 = vcombine.low %v4752_v26, %v4759_v15  ;;  %vm3867_vm4 = vcmp.le.f32.partialorder %v3861_v19, -1e+38  ;;  %v3868_v46 = vsel %vm3862_vm14, 0.0, %v3826_v62  ;;  %v3869_v48 = vsel %vm3863_vm15, 0.0, %v3833_v33 }
 0x33b   :  { %v3870_v23 = vsel %vm3864_vm1, 0.0, %v3840_v63  ;;  %v3871_v18 = vsel %vm3865_vm2, 0.0, %v3847_v56  ;;  %v3872_v58 = vsel %vm3866_vm3, 0.0, %v3854_v9  ;;  %v3873_v49 = vsel %vm3867_vm4, 0.0, %v3861_v19 }
 0x33c   :  { %4763 = vst.msk [vmem:[#allocation2 + $0x5] ss:$8 sm:$0xf] %vm14581_vm0, %v4760_v39  ;;  %4764 = vst.msk [vmem:[#allocation2 + $0x5] ss:$8 sm:$0x30] %vm14581_vm0, %v4760_v39  ;;  %v3880_v27 = vmul.f32 %v3868_v46, %v14481_v29  ;;  %v3881_v45 = vmul.f32 %v3869_v48, %v14481_v29  ;;  %v3882_v42 = vmul.f32 %v3870_v23, %v14481_v29 }
 0x33d   :  { %v3883_v22 = vmul.f32 %v3871_v18, %v14481_v29  ;;  %v14901_v10 = vpop.eup %9352  ;;  %v3884_v52 = vmul.f32 %v3872_v58, %v14481_v29  ;;  %v3885_v44 = vmul.f32 %v3873_v49, %v14481_v29  ;;  %v5967_v20 = vrot.slane %v5739_v17, %v9797_v4 }
 0x33e   :  { %v5971_v1 = vrot.slane %v5739_v17, %v9800_v5  ;;  %v3886_v38 = vadd.f32 %v3880_v27, %v14856_v28  ;;  %v3887_v47 = vadd.f32 %v3881_v45, %v14872_v57  ;;  %v3888_v3 = vadd.f32 %v3882_v42, %v3876_v51 }
 0x33f   :  { %v3889_v53 = vadd.f32 %v3883_v22, %v3877_v50  ;;  %v3890_v25 = vadd.f32 %v3884_v52, %v3878_v36  ;;  %v3891_v59 = vadd.f32 %v3885_v44, %v3879_v30  ;;  %v5975_v21 = vrot.slane %v5739_v17, %v9854_v34 }
 0x340   :  { %v5979_v13 = vrot.slane %v5739_v17, %v9911_v11  ;;  %v3895_v6 = vrot.slane %v3886_v38, 4  ;;  %v3901_v55 = vrot.slane %v3887_v47, 4  ;;  %v3907_v43 = vrot.slane %v3888_v3, 4 }
 0x341   :  { %v3913_v35 = vrot.slane %v3889_v53, 4  ;;  %v3919_v40 = vrot.slane %v3890_v25, 4  ;;  %v3925_v37 = vrot.slane %v3891_v59, 4  ;;  %v5983_v0 = vrot.slane %v5739_v17, %v9965_v14 }
 0x342   :  { %v5987_v28 = vrot.slane %v5739_v17, %v10057_v7  ;;  %v3896_v41 = vadd.f32 %v3895_v6, %v3886_v38  ;;  %v3902_v57 = vadd.f32 %v3901_v55, %v3887_v47  ;;  %v3908_v51 = vadd.f32 %v3907_v43, %v3888_v3  ;;  %v9493_v38 = vld [vmem:[#allocation8 + $0x158] sm:$0xff]  ;;  %v9495_v55 = vld [vmem:[#allocation8 + $0x168] sm:$0xff] }
 0x343   :  { %v3914_v50 = vadd.f32 %v3913_v35, %v3889_v53  ;;  %v3920_v36 = vadd.f32 %v3919_v40, %v3890_v25  ;;  %v3926_v30 = vadd.f32 %v3925_v37, %v3891_v59  ;;  %v6078_v62 = vmul.f32 %v5967_v20, %v14453_v12  ;;  %v9492_v20 = vld [vmem:[#allocation8 + $0x150] sm:$0xff]  ;;  %v5607_v35 = vpop.permute.xlu1 %5606 }
 0x344   :  { %v6079_v33 = vmul.f32 %v5971_v1, %v14453_v12  ;;  %v3897_v15 = vrot.slane %v3896_v41, 2  ;;  %v3903_v63 = vrot.slane %v3902_v57, 2  ;;  %v3909_v56 = vrot.slane %v3908_v51, 2 }
 0x345   :  { %v3915_v9 = vrot.slane %v3914_v50, 2  ;;  %v3921_v26 = vrot.slane %v3920_v36, 2  ;;  %v3927_v19 = vrot.slane %v3926_v30, 2  ;;  %v6080_v32 = vmul.f32 %v5975_v21, %v14453_v12 }
 0x346   :  { %v6081_v31 = vmul.f32 %v5979_v13, %v14453_v12  ;;  %v3898_v17 = vadd.f32 %v3897_v15, %v3896_v41  ;;  %v3904_v39 = vadd.f32 %v3903_v63, %v3902_v57  ;;  %v3910_v46 = vadd.f32 %v3909_v56, %v3908_v51  ;;  %v9494_v13 = vld [vmem:[#allocation8 + $0x160] sm:$0xff]  ;;  %v9496_v51 = vld [vmem:[#allocation8 + $0x170] sm:$0xff] }
 0x347   :  { %v3916_v48 = vadd.f32 %v3915_v9, %v3914_v50  ;;  %v3922_v23 = vadd.f32 %v3921_v26, %v3920_v36  ;;  %v3928_v18 = vadd.f32 %v3927_v19, %v3926_v30  ;;  %v6082_v58 = vmul.f32 %v5983_v0, %v14453_v12  ;;  %v9497_v36 = vld [vmem:[#allocation8 + $0x178] sm:$0xff] }
 0x348   :  { %v6083_v49 = vmul.f32 %v5987_v28, %v14453_v12  ;;  %v3899_v27 = vrot.slane %v3898_v17, 1  ;;  %v3905_v45 = vrot.slane %v3904_v39, 1  ;;  %v3911_v42 = vrot.slane %v3910_v46, 1 }
 0x349   :  { %v3917_v22 = vrot.slane %v3916_v48, 1  ;;  %v3923_v52 = vrot.slane %v3922_v23, 1  ;;  %v3929_v44 = vrot.slane %v3928_v18, 1  ;;  %v14922_v1 = vmul.f32 %v9492_v20, %v14468_v24 }
 0x34a   :  { %v14925_v47 = vmul.f32 %v9493_v38, %v14468_v24  ;;  %v3900_v3 = vadd.f32 %v3899_v27, %v3898_v17  ;;  %v3906_v53 = vadd.f32 %v3905_v45, %v3904_v39  ;;  %v3912_v25 = vadd.f32 %v3911_v42, %v3910_v46 }
 0x34b   :  { %v3918_v59 = vadd.f32 %v3917_v22, %v3916_v48  ;;  %v3924_v12 = vadd.f32 %v3923_v52, %v3922_v23  ;;  %v3930_v21 = vadd.f32 %v3929_v44, %v3928_v18  ;;  %v14928_v6 = vmul.f32 %v9494_v13, %v14468_v24  ;;  %v16840_v44 = vld [vmem:[#allocation66_spill] sm:$0xff]  ;;  %v16843_v13 = vld [vmem:[#allocation77_spill] sm:$0xff] }
 0x34c   :  { %v6205_v43 = vmul.f32 %v9495_v55, %v14468_v24  ;;  %v3933_v40 = vmul.f32 %v14901_v10, %v3900_v3  ;;  %v3934_v37 = vmul.f32 %v14901_v10, %v3906_v53  ;;  %v3935_v0 = vmul.f32 %v14901_v10, %v3912_v25 }
 0x34d   :  { %v3936_v28 = vmul.f32 %v14901_v10, %v3918_v59  ;;  %v3937_v41 = vmul.f32 %v14901_v10, %v3924_v12  ;;  %v3938_v57 = vmul.f32 %v14901_v10, %v3930_v21  ;;  %v6206_v50 = vmul.f32 %v9496_v51, %v14468_v24  ;;  %v16841_v12 = vld [vmem:[#allocation80_spill] sm:$0xff]  ;;  %v16842_v21 = vld [vmem:[#allocation75_spill] sm:$0xff] }
 0x34e   :  { %v6207_v30 = vmul.f32 %v9497_v36, %v14468_v24  ;;  %v3945_v15 = vcombine.low %v3933_v40, %v3934_v37  ;;  %v6259_v56 = vstv %s14933_s18  ;;  %vm5615_vm5 = vcmp.gt.f32.partialorder %v5607_v35, 0.0 }
 0x34f   :  { %v3946_v63 = vcombine.low %v3935_v0, %v3936_v28  ;;  %v3947_v9 = vcombine.low %v3937_v41, %v3938_v57  ;;  %v6142_v26 = vsel %vm5615_vm5, %v6078_v62, -3e+38  ;;  %v6143_v19 = vsel %vm5615_vm5, %v6079_v33, -3e+38  ;;  %v16839_v33 = vld [vmem:[#allocation59_spill] sm:$0xff]  ;;  %v16845_v0 = vld [vmem:[#allocation128_spill] sm:$0xff] }
 0x350   :  { %v6144_v17 = vsel %vm5615_vm5, %v6080_v32, -3e+38  ;;  %v3954_v39 = vrot.slane %v3945_v15, %v16806_v16  ;;  %v6145_v48 = vsel %vm5615_vm5, %v6081_v31, -3e+38  ;;  %v6146_v10 = vsel %vm5615_vm5, %v6082_v58, -3e+38 }
 0x351   :  { %v3961_v46 = vrot.slane %v3946_v63, %v16806_v16  ;;  %v3968_v23 = vrot.slane %v3947_v9, %v16806_v16  ;;  %v6147_v18 = vsel %vm5615_vm5, %v6083_v49, -3e+38  ;;  %v6154_v27 = vmax.f32 %v14412_v8, %v6142_v26  ;;  %v16846_v28 = vld [vmem:[#allocation103_spill] sm:$0xff]  ;;  %v16847_v63 = vld [vmem:[#allocation86_spill] sm:$0xff]  ;;  %v16848_v9 = vld [vmem:[#allocation100_spill] sm:$0xff] }
 0x352   :  { %v6161_v45 = vmax.f32 %v14423_v61, %v6143_v19  ;;  %v6168_v22 = vmax.f32 %v14428_v54, %v6144_v17  ;;  %v6175_v62 = vmax.f32 %v14440_v60, %v6145_v48  ;;  %v6182_v32 = vmax.f32 %v16839_v33, %v6146_v10  ;;  %v16849_v26 = vld [vmem:[#allocation78_spill] sm:$0xff] }
 0x353   :  { %v3969_v42 = vcombine.low %v3954_v39, %v3961_v46  ;;  %v3983_v52 = vrot.slane %v3968_v23, %v16806_v16  ;;  %v6189_v20 = vmax.f32 %v16840_v44, %v6147_v18  ;;  %vm6190_vm6 = vcmp.le.f32.partialorder %v6154_v27, -1e+38 }
 0x354   :  { %vm6191_vm7 = vcmp.le.f32.partialorder %v6161_v45, -1e+38  ;;  %vm6192_vm8 = vcmp.le.f32.partialorder %v6168_v22, -1e+38  ;;  %vm6193_vm9 = vcmp.le.f32.partialorder %v6175_v62, -1e+38  ;;  %v16844_v55 = vmax.f32 %v16842_v21, %v16843_v13 }
 0x355   :  { %v3976_v31 = vrot.slane %v3969_v42, %v16806_v16  ;;  %vm6194_vm10 = vcmp.le.f32.partialorder %v6182_v32, -1e+38  ;;  %vm6195_vm11 = vcmp.le.f32.partialorder %v6189_v20, -1e+38  ;;  %v6196_v8 = vsel %vm6190_vm6, 0.0, %v6154_v27 }
 0x356   :  { %v6197_v61 = vsel %vm6191_vm7, 0.0, %v6161_v45  ;;  %v6198_v58 = vsel %vm6192_vm8, 0.0, %v6168_v22  ;;  %v6199_v49 = vsel %vm6193_vm9, 0.0, %v6175_v62  ;;  %v6200_v60 = vsel %vm6194_vm10, 0.0, %v6182_v32 }
 0x357   :  { %v3984_v54 = vcombine.low %v3976_v31, %v3983_v52  ;;  %v6201_v38 = vsel %vm6195_vm11, 0.0, %v6189_v20  ;;  %v6208_v3 = vmul.f32 %v6196_v8, %v14481_v29  ;;  %v6209_v53 = vmul.f32 %v6197_v61, %v14481_v29 }
 0x358   :  { %v6210_v25 = vmul.f32 %v6198_v58, %v14481_v29  ;;  %v6211_v59 = vmul.f32 %v6199_v49, %v14481_v29  ;;  %v14963_v35 = vmax.f32 %v16844_v55, %v16841_v12  ;;  %v6212_v40 = vmul.f32 %v6200_v60, %v14481_v29 }
 0x359   :  { %3987 = vst.msk [vmem:[#allocation2 + $0x4] ss:$8 sm:$0xf] %vm14581_vm0, %v3984_v54  ;;  %3988 = vst.msk [vmem:[#allocation2 + $0x4] ss:$8 sm:$0x30] %vm14581_vm0, %v3984_v54  ;;  %v6213_v37 = vmul.f32 %v6201_v38, %v14481_v29  ;;  %v14973_v41 = vcombine.high %v16846_v28, %v16845_v0  ;;  %v6214_v57 = vadd.f32 %v6208_v3, %v14922_v1  ;;  %9354 = vrcp.f32 %v6259_v56 }
 0x35a   :  { %v6215_v51 = vadd.f32 %v6209_v53, %v14925_v47  ;;  %v6216_v36 = vadd.f32 %v6210_v25, %v14928_v6  ;;  %v6217_v15 = vadd.f32 %v6211_v59, %v6205_v43  ;;  %v16850_v19 = vmax.f32 %v16848_v9, %v16849_v26  ;;  %v9498_v6 = vld [vmem:[#allocation8 + $0x120] sm:$0xff] }
 0x35b   :  { %v6218_v39 = vadd.f32 %v6212_v40, %v6206_v50  ;;  %v6219_v46 = vadd.f32 %v6213_v37, %v6207_v30  ;;  %v6223_v48 = vrot.slane %v6214_v57, 4  ;;  %v5191_v47 = vrot.slane %v14973_v41, %v9797_v4  ;;  %v16851_v59 = vld [vmem:[#allocation43_spill] sm:$0xff] }
 0x35c   :  { %v14982_v17 = vmax.f32 %v16850_v19, %v16847_v63  ;;  %v6229_v10 = vrot.slane %v6215_v51, 4  ;;  %v6235_v23 = vrot.slane %v6216_v36, 4  ;;  %v6241_v18 = vrot.slane %v6217_v15, 4 }
 0x35d   :  { %v6247_v27 = vrot.slane %v6218_v39, 4  ;;  %v6253_v1 = vrot.slane %v6219_v46, 4  ;;  %v14987_v43 = vmul.f32 %v9498_v6, %v14468_v24  ;;  %v6224_v45 = vadd.f32 %v6223_v48, %v6214_v57  ;;  %v9499_v6 = vld [vmem:[#allocation8 + $0x128] sm:$0xff] }
 0x35e   :  { %v6230_v42 = vadd.f32 %v6229_v10, %v6215_v51  ;;  %v6236_v22 = vadd.f32 %v6235_v23, %v6216_v36  ;;  %v6242_v62 = vadd.f32 %v6241_v18, %v6217_v15  ;;  %v5195_v30 = vrot.slane %v14973_v41, %v9800_v5  ;;  %v4831_v18 = vpop.permute.xlu0 %4830 }
 0x35f   :  { %v6248_v56 = vadd.f32 %v6247_v27, %v6218_v39  ;;  %v6254_v50 = vadd.f32 %v6253_v1, %v6219_v46  ;;  %v5199_v33 = vrot.slane %v14973_v41, %v9854_v34  ;;  %v6225_v32 = vrot.slane %v6224_v45, 2 }
 0x360   :  { %v6231_v52 = vrot.slane %v6230_v42, 2  ;;  %v6237_v44 = vrot.slane %v6236_v22, 2  ;;  %v6243_v20 = vrot.slane %v6242_v62, 2  ;;  %v5203_v61 = vrot.slane %v14973_v41, %v9911_v11 }
 0x361   :  { %v6249_v31 = vrot.slane %v6248_v56, 2  ;;  %v6255_v8 = vrot.slane %v6254_v50, 2  ;;  %v5207_v58 = vrot.slane %v14973_v41, %v9965_v14  ;;  %v6226_v54 = vadd.f32 %v6225_v32, %v6224_v45  ;;  %v9502_v32 = vld [vmem:[#allocation8 + $0x140] sm:$0xff] }
 0x362   :  { %v6232_v49 = vadd.f32 %v6231_v52, %v6230_v42  ;;  %v6238_v60 = vadd.f32 %v6237_v44, %v6236_v22  ;;  %v6244_v38 = vadd.f32 %v6243_v20, %v6242_v62  ;;  %v5211_v25 = vrot.slane %v14973_v41, %v10057_v7  ;;  %v9500_v62 = vld [vmem:[#allocation8 + $0x130] sm:$0xff]  ;;  %v9503_v44 = vld [vmem:[#allocation8 + $0x148] sm:$0xff] }
 0x363   :  { %v6250_v3 = vadd.f32 %v6249_v31, %v6248_v56  ;;  %v6256_v53 = vadd.f32 %v6255_v8, %v6254_v50  ;;  %v5302_v12 = vmul.f32 %v5191_v47, %v16851_v59  ;;  %v6227_v21 = vrot.slane %v6226_v54, 1  ;;  %v9355_v37 = vpop.eup %9354  ;;  %v9501_v50 = vld [vmem:[#allocation8 + $0x138] sm:$0xff] }
 0x364   :  { %v6233_v13 = vrot.slane %v6232_v49, 1  ;;  %v6239_v55 = vrot.slane %v6238_v60, 1  ;;  %v6245_v40 = vrot.slane %v6244_v38, 1  ;;  %v5303_v57 = vmul.f32 %v5195_v30, %v16851_v59 }
 0x365   :  { %v6251_v0 = vrot.slane %v6250_v3, 1  ;;  %v6257_v28 = vrot.slane %v6256_v53, 1  ;;  %v5304_v51 = vmul.f32 %v5199_v33, %v16851_v59  ;;  %v6228_v36 = vadd.f32 %v6227_v21, %v6226_v54 }
 0x366   :  { %v6234_v15 = vadd.f32 %v6233_v13, %v6232_v49  ;;  %v6240_v63 = vadd.f32 %v6239_v55, %v6238_v60  ;;  %v6246_v9 = vadd.f32 %v6245_v40, %v6244_v38  ;;  %v5305_v19 = vmul.f32 %v5203_v61, %v16851_v59  ;;  %v16854_v55 = vld [vmem:[#allocation61_spill] sm:$0xff]  ;;  %v16855_v40 = vld [vmem:[#allocation52_spill] sm:$0xff] }
 0x367   :  { %v6252_v41 = vadd.f32 %v6251_v0, %v6250_v3  ;;  %v6258_v26 = vadd.f32 %v6257_v28, %v6256_v53  ;;  %v5306_v39 = vmul.f32 %v5207_v58, %v16851_v59  ;;  %v6261_v46 = vmul.f32 %v9355_v37, %v6228_v36 }
 0x368   :  { %v6262_v48 = vmul.f32 %v9355_v37, %v6234_v15  ;;  %v6263_v10 = vmul.f32 %v9355_v37, %v6240_v63  ;;  %v6264_v23 = vmul.f32 %v9355_v37, %v6246_v9  ;;  %v5307_v47 = vmul.f32 %v5211_v25, %v16851_v59  ;;  %v16852_v25 = vld [vmem:[#allocation58_spill] sm:$0xff] }
 0x369   :  { %v6265_v27 = vmul.f32 %v9355_v37, %v6252_v41  ;;  %v6266_v1 = vmul.f32 %v9355_v37, %v6258_v26  ;;  %v5427_v45 = vmul.f32 %v9499_v6, %v14468_v24  ;;  %v5428_v56 = vmul.f32 %v9500_v62, %v14468_v24  ;;  %v16853_v59 = vld [vmem:[#allocation102_spill] sm:$0xff] }
 0x36a   :  { %v6273_v42 = vcombine.low %v6261_v46, %v6262_v48  ;;  %v6274_v22 = vcombine.low %v6263_v10, %v6264_v23  ;;  %v5429_v30 = vmul.f32 %v9501_v50, %v14468_v24  ;;  %v5430_v52 = vmul.f32 %v9502_v32, %v14468_v24 }
 0x36b   :  { %v6275_v33 = vcombine.low %v6265_v27, %v6266_v1  ;;  %v5431_v20 = vmul.f32 %v9503_v44, %v14468_v24  ;;  %vm4839_vm12 = vcmp.gt.f32.partialorder %v4831_v18, 0.0 }
 0x36c   :  { %v6282_v31 = vrot.slane %v6273_v42, %v16806_v16  ;;  %v6289_v8 = vrot.slane %v6274_v22, %v16806_v16  ;;  %v5366_v61 = vsel %vm4839_vm12, %v5302_v12, -3e+38  ;;  %v5367_v58 = vsel %vm4839_vm12, %v5303_v57, -3e+38 }
 0x36d   :  { %v6296_v54 = vrot.slane %v6275_v33, %v16806_v16  ;;  %v5368_v49 = vsel %vm4839_vm12, %v5304_v51, -3e+38  ;;  %v5369_v60 = vsel %vm4839_vm12, %v5305_v19, -3e+38  ;;  %v5370_v38 = vsel %vm4839_vm12, %v5306_v39, -3e+38 }
 0x36e   :  { %v6297_v3 = vcombine.low %v6282_v31, %v6289_v8  ;;  %v5371_v53 = vsel %vm4839_vm12, %v5307_v47, -3e+38  ;;  %v5378_v24 = vmax.f32 %v16852_v25, %v5366_v61  ;;  %v5385_v21 = vmax.f32 %v16853_v59, %v5367_v58 }
 0x36f   :  { %v6311_v13 = vrot.slane %v6296_v54, %v16806_v16  ;;  %v5392_v12 = vmax.f32 %v16854_v55, %v5368_v49  ;;  %v5399_v37 = vmax.f32 %v16855_v40, %v5369_v60  ;;  %v5406_v0 = vmax.f32 %v14963_v35, %v5370_v38 }
 0x370   :  { %v6304_v28 = vrot.slane %v6297_v3, %v16806_v16  ;;  %v5413_v57 = vmax.f32 %v14982_v17, %v5371_v53  ;;  %vm5414_vm13 = vcmp.le.f32.partialorder %v5378_v24, -1e+38  ;;  %vm5415_vm14 = vcmp.le.f32.partialorder %v5385_v21, -1e+38 }
 0x371   :  { %v5483_v51 = vstv %s15017_s20  ;;  %vm5416_vm15 = vcmp.le.f32.partialorder %v5392_v12, -1e+38  ;;  %vm5417_vm1 = vcmp.le.f32.partialorder %v5399_v37, -1e+38  ;;  %vm5418_vm2 = vcmp.le.f32.partialorder %v5406_v0, -1e+38 }
 0x372   :  { %v6312_v36 = vcombine.low %v6304_v28, %v6311_v13  ;;  %vm5419_vm3 = vcmp.le.f32.partialorder %v5413_v57, -1e+38  ;;  %v5420_v15 = vsel %vm5414_vm13, 0.0, %v5378_v24  ;;  %v5421_v63 = vsel %vm5415_vm14, 0.0, %v5385_v21 }
 0x373   :  { %v5422_v9 = vsel %vm5416_vm15, 0.0, %v5392_v12  ;;  %v5423_v41 = vsel %vm5417_vm1, 0.0, %v5399_v37  ;;  %v5424_v26 = vsel %vm5418_vm2, 0.0, %v5406_v0  ;;  %v5425_v19 = vsel %vm5419_vm3, 0.0, %v5413_v57 }
 0x374   :  { %6315 = vst.msk [vmem:[#allocation2 + $0x7] ss:$8 sm:$0xf] %vm14581_vm0, %v6312_v36  ;;  %6316 = vst.msk [vmem:[#allocation2 + $0x7] ss:$8 sm:$0x30] %vm14581_vm0, %v6312_v36  ;;  %v5432_v35 = vmul.f32 %v5420_v15, %v14481_v29  ;;  %v5433_v17 = vmul.f32 %v5421_v63, %v14481_v29  ;;  %v5434_v39 = vmul.f32 %v5422_v9, %v14481_v29  ;;  %9356 = vrcp.f32 %v5483_v51 }
 0x375   :  { %v5435_v46 = vmul.f32 %v5423_v41, %v14481_v29  ;;  %v5436_v48 = vmul.f32 %v5424_v26, %v14481_v29  ;;  %v5437_v10 = vmul.f32 %v5425_v19, %v14481_v29 }
 0x376   :  { %v5438_v23 = vadd.f32 %v5432_v35, %v14987_v43  ;;  %v5439_v18 = vadd.f32 %v5433_v17, %v5427_v45  ;;  %v5440_v27 = vadd.f32 %v5434_v39, %v5428_v56 }
 0x377   :  { %v5441_v1 = vadd.f32 %v5435_v46, %v5429_v30  ;;  %v5442_v47 = vadd.f32 %v5436_v48, %v5430_v52  ;;  %v5443_v6 = vadd.f32 %v5437_v10, %v5431_v20 }
 0x378   :  { %v5447_v42 = vrot.slane %v5438_v23, 4  ;;  %v5453_v22 = vrot.slane %v5439_v18, 4  ;;  %v5459_v62 = vrot.slane %v5440_v27, 4 }
 0x379   :  { %v5465_v50 = vrot.slane %v5441_v1, 4  ;;  %v5471_v33 = vrot.slane %v5442_v47, 4  ;;  %v5477_v32 = vrot.slane %v5443_v6, 4 }
 0x37a   :  { %v5448_v44 = vadd.f32 %v5447_v42, %v5438_v23  ;;  %v5454_v31 = vadd.f32 %v5453_v22, %v5439_v18  ;;  %v5460_v8 = vadd.f32 %v5459_v62, %v5440_v27 }
 0x37b   :  { %v5466_v61 = vadd.f32 %v5465_v50, %v5441_v1  ;;  %v5472_v58 = vadd.f32 %v5471_v33, %v5442_v47  ;;  %v5478_v29 = vadd.f32 %v5477_v32, %v5443_v6  ;;  %v9006_v1 = vld [vmem:[#allocation12 + $0x600] ss:$24 sps:$4 sm:$0xff]  }
 0x37c   :  { %v5449_v54 = vrot.slane %v5448_v44, 2  ;;  %v5455_v43 = vrot.slane %v5454_v31, 2  ;;  %v5461_v45 = vrot.slane %v5460_v8, 2  ;;  %v9009_v50 = vld [vmem:[#allocation12 + $0x8] ss:$24 sps:$4 sm:$0xff]  }
 0x37d   :  { %v5467_v56 = vrot.slane %v5466_v61, 2  ;;  %v5473_v30 = vrot.slane %v5472_v58, 2  ;;  %v5479_v49 = vrot.slane %v5478_v29, 2 }
 0x37e   :  { %v5450_v52 = vadd.f32 %v5449_v54, %v5448_v44  ;;  %v5456_v20 = vadd.f32 %v5455_v43, %v5454_v31  ;;  %v5462_v60 = vadd.f32 %v5461_v45, %v5460_v8  ;;  %v9357_v13 = vpop.eup %9356  ;;  %v9017_v31 = vld [vmem:[#allocation12 + $0x3c] ss:$24 sps:$4 sm:$0xff]   ;;  %v9023_v54 = vld [vmem:[#allocation12 + $0x6c] ss:$24 sps:$4 sm:$0xff]   ;;  %v9018_v43 = vld [vmem:[#allocation12 + $0x660] ss:$24 sps:$4 sm:$0xff]  }
 0x37f   :  { %v5468_v38 = vadd.f32 %v5467_v56, %v5466_v61  ;;  %v5474_v3 = vadd.f32 %v5473_v30, %v5472_v58  ;;  %v5480_v53 = vadd.f32 %v5479_v49, %v5478_v29  ;;  %v9012_v61 = vld [vmem:[#allocation12 + $0x630] ss:$24 sps:$4 sm:$0xff]   ;;  %v9020_v29 = vld [vmem:[#allocation12 + $0x664] ss:$24 sps:$4 sm:$0xff]   ;;  %v9026_v56 = vld [vmem:[#allocation12 + $0x694] ss:$24 sps:$4 sm:$0xff]  }
 0x380   :  { %v5451_v25 = vrot.slane %v5450_v52, 1  ;;  %v5457_v24 = vrot.slane %v5456_v20, 1  ;;  %v5463_v59 = vrot.slane %v5462_v60, 1  ;;  %v9015_v58 = vld [vmem:[#allocation12 + $0x38] ss:$24 sps:$4 sm:$0xff]  }
 0x381   :  { %v5469_v21 = vrot.slane %v5468_v38, 1  ;;  %v5475_v55 = vrot.slane %v5474_v3, 1  ;;  %v5481_v12 = vrot.slane %v5480_v53, 1  ;;  %v9021_v45 = vld [vmem:[#allocation12 + $0x68] ss:$24 sps:$4 sm:$0xff]  }
 0x382   :  { %v5452_v40 = vadd.f32 %v5451_v25, %v5450_v52  ;;  %v5458_v37 = vadd.f32 %v5457_v24, %v5456_v20  ;;  %v5464_v0 = vadd.f32 %v5463_v59, %v5462_v60  ;;  %v9029_v30 = vld [vmem:[#allocation12 + $0x9c] ss:$24 sps:$4 sm:$0xff]   ;;  %v9024_v49 = vld [vmem:[#allocation12 + $0x690] ss:$24 sps:$4 sm:$0xff]   ;;  %v9035_v60 = vld [vmem:[#allocation12 + $0xcc] ss:$24 sps:$4 sm:$0xff]  }
 0x383   :  { %v5470_v28 = vadd.f32 %v5469_v21, %v5468_v38  ;;  %v5476_v57 = vadd.f32 %v5475_v55, %v5474_v3  ;;  %v5482_v51 = vadd.f32 %v5481_v12, %v5480_v53  ;;  %v9027_v52 = vld [vmem:[#allocation12 + $0x98] ss:$24 sps:$4 sm:$0xff]   ;;  %v9032_v20 = vld [vmem:[#allocation12 + $0x6c4] ss:$24 sps:$4 sm:$0xff]   ;;  %v9033_v3 = vld [vmem:[#allocation12 + $0xc8] ss:$24 sps:$4 sm:$0xff]  }
 0x384   :  { %v5485_v36 = vmul.f32 %v9357_v13, %v5452_v40  ;;  %v5486_v15 = vmul.f32 %v9357_v13, %v5458_v37  ;;  %v5487_v63 = vmul.f32 %v9357_v13, %v5464_v0  ;;  %v9030_v38 = vld [vmem:[#allocation12 + $0x6c0] ss:$24 sps:$4 sm:$0xff]   ;;  %v9038_v53 = vld [vmem:[#allocation12 + $0x6f4] ss:$24 sps:$4 sm:$0xff]   ;;  %v9036_v24 = vld [vmem:[#allocation12 + $0x6f0] ss:$24 sps:$4 sm:$0xff]  }
 0x385   :  { %v5488_v9 = vmul.f32 %v9357_v13, %v5470_v28  ;;  %v5489_v41 = vmul.f32 %v9357_v13, %v5476_v57  ;;  %v5490_v26 = vmul.f32 %v9357_v13, %v5482_v51  ;;  %v9041_v25 = vld [vmem:[#allocation12 + $0xfc] ss:$24 sps:$4 sm:$0xff]   ;;  %v9039_v59 = vld [vmem:[#allocation12 + $0xf8] ss:$24 sps:$4 sm:$0xff]   ;;  %v9047_v13 = vld [vmem:[#allocation12 + $0x12c] ss:$24 sps:$4 sm:$0xff]  }
 0x386   :  { %v5497_v19 = vcombine.low %v5485_v36, %v5486_v15  ;;  %v9044_v21 = vld [vmem:[#allocation12 + $0x724] ss:$24 sps:$4 sm:$0xff]   ;;  %v9042_v55 = vld [vmem:[#allocation12 + $0x720] ss:$24 sps:$4 sm:$0xff]   ;;  %v9050_v40 = vld [vmem:[#allocation12 + $0x754] ss:$24 sps:$4 sm:$0xff]  }
 0x387   :  { %v5498_v35 = vcombine.low %v5487_v63, %v5488_v9  ;;  %v5499_v17 = vcombine.low %v5489_v41, %v5490_v26  ;;  %v9045_v12 = vld [vmem:[#allocation12 + $0x128] ss:$24 sps:$4 sm:$0xff]   ;;  %v9053_v37 = vld [vmem:[#allocation12 + $0x15c] ss:$24 sps:$4 sm:$0xff]   ;;  %v9051_v28 = vld [vmem:[#allocation12 + $0x158] ss:$24 sps:$4 sm:$0xff]  }
 0x388   :  { %v5506_v39 = vrot.slane %v5497_v19, %v16806_v16  ;;  %v9048_v0 = vld [vmem:[#allocation12 + $0x750] ss:$24 sps:$4 sm:$0xff]   ;;  %v9056_v57 = vld [vmem:[#allocation12 + $0x784] ss:$24 sps:$4 sm:$0xff]   ;;  %v9054_v36 = vld [vmem:[#allocation12 + $0x780] ss:$24 sps:$4 sm:$0xff]  }
 0x389   :  { %v5513_v46 = vrot.slane %v5498_v35, %v16806_v16  ;;  %v5520_v48 = vrot.slane %v5499_v17, %v16806_v16  ;;  %v9059_v51 = vld [vmem:[#allocation12 + $0x18c] ss:$24 sps:$4 sm:$0xff]   ;;  %v9057_v15 = vld [vmem:[#allocation12 + $0x188] ss:$24 sps:$4 sm:$0xff]   ;;  %v9065_v9 = vld [vmem:[#allocation12 + $0x1bc] ss:$24 sps:$4 sm:$0xff]  }
 0x38a   :  { %v9062_v63 = vld [vmem:[#allocation12 + $0x7b4] ss:$24 sps:$4 sm:$0xff]   ;;  %v9060_v41 = vld [vmem:[#allocation12 + $0x7b0] ss:$24 sps:$4 sm:$0xff]   ;;  %v9068_v19 = vld [vmem:[#allocation12 + $0x7e4] ss:$24 sps:$4 sm:$0xff]  }
 0x38b   :  { %v5521_v10 = vcombine.low %v5506_v39, %v5513_v46  ;;  %v5535_v18 = vrot.slane %v5520_v48, %v16806_v16  ;;  %v9063_v26 = vld [vmem:[#allocation12 + $0x1b8] ss:$24 sps:$4 sm:$0xff]   ;;  %v9071_v35 = vld [vmem:[#allocation12 + $0x1ec] ss:$24 sps:$4 sm:$0xff]   ;;  %v9069_v39 = vld [vmem:[#allocation12 + $0x1e8] ss:$24 sps:$4 sm:$0xff]  }
 0x38c   :  { %v9066_v17 = vld [vmem:[#allocation12 + $0x7e0] ss:$24 sps:$4 sm:$0xff]   ;;  %v9074_v46 = vld [vmem:[#allocation12 + $0x814] ss:$24 sps:$4 sm:$0xff]  }
 0x38d   :  { %v5528_v23 = vrot.slane %v5521_v10, %v16806_v16  ;;  %v9077_v48 = vld [vmem:[#allocation12 + $0x21c] ss:$24 sps:$4 sm:$0xff]   ;;  %v9072_v10 = vld [vmem:[#allocation12 + $0x810] ss:$24 sps:$4 sm:$0xff]  }
 0x38f   :  { %v5536_v27 = vcombine.low %v5528_v23, %v5535_v18  ;;  %v9075_v23 = vld [vmem:[#allocation12 + $0x218] ss:$24 sps:$4 sm:$0xff]   ;;  %v9080_v18 = vld [vmem:[#allocation12 + $0x844] ss:$24 sps:$4 sm:$0xff]  }
 0x391   :  { %5539 = vst.msk [vmem:[#allocation2 + $0x6] ss:$8 sm:$0xf] %vm14581_vm0, %v5536_v27  ;;  %5540 = vst.msk [vmem:[#allocation2 + $0x6] ss:$8 sm:$0x30] %vm14581_vm0, %v5536_v27 }
 0x392   :  { %v9083_v27 = vld [vmem:[#allocation12 + $0x24c] ss:$24 sps:$4 sm:$0xff]  }
 0x398   :  { %v6318_v47 = vld [vmem:[#allocation2 + $0x8] sm:$0xff]  ;;  %v6320_v6 = vld [vmem:[#allocation2 + $0x18] sm:$0xff]  ;;  %v6317_v42 = vld [vmem:[#allocation2] sm:$0xff] }
 0x399   :  { %v15048_v22 = vpack.c.bf16 %v6318_v47, %v6318_v47  ;;  %v15050_v62 = vpack.c.bf16 %v6320_v6, %v6320_v6  ;;  %v15052_v33 = vpack.c.bf16 %v6317_v42, %v6317_v42  ;;  %v6319_v32 = vld [vmem:[#allocation2 + $0x10] sm:$0xff]  ;;  %v6322_v16 = vld [vmem:[#allocation2 + $0x28] sm:$0xff]  ;;  %v9086_v6 = vld [vmem:[#allocation12 + $0x874] ss:$24 sps:$4 sm:$0xff]  }
 0x39a   :  { %v15054_v44 = vpack.c.bf16 %v6319_v32, %v6319_v32  ;;  %v15060_v8 = vpack.c.bf16 %v6322_v16, %v6322_v16  ;;  %v9081_v47 = vld [vmem:[#allocation12 + $0x248] ss:$24 sps:$4 sm:$0xff]   ;;  %v9089_v42 = vld [vmem:[#allocation12 + $0x27c] ss:$24 sps:$4 sm:$0xff]   ;;  %v9087_v32 = vld [vmem:[#allocation12 + $0x278] ss:$24 sps:$4 sm:$0xff]  }
 0x39b   :  { %8121 = vmatprep.mubr.bf16.mxu1 %v15048_v22  ;;  %8162 = vmatprep.mubr.bf16.mxu0 %v15050_v62  ;;  %v9092_v16 = vld [vmem:[#allocation12 + $0x8a4] ss:$24 sps:$4 sm:$0xff]  }
 0x39c   :  { %8122 = vmatmul.mubr.bf16.vlgmr.msra.gmra.mrb[0].mxu1 %v15052_v33  ;;  %8163 = vmatmul.mubr.bf16.vlgmr.msra.gmra.mrb[0].mxu0 %v15054_v44 }
 0x39d   :  { %8172 = vmatpush1.bf16.msra.mxu0 %v9006_v1  ;;  %8213 = vmatpush1.bf16.msra.mxu1 %v9009_v50  ;;  %v9078_v1 = vld [vmem:[#allocation12 + $0x840] ss:$24 sps:$4 sm:$0xff]   ;;  %v9084_v50 = vld [vmem:[#allocation12 + $0x870] ss:$24 sps:$4 sm:$0xff]  }
 0x39e   :  { %8203 = vmatprep.mubr.bf16.mxu0 %v15060_v8  ;;  %8244 = vmatprep.mubr.bf16.mxu1 %v15048_v22 }
 0x39f   :  { %8173 = vmatprep.subr.bf16.mxu0 %v9014_v2  ;;  %8214 = vmatprep.subr.bf16.mxu1 %v9017_v31  ;;  %v9095_v2 = vld [vmem:[#allocation12 + $0x2ac] ss:$24 sps:$4 sm:$0xff]   ;;  %v9090_v31 = vld [vmem:[#allocation12 + $0x8a0] ss:$24 sps:$4 sm:$0xff]  }
 0x3a1   :  { %8174 = vmatpush1.bf16.msra.mxu0 %v9012_v61  ;;  %8215 = vmatpush1.bf16.msra.mxu1 %v9015_v58  ;;  %v9093_v61 = vld [vmem:[#allocation12 + $0x2a8] ss:$24 sps:$4 sm:$0xff]   ;;  %v9098_v58 = vld [vmem:[#allocation12 + $0x8d4] ss:$24 sps:$4 sm:$0xff]  }
 0x3a2   :  { %8175 = vmatprep.subr.bf16.mxu0 %v9020_v29  ;;  %8216 = vmatprep.subr.bf16.mxu1 %v9023_v54  ;;  %v9101_v29 = vld [vmem:[#allocation12 + $0x2dc] ss:$24 sps:$4 sm:$0xff]   ;;  %v9096_v54 = vld [vmem:[#allocation12 + $0x8d0] ss:$24 sps:$4 sm:$0xff]  }
 0x3a5   :  { %8176 = vmatpush1.bf16.msra.mxu0 %v9018_v43  ;;  %8217 = vmatpush1.bf16.msra.mxu1 %v9021_v45  ;;  %v9099_v43 = vld [vmem:[#allocation12 + $0x2d8] ss:$24 sps:$4 sm:$0xff]   ;;  %v9104_v45 = vld [vmem:[#allocation12 + $0x30c] ss:$24 sps:$4 sm:$0xff]  }
 0x3a6   :  { %8177 = vmatprep.subr.bf16.mxu0 %v9026_v56  ;;  %8218 = vmatprep.subr.bf16.mxu1 %v9029_v30  ;;  %v9107_v56 = vld [vmem:[#allocation12 + $0x14] ss:$24 sps:$4 sm:$0xff]  }
 0x3a7   :  { %v6321_v30 = vld [vmem:[#allocation2 + $0x20] sm:$0xff] }
 0x3a9   :  { %8178 = vmatpush1.bf16.msra.mxu0 %v9024_v49  ;;  %8219 = vmatpush1.bf16.msra.mxu1 %v9027_v52  ;;  %v9102_v49 = vld [vmem:[#allocation12 + $0x308] ss:$24 sps:$4 sm:$0xff]   ;;  %v15064_v52 = vpack.c.bf16 %v6321_v30, %v6321_v30  ;;  %v9180_v30 = vld [vmem:[#allocation12 + $0x578] ss:$24 sps:$4 sm:$0xff]  }
 0x3aa   :  { %8179 = vmatprep.subr.bf16.mxu0 %v9032_v20  ;;  %8220 = vmatprep.subr.bf16.mxu1 %v9035_v60  ;;  %v9105_v20 = vld [vmem:[#allocation12 + $0x10] ss:$24 sps:$4 sm:$0xff]   ;;  %v9110_v60 = vld [vmem:[#allocation12 + $0x33c] ss:$24 sps:$4 sm:$0xff]  }
 0x3ad   :  { %8180 = vmatpush1.bf16.msra.mxu0 %v9030_v38  ;;  %8221 = vmatpush1.bf16.msra.mxu1 %v9033_v3  ;;  %v9113_v38 = vld [vmem:[#allocation12 + $0x44] ss:$24 sps:$4 sm:$0xff]   ;;  %v9108_v3 = vld [vmem:[#allocation12 + $0x338] ss:$24 sps:$4 sm:$0xff]  }
 0x3ae   :  { %8181 = vmatprep.subr.bf16.mxu0 %v9038_v53  ;;  %8222 = vmatprep.subr.bf16.mxu1 %v9041_v25  ;;  %v9111_v53 = vld [vmem:[#allocation12 + $0x40] ss:$24 sps:$4 sm:$0xff]   ;;  %v9116_v25 = vld [vmem:[#allocation12 + $0x36c] ss:$24 sps:$4 sm:$0xff]  }
 0x3b1   :  { %8182 = vmatpush1.bf16.msra.mxu0 %v9036_v24  ;;  %8223 = vmatpush1.bf16.msra.mxu1 %v9039_v59  ;;  %v9119_v24 = vld [vmem:[#allocation12 + $0x74] ss:$24 sps:$4 sm:$0xff]   ;;  %v9114_v59 = vld [vmem:[#allocation12 + $0x368] ss:$24 sps:$4 sm:$0xff]  }
 0x3b2   :  { %8183 = vmatprep.subr.bf16.mxu0 %v9044_v21  ;;  %8224 = vmatprep.subr.bf16.mxu1 %v9047_v13  ;;  %v9117_v21 = vld [vmem:[#allocation12 + $0x70] ss:$24 sps:$4 sm:$0xff]   ;;  %v9122_v13 = vld [vmem:[#allocation12 + $0x39c] ss:$24 sps:$4 sm:$0xff]  }
 0x3b5   :  { %8184 = vmatpush1.bf16.msra.mxu0 %v9042_v55  ;;  %8225 = vmatpush1.bf16.msra.mxu1 %v9045_v12  ;;  %v9125_v55 = vld [vmem:[#allocation12 + $0xa4] ss:$24 sps:$4 sm:$0xff]   ;;  %v9120_v12 = vld [vmem:[#allocation12 + $0x398] ss:$24 sps:$4 sm:$0xff]  }
 0x3b6   :  { %8185 = vmatprep.subr.bf16.mxu0 %v9050_v40  ;;  %8226 = vmatprep.subr.bf16.mxu1 %v9053_v37  ;;  %v9123_v40 = vld [vmem:[#allocation12 + $0xa0] ss:$24 sps:$4 sm:$0xff]   ;;  %v9128_v37 = vld [vmem:[#allocation12 + $0x3cc] ss:$24 sps:$4 sm:$0xff]  }
 0x3b9   :  { %8186 = vmatpush1.bf16.msra.mxu0 %v9048_v0  ;;  %8227 = vmatpush1.bf16.msra.mxu1 %v9051_v28  ;;  %v9126_v0 = vld [vmem:[#allocation12 + $0x3c8] ss:$24 sps:$4 sm:$0xff]  }
 0x3ba   :  { %8187 = vmatprep.subr.bf16.mxu0 %v9056_v57  ;;  %8228 = vmatprep.subr.bf16.mxu1 %v9059_v51  ;;  %v9129_v28 = vld [vmem:[#allocation12 + $0xd0] ss:$24 sps:$4 sm:$0xff]   ;;  %v9134_v57 = vld [vmem:[#allocation12 + $0x3fc] ss:$24 sps:$4 sm:$0xff]  }
 0x3bb   :  { %v9137_v51 = vld [vmem:[#allocation12 + $0x104] ss:$24 sps:$4 sm:$0xff]  }
 0x3bd   :  { %8188 = vmatpush1.bf16.msra.mxu0 %v9054_v36  ;;  %8229 = vmatpush1.bf16.msra.mxu1 %v9057_v15  ;;  %v9132_v36 = vld [vmem:[#allocation12 + $0x3f8] ss:$24 sps:$4 sm:$0xff]  }
 0x3be   :  { %8189 = vmatprep.subr.bf16.mxu0 %v9062_v63  ;;  %8230 = vmatprep.subr.bf16.mxu1 %v9065_v9  ;;  %v9135_v15 = vld [vmem:[#allocation12 + $0x100] ss:$24 sps:$4 sm:$0xff]   ;;  %v9140_v63 = vld [vmem:[#allocation12 + $0x42c] ss:$24 sps:$4 sm:$0xff]  }
 0x3bf   :  { %v9143_v9 = vld [vmem:[#allocation12 + $0x134] ss:$24 sps:$4 sm:$0xff]  }
 0x3c1   :  { %8190 = vmatpush1.bf16.msra.mxu0 %v9060_v41  ;;  %8231 = vmatpush1.bf16.msra.mxu1 %v9063_v26  ;;  %v9138_v41 = vld [vmem:[#allocation12 + $0x428] ss:$24 sps:$4 sm:$0xff]  }
 0x3c2   :  { %8191 = vmatprep.subr.bf16.mxu0 %v9068_v19  ;;  %8232 = vmatprep.subr.bf16.mxu1 %v9071_v35  ;;  %v9141_v26 = vld [vmem:[#allocation12 + $0x130] ss:$24 sps:$4 sm:$0xff]   ;;  %v9146_v19 = vld [vmem:[#allocation12 + $0x45c] ss:$24 sps:$4 sm:$0xff]  }
 0x3c3   :  { %v9149_v35 = vld [vmem:[#allocation12 + $0x164] ss:$24 sps:$4 sm:$0xff]  }
 0x3c5   :  { %8192 = vmatpush1.bf16.msra.mxu0 %v9066_v17  ;;  %8233 = vmatpush1.bf16.msra.mxu1 %v9069_v39  ;;  %v9144_v17 = vld [vmem:[#allocation12 + $0x458] ss:$24 sps:$4 sm:$0xff]  }
 0x3c6   :  { %8193 = vmatprep.subr.bf16.mxu0 %v9074_v46  ;;  %8234 = vmatprep.subr.bf16.mxu1 %v9077_v48  ;;  %v9147_v39 = vld [vmem:[#allocation12 + $0x160] ss:$24 sps:$4 sm:$0xff]   ;;  %v9152_v46 = vld [vmem:[#allocation12 + $0x48c] ss:$24 sps:$4 sm:$0xff]  }
 0x3c7   :  { %v9155_v48 = vld [vmem:[#allocation12 + $0x194] ss:$24 sps:$4 sm:$0xff]  }
 0x3c9   :  { %8194 = vmatpush1.bf16.msra.mxu0 %v9072_v10  ;;  %8235 = vmatpush1.bf16.msra.mxu1 %v9075_v23  ;;  %v9150_v10 = vld [vmem:[#allocation12 + $0x488] ss:$24 sps:$4 sm:$0xff]  }
 0x3ca   :  { %8195 = vmatprep.subr.bf16.mxu0 %v9080_v18  ;;  %8236 = vmatprep.subr.bf16.mxu1 %v9083_v27  ;;  %v9153_v23 = vld [vmem:[#allocation12 + $0x190] ss:$24 sps:$4 sm:$0xff]   ;;  %v9158_v18 = vld [vmem:[#allocation12 + $0x4bc] ss:$24 sps:$4 sm:$0xff]  }
 0x3cb   :  { %v9161_v27 = vld [vmem:[#allocation12 + $0x1c4] ss:$24 sps:$4 sm:$0xff]  }
 0x3cd   :  { %8196 = vmatpush1.bf16.msra.mxu0 %v9078_v1  ;;  %8237 = vmatpush1.bf16.msra.mxu1 %v9081_v47  ;;  %v9156_v1 = vld [vmem:[#allocation12 + $0x4b8] ss:$24 sps:$4 sm:$0xff]  }
 0x3ce   :  { %8197 = vmatprep.subr.bf16.mxu0 %v9086_v6  ;;  %8238 = vmatprep.subr.bf16.mxu1 %v9089_v42  ;;  %v9159_v47 = vld [vmem:[#allocation12 + $0x1c0] ss:$24 sps:$4 sm:$0xff]   ;;  %v9164_v6 = vld [vmem:[#allocation12 + $0x4ec] ss:$24 sps:$4 sm:$0xff]  }
 0x3cf   :  { %v9167_v42 = vld [vmem:[#allocation12 + $0x1f4] ss:$24 sps:$4 sm:$0xff]  }
 0x3d1   :  { %8198 = vmatpush1.bf16.msra.mxu0 %v9084_v50  ;;  %8239 = vmatpush1.bf16.msra.mxu1 %v9087_v32  ;;  %v9162_v50 = vld [vmem:[#allocation12 + $0x4e8] ss:$24 sps:$4 sm:$0xff]  }
 0x3d2   :  { %8199 = vmatprep.subr.bf16.mxu0 %v9092_v16  ;;  %8240 = vmatprep.subr.bf16.mxu1 %v9095_v2  ;;  %v9165_v32 = vld [vmem:[#allocation12 + $0x1f0] ss:$24 sps:$4 sm:$0xff]   ;;  %v9170_v16 = vld [vmem:[#allocation12 + $0x51c] ss:$24 sps:$4 sm:$0xff]  }
 0x3d3   :  { %v9173_v2 = vld [vmem:[#allocation12 + $0x224] ss:$24 sps:$4 sm:$0xff]  }
 0x3d5   :  { %8200 = vmatpush1.bf16.msra.mxu0 %v9090_v31  ;;  %8241 = vmatpush1.bf16.msra.mxu1 %v9093_v61  ;;  %v9168_v31 = vld [vmem:[#allocation12 + $0x518] ss:$24 sps:$4 sm:$0xff]  }
 0x3d6   :  { %8201 = vmatprep.subr.bf16.mxu0 %v9098_v58  ;;  %8242 = vmatprep.subr.bf16.mxu1 %v9101_v29  ;;  %v9171_v61 = vld [vmem:[#allocation12 + $0x220] ss:$24 sps:$4 sm:$0xff]   ;;  %v9176_v58 = vld [vmem:[#allocation12 + $0x54c] ss:$24 sps:$4 sm:$0xff]  }
 0x3d7   :  { %v9179_v29 = vld [vmem:[#allocation12 + $0x254] ss:$24 sps:$4 sm:$0xff]  }
 0x3d9   :  { %8202 = vmatpush1.bf16.msra.mxu0 %v9096_v54  ;;  %8243 = vmatpush1.bf16.msra.mxu1 %v9099_v43  ;;  %v9174_v54 = vld [vmem:[#allocation12 + $0x548] ss:$24 sps:$4 sm:$0xff]  }
 0x3da   :  { %8253 = vmatprep.subr.bf16.mxu1 %v9104_v45  ;;  %8335 = vmatprep.subr.bf16.mxu0 %v9107_v56  ;;  %v9177_v43 = vld [vmem:[#allocation12 + $0x250] ss:$24 sps:$4 sm:$0xff]   ;;  %v9182_v45 = vld [vmem:[#allocation12 + $0x57c] ss:$24 sps:$4 sm:$0xff]  }
 0x3db   :  { %v9185_v56 = vld [vmem:[#allocation12 + $0x284] ss:$24 sps:$4 sm:$0xff]  }
 0x3dc   :  { %8204 = vmatmul.mubr.bf16.vlgmr.msra.gmra.mrb[0].mxu0 %v15064_v52  ;;  %8245 = vmatmul.mubr.bf16.vlgmr.msra.gmra.mrb[4].mxu1 %v15052_v33 }
 0x3dd   :  { %8254 = vmatpush1.bf16.msra.mxu1 %v9102_v49  ;;  %8285 = vmatprep.mubr.bf16.mxu1 %v15050_v62  ;;  %v9183_v49 = vld [vmem:[#allocation12 + $0x280] ss:$24 sps:$4 sm:$0xff]  }
 0x3de   :  { %8336 = vmatpush1.bf16.msra.mxu0 %v9105_v20  ;;  %8367 = vmatprep.mubr.bf16.mxu0 %v15048_v22  ;;  %v9131_v22 = vld [vmem:[#allocation12 + $0xd4] ss:$24 sps:$4 sm:$0xff]  }
 0x3df   :  { %8255 = vmatprep.subr.bf16.mxu1 %v9110_v60  ;;  %8337 = vmatprep.subr.bf16.mxu0 %v9113_v38  ;;  %v9188_v20 = vld [vmem:[#allocation12 + $0x5ac] ss:$24 sps:$4 sm:$0xff]   ;;  %v9186_v38 = vld [vmem:[#allocation12 + $0x5a8] ss:$24 sps:$4 sm:$0xff]  }
 0x3e0   :  { %v9191_v60 = vld [vmem:[#allocation12 + $0x2b4] ss:$24 sps:$4 sm:$0xff]  }
 0x3e1   :  { %8256 = vmatpush1.bf16.msra.mxu1 %v9108_v3  ;;  %v9189_v3 = vld [vmem:[#allocation12 + $0x2b0] ss:$24 sps:$4 sm:$0xff]  }
 0x3e2   :  { %8338 = vmatpush1.bf16.msra.mxu0 %v9111_v53  ;;  %8257 = vmatprep.subr.bf16.mxu1 %v9116_v25  ;;  %v9194_v53 = vld [vmem:[#allocation12 + $0x5dc] ss:$24 sps:$4 sm:$0xff]  }
 0x3e3   :  { %8339 = vmatprep.subr.bf16.mxu0 %v9119_v24  ;;  %v9197_v25 = vld [vmem:[#allocation12 + $0x2e4] ss:$24 sps:$4 sm:$0xff]   ;;  %v9192_v24 = vld [vmem:[#allocation12 + $0x5d8] ss:$24 sps:$4 sm:$0xff]  }
 0x3e5   :  { %8258 = vmatpush1.bf16.msra.mxu1 %v9114_v59  ;;  %v9195_v59 = vld [vmem:[#allocation12 + $0x2e0] ss:$24 sps:$4 sm:$0xff]  }
 0x3e6   :  { %8340 = vmatpush1.bf16.msra.mxu0 %v9117_v21  ;;  %8259 = vmatprep.subr.bf16.mxu1 %v9122_v13  ;;  %v9200_v21 = vld [vmem:[#allocation12 + $0x60c] ss:$24 sps:$4 sm:$0xff]  }
 0x3e7   :  { %8341 = vmatprep.subr.bf16.mxu0 %v9125_v55  ;;  %v9203_v13 = vld [vmem:[#allocation12 + $0x314] ss:$24 sps:$4 sm:$0xff]   ;;  %v9198_v55 = vld [vmem:[#allocation12 + $0x608] ss:$24 sps:$4 sm:$0xff]  }
 0x3e9   :  { %8260 = vmatpush1.bf16.msra.mxu1 %v9120_v12  ;;  %v9201_v12 = vld [vmem:[#allocation12 + $0x310] ss:$24 sps:$4 sm:$0xff]  }
 0x3ea   :  { %8342 = vmatpush1.bf16.msra.mxu0 %v9123_v40  ;;  %8261 = vmatprep.subr.bf16.mxu1 %v9128_v37  ;;  %v9206_v40 = vld [vmem:[#allocation12 + $0x63c] ss:$24 sps:$4 sm:$0xff]  }
 0x3eb   :  { %8343 = vmatprep.subr.bf16.mxu0 %v9131_v22  ;;  %v9209_v37 = vld [vmem:[#allocation12 + $0x344] ss:$24 sps:$4 sm:$0xff]   ;;  %v9204_v22 = vld [vmem:[#allocation12 + $0x638] ss:$24 sps:$4 sm:$0xff]  }
 0x3ed   :  { %8262 = vmatpush1.bf16.msra.mxu1 %v9126_v0  ;;  %v9207_v0 = vld [vmem:[#allocation12 + $0x340] ss:$24 sps:$4 sm:$0xff]  }
 0x3ee   :  { %8344 = vmatpush1.bf16.msra.mxu0 %v9129_v28  ;;  %8263 = vmatprep.subr.bf16.mxu1 %v9134_v57  ;;  %v9212_v28 = vld [vmem:[#allocation12 + $0x66c] ss:$24 sps:$4 sm:$0xff]  }
 0x3ef   :  { %8345 = vmatprep.subr.bf16.mxu0 %v9137_v51  ;;  %v9215_v57 = vld [vmem:[#allocation12 + $0x374] ss:$24 sps:$4 sm:$0xff]   ;;  %v9210_v51 = vld [vmem:[#allocation12 + $0x668] ss:$24 sps:$4 sm:$0xff]  }
 0x3f1   :  { %8264 = vmatpush1.bf16.msra.mxu1 %v9132_v36  ;;  %v9213_v36 = vld [vmem:[#allocation12 + $0x370] ss:$24 sps:$4 sm:$0xff]  }
 0x3f2   :  { %8346 = vmatpush1.bf16.msra.mxu0 %v9135_v15  ;;  %8265 = vmatprep.subr.bf16.mxu1 %v9140_v63  ;;  %v9218_v15 = vld [vmem:[#allocation12 + $0x69c] ss:$24 sps:$4 sm:$0xff]   ;;  %v9216_v63 = vld [vmem:[#allocation12 + $0x698] ss:$24 sps:$4 sm:$0xff]  }
 0x3f3   :  { %8347 = vmatprep.subr.bf16.mxu0 %v9143_v9  ;;  %v9219_v9 = vld [vmem:[#allocation12 + $0x3a0] ss:$24 sps:$4 sm:$0xff]  }
 0x3f5   :  { %8266 = vmatpush1.bf16.msra.mxu1 %v9138_v41  ;;  %v9224_v41 = vld [vmem:[#allocation12 + $0x6cc] ss:$24 sps:$4 sm:$0xff]  }
 0x3f6   :  { %8348 = vmatpush1.bf16.msra.mxu0 %v9141_v26  ;;  %8267 = vmatprep.subr.bf16.mxu1 %v9146_v19  ;;  %v9227_v26 = vld [vmem:[#allocation12 + $0x3d4] ss:$24 sps:$4 sm:$0xff]   ;;  %v9225_v19 = vld [vmem:[#allocation12 + $0x3d0] ss:$24 sps:$4 sm:$0xff]  }
 0x3f7   :  { %8349 = vmatprep.subr.bf16.mxu0 %v9149_v35  ;;  %v9230_v35 = vld [vmem:[#allocation12 + $0x6fc] ss:$24 sps:$4 sm:$0xff]  }
 0x3f9   :  { %8268 = vmatpush1.bf16.msra.mxu1 %v9144_v17  ;;  %v9233_v17 = vld [vmem:[#allocation12 + $0x404] ss:$24 sps:$4 sm:$0xff]  }
 0x3fa   :  { %8350 = vmatpush1.bf16.msra.mxu0 %v9147_v39  ;;  %8269 = vmatprep.subr.bf16.mxu1 %v9152_v46  ;;  %v9228_v39 = vld [vmem:[#allocation12 + $0x6f8] ss:$24 sps:$4 sm:$0xff]  }
 0x3fb   :  { %8351 = vmatprep.subr.bf16.mxu0 %v9155_v48  ;;  %v9231_v46 = vld [vmem:[#allocation12 + $0x400] ss:$24 sps:$4 sm:$0xff]   ;;  %v9236_v48 = vld [vmem:[#allocation12 + $0x72c] ss:$24 sps:$4 sm:$0xff]  }
 0x3fd   :  { %8270 = vmatpush1.bf16.msra.mxu1 %v9150_v10  ;;  %v9239_v10 = vld [vmem:[#allocation12 + $0x434] ss:$24 sps:$4 sm:$0xff]  }
 0x3fe   :  { %8352 = vmatpush1.bf16.msra.mxu0 %v9153_v23  ;;  %8271 = vmatprep.subr.bf16.mxu1 %v9158_v18  ;;  %v9234_v23 = vld [vmem:[#allocation12 + $0x728] ss:$24 sps:$4 sm:$0xff]  }
 0x3ff   :  { %8353 = vmatprep.subr.bf16.mxu0 %v9161_v27  ;;  %v9237_v18 = vld [vmem:[#allocation12 + $0x430] ss:$24 sps:$4 sm:$0xff]   ;;  %v9242_v27 = vld [vmem:[#allocation12 + $0x75c] ss:$24 sps:$4 sm:$0xff]  }
 0x401   :  { %8272 = vmatpush1.bf16.msra.mxu1 %v9156_v1  ;;  %v9245_v1 = vld [vmem:[#allocation12 + $0x464] ss:$24 sps:$4 sm:$0xff]  }
 0x402   :  { %8354 = vmatpush1.bf16.msra.mxu0 %v9159_v47  ;;  %8273 = vmatprep.subr.bf16.mxu1 %v9164_v6  ;;  %v9240_v47 = vld [vmem:[#allocation12 + $0x758] ss:$24 sps:$4 sm:$0xff]  }
 0x403   :  { %8355 = vmatprep.subr.bf16.mxu0 %v9167_v42  ;;  %v9243_v6 = vld [vmem:[#allocation12 + $0x460] ss:$24 sps:$4 sm:$0xff]   ;;  %v9248_v42 = vld [vmem:[#allocation12 + $0x78c] ss:$24 sps:$4 sm:$0xff]  }
 0x405   :  { %8274 = vmatpush1.bf16.msra.mxu1 %v9162_v50  ;;  %v9251_v50 = vld [vmem:[#allocation12 + $0x494] ss:$24 sps:$4 sm:$0xff]  }
 0x406   :  { %8356 = vmatpush1.bf16.msra.mxu0 %v9165_v32  ;;  %8275 = vmatprep.subr.bf16.mxu1 %v9170_v16  ;;  %v9246_v32 = vld [vmem:[#allocation12 + $0x788] ss:$24 sps:$4 sm:$0xff]  }
 0x407   :  { %8357 = vmatprep.subr.bf16.mxu0 %v9173_v2  ;;  %v9249_v16 = vld [vmem:[#allocation12 + $0x490] ss:$24 sps:$4 sm:$0xff]   ;;  %v9254_v2 = vld [vmem:[#allocation12 + $0x7bc] ss:$24 sps:$4 sm:$0xff]  }
 0x409   :  { %8276 = vmatpush1.bf16.msra.mxu1 %v9168_v31  ;;  %v9257_v31 = vld [vmem:[#allocation12 + $0x4c4] ss:$24 sps:$4 sm:$0xff]  }
 0x40a   :  { %8358 = vmatpush1.bf16.msra.mxu0 %v9171_v61  ;;  %8277 = vmatprep.subr.bf16.mxu1 %v9176_v58  ;;  %v9252_v61 = vld [vmem:[#allocation12 + $0x7b8] ss:$24 sps:$4 sm:$0xff]  }
 0x40b   :  { %8359 = vmatprep.subr.bf16.mxu0 %v9179_v29  ;;  %v9255_v58 = vld [vmem:[#allocation12 + $0x4c0] ss:$24 sps:$4 sm:$0xff]   ;;  %v9260_v29 = vld [vmem:[#allocation12 + $0x7ec] ss:$24 sps:$4 sm:$0xff]  }
 0x40d   :  { %8278 = vmatpush1.bf16.msra.mxu1 %v9174_v54  ;;  %v9263_v54 = vld [vmem:[#allocation12 + $0x4f4] ss:$24 sps:$4 sm:$0xff]  }
 0x40e   :  { %8360 = vmatpush1.bf16.msra.mxu0 %v9177_v43  ;;  %8279 = vmatprep.subr.bf16.mxu1 %v9182_v45  ;;  %v9258_v43 = vld [vmem:[#allocation12 + $0x7e8] ss:$24 sps:$4 sm:$0xff]  }
 0x40f   :  { %8361 = vmatprep.subr.bf16.mxu0 %v9185_v56  ;;  %v9261_v45 = vld [vmem:[#allocation12 + $0x4f0] ss:$24 sps:$4 sm:$0xff]   ;;  %v9266_v56 = vld [vmem:[#allocation12 + $0x81c] ss:$24 sps:$4 sm:$0xff]  }
 0x411   :  { %8280 = vmatpush1.bf16.msra.mxu1 %v9180_v30  ;;  %v9269_v30 = vld [vmem:[#allocation12 + $0x524] ss:$24 sps:$4 sm:$0xff]  }
 0x412   :  { %8362 = vmatpush1.bf16.msra.mxu0 %v9183_v49  ;;  %8281 = vmatprep.subr.bf16.mxu1 %v9188_v20  ;;  %v9264_v49 = vld [vmem:[#allocation12 + $0x818] ss:$24 sps:$4 sm:$0xff]  }
 0x413   :  { %8363 = vmatprep.subr.bf16.mxu0 %v9191_v60  ;;  %v9267_v20 = vld [vmem:[#allocation12 + $0x520] ss:$24 sps:$4 sm:$0xff]   ;;  %v9272_v60 = vld [vmem:[#allocation12 + $0x84c] ss:$24 sps:$4 sm:$0xff]  }
 0x415   :  { %8282 = vmatpush1.bf16.msra.mxu1 %v9186_v38  ;;  %v9275_v38 = vld [vmem:[#allocation12 + $0x554] ss:$24 sps:$4 sm:$0xff]  }
 0x416   :  { %8364 = vmatpush1.bf16.msra.mxu0 %v9189_v3  ;;  %8283 = vmatprep.subr.bf16.mxu1 %v9194_v53  ;;  %v9270_v3 = vld [vmem:[#allocation12 + $0x848] ss:$24 sps:$4 sm:$0xff]  }
 0x417   :  { %8365 = vmatprep.subr.bf16.mxu0 %v9197_v25  ;;  %v9273_v53 = vld [vmem:[#allocation12 + $0x550] ss:$24 sps:$4 sm:$0xff]   ;;  %v9278_v25 = vld [vmem:[#allocation12 + $0x87c] ss:$24 sps:$4 sm:$0xff]  }
 0x419   :  { %8284 = vmatpush1.bf16.msra.mxu1 %v9192_v24  ;;  %v9281_v24 = vld [vmem:[#allocation12 + $0x584] ss:$24 sps:$4 sm:$0xff]  }
 0x41a   :  { %8366 = vmatpush1.bf16.msra.mxu0 %v9195_v59  ;;  %8294 = vmatprep.subr.bf16.mxu1 %v9200_v21  ;;  %v9276_v59 = vld [vmem:[#allocation12 + $0x878] ss:$24 sps:$4 sm:$0xff]  }
 0x41b   :  { %8376 = vmatprep.subr.bf16.mxu0 %v9203_v13  ;;  %v9279_v21 = vld [vmem:[#allocation12 + $0x580] ss:$24 sps:$4 sm:$0xff]   ;;  %v9284_v13 = vld [vmem:[#allocation12 + $0x8ac] ss:$24 sps:$4 sm:$0xff]  }
 0x41c   :  { %8286 = vmatmul.mubr.bf16.vlgmr.msra.gmra.mrb[4].mxu1 %v15054_v44 }
 0x41d   :  { %8368 = vmatmul.mubr.bf16.vlgmr.msra.gmra.mrb[4].mxu0 %v15052_v33  ;;  %8295 = vmatpush1.bf16.msra.mxu1 %v9198_v55  ;;  %v9221_v33 = vld [vmem:[#allocation12 + $0x3a4] ss:$24 sps:$4 sm:$0xff]   ;;  %v9287_v55 = vld [vmem:[#allocation12 + $0x5b4] ss:$24 sps:$4 sm:$0xff]  }
 0x41e   :  { %8326 = vmatprep.mubr.bf16.mxu1 %v15060_v8  ;;  %8377 = vmatpush1.bf16.msra.mxu0 %v9201_v12  ;;  %v9282_v12 = vld [vmem:[#allocation12 + $0x8a8] ss:$24 sps:$4 sm:$0xff]  }
 0x41f   :  { %8408 = vmatprep.mubr.bf16.mxu0 %v15050_v62  ;;  %8296 = vmatprep.subr.bf16.mxu1 %v9206_v40  ;;  %v9222_v62 = vld [vmem:[#allocation12 + $0x6c8] ss:$24 sps:$4 sm:$0xff]  }
 0x420   :  { %8378 = vmatprep.subr.bf16.mxu0 %v9209_v37  ;;  %v9285_v40 = vld [vmem:[#allocation12 + $0x5b0] ss:$24 sps:$4 sm:$0xff]   ;;  %v9290_v37 = vld [vmem:[#allocation12 + $0x8dc] ss:$24 sps:$4 sm:$0xff]  }
 0x421   :  { %8297 = vmatpush1.bf16.msra.mxu1 %v9204_v22  ;;  %v9293_v22 = vld [vmem:[#allocation12 + $0x5e4] ss:$24 sps:$4 sm:$0xff]  }
 0x422   :  { %8379 = vmatpush1.bf16.msra.mxu0 %v9207_v0  ;;  %8298 = vmatprep.subr.bf16.mxu1 %v9212_v28  ;;  %v9288_v0 = vld [vmem:[#allocation12 + $0x8d8] ss:$24 sps:$4 sm:$0xff]  }
 0x423   :  { %8380 = vmatprep.subr.bf16.mxu0 %v9215_v57  ;;  %v9291_v28 = vld [vmem:[#allocation12 + $0x5e0] ss:$24 sps:$4 sm:$0xff]   ;;  %v9296_v57 = vld [vmem:[#allocation12 + $0x614] ss:$24 sps:$4 sm:$0xff]  }
 0x425   :  { %8299 = vmatpush1.bf16.msra.mxu1 %v9210_v51  ;;  %v9294_v51 = vld [vmem:[#allocation12 + $0x610] ss:$24 sps:$4 sm:$0xff]  }
 0x426   :  { %8381 = vmatpush1.bf16.msra.mxu0 %v9213_v36  ;;  %8300 = vmatprep.subr.bf16.mxu1 %v9218_v15  ;;  %v9299_v36 = vld [vmem:[#allocation12 + $0x644] ss:$24 sps:$4 sm:$0xff]   ;;  %v9297_v15 = vld [vmem:[#allocation12 + $0x640] ss:$24 sps:$4 sm:$0xff]  }
 0x427   :  { %8382 = vmatprep.subr.bf16.mxu0 %v9221_v33  ;;  %v9302_v33 = vld [vmem:[#allocation12 + $0x674] ss:$24 sps:$4 sm:$0xff]  }
 0x429   :  { %8301 = vmatpush1.bf16.msra.mxu1 %v9216_v63  ;;  %v9300_v63 = vld [vmem:[#allocation12 + $0x670] ss:$24 sps:$4 sm:$0xff]  }
 0x42a   :  { %8383 = vmatpush1.bf16.msra.mxu0 %v9219_v9  ;;  %8302 = vmatprep.subr.bf16.mxu1 %v9224_v41  ;;  %v9305_v9 = vld [vmem:[#allocation12 + $0x6a4] ss:$24 sps:$4 sm:$0xff]   ;;  %v9303_v41 = vld [vmem:[#allocation12 + $0x6a0] ss:$24 sps:$4 sm:$0xff]  }
 0x42b   :  { %8384 = vmatprep.subr.bf16.mxu0 %v9227_v26  ;;  %v9308_v26 = vld [vmem:[#allocation12 + $0x6d4] ss:$24 sps:$4 sm:$0xff]  }
 0x42d   :  { %8303 = vmatpush1.bf16.msra.mxu1 %v9222_v62  ;;  %v9306_v62 = vld [vmem:[#allocation12 + $0x6d0] ss:$24 sps:$4 sm:$0xff]  }
 0x42e   :  { %8385 = vmatpush1.bf16.msra.mxu0 %v9225_v19  ;;  %8304 = vmatprep.subr.bf16.mxu1 %v9230_v35  ;;  %v9311_v19 = vld [vmem:[#allocation12 + $0x704] ss:$24 sps:$4 sm:$0xff]  }
 0x42f   :  { %8386 = vmatprep.subr.bf16.mxu0 %v9233_v17 }
 0x431   :  { %8305 = vmatpush1.bf16.msra.mxu1 %v9228_v39 }
 0x432   :  { %8387 = vmatpush1.bf16.msra.mxu0 %v9231_v46  ;;  %8306 = vmatprep.subr.bf16.mxu1 %v9236_v48  ;;  %v9312_v48 = vld [vmem:[#allocation12 + $0x730] ss:$24 sps:$4 sm:$0xff]  }
 0x433   :  { %8388 = vmatprep.subr.bf16.mxu0 %v9239_v10  ;;  %v9317_v10 = vld [vmem:[#allocation12 + $0x764] ss:$24 sps:$4 sm:$0xff]  }
 0x435   :  { %8307 = vmatpush1.bf16.msra.mxu1 %v9234_v23  ;;  %v9315_v23 = vld [vmem:[#allocation12 + $0x760] ss:$24 sps:$4 sm:$0xff]  }
 0x436   :  { %8389 = vmatpush1.bf16.msra.mxu0 %v9237_v18  ;;  %8308 = vmatprep.subr.bf16.mxu1 %v9242_v27  ;;  %v9320_v18 = vld [vmem:[#allocation12 + $0x794] ss:$24 sps:$4 sm:$0xff]   ;;  %v9318_v27 = vld [vmem:[#allocation12 + $0x790] ss:$24 sps:$4 sm:$0xff]  }
 0x437   :  { %8390 = vmatprep.subr.bf16.mxu0 %v9245_v1  ;;  %v9323_v1 = vld [vmem:[#allocation12 + $0x7c4] ss:$24 sps:$4 sm:$0xff]  }
 0x439   :  { %8309 = vmatpush1.bf16.msra.mxu1 %v9240_v47  ;;  %v9321_v47 = vld [vmem:[#allocation12 + $0x7c0] ss:$24 sps:$4 sm:$0xff]  }
 0x43a   :  { %8391 = vmatpush1.bf16.msra.mxu0 %v9243_v6  ;;  %8310 = vmatprep.subr.bf16.mxu1 %v9248_v42  ;;  %v9326_v6 = vld [vmem:[#allocation12 + $0x7f4] ss:$24 sps:$4 sm:$0xff]   ;;  %v9324_v42 = vld [vmem:[#allocation12 + $0x7f0] ss:$24 sps:$4 sm:$0xff]  }
 0x43b   :  { %8392 = vmatprep.subr.bf16.mxu0 %v9251_v50  ;;  %v9329_v50 = vld [vmem:[#allocation12 + $0x824] ss:$24 sps:$4 sm:$0xff]  }
 0x43d   :  { %8311 = vmatpush1.bf16.msra.mxu1 %v9246_v32  ;;  %v9327_v32 = vld [vmem:[#allocation12 + $0x820] ss:$24 sps:$4 sm:$0xff]  }
 0x43e   :  { %8393 = vmatpush1.bf16.msra.mxu0 %v9249_v16  ;;  %8312 = vmatprep.subr.bf16.mxu1 %v9254_v2  ;;  %v9332_v16 = vld [vmem:[#allocation12 + $0x854] ss:$24 sps:$4 sm:$0xff]   ;;  %v9330_v2 = vld [vmem:[#allocation12 + $0x850] ss:$24 sps:$4 sm:$0xff]  }
 0x43f   :  { %8394 = vmatprep.subr.bf16.mxu0 %v9257_v31  ;;  %v9335_v31 = vld [vmem:[#allocation12 + $0x884] ss:$24 sps:$4 sm:$0xff]  }
 0x441   :  { %8313 = vmatpush1.bf16.msra.mxu1 %v9252_v61  ;;  %v9333_v61 = vld [vmem:[#allocation12 + $0x880] ss:$24 sps:$4 sm:$0xff]  }
 0x442   :  { %8395 = vmatpush1.bf16.msra.mxu0 %v9255_v58  ;;  %8314 = vmatprep.subr.bf16.mxu1 %v9260_v29  ;;  %v9338_v58 = vld [vmem:[#allocation12 + $0x8b4] ss:$24 sps:$4 sm:$0xff]   ;;  %v9336_v29 = vld [vmem:[#allocation12 + $0x8b0] ss:$24 sps:$4 sm:$0xff]  }
 0x443   :  { %8396 = vmatprep.subr.bf16.mxu0 %v9263_v54  ;;  %v9341_v54 = vld [vmem:[#allocation12 + $0x8e4] ss:$24 sps:$4 sm:$0xff]  }
 0x445   :  { %8315 = vmatpush1.bf16.msra.mxu1 %v9258_v43  ;;  %v9339_v43 = vld [vmem:[#allocation12 + $0x8e0] ss:$24 sps:$4 sm:$0xff]  }
 0x446   :  { %8397 = vmatpush1.bf16.msra.mxu0 %v9261_v45  ;;  %8316 = vmatprep.subr.bf16.mxu1 %v9266_v56  ;;  %v6617_v45 = vld [vmem:[#allocation14] sm:$0x3f] }
 0x447   :  { %8398 = vmatprep.subr.bf16.mxu0 %v9269_v30  ;;  %v6622_v56 = vrot.slane %v6617_v45, %v9797_v4  ;;  %v6626_v30 = vrot.slane %v6617_v45, %v9800_v5 }
 0x449   :  { %8317 = vmatpush1.bf16.msra.mxu1 %v9264_v49 }
 0x44a   :  { %8399 = vmatpush1.bf16.msra.mxu0 %v9267_v20  ;;  %8318 = vmatprep.subr.bf16.mxu1 %v9272_v60 }
 0x44b   :  { %8400 = vmatprep.subr.bf16.mxu0 %v9275_v38 }
 0x44d   :  { %8319 = vmatpush1.bf16.msra.mxu1 %v9270_v3 }
 0x44e   :  { %8401 = vmatpush1.bf16.msra.mxu0 %v9273_v53  ;;  %8320 = vmatprep.subr.bf16.mxu1 %v9278_v25 }
 0x44f   :  { %8402 = vmatprep.subr.bf16.mxu0 %v9281_v24 }
 0x451   :  { %8321 = vmatpush1.bf16.msra.mxu1 %v9276_v59 }
 0x452   :  { %8403 = vmatpush1.bf16.msra.mxu0 %v9279_v21  ;;  %8322 = vmatprep.subr.bf16.mxu1 %v9284_v13 }
 0x453   :  { %8404 = vmatprep.subr.bf16.mxu0 %v9287_v55 }
 0x455   :  { %8323 = vmatpush1.bf16.msra.mxu1 %v9282_v12 }
 0x456   :  { %8405 = vmatpush1.bf16.msra.mxu0 %v9285_v40  ;;  %8324 = vmatprep.subr.bf16.mxu1 %v9290_v37  ;;  %v6630_v40 = vrot.slane %v6617_v45, %v9854_v34  ;;  %v6634_v37 = vrot.slane %v6617_v45, %v9911_v11  ;;  %v6638_v11 = vrot.slane %v6617_v45, %v9965_v14 }
 0x457   :  { %8406 = vmatprep.subr.bf16.mxu0 %v9293_v22 }
 0x459   :  { %8325 = vmatpush1.bf16.msra.mxu1 %v9288_v0 }
 0x45a   :  { %8407 = vmatpush1.bf16.msra.mxu0 %v9291_v28 }
 0x45b   :  { %8417 = vmatprep.subr.bf16.mxu0 %v9296_v57 }
 0x45c   :  { %8327 = vmatmul.mubr.bf16.vlgmr.msra.gmra.mrb[4].mxu1 %v15064_v52 }
 0x45d   :  { %8409 = vmatmul.mubr.bf16.vlgmr.msra.gmra.mrb[4].mxu0 %v15054_v44  ;;  %v9309_v44 = vld [vmem:[#allocation12 + $0x700] ss:$24 sps:$4 sm:$0xff]  }
 0x45e   :  { %8418 = vmatpush1.bf16.msra.mxu0 %v9294_v51  ;;  %8449 = vmatprep.mubr.bf16.mxu0 %v15060_v8  ;;  %v9314_v8 = vld [vmem:[#allocation12 + $0x734] ss:$24 sps:$4 sm:$0xff]  }
 0x45f   :  { %8419 = vmatprep.subr.bf16.mxu0 %v9299_v36 }
 0x462   :  { %8420 = vmatpush1.bf16.msra.mxu0 %v9297_v15 }
 0x463   :  { %8421 = vmatprep.subr.bf16.mxu0 %v9302_v33 }
 0x466   :  { %8422 = vmatpush1.bf16.msra.mxu0 %v9300_v63 }
 0x467   :  { %8423 = vmatprep.subr.bf16.mxu0 %v9305_v9 }
 0x46a   :  { %8424 = vmatpush1.bf16.msra.mxu0 %v9303_v41 }
 0x46b   :  { %8425 = vmatprep.subr.bf16.mxu0 %v9308_v26 }
 0x46e   :  { %8426 = vmatpush1.bf16.msra.mxu0 %v9306_v62 }
 0x46f   :  { %v8123_v35 = vpop.f32.mrb[0].mxu1  ;;  %8427 = vmatprep.subr.bf16.mxu0 %v9311_v19  ;;  %v6642_v19 = vrot.slane %v6617_v45, %v10057_v7 }
 0x470   :  { %v8125_v17 = vpop.f32.mrb[1].mxu1  ;;  %v8124_v49 = vadd.f32 %v8123_v35, %v6622_v56 }
 0x471   :  { %v8127_v39 = vpop.f32.mrb[2].mxu1  ;;  %v8126_v20 = vadd.f32 %v8125_v17, %v6626_v30 }
 0x472   :  { %8428 = vmatpush1.bf16.msra.mxu0 %v9309_v44  ;;  %v8128_v46 = vpop.f32.mrb[3].mxu1 }
 0x473   :  { %8429 = vmatprep.subr.bf16.mxu0 %v9314_v8 }
 0x476   :  { %8430 = vmatpush1.bf16.msra.mxu0 %v9312_v48 }
 0x477   :  { %8431 = vmatprep.subr.bf16.mxu0 %v9317_v10 }
 0x47a   :  { %8432 = vmatpush1.bf16.msra.mxu0 %v9315_v23 }
 0x47b   :  { %8433 = vmatprep.subr.bf16.mxu0 %v9320_v18 }
 0x47e   :  { %8434 = vmatpush1.bf16.msra.mxu0 %v9318_v27 }
 0x47f   :  { %8435 = vmatprep.subr.bf16.mxu0 %v9323_v1 }
 0x482   :  { %8436 = vmatpush1.bf16.msra.mxu0 %v9321_v47 }
 0x483   :  { %8437 = vmatprep.subr.bf16.mxu0 %v9326_v6 }
 0x486   :  { %8438 = vmatpush1.bf16.msra.mxu0 %v9324_v42 }
 0x487   :  { %8439 = vmatprep.subr.bf16.mxu0 %v9329_v50 }
 0x48a   :  { %8440 = vmatpush1.bf16.msra.mxu0 %v9327_v32 }
 0x48b   :  { %8441 = vmatprep.subr.bf16.mxu0 %v9332_v16 }
 0x48e   :  { %8442 = vmatpush1.bf16.msra.mxu0 %v9330_v2 }
 0x48f   :  { %8443 = vmatprep.subr.bf16.mxu0 %v9335_v31 }
 0x492   :  { %8444 = vmatpush1.bf16.msra.mxu0 %v9333_v61 }
 0x493   :  { %8445 = vmatprep.subr.bf16.mxu0 %v9338_v58 }
 0x496   :  { %8446 = vmatpush1.bf16.msra.mxu0 %v9336_v29 }
 0x497   :  { %8447 = vmatprep.subr.bf16.mxu0 %v9341_v54 }
 0x49a   :  { %8448 = vmatpush1.bf16.msra.mxu0 %v9339_v43 }
 0x49d   :  { %8450 = vmatmul.mubr.bf16.vlgmr.msra.gmra.mrb[4].mxu0 %v15064_v52 }
 0x4af   :  { %v8205_v60 = vpop.f32.mrb[0].mxu0 }
 0x4b0   :  { %v8820_v38 = vadd.f32 %v8205_v60, %v8124_v49  ;;  %v8207_v3 = vpop.f32.mrb[1].mxu0 }
 0x4b1   :  { %v8822_v53 = vadd.f32 %v8207_v3, %v8126_v20  ;;  %v8209_v25 = vpop.f32.mrb[2].mxu0 }
 0x4b2   :  { %v8813_v24 = vmul.f32 -1.442695, %v8820_v38  ;;  %v8210_v59 = vpop.f32.mrb[3].mxu0 }
 0x4b3   :  { %v8814_v21 = vmul.f32 -1.442695, %v8822_v53 }
 0x4b4   :  { %9358 = vpow2.f32 %v8813_v24 }
 0x4b5   :  { %9360 = vpow2.f32 %v8814_v21 }
 0x4be   :  { %v9359_v13 = vpop.eup %9358 }
 0x4bf   :  { %v9361_v55 = vpop.eup %9360  ;;  %v8476_v52 = vadd.f32 1.0, %v9359_v13 }
 0x4c0   :  { %v8477_v12 = vadd.f32 1.0, %v9361_v55 }
 0x4c1   :  { %9362 = vrcp.f32 %v8476_v52 }
 0x4c2   :  { %9364 = vrcp.f32 %v8477_v12 }
 0x4cb   :  { %v9363_v4 = vpop.eup %9362 }
 0x4cc   :  { %v9365_v5 = vpop.eup %9364  ;;  %8494 = vst [vmem:[#allocation15] sm:$0xff] %v9363_v4 }
 0x4cd   :  { %8495 = vst [vmem:[#allocation15 + $0x8] sm:$0xff] %v9365_v5 }
 0x52f   :  { %v8328_v22 = vpop.f32.mrb[4].mxu1 }
 0x530   :  { %v8823_v0 = vadd.f32 %v8328_v22, %v6630_v40  ;;  %v8330_v28 = vpop.f32.mrb[5].mxu1 }
 0x531   :  { %v8824_v57 = vadd.f32 %v8330_v28, %v6634_v37  ;;  %v8332_v51 = vpop.f32.mrb[6].mxu1 }
 0x532   :  { %v8815_v36 = vmul.f32 -1.442695, %v8823_v0  ;;  %v8333_v15 = vpop.f32.mrb[7].mxu1 }
 0x533   :  { %v8816_v33 = vmul.f32 -1.442695, %v8824_v57 }
 0x534   :  { %9366 = vpow2.f32 %v8815_v36 }
 0x535   :  { %9368 = vpow2.f32 %v8816_v33 }
 0x53e   :  { %v9367_v63 = vpop.eup %9366 }
 0x53f   :  { %v9369_v9 = vpop.eup %9368  ;;  %v8478_v41 = vadd.f32 1.0, %v9367_v63 }
 0x540   :  { %v8479_v26 = vadd.f32 1.0, %v9369_v9 }
 0x541   :  { %9370 = vrcp.f32 %v8478_v41 }
 0x542   :  { %9372 = vrcp.f32 %v8479_v26 }
 0x54b   :  { %v9371_v62 = vpop.eup %9370 }
 0x54c   :  { %v9373_v34 = vpop.eup %9372  ;;  %8496 = vst [vmem:[#allocation15 + $0x10] sm:$0xff] %v9371_v62 }
 0x54d   :  { %8497 = vst [vmem:[#allocation15 + $0x18] sm:$0xff] %v9373_v34 }
 0x570   :  { %v8451_v44 = vpop.f32.mrb[4].mxu0 }
 0x571   :  { %v8825_v35 = vadd.f32 %v8451_v44, %v6638_v11  ;;  %v8453_v8 = vpop.f32.mrb[5].mxu0 }
 0x572   :  { %v8826_v17 = vadd.f32 %v8453_v8, %v6642_v19  ;;  %v8455_v39 = vpop.f32.mrb[6].mxu0 }
 0x573   :  { %v8817_v46 = vmul.f32 -1.442695, %v8825_v35  ;;  %v8456_v48 = vpop.f32.mrb[7].mxu0 }
 0x574   :  { %v8818_v10 = vmul.f32 -1.442695, %v8826_v17 }
 0x575   :  { %9374 = vpow2.f32 %v8817_v46 }
 0x576   :  { %9376 = vpow2.f32 %v8818_v10 }
 0x57f   :  { %v9375_v23 = vpop.eup %9374 }
 0x580   :  { %v9377_v18 = vpop.eup %9376  ;;  %v8480_v27 = vadd.f32 1.0, %v9375_v23 }
 0x581   :  { %v8481_v1 = vadd.f32 1.0, %v9377_v18 }
 0x582   :  { %9378 = vrcp.f32 %v8480_v27 }
 0x583   :  { %9380 = vrcp.f32 %v8481_v1 }
 0x58c   :  { %v9379_v14 = vpop.eup %9378 }
 0x58d   :  { %v9381_v7 = vpop.eup %9380  ;;  %8498 = vst [vmem:[#allocation15 + $0x20] sm:$0xff] %v9379_v14 }
 0x58e   :  { %8499 = vst [vmem:[#allocation15 + $0x28] sm:$0xff] %v9381_v7 }
 0x58f   :  { %9635 = shalt.err (!%p9632_p5)
}
 0x590   :  { %s9636_s1 = scalar_lea.hbm %s15103_s7, 768 }
 0x591   :  { %p9637_p6 = scmp.ne.s32.totalorder %s15103_s7, %s9636_s1  ;;  %p9640_p7 = scmp.lt.u32.totalorder %s9636_s1, %s15103_s7 }
 0x593   :  { %p9642_p8 = pnand %p9640_p7, %p9637_p6 }
 0x595   :  { %9645 = shalt.err (!%p9642_p8)
}
 0x596   :  { %8509 = dma.vmem_to_hbm [thread:$0]  %s8507_s22, 768, %s15103_s7, [#allocation6]  }
 0x597   :  { %9654 = dma.done.wait [#allocation6], 768  }
 0x598   :  { %9655 = vsyncadd [#allocation6], 4294966528 }
 0x599   :  { %8513 = vsyncpa [#allocation5], 1 }
 0x59a   :  { %8514 = vsyncpa [#allocation10], 1 }
 0x59b   :  { %8515 = vsyncpa [#allocation13], 1 }
 0x59c   :  { %8516 = vsyncpa [#allocation6], 1 }
 0x59d   :  { %8517 = vsyncpa [#allocation7], 1 }

</bundles_post_ra>
